<compile_context>
chip_gen: v7x
topology: tpu7x:2x2x1
jax: 0.10.0
libtpu: 0.0.40
codegen_flags: <defaults>
</compile_context>

<pallas_src>
import jax
import jax.numpy as jnp
from jax.experimental import pallas as pl
from jax.experimental.pallas import tpu as pltpu

IN_FEATURES = 3072
HIDDEN = 1300
H_PAD = 1408            # 11 * 128, lane-dense hidden dimension
OUT_FEATURES = 10
O_PAD = 128             # lane-dense output dimension (sliced back to 10)


def _round_up(a, m):
    return (a + m - 1) // m * m


def _ffnn_kernel(x_ref, w1_ref, b1_ref, w2_ref, b2_ref, out_ref):
    # One grid step = one batch block.  W1/W2/b1/b2 have constant block
    # indices, so they are fetched from HBM exactly once across the grid.
    # fc1: (BM, 3072)bf16 @ (3072, 1408)bf16 with f32 accumulation.
    h = jax.nn.sigmoid(
        jnp.dot(x_ref[...], w1_ref[...], preferred_element_type=jnp.float32)
        + b1_ref[...]
    )
    # INVARIANT: padded hidden units (cols 1300..1407) hold sigmoid(0)=0.5
    # here; that is harmless ONLY because the corresponding rows of w2_ref
    # are zero-padded (see prepare_params).  Do not reuse `h` elsewhere or
    # re-bias/quantize W2 without preserving that zero pad.
    logits = jnp.dot(h.astype(jnp.bfloat16), w2_ref[...],
                     preferred_element_type=jnp.float32) + b2_ref[...]
    out_ref[...] = jax.nn.sigmoid(logits).astype(out_ref.dtype)


def prepare_params(w1, b1, w2, b2):
    """One-time weight preprocessing, hoisted out of the per-call path.

    w1: (3072, 1300), b1: (1300,), w2: (1300, 10), b2: (10,)  (W = torch W.T)
    Returns lane-dense, bf16-cast weights ready for the kernel.
    """
    # bf16 W1 halves the dominant HBM read vs f32 (f32 accumulation in-kernel).
    # TODO(synk): on v5e/v6e an int8 per-channel-quantized W1 (fp8 on v7x)
    # would halve this read again; kept bf16 here for portability/accuracy.
    w1_p = jnp.pad(w1, ((0, 0), (0, H_PAD - HIDDEN))).astype(jnp.bfloat16)
    # Padded hidden units get bias 0 -> sigmoid(0)=0.5, but their W2 rows are
    # zero (by jnp.pad) so they contribute nothing to the logits.  Padded
    # output lanes (10..127) are sliced off by the wrapper.
    b1_p = jnp.pad(b1.astype(jnp.float32), (0, H_PAD - HIDDEN)).reshape(1, H_PAD)
    w2_p = jnp.pad(w2, ((0, H_PAD - HIDDEN), (0, O_PAD - OUT_FEATURES))
                   ).astype(jnp.bfloat16)
    b2_p = jnp.pad(b2.astype(jnp.float32),
                   (0, O_PAD - OUT_FEATURES)).reshape(1, O_PAD)
    return w1_p, b1_p, w2_p, b2_p


def hyperparams_ffnn(x, w1_p, b1_p, w2_p, b2_p):
    """x: (B, 3, 32, 32) or anything flattenable to (B, 3072), float32.

    Weight args must come from prepare_params().  Returns (B, 10) float32.
    """
    x2d = x.reshape(-1, IN_FEATURES).astype(jnp.float32)
    B = x2d.shape[0]

    # Batch tiling: small batches -> one sublane-aligned block; large batches
    # -> 256-row blocks (matches the 256-wide MXU on v6e/v7x).
    BM = _round_up(B, 8) if B <= 256 else 256
    B_pad = _round_up(B, BM)
    if B_pad != B:
        x2d = jnp.pad(x2d, ((0, B_pad - B), (0, 0)))
    x_bf = x2d.astype(jnp.bfloat16)

    num_blocks = B_pad // BM
    # Only shard the batch across TCs (v7x megacore) when B is large enough
    # that x traffic dominates the duplicated W1 read; otherwise keep it on
    # one core so the resident W1 is fetched once total.
    batch_sem = "parallel" if B_pad >= 2048 else "arbitrary"

    out = pl.pallas_call(
        _ffnn_kernel,
        out_shape=jax.ShapeDtypeStruct((B_pad, O_PAD), jnp.float32),
        grid_spec=pltpu.PrefetchScalarGridSpec(
            num_scalar_prefetch=0,
            grid=(num_blocks,),
            in_specs=[
                pl.BlockSpec((BM, IN_FEATURES), lambda i: (i, 0)),      # x block
                pl.BlockSpec((IN_FEATURES, H_PAD), lambda i: (0, 0)),   # W1 (resident)
                pl.BlockSpec((1, H_PAD), lambda i: (0, 0)),             # b1
                pl.BlockSpec((H_PAD, O_PAD), lambda i: (0, 0)),         # W2 (resident)
                pl.BlockSpec((1, O_PAD), lambda i: (0, 0)),             # b2
            ],
            out_specs=pl.BlockSpec((BM, O_PAD), lambda i: (i, 0)),
        ),
        compiler_params=pltpu.CompilerParams(
            dimension_semantics=(batch_sem,),
            vmem_limit_bytes=40 * 1024 * 1024,
        ),
    )(x_bf, w1_p, b1_p, w2_p, b2_p)

    return out[:B, :OUT_FEATURES]


def _init_params(key):
    """Deterministic init mimicking nn.Linear's U(-1/sqrt(fan_in), 1/sqrt(fan_in))."""
    k1, k2, k3, k4 = jax.random.split(key, 4)
    bound1 = 1.0 / jnp.sqrt(IN_FEATURES)
    bound2 = 1.0 / jnp.sqrt(HIDDEN)
    w1 = jax.random.uniform(k1, (IN_FEATURES, HIDDEN), jnp.float32,
                            -bound1, bound1)
    b1 = jax.random.uniform(k2, (HIDDEN,), jnp.float32, -bound1, bound1)
    w2 = jax.random.uniform(k3, (HIDDEN, OUT_FEATURES), jnp.float32,
                            -bound2, bound2)
    b2 = jax.random.uniform(k4, (OUT_FEATURES,), jnp.float32, -bound2, bound2)
    return w1, b1, w2, b2


def _reference(x, w1, b1, w2, b2):
    x2d = x.reshape(-1, IN_FEATURES)
    h = jax.nn.sigmoid(x2d @ w1 + b1)
    return jax.nn.sigmoid(h @ w2 + b2)


if __name__ == "__main__":
    key = jax.random.PRNGKey(0)
    kx, kp = jax.random.split(key)
    # CIFAR-like input: batch=2, channels=3, 32x32  ->  view(-1, 3072)
    x = jax.random.normal(kx, (2, 3, 32, 32), jnp.float32)
    w1, b1, w2, b2 = _init_params(kp)

    # One-time weight prep (hoisted out of the per-call path).
    params = prepare_params(w1, b1, w2, b2)
    params = tuple(jax.block_until_ready(p) for p in params)

    out = hyperparams_ffnn(x, *params)
    out = jax.block_until_ready(out)

    ref = _reference(x, w1, b1, w2, b2)
    assert out.shape == (2, OUT_FEATURES)
    # bf16 fc1/fc2 operands (f32 accumulation) vs. full-f32 reference.
    assert jnp.allclose(out, ref, atol=2e-2, rtol=0.0), (
        f"max abs diff {jnp.max(jnp.abs(out - ref))}")

    print("KERNEL_OK")
</pallas_src>

<mosaic_0001>
module attributes {stable_mosaic.version = 11 : i64} {
  func.func @_ffnn_kernel(%arg0: i32, %arg1: memref<8x3072xbf16, #tpu.memory_space<vmem>>, %arg2: memref<3072x1408xbf16, #tpu.memory_space<vmem>>, %arg3: memref<1x1408xf32, #tpu.memory_space<vmem>>, %arg4: memref<1408x128xbf16, #tpu.memory_space<vmem>>, %arg5: memref<1x128xf32, #tpu.memory_space<vmem>>, %arg6: memref<8x128xf32, #tpu.memory_space<vmem>>) attributes {dimension_semantics = [#tpu.dimension_semantics<arbitrary>], iteration_bounds = array<i64: 1>, scalar_prefetch = 0 : i64, scratch_operands = 0 : i64, tpu.core_type = #tpu.core_type<tc>, window_params = [{transform_indices = @transform_0, window_bounds = array<i64: 8, 3072>}, {pipeline_mode = #tpu.pipeline_mode<synchronous>, transform_indices = @transform_1, window_bounds = array<i64: 3072, 1408>}, {pipeline_mode = #tpu.pipeline_mode<synchronous>, transform_indices = @transform_2, window_bounds = array<i64: 1, 1408>}, {pipeline_mode = #tpu.pipeline_mode<synchronous>, transform_indices = @transform_3, window_bounds = array<i64: 1408, 128>}, {pipeline_mode = #tpu.pipeline_mode<synchronous>, transform_indices = @transform_4, window_bounds = array<i64: 1, 128>}, {transform_indices = @transform_5, window_bounds = array<i64: 8, 128>}]} {
    %c0 = arith.constant 0 : index
    %c0_0 = arith.constant 0 : index
    %0 = vector.load %arg1[%c0, %c0_0] : memref<8x3072xbf16, #tpu.memory_space<vmem>>, vector<8x3072xbf16>
    %c0_1 = arith.constant 0 : index
    %c0_2 = arith.constant 0 : index
    %1 = vector.load %arg2[%c0_1, %c0_2] : memref<3072x1408xbf16, #tpu.memory_space<vmem>>, vector<3072x1408xbf16>
    %cst = arith.constant dense<0.000000e+00> : vector<8x1408xf32>
    %2 = tpu.matmul %0, %1, %cst {dimension_numbers = #tpu.dot_dimension_numbers<[1], [0], [0], [1], [0, 0, 1, 1], [], []>} : vector<8x3072xbf16>, vector<3072x1408xbf16>, vector<8x1408xf32> -> vector<8x1408xf32>
    %c0_3 = arith.constant 0 : index
    %c0_4 = arith.constant 0 : index
    %3 = vector.load %arg3[%c0_3, %c0_4] : memref<1x1408xf32, #tpu.memory_space<vmem>>, vector<1x1408xf32>
    %4 = vector.broadcast %3 : vector<1x1408xf32> to vector<8x1408xf32>
    %5 = arith.addf %2, %4 : vector<8x1408xf32>
    %6 = arith.negf %5 : vector<8x1408xf32>
    %7 = math.exp %6 : vector<8x1408xf32>
    %cst_5 = arith.constant 1.000000e+00 : f32
    %8 = vector.broadcast %cst_5 : f32 to vector<8x1408xf32>
    %9 = arith.addf %8, %7 : vector<8x1408xf32>
    %10 = arith.divf %8, %9 : vector<8x1408xf32>
    %11 = arith.truncf %10 : vector<8x1408xf32> to vector<8x1408xbf16>
    %c0_6 = arith.constant 0 : index
    %c0_7 = arith.constant 0 : index
    %12 = vector.load %arg4[%c0_6, %c0_7] : memref<1408x128xbf16, #tpu.memory_space<vmem>>, vector<1408x128xbf16>
    %cst_8 = arith.constant dense<0.000000e+00> : vector<8x128xf32>
    %13 = tpu.matmul %11, %12, %cst_8 {dimension_numbers = #tpu.dot_dimension_numbers<[1], [0], [0], [1], [0, 0, 1, 1], [], []>} : vector<8x1408xbf16>, vector<1408x128xbf16>, vector<8x128xf32> -> vector<8x128xf32>
    %c0_9 = arith.constant 0 : index
    %c0_10 = arith.constant 0 : index
    %14 = vector.load %arg5[%c0_9, %c0_10] : memref<1x128xf32, #tpu.memory_space<vmem>>, vector<1x128xf32>
    %15 = vector.broadcast %14 : vector<1x128xf32> to vector<8x128xf32>
    %16 = arith.addf %13, %15 : vector<8x128xf32>
    %17 = arith.negf %16 : vector<8x128xf32>
    %18 = math.exp %17 : vector<8x128xf32>
    %cst_11 = arith.constant 1.000000e+00 : f32
    %19 = vector.broadcast %cst_11 : f32 to vector<8x128xf32>
    %20 = arith.addf %19, %18 : vector<8x128xf32>
    %21 = arith.divf %19, %20 : vector<8x128xf32>
    %c0_12 = arith.constant 0 : index
    %c0_13 = arith.constant 0 : index
    %22 = vector.load %arg6[%c0_12, %c0_13] : memref<8x128xf32, #tpu.memory_space<vmem>>, vector<8x128xf32>
    tpu.vector_store %arg6[%c0_12, %c0_13], %21 {strides = array<i32>} : memref<8x128xf32, #tpu.memory_space<vmem>>, vector<8x128xf32>,
    return
  }
  func.func @transform_0(%arg0: i32) -> (i32, i32) {
    %c0_i32 = arith.constant 0 : i32
    %c0_i32_0 = arith.constant 0 : i32
    return %arg0, %c0_i32 : i32, i32
  }
  func.func @transform_1(%arg0: i32) -> (i32, i32) {
    %c0_i32 = arith.constant 0 : i32
    %c0_i32_0 = arith.constant 0 : i32
    %c0_i32_1 = arith.constant 0 : i32
    return %c0_i32, %c0_i32_0 : i32, i32
  }
  func.func @transform_2(%arg0: i32) -> (i32, i32) {
    %c0_i32 = arith.constant 0 : i32
    %c0_i32_0 = arith.constant 0 : i32
    %c0_i32_1 = arith.constant 0 : i32
    return %c0_i32, %c0_i32_0 : i32, i32
  }
  func.func @transform_3(%arg0: i32) -> (i32, i32) {
    %c0_i32 = arith.constant 0 : i32
    %c0_i32_0 = arith.constant 0 : i32
    %c0_i32_1 = arith.constant 0 : i32
    return %c0_i32, %c0_i32_0 : i32, i32
  }
  func.func @transform_4(%arg0: i32) -> (i32, i32) {
    %c0_i32 = arith.constant 0 : i32
    %c0_i32_0 = arith.constant 0 : i32
    %c0_i32_1 = arith.constant 0 : i32
    return %c0_i32, %c0_i32_0 : i32, i32
  }
  func.func @transform_5(%arg0: i32) -> (i32, i32) {
    %c0_i32 = arith.constant 0 : i32
    %c0_i32_0 = arith.constant 0 : i32
    return %arg0, %c0_i32 : i32, i32
  }
}

</mosaic_0001>

<bundles_post_ra>
// kernel: tpu_custom_call.1
= control target key start
LH: loop header
LB: loop body
LE: loop exit
PB: predicated region body
PF: predicated region fallthrough
CT: control target
= control target key end

     0   :  { %10 = vsyncpa [#allocation3], 0  ;;  %s23982_s0 = inlined_call_operand.hbm [shape: bf16[8,3072], index: 0, kind: input, shape index: {}]   ;;  %s23983_s1 = inlined_call_operand.hbm [shape: bf16[3072,1408], index: 1, kind: input, shape index: {}]   ;;  %s23984_s2 = inlined_call_operand.hbm [shape: f32[1,1408], index: 2, kind: input, shape index: {}]   ;;  %s23985_s3 = inlined_call_operand.hbm [shape: bf16[1408,128], index: 3, kind: input, shape index: {}]   ;;  %s23986_s4 = inlined_call_operand.hbm [shape: f32[1,128], index: 4, kind: input, shape index: {}]   ;;  %s23987_s5 = inlined_call_operand.hbm [shape: f32[8,128], index: 5, kind: output, shape index: {}]  }
   0x1   :  { %11 = vsyncpa [#allocation6], 0 }
   0x2   :  { %12 = vsyncpa [#allocation9], 0 }
   0x3   :  { %13 = vsyncpa [#allocation4], 0  ;;  %s23541_s18 = smov [#allocation5]   ;;  %s23401_s22 = scalar_lea.hbm %s23983_s1, 270336 }
   0x4   :  { %s29_s19 = sshll.u32 %s23541_s18, 4  ;;  %p23402_p0 = scmp.ne.s32.totalorder %s23983_s1, %s23401_s22  ;;  %s30_s19 = int_to_ptr.vmem [resolvable:$true] %s29_s19 }
   0x5   :  { %p23405_p1 = scmp.lt.u32.totalorder %s23401_s22, %s23983_s1 }
   0x7   :  { %p23407_p2 = pnand %p23405_p1, %p23402_p0 }
   0x9   :  { %23410 = shalt.err (!%p23407_p2)
}
   0xa   :  { %s23411_s27 = scalar_lea.vmem %s30_s19, 270336  ;;  %p23416_p4 = scmp.lt.s32.totalorder %s30_s19, %s30_s19 }
   0xb   :  { %p23412_p3 = scmp.ne.s32.totalorder %s30_s19, %s23411_s27  ;;  %p23417_p5 = scmp.lt.s32.totalorder %s23411_s27, %s23411_s27 }
   0xd   :  { %p23418_p6 = por %p23417_p5, %p23416_p4 }
   0xf   :  { %p23419_p7 = pnand %p23418_p6, %p23412_p3 }
  0x11   :  { %23422 = shalt.err (!%p23419_p7)
}
  0x12   :  { %s23542_s28 = smov 704   ;;  %s23543_s29 = smov 44  }
  0x13   :  { %35 = dma.hbm_to_vmem [thread:$0]  %s23983_s1, 270336, %s30_s19, [#allocation6], %s23542_s28, %s23542_s28, %s23543_s29  }
  0x14   :  { %s23544_s7 = smov [#allocation8]   ;;  %s23423_s11 = scalar_lea.hbm %s23985_s3, 11264 }
  0x15   :  { %s51_s8 = sshll.u32 %s23544_s7, 4  ;;  %p23424_p8 = scmp.ne.s32.totalorder %s23985_s3, %s23423_s11  ;;  %s52_s8 = int_to_ptr.vmem [resolvable:$true] %s51_s8 }
  0x16   :  { %p23427_p9 = scmp.lt.u32.totalorder %s23423_s11, %s23985_s3 }
  0x18   :  { %p23429_p10 = pnand %p23427_p9, %p23424_p8 }
  0x1a   :  { %23432 = shalt.err (!%p23429_p10)
}
  0x1b   :  { %s23433_s16 = scalar_lea.vmem %s52_s8, 11264  ;;  %p23438_p12 = scmp.lt.s32.totalorder %s52_s8, %s52_s8 }
  0x1c   :  { %p23434_p11 = scmp.ne.s32.totalorder %s52_s8, %s23433_s16  ;;  %p23439_p13 = scmp.lt.s32.totalorder %s23433_s16, %s23433_s16 }
  0x1e   :  { %p23440_p0 = por %p23439_p13, %p23438_p12 }
  0x20   :  { %p23441_p1 = pnand %p23440_p0, %p23434_p11 }
  0x22   :  { %23444 = shalt.err (!%p23441_p1)
}
  0x23   :  { %s23545_s1 = smov 64   ;;  %s23546_s17 = smov 4  }
  0x24   :  { %57 = dma.hbm_to_vmem [thread:$0]  %s23985_s3, 11264, %s52_s8, [#allocation9], %s23545_s1, %s23545_s1, %s23546_s17  }
  0x25   :  { %s23547_s20 = smov [#allocation2]   ;;  %s23548_s22 = smov [#allocation7]  }
  0x26   :  { %s20_s21 = sshll.u32 %s23547_s20, 4  ;;  %s42_s23 = sshll.u32 %s23548_s22, 4  ;;  %s21_s21 = int_to_ptr.vmem [resolvable:$true] %s20_s21  ;;  %s43_s23 = int_to_ptr.vmem [resolvable:$true] %s42_s23 }
  0x27   :  { %s23445_s26 = scalar_lea.hbm %s23982_s0, 1536 }
  0x28   :  { %p23446_p2 = scmp.ne.s32.totalorder %s23982_s0, %s23445_s26  ;;  %p23449_p3 = scmp.lt.u32.totalorder %s23445_s26, %s23982_s0 }
  0x2a   :  { %p23451_p4 = pnand %p23449_p3, %p23446_p2 }
  0x2c   :  { %23454 = shalt.err (!%p23451_p4)
}
  0x2d   :  { %s23455_s3 = scalar_lea.vmem %s21_s21, 1536  ;;  %p23460_p6 = scmp.lt.s32.totalorder %s21_s21, %s21_s21 }
  0x2e   :  { %p23456_p5 = scmp.ne.s32.totalorder %s21_s21, %s23455_s3  ;;  %p23461_p7 = scmp.lt.s32.totalorder %s23455_s3, %s23455_s3 }
  0x30   :  { %p23462_p8 = por %p23461_p7, %p23460_p6 }
  0x32   :  { %p23463_p9 = pnand %p23462_p8, %p23456_p5 }
  0x34   :  { %23466 = shalt.err (!%p23463_p9)
}
  0x35   :  { %23 = dma.hbm_to_vmem [thread:$0]  %s23982_s0, 1536, %s21_s21, [#allocation3]  }
  0x36   :  { %s23467_s10 = scalar_lea.hbm %s23984_s2, 176 }
  0x37   :  { %p23468_p10 = scmp.ne.s32.totalorder %s23984_s2, %s23467_s10  ;;  %p23471_p11 = scmp.lt.u32.totalorder %s23467_s10, %s23984_s2 }
  0x39   :  { %p23473_p12 = pnand %p23471_p11, %p23468_p10 }
  0x3b   :  { %23476 = shalt.err (!%p23473_p12)
}
  0x3c   :  { %s23477_s15 = scalar_lea.vmem %s43_s23, 176  ;;  %s23481_s16 = scalar_lea.vmem %s43_s23, 192 }
  0x3d   :  { %p23478_p13 = scmp.ne.s32.totalorder %s43_s23, %s23477_s15  ;;  %p23482_p0 = scmp.lt.s32.totalorder %s43_s23, %s43_s23 }
  0x3e   :  { %p23483_p1 = scmp.lt.s32.totalorder %s23481_s16, %s23477_s15 }
  0x40   :  { %p23484_p2 = por %p23483_p1, %p23482_p0 }
  0x42   :  { %p23485_p3 = pnand %p23484_p2, %p23478_p13 }
  0x44   :  { %23488 = shalt.err (!%p23485_p3)
}
  0x45   :  { %45 = dma.hbm_to_vmem [thread:$0]  %s23984_s2, 176, %s43_s23, [#allocation6]  }
  0x46   :  { %s23549_s17 = smov [#allocation10]   ;;  %s23489_s21 = scalar_lea.hbm %s23986_s4, 16 }
  0x47   :  { %s64_s18 = sshll.u32 %s23549_s17, 4  ;;  %p23490_p4 = scmp.ne.s32.totalorder %s23986_s4, %s23489_s21  ;;  %s65_s18 = int_to_ptr.vmem [resolvable:$true] %s64_s18 }
  0x48   :  { %p23493_p5 = scmp.lt.u32.totalorder %s23489_s21, %s23986_s4 }
  0x4a   :  { %p23495_p6 = pnand %p23493_p5, %p23490_p4 }
  0x4c   :  { %23498 = shalt.err (!%p23495_p6)
}
  0x4d   :  { %s23499_s27 = scalar_lea.vmem %s65_s18, 16  ;;  %s23503_s2 = scalar_lea.vmem %s65_s18, 32 }
  0x4e   :  { %p23500_p7 = scmp.ne.s32.totalorder %s65_s18, %s23499_s27  ;;  %p23504_p8 = scmp.lt.s32.totalorder %s65_s18, %s65_s18 }
  0x4f   :  { %p23505_p9 = scmp.lt.s32.totalorder %s23503_s2, %s23499_s27 }
  0x51   :  { %p23506_p10 = por %p23505_p9, %p23504_p8 }
  0x53   :  { %p23507_p11 = pnand %p23506_p10, %p23500_p7 }
  0x55   :  { %23510 = shalt.err (!%p23507_p11)
}
  0x56   :  { %67 = dma.hbm_to_vmem [thread:$0]  %s23986_s4, 16, %s65_s18, [#allocation9]  }
  0x57   :  { %23533 = dma.done.wait [#allocation3], 1536  }
  0x58   :  { %23534 = vsyncadd [#allocation3], 4294965760 }
  0x59   :  { %23535 = dma.done.wait [#allocation6], 270512  }
  0x5a   :  { %23536 = vsyncadd [#allocation6], 4294696784 }
  0x5b   :  { %23537 = dma.done.wait [#allocation9], 11280  }
  0x5c   :  { %23538 = vsyncadd [#allocation9], 4294956016  ;;  %v20167_v0 = vld [vmem:[#allocation5 + $0x4] ss:$44 sps:$4 sm:$0xff]   ;;  %v20171_v2 = vld [vmem:[#allocation5] ss:$44 sps:$4 sm:$0xff]  }
  0x5d   :  { %v20169_v1 = vld [vmem:[#allocation5 + $0x584] ss:$44 sps:$4 sm:$0xff]   ;;  %13295 = vmatprep.subr.bf16.mxu1 %v20167_v0  ;;  %v20172_v3 = vld [vmem:[#allocation5 + $0x580] ss:$44 sps:$4 sm:$0xff]   ;;  %v20173_v4 = vld [vmem:[#allocation5 + $0x5c] ss:$44 sps:$4 sm:$0xff]  }
  0x5e   :  { %13336 = vmatprep.subr.bf16.mxu0 %v20169_v1  ;;  %13296 = vmatpush1.bf16.msra.mxu1 %v20171_v2  ;;  %v20175_v5 = vld [vmem:[#allocation5 + $0x5dc] ss:$44 sps:$4 sm:$0xff]   ;;  %v20177_v6 = vld [vmem:[#allocation5 + $0x58] ss:$44 sps:$4 sm:$0xff]   ;;  %v20179_v8 = vld [vmem:[#allocation5 + $0xb4] ss:$44 sps:$4 sm:$0xff]  }
  0x5f   :  { %13337 = vmatpush1.bf16.msra.mxu0 %v20172_v3  ;;  %13297 = vmatprep.subr.bf16.mxu1 %v20173_v4  ;;  %v20178_v7 = vld [vmem:[#allocation5 + $0x5d8] ss:$44 sps:$4 sm:$0xff]   ;;  %v20181_v9 = vld [vmem:[#allocation5 + $0x634] ss:$44 sps:$4 sm:$0xff]   ;;  %v20183_v10 = vld [vmem:[#allocation5 + $0xb0] ss:$44 sps:$4 sm:$0xff]  }
  0x60   :  { %13338 = vmatprep.subr.bf16.mxu0 %v20175_v5  ;;  %v20184_v11 = vld [vmem:[#allocation5 + $0x630] ss:$44 sps:$4 sm:$0xff]   ;;  %v20185_v12 = vld [vmem:[#allocation5 + $0x10c] ss:$44 sps:$4 sm:$0xff]   ;;  %v20189_v14 = vld [vmem:[#allocation5 + $0x108] ss:$44 sps:$4 sm:$0xff]  }
  0x61   :  { %v20187_v13 = vld [vmem:[#allocation5 + $0x68c] ss:$44 sps:$4 sm:$0xff]   ;;  %v20190_v15 = vld [vmem:[#allocation5 + $0x688] ss:$44 sps:$4 sm:$0xff]   ;;  %v20191_v16 = vld [vmem:[#allocation5 + $0x164] ss:$44 sps:$4 sm:$0xff]  }
  0x62   :  { %13298 = vmatpush1.bf16.msra.mxu1 %v20177_v6  ;;  %v20193_v17 = vld [vmem:[#allocation5 + $0x6e4] ss:$44 sps:$4 sm:$0xff]   ;;  %v20195_v18 = vld [vmem:[#allocation5 + $0x160] ss:$44 sps:$4 sm:$0xff]   ;;  %v20197_v20 = vld [vmem:[#allocation5 + $0x1bc] ss:$44 sps:$4 sm:$0xff]  }
  0x63   :  { %13339 = vmatpush1.bf16.msra.mxu0 %v20178_v7  ;;  %13299 = vmatprep.subr.bf16.mxu1 %v20179_v8  ;;  %v20196_v19 = vld [vmem:[#allocation5 + $0x6e0] ss:$44 sps:$4 sm:$0xff]   ;;  %v20199_v21 = vld [vmem:[#allocation5 + $0x73c] ss:$44 sps:$4 sm:$0xff]   ;;  %v20201_v22 = vld [vmem:[#allocation5 + $0x1b8] ss:$44 sps:$4 sm:$0xff]  }
  0x64   :  { %13340 = vmatprep.subr.bf16.mxu0 %v20181_v9  ;;  %v20202_v23 = vld [vmem:[#allocation5 + $0x738] ss:$44 sps:$4 sm:$0xff]   ;;  %v20203_v24 = vld [vmem:[#allocation5 + $0x214] ss:$44 sps:$4 sm:$0xff]   ;;  %v20207_v26 = vld [vmem:[#allocation5 + $0x210] ss:$44 sps:$4 sm:$0xff]  }
  0x65   :  { %v20205_v25 = vld [vmem:[#allocation5 + $0x794] ss:$44 sps:$4 sm:$0xff]   ;;  %v20208_v27 = vld [vmem:[#allocation5 + $0x790] ss:$44 sps:$4 sm:$0xff]   ;;  %v20209_v28 = vld [vmem:[#allocation5 + $0x26c] ss:$44 sps:$4 sm:$0xff]  }
  0x66   :  { %13300 = vmatpush1.bf16.msra.mxu1 %v20183_v10  ;;  %v20211_v29 = vld [vmem:[#allocation5 + $0x7ec] ss:$44 sps:$4 sm:$0xff]   ;;  %v20213_v30 = vld [vmem:[#allocation5 + $0x268] ss:$44 sps:$4 sm:$0xff]   ;;  %v20215_v32 = vld [vmem:[#allocation5 + $0x2c4] ss:$44 sps:$4 sm:$0xff]  }
  0x67   :  { %13341 = vmatpush1.bf16.msra.mxu0 %v20184_v11  ;;  %13301 = vmatprep.subr.bf16.mxu1 %v20185_v12  ;;  %v20214_v31 = vld [vmem:[#allocation5 + $0x7e8] ss:$44 sps:$4 sm:$0xff]   ;;  %v20217_v33 = vld [vmem:[#allocation5 + $0x844] ss:$44 sps:$4 sm:$0xff]   ;;  %v20219_v34 = vld [vmem:[#allocation5 + $0x2c0] ss:$44 sps:$4 sm:$0xff]  }
  0x68   :  { %13342 = vmatprep.subr.bf16.mxu0 %v20187_v13  ;;  %v20220_v35 = vld [vmem:[#allocation5 + $0x840] ss:$44 sps:$4 sm:$0xff]   ;;  %v20221_v36 = vld [vmem:[#allocation5 + $0x31c] ss:$44 sps:$4 sm:$0xff]   ;;  %v20225_v38 = vld [vmem:[#allocation5 + $0x318] ss:$44 sps:$4 sm:$0xff]  }
  0x69   :  { %v20223_v37 = vld [vmem:[#allocation5 + $0x89c] ss:$44 sps:$4 sm:$0xff]   ;;  %v20226_v39 = vld [vmem:[#allocation5 + $0x898] ss:$44 sps:$4 sm:$0xff]   ;;  %v20227_v40 = vld [vmem:[#allocation5 + $0x374] ss:$44 sps:$4 sm:$0xff]  }
  0x6a   :  { %13302 = vmatpush1.bf16.msra.mxu1 %v20189_v14  ;;  %v20229_v41 = vld [vmem:[#allocation5 + $0x8f4] ss:$44 sps:$4 sm:$0xff]   ;;  %v20231_v42 = vld [vmem:[#allocation5 + $0x370] ss:$44 sps:$4 sm:$0xff]   ;;  %v20233_v44 = vld [vmem:[#allocation5 + $0x3cc] ss:$44 sps:$4 sm:$0xff]  }
  0x6b   :  { %13343 = vmatpush1.bf16.msra.mxu0 %v20190_v15  ;;  %13303 = vmatprep.subr.bf16.mxu1 %v20191_v16  ;;  %v20232_v43 = vld [vmem:[#allocation5 + $0x8f0] ss:$44 sps:$4 sm:$0xff]   ;;  %v20235_v45 = vld [vmem:[#allocation5 + $0x94c] ss:$44 sps:$4 sm:$0xff]   ;;  %v84_v46 = vld [vmem:[#allocation2] sm:$0xff]  ;;  %vm23551_vm0 = vmmov 0  }
  0x6c   :  { %13344 = vmatprep.subr.bf16.mxu0 %v20193_v17  ;;  %v23643_v47 = vcombine.high %v84_v46, %v84_v46  ;;  %v85_v48 = vld [vmem:[#allocation2 + $0x8] sm:$0xff]  ;;  %v20239_v52 = vld [vmem:[#allocation5 + $0x424] ss:$44 sps:$4 sm:$0xff]   ;;  %v20251_v60 = vld [vmem:[#allocation5 + $0x4d4] ss:$44 sps:$4 sm:$0xff]   ;;  %v23649_v6 = vcombine.low %v84_v46, %v84_v46  ;;  %s23552_s4 = smov [#allocation11]  }
  0x6d   :  { %v20237_v49 = vld [vmem:[#allocation5 + $0x3c8] ss:$44 sps:$4 sm:$0xff]   ;;  %v23645_v51 = vcombine.high %v85_v48, %v85_v48  ;;  %v20241_v53 = vld [vmem:[#allocation5 + $0x9a4] ss:$44 sps:$4 sm:$0xff]   ;;  %v20243_v54 = vld [vmem:[#allocation5 + $0x420] ss:$44 sps:$4 sm:$0xff]   ;;  %v23651_v7 = vcombine.low %v85_v48, %v85_v48 }
  0x6e   :  { %13304 = vmatpush1.bf16.msra.mxu1 %v20195_v18  ;;  %v20238_v50 = vld [vmem:[#allocation5 + $0x948] ss:$44 sps:$4 sm:$0xff]   ;;  %13327 = vmatprep.mubr.bf16.mxu1 %v23643_v47  ;;  %v20244_v55 = vld [vmem:[#allocation5 + $0x9a0] ss:$44 sps:$4 sm:$0xff]   ;;  %v20249_v58 = vld [vmem:[#allocation5 + $0x478] ss:$44 sps:$4 sm:$0xff]  }
  0x6f   :  { %13345 = vmatpush1.bf16.msra.mxu0 %v20196_v19  ;;  %13305 = vmatprep.subr.bf16.mxu1 %v20197_v20  ;;  %v20245_v56 = vld [vmem:[#allocation5 + $0x47c] ss:$44 sps:$4 sm:$0xff]   ;;  %v20250_v59 = vld [vmem:[#allocation5 + $0x9f8] ss:$44 sps:$4 sm:$0xff]   ;;  %v20253_v61 = vld [vmem:[#allocation5 + $0xa54] ss:$44 sps:$4 sm:$0xff]  }
  0x70   :  { %13346 = vmatprep.subr.bf16.mxu0 %v20199_v21  ;;  %13368 = vmatprep.mubr.bf16.mxu0 %v23645_v51  ;;  %v20247_v57 = vld [vmem:[#allocation5 + $0x9fc] ss:$44 sps:$4 sm:$0xff]   ;;  %v20257_v0 = vld [vmem:[#allocation5 + $0x52c] ss:$44 sps:$4 sm:$0xff]   ;;  %v20267_v4 = vld [vmem:[#allocation5 + $0xb04] ss:$44 sps:$4 sm:$0xff]  }
  0x71   :  { %v20255_v62 = vld [vmem:[#allocation5 + $0x4d0] ss:$44 sps:$4 sm:$0xff]   ;;  %v20259_v1 = vld [vmem:[#allocation5 + $0xaac] ss:$44 sps:$4 sm:$0xff]   ;;  %v20261_v2 = vld [vmem:[#allocation5 + $0x528] ss:$44 sps:$4 sm:$0xff]  }
  0x72   :  { %13306 = vmatpush1.bf16.msra.mxu1 %v20201_v22  ;;  %v20256_v63 = vld [vmem:[#allocation5 + $0xa50] ss:$44 sps:$4 sm:$0xff]   ;;  %v20262_v3 = vld [vmem:[#allocation5 + $0xaa8] ss:$44 sps:$4 sm:$0xff]   ;;  %v20270_v5 = vld [vmem:[#allocation5 + $0xc] ss:$44 sps:$4 sm:$0xff]  }
  0x73   :  { %13347 = vmatpush1.bf16.msra.mxu0 %v20202_v23  ;;  %13307 = vmatprep.subr.bf16.mxu1 %v20203_v24  ;;  %v20265_v8 = vld [vmem:[#allocation5 + $0xb00] ss:$44 sps:$4 sm:$0xff]   ;;  %v20268_v9 = vld [vmem:[#allocation5 + $0x8] ss:$44 sps:$4 sm:$0xff]   ;;  %v20278_v11 = vld [vmem:[#allocation5 + $0x64] ss:$44 sps:$4 sm:$0xff]  }
  0x74   :  { %13348 = vmatprep.subr.bf16.mxu0 %v20205_v25  ;;  %v20275_v10 = vld [vmem:[#allocation5 + $0xb5c] ss:$44 sps:$4 sm:$0xff]   ;;  %v20273_v12 = vld [vmem:[#allocation5 + $0xb58] ss:$44 sps:$4 sm:$0xff]   ;;  %v20276_v13 = vld [vmem:[#allocation5 + $0x60] ss:$44 sps:$4 sm:$0xff]  }
  0x75   :  { %v20281_v14 = vld [vmem:[#allocation5 + $0xbb4] ss:$44 sps:$4 sm:$0xff]   ;;  %v20284_v15 = vld [vmem:[#allocation5 + $0xbc] ss:$44 sps:$4 sm:$0xff]   ;;  %v20282_v17 = vld [vmem:[#allocation5 + $0xb8] ss:$44 sps:$4 sm:$0xff]  }
  0x76   :  { %13308 = vmatpush1.bf16.msra.mxu1 %v20207_v26  ;;  %v20279_v16 = vld [vmem:[#allocation5 + $0xbb0] ss:$44 sps:$4 sm:$0xff]   ;;  %v20287_v18 = vld [vmem:[#allocation5 + $0xc0c] ss:$44 sps:$4 sm:$0xff]   ;;  %v20290_v19 = vld [vmem:[#allocation5 + $0x114] ss:$44 sps:$4 sm:$0xff]  }
  0x77   :  { %13349 = vmatpush1.bf16.msra.mxu0 %v20208_v27  ;;  %13309 = vmatprep.subr.bf16.mxu1 %v20209_v28  ;;  %v20285_v20 = vld [vmem:[#allocation5 + $0xc08] ss:$44 sps:$4 sm:$0xff]   ;;  %v20288_v21 = vld [vmem:[#allocation5 + $0x110] ss:$44 sps:$4 sm:$0xff]   ;;  %v20296_v23 = vld [vmem:[#allocation5 + $0x16c] ss:$44 sps:$4 sm:$0xff]  }
  0x78   :  { %13350 = vmatprep.subr.bf16.mxu0 %v20211_v29  ;;  %v20293_v22 = vld [vmem:[#allocation5 + $0xc64] ss:$44 sps:$4 sm:$0xff]   ;;  %v20291_v24 = vld [vmem:[#allocation5 + $0xc60] ss:$44 sps:$4 sm:$0xff]   ;;  %v20294_v25 = vld [vmem:[#allocation5 + $0x168] ss:$44 sps:$4 sm:$0xff]  }
  0x79   :  { %v20299_v26 = vld [vmem:[#allocation5 + $0xcbc] ss:$44 sps:$4 sm:$0xff]   ;;  %v20302_v27 = vld [vmem:[#allocation5 + $0x1c4] ss:$44 sps:$4 sm:$0xff]   ;;  %v20300_v29 = vld [vmem:[#allocation5 + $0x1c0] ss:$44 sps:$4 sm:$0xff]  }
  0x7a   :  { %13310 = vmatpush1.bf16.msra.mxu1 %v20213_v30  ;;  %v20297_v28 = vld [vmem:[#allocation5 + $0xcb8] ss:$44 sps:$4 sm:$0xff]   ;;  %v20305_v30 = vld [vmem:[#allocation5 + $0xd14] ss:$44 sps:$4 sm:$0xff]   ;;  %s17276_s29 = sshll.u32 %s23552_s4, 4  ;;  %s17277_s29 = int_to_ptr.vmem [resolvable:$true] %s17276_s29 }
  0x7b   :  { %13351 = vmatpush1.bf16.msra.mxu0 %v20214_v31  ;;  %13311 = vmatprep.subr.bf16.mxu1 %v20215_v32  ;;  %v20308_v31 = vld [vmem:[#allocation5 + $0x21c] ss:$44 sps:$4 sm:$0xff]   ;;  %v23656_v32 = vld [vmem:[#allocation2 + $0x10] sm:$0xff]  ;;  %v20321_v46 = vld [vmem:[#allocation5 + $0xe18] ss:$44 sps:$4 sm:$0xff]   ;;  %s23511_s30 = scalar_lea.vmem %s17277_s29, 128  ;;  %p23516_p13 = scmp.lt.s32.totalorder %s17277_s29, %s17277_s29 }
  0x7c   :  { %13352 = vmatprep.subr.bf16.mxu0 %v20217_v33  ;;  %v20303_v33 = vld [vmem:[#allocation5 + $0xd10] ss:$44 sps:$4 sm:$0xff]   ;;  %v20324_v48 = vld [vmem:[#allocation5 + $0x320] ss:$44 sps:$4 sm:$0xff]   ;;  %p23512_p12 = scmp.ne.s32.totalorder %s17277_s29, %s23511_s30  ;;  %p23517_p0 = scmp.lt.s32.totalorder %s23511_s30, %s23511_s30 }
  0x7e   :  { %13312 = vmatpush1.bf16.msra.mxu1 %v20219_v34  ;;  %v23660_v34 = vcombine.high %v23656_v32, %v23656_v32  ;;  %p23518_p1 = por %p23517_p0, %p23516_p13 }
  0x7f   :  { %13353 = vmatpush1.bf16.msra.mxu0 %v20220_v35  ;;  %13313 = vmatprep.subr.bf16.mxu1 %v20221_v36  ;;  %v20306_v35 = vld [vmem:[#allocation5 + $0x218] ss:$44 sps:$4 sm:$0xff]  }
  0x80   :  { %13354 = vmatprep.subr.bf16.mxu0 %v20223_v37  ;;  %v20311_v36 = vld [vmem:[#allocation5 + $0xd6c] ss:$44 sps:$4 sm:$0xff]   ;;  %v20314_v37 = vld [vmem:[#allocation5 + $0x274] ss:$44 sps:$4 sm:$0xff]   ;;  %p23519_p2 = pnand %p23518_p1, %p23512_p12 }
  0x82   :  { %13314 = vmatpush1.bf16.msra.mxu1 %v20225_v38  ;;  %v20309_v38 = vld [vmem:[#allocation5 + $0xd68] ss:$44 sps:$4 sm:$0xff]  }
  0x83   :  { %13355 = vmatpush1.bf16.msra.mxu0 %v20226_v39  ;;  %13315 = vmatprep.subr.bf16.mxu1 %v20227_v40  ;;  %v20312_v39 = vld [vmem:[#allocation5 + $0x270] ss:$44 sps:$4 sm:$0xff]  }
  0x84   :  { %13356 = vmatprep.subr.bf16.mxu0 %v20229_v41  ;;  %v20317_v40 = vld [vmem:[#allocation5 + $0xdc4] ss:$44 sps:$4 sm:$0xff]   ;;  %v20320_v41 = vld [vmem:[#allocation5 + $0x2cc] ss:$44 sps:$4 sm:$0xff]  }
  0x86   :  { %13316 = vmatpush1.bf16.msra.mxu1 %v20231_v42  ;;  %v20315_v42 = vld [vmem:[#allocation5 + $0xdc0] ss:$44 sps:$4 sm:$0xff]  }
  0x87   :  { %13357 = vmatpush1.bf16.msra.mxu0 %v20232_v43  ;;  %13317 = vmatprep.subr.bf16.mxu1 %v20233_v44  ;;  %v20318_v43 = vld [vmem:[#allocation5 + $0x2c8] ss:$44 sps:$4 sm:$0xff]  }
  0x88   :  { %13358 = vmatprep.subr.bf16.mxu0 %v20235_v45  ;;  %v20323_v44 = vld [vmem:[#allocation5 + $0xe1c] ss:$44 sps:$4 sm:$0xff]   ;;  %v20326_v45 = vld [vmem:[#allocation5 + $0x324] ss:$44 sps:$4 sm:$0xff]  }
  0x8a   :  { %13318 = vmatpush1.bf16.msra.mxu1 %v20237_v49  ;;  %v20329_v49 = vld [vmem:[#allocation5 + $0xe74] ss:$44 sps:$4 sm:$0xff]  }
  0x8b   :  { %13359 = vmatpush1.bf16.msra.mxu0 %v20238_v50  ;;  %13319 = vmatprep.subr.bf16.mxu1 %v20239_v52  ;;  %v20332_v50 = vld [vmem:[#allocation5 + $0x37c] ss:$44 sps:$4 sm:$0xff]  }
  0x8c   :  { %13360 = vmatprep.subr.bf16.mxu0 %v20241_v53  ;;  %v20327_v52 = vld [vmem:[#allocation5 + $0xe70] ss:$44 sps:$4 sm:$0xff]   ;;  %v20330_v53 = vld [vmem:[#allocation5 + $0x378] ss:$44 sps:$4 sm:$0xff]  }
  0x8e   :  { %13320 = vmatpush1.bf16.msra.mxu1 %v20243_v54  ;;  %v20335_v54 = vld [vmem:[#allocation5 + $0xecc] ss:$44 sps:$4 sm:$0xff]  }
  0x8f   :  { %13361 = vmatpush1.bf16.msra.mxu0 %v20244_v55  ;;  %13321 = vmatprep.subr.bf16.mxu1 %v20245_v56  ;;  %v20338_v55 = vld [vmem:[#allocation5 + $0x3d4] ss:$44 sps:$4 sm:$0xff]  }
  0x90   :  { %13362 = vmatprep.subr.bf16.mxu0 %v20247_v57  ;;  %v20333_v56 = vld [vmem:[#allocation5 + $0xec8] ss:$44 sps:$4 sm:$0xff]   ;;  %v20336_v57 = vld [vmem:[#allocation5 + $0x3d0] ss:$44 sps:$4 sm:$0xff]  }
  0x92   :  { %13322 = vmatpush1.bf16.msra.mxu1 %v20249_v58  ;;  %v20341_v58 = vld [vmem:[#allocation5 + $0xf24] ss:$44 sps:$4 sm:$0xff]  }
  0x93   :  { %13363 = vmatpush1.bf16.msra.mxu0 %v20250_v59  ;;  %13323 = vmatprep.subr.bf16.mxu1 %v20251_v60  ;;  %v20344_v59 = vld [vmem:[#allocation5 + $0x42c] ss:$44 sps:$4 sm:$0xff]  }
  0x94   :  { %13364 = vmatprep.subr.bf16.mxu0 %v20253_v61  ;;  %v20339_v60 = vld [vmem:[#allocation5 + $0xf20] ss:$44 sps:$4 sm:$0xff]   ;;  %v20342_v61 = vld [vmem:[#allocation5 + $0x428] ss:$44 sps:$4 sm:$0xff]  }
  0x96   :  { %13324 = vmatpush1.bf16.msra.mxu1 %v20255_v62  ;;  %v20347_v62 = vld [vmem:[#allocation5 + $0xf7c] ss:$44 sps:$4 sm:$0xff]  }
  0x97   :  { %13365 = vmatpush1.bf16.msra.mxu0 %v20256_v63  ;;  %13325 = vmatprep.subr.bf16.mxu1 %v20257_v0  ;;  %v20350_v63 = vld [vmem:[#allocation5 + $0x484] ss:$44 sps:$4 sm:$0xff]  }
  0x98   :  { %13366 = vmatprep.subr.bf16.mxu0 %v20259_v1  ;;  %v20345_v0 = vld [vmem:[#allocation5 + $0xf78] ss:$44 sps:$4 sm:$0xff]   ;;  %v20348_v1 = vld [vmem:[#allocation5 + $0x480] ss:$44 sps:$4 sm:$0xff]  }
  0x9a   :  { %13326 = vmatpush1.bf16.msra.mxu1 %v20261_v2  ;;  %v20353_v2 = vld [vmem:[#allocation5 + $0xfd4] ss:$44 sps:$4 sm:$0xff]  }
  0x9b   :  { %13367 = vmatpush1.bf16.msra.mxu0 %v20262_v3  ;;  %13787 = vmatprep.subr.bf16.mxu1 %v20270_v5  ;;  %v20356_v3 = vld [vmem:[#allocation5 + $0x4dc] ss:$44 sps:$4 sm:$0xff]   ;;  %v20354_v5 = vld [vmem:[#allocation5 + $0x4d8] ss:$44 sps:$4 sm:$0xff]  }
  0x9c   :  { %13377 = vmatprep.subr.bf16.mxu0 %v20267_v4  ;;  %v20351_v4 = vld [vmem:[#allocation5 + $0xfd0] ss:$44 sps:$4 sm:$0xff]  }
  0x9d   :  { %13328 = vmatmul.mubr.bf16.vlgmr.msra.gmra.mrb[0].mxu1 %v23649_v6 }
  0x9e   :  { %13369 = vmatmul.mubr.bf16.vlgmr.msra.gmra.mrb[0].mxu0 %v23651_v7  ;;  %13788 = vmatpush1.bf16.msra.mxu1 %v20268_v9  ;;  %v20362_v9 = vld [vmem:[#allocation5 + $0x534] ss:$44 sps:$4 sm:$0xff]  }
  0x9f   :  { %13378 = vmatpush1.bf16.msra.mxu0 %v20265_v8  ;;  %13789 = vmatprep.subr.bf16.mxu1 %v20278_v11  ;;  %v20359_v8 = vld [vmem:[#allocation5 + $0x102c] ss:$44 sps:$4 sm:$0xff]   ;;  %v20360_v11 = vld [vmem:[#allocation5 + $0x530] ss:$44 sps:$4 sm:$0xff]  }
  0xa0   :  { %13379 = vmatprep.subr.bf16.mxu0 %v20275_v10  ;;  %13819 = vmatprep.mubr.bf16.mxu1 %v23643_v47  ;;  %v20357_v10 = vld [vmem:[#allocation5 + $0x1028] ss:$44 sps:$4 sm:$0xff]  }
  0xa1   :  { %13409 = vmatprep.mubr.bf16.mxu0 %v23660_v34 }
  0xa2   :  { %13790 = vmatpush1.bf16.msra.mxu1 %v20276_v13  ;;  %v20369_v13 = vld [vmem:[#allocation5 + $0x58c] ss:$44 sps:$4 sm:$0xff]  }
  0xa3   :  { %13380 = vmatpush1.bf16.msra.mxu0 %v20273_v12  ;;  %13791 = vmatprep.subr.bf16.mxu1 %v20284_v15  ;;  %v20366_v12 = vld [vmem:[#allocation5 + $0x1084] ss:$44 sps:$4 sm:$0xff]   ;;  %v20367_v15 = vld [vmem:[#allocation5 + $0x588] ss:$44 sps:$4 sm:$0xff]  }
  0xa4   :  { %13381 = vmatprep.subr.bf16.mxu0 %v20281_v14  ;;  %v20364_v14 = vld [vmem:[#allocation5 + $0x1080] ss:$44 sps:$4 sm:$0xff]  }
  0xa6   :  { %13792 = vmatpush1.bf16.msra.mxu1 %v20282_v17  ;;  %v20373_v17 = vld [vmem:[#allocation5 + $0x10dc] ss:$44 sps:$4 sm:$0xff]  }
  0xa7   :  { %13382 = vmatpush1.bf16.msra.mxu0 %v20279_v16  ;;  %13793 = vmatprep.subr.bf16.mxu1 %v20290_v19  ;;  %v23665_v16 = vcombine.low %v23656_v32, %v23656_v32  ;;  %v23667_v19 = vld [vmem:[#allocation2 + $0x18] sm:$0xff] }
  0xa8   :  { %13383 = vmatprep.subr.bf16.mxu0 %v20287_v18  ;;  %v20376_v18 = vld [vmem:[#allocation5 + $0x5e4] ss:$44 sps:$4 sm:$0xff]   ;;  %v20394_v32 = vld [vmem:[#allocation5 + $0x6ec] ss:$44 sps:$4 sm:$0xff]  }
  0xaa   :  { %13794 = vmatpush1.bf16.msra.mxu1 %v20288_v21  ;;  %v20371_v21 = vld [vmem:[#allocation5 + $0x10d8] ss:$44 sps:$4 sm:$0xff]  }
  0xab   :  { %13384 = vmatpush1.bf16.msra.mxu0 %v20285_v20  ;;  %13795 = vmatprep.subr.bf16.mxu1 %v20296_v23  ;;  %v23671_v20 = vcombine.high %v23667_v19, %v23667_v19  ;;  %v20379_v23 = vld [vmem:[#allocation5 + $0x1134] ss:$44 sps:$4 sm:$0xff]  }
  0xac   :  { %13385 = vmatprep.subr.bf16.mxu0 %v20293_v22  ;;  %v20374_v22 = vld [vmem:[#allocation5 + $0x5e0] ss:$44 sps:$4 sm:$0xff]  }
  0xae   :  { %13796 = vmatpush1.bf16.msra.mxu1 %v20294_v25  ;;  %v20377_v25 = vld [vmem:[#allocation5 + $0x1130] ss:$44 sps:$4 sm:$0xff]  }
  0xaf   :  { %13386 = vmatpush1.bf16.msra.mxu0 %v20291_v24  ;;  %13797 = vmatprep.subr.bf16.mxu1 %v20302_v27  ;;  %v20382_v24 = vld [vmem:[#allocation5 + $0x63c] ss:$44 sps:$4 sm:$0xff]   ;;  %v20385_v27 = vld [vmem:[#allocation5 + $0x118c] ss:$44 sps:$4 sm:$0xff]  }
  0xb0   :  { %13387 = vmatprep.subr.bf16.mxu0 %v20299_v26  ;;  %v20380_v26 = vld [vmem:[#allocation5 + $0x638] ss:$44 sps:$4 sm:$0xff]  }
  0xb2   :  { %13798 = vmatpush1.bf16.msra.mxu1 %v20300_v29  ;;  %v20383_v29 = vld [vmem:[#allocation5 + $0x1188] ss:$44 sps:$4 sm:$0xff]  }
  0xb3   :  { %13388 = vmatpush1.bf16.msra.mxu0 %v20297_v28  ;;  %13799 = vmatprep.subr.bf16.mxu1 %v20308_v31  ;;  %v20388_v28 = vld [vmem:[#allocation5 + $0x694] ss:$44 sps:$4 sm:$0xff]   ;;  %v20391_v31 = vld [vmem:[#allocation5 + $0x11e4] ss:$44 sps:$4 sm:$0xff]  }
  0xb4   :  { %13389 = vmatprep.subr.bf16.mxu0 %v20305_v30  ;;  %v20386_v30 = vld [vmem:[#allocation5 + $0x690] ss:$44 sps:$4 sm:$0xff]  }
  0xb6   :  { %13800 = vmatpush1.bf16.msra.mxu1 %v20306_v35  ;;  %v20392_v35 = vld [vmem:[#allocation5 + $0x6e8] ss:$44 sps:$4 sm:$0xff]  }
  0xb7   :  { %13390 = vmatpush1.bf16.msra.mxu0 %v20303_v33  ;;  %13801 = vmatprep.subr.bf16.mxu1 %v20314_v37  ;;  %v20389_v33 = vld [vmem:[#allocation5 + $0x11e0] ss:$44 sps:$4 sm:$0xff]   ;;  %v20400_v37 = vld [vmem:[#allocation5 + $0x744] ss:$44 sps:$4 sm:$0xff]  }
  0xb8   :  { %13391 = vmatprep.subr.bf16.mxu0 %v20311_v36  ;;  %v20397_v36 = vld [vmem:[#allocation5 + $0x123c] ss:$44 sps:$4 sm:$0xff]  }
  0xba   :  { %13802 = vmatpush1.bf16.msra.mxu1 %v20312_v39  ;;  %v20398_v39 = vld [vmem:[#allocation5 + $0x740] ss:$44 sps:$4 sm:$0xff]  }
  0xbb   :  { %13392 = vmatpush1.bf16.msra.mxu0 %v20309_v38  ;;  %13803 = vmatprep.subr.bf16.mxu1 %v20320_v41  ;;  %v20395_v38 = vld [vmem:[#allocation5 + $0x1238] ss:$44 sps:$4 sm:$0xff]   ;;  %v20406_v41 = vld [vmem:[#allocation5 + $0x79c] ss:$44 sps:$4 sm:$0xff]  }
  0xbc   :  { %13393 = vmatprep.subr.bf16.mxu0 %v20317_v40  ;;  %v20403_v40 = vld [vmem:[#allocation5 + $0x1294] ss:$44 sps:$4 sm:$0xff]  }
  0xbe   :  { %13804 = vmatpush1.bf16.msra.mxu1 %v20318_v43  ;;  %v20404_v43 = vld [vmem:[#allocation5 + $0x798] ss:$44 sps:$4 sm:$0xff]  }
  0xbf   :  { %13394 = vmatpush1.bf16.msra.mxu0 %v20315_v42  ;;  %13805 = vmatprep.subr.bf16.mxu1 %v20326_v45  ;;  %v20401_v42 = vld [vmem:[#allocation5 + $0x1290] ss:$44 sps:$4 sm:$0xff]   ;;  %v20412_v45 = vld [vmem:[#allocation5 + $0x7f4] ss:$44 sps:$4 sm:$0xff]  }
  0xc0   :  { %13395 = vmatprep.subr.bf16.mxu0 %v20323_v44  ;;  %v20409_v44 = vld [vmem:[#allocation5 + $0x12ec] ss:$44 sps:$4 sm:$0xff]  }
  0xc2   :  { %13806 = vmatpush1.bf16.msra.mxu1 %v20324_v48  ;;  %v20410_v48 = vld [vmem:[#allocation5 + $0x7f0] ss:$44 sps:$4 sm:$0xff]  }
  0xc3   :  { %13396 = vmatpush1.bf16.msra.mxu0 %v20321_v46  ;;  %13807 = vmatprep.subr.bf16.mxu1 %v20332_v50  ;;  %v20407_v46 = vld [vmem:[#allocation5 + $0x12e8] ss:$44 sps:$4 sm:$0xff]   ;;  %v20418_v50 = vld [vmem:[#allocation5 + $0x84c] ss:$44 sps:$4 sm:$0xff]  }
  0xc4   :  { %13397 = vmatprep.subr.bf16.mxu0 %v20329_v49  ;;  %v20415_v49 = vld [vmem:[#allocation5 + $0x1344] ss:$44 sps:$4 sm:$0xff]  }
  0xc6   :  { %13808 = vmatpush1.bf16.msra.mxu1 %v20330_v53  ;;  %v20416_v53 = vld [vmem:[#allocation5 + $0x848] ss:$44 sps:$4 sm:$0xff]  }
  0xc7   :  { %13398 = vmatpush1.bf16.msra.mxu0 %v20327_v52  ;;  %13809 = vmatprep.subr.bf16.mxu1 %v20338_v55  ;;  %v20413_v52 = vld [vmem:[#allocation5 + $0x1340] ss:$44 sps:$4 sm:$0xff]   ;;  %v20424_v55 = vld [vmem:[#allocation5 + $0x8a4] ss:$44 sps:$4 sm:$0xff]  }
  0xc8   :  { %13399 = vmatprep.subr.bf16.mxu0 %v20335_v54  ;;  %v20421_v54 = vld [vmem:[#allocation5 + $0x139c] ss:$44 sps:$4 sm:$0xff]  }
  0xca   :  { %13810 = vmatpush1.bf16.msra.mxu1 %v20336_v57  ;;  %v20422_v57 = vld [vmem:[#allocation5 + $0x8a0] ss:$44 sps:$4 sm:$0xff]  }
  0xcb   :  { %13400 = vmatpush1.bf16.msra.mxu0 %v20333_v56  ;;  %13811 = vmatprep.subr.bf16.mxu1 %v20344_v59  ;;  %v20419_v56 = vld [vmem:[#allocation5 + $0x1398] ss:$44 sps:$4 sm:$0xff]   ;;  %v20430_v59 = vld [vmem:[#allocation5 + $0x8fc] ss:$44 sps:$4 sm:$0xff]  }
  0xcc   :  { %13401 = vmatprep.subr.bf16.mxu0 %v20341_v58  ;;  %v20427_v58 = vld [vmem:[#allocation5 + $0x13f4] ss:$44 sps:$4 sm:$0xff]  }
  0xce   :  { %13812 = vmatpush1.bf16.msra.mxu1 %v20342_v61  ;;  %v20428_v61 = vld [vmem:[#allocation5 + $0x8f8] ss:$44 sps:$4 sm:$0xff]  }
  0xcf   :  { %13402 = vmatpush1.bf16.msra.mxu0 %v20339_v60  ;;  %13813 = vmatprep.subr.bf16.mxu1 %v20350_v63  ;;  %v20425_v60 = vld [vmem:[#allocation5 + $0x13f0] ss:$44 sps:$4 sm:$0xff]   ;;  %v20436_v63 = vld [vmem:[#allocation5 + $0x954] ss:$44 sps:$4 sm:$0xff]  }
  0xd0   :  { %13403 = vmatprep.subr.bf16.mxu0 %v20347_v62  ;;  %v20433_v62 = vld [vmem:[#allocation5 + $0x144c] ss:$44 sps:$4 sm:$0xff]  }
  0xd2   :  { %13814 = vmatpush1.bf16.msra.mxu1 %v20348_v1  ;;  %v20434_v1 = vld [vmem:[#allocation5 + $0x950] ss:$44 sps:$4 sm:$0xff]  }
  0xd3   :  { %13404 = vmatpush1.bf16.msra.mxu0 %v20345_v0  ;;  %13815 = vmatprep.subr.bf16.mxu1 %v20356_v3  ;;  %v20431_v0 = vld [vmem:[#allocation5 + $0x1448] ss:$44 sps:$4 sm:$0xff]   ;;  %v20442_v3 = vld [vmem:[#allocation5 + $0x9ac] ss:$44 sps:$4 sm:$0xff]  }
  0xd4   :  { %13405 = vmatprep.subr.bf16.mxu0 %v20353_v2  ;;  %v20439_v2 = vld [vmem:[#allocation5 + $0x14a4] ss:$44 sps:$4 sm:$0xff]  }
  0xd6   :  { %13816 = vmatpush1.bf16.msra.mxu1 %v20354_v5  ;;  %v20440_v5 = vld [vmem:[#allocation5 + $0x9a8] ss:$44 sps:$4 sm:$0xff]  }
  0xd7   :  { %13406 = vmatpush1.bf16.msra.mxu0 %v20351_v4  ;;  %13817 = vmatprep.subr.bf16.mxu1 %v20362_v9  ;;  %v20437_v4 = vld [vmem:[#allocation5 + $0x14a0] ss:$44 sps:$4 sm:$0xff]   ;;  %v20448_v9 = vld [vmem:[#allocation5 + $0xa04] ss:$44 sps:$4 sm:$0xff]  }
  0xd8   :  { %13407 = vmatprep.subr.bf16.mxu0 %v20359_v8  ;;  %v20445_v8 = vld [vmem:[#allocation5 + $0x14fc] ss:$44 sps:$4 sm:$0xff]  }
  0xda   :  { %13818 = vmatpush1.bf16.msra.mxu1 %v20360_v11  ;;  %v20446_v11 = vld [vmem:[#allocation5 + $0xa00] ss:$44 sps:$4 sm:$0xff]  }
  0xdb   :  { %13408 = vmatpush1.bf16.msra.mxu0 %v20357_v10  ;;  %13828 = vmatprep.subr.bf16.mxu1 %v20369_v13  ;;  %v20443_v10 = vld [vmem:[#allocation5 + $0x14f8] ss:$44 sps:$4 sm:$0xff]   ;;  %v20454_v13 = vld [vmem:[#allocation5 + $0xa5c] ss:$44 sps:$4 sm:$0xff]  }
  0xdc   :  { %13418 = vmatprep.subr.bf16.mxu0 %v20366_v12  ;;  %v20451_v12 = vld [vmem:[#allocation5 + $0x1554] ss:$44 sps:$4 sm:$0xff]  }
  0xdd   :  { %13820 = vmatmul.mubr.bf16.vlgmr.msra.gmra.mrb[4].mxu1 %v23649_v6 }
  0xde   :  { %13410 = vmatmul.mubr.bf16.vlgmr.msra.gmra.mrb[0].mxu0 %v23665_v16  ;;  %13829 = vmatpush1.bf16.msra.mxu1 %v20367_v15  ;;  %v20452_v15 = vld [vmem:[#allocation5 + $0xa58] ss:$44 sps:$4 sm:$0xff]  }
  0xdf   :  { %13419 = vmatpush1.bf16.msra.mxu0 %v20364_v14  ;;  %13830 = vmatprep.subr.bf16.mxu1 %v20376_v18  ;;  %v20449_v14 = vld [vmem:[#allocation5 + $0x1550] ss:$44 sps:$4 sm:$0xff]   ;;  %v20460_v18 = vld [vmem:[#allocation5 + $0xab4] ss:$44 sps:$4 sm:$0xff]  }
  0xe0   :  { %13420 = vmatprep.subr.bf16.mxu0 %v20373_v17  ;;  %13450 = vmatprep.mubr.bf16.mxu0 %v23671_v20  ;;  %v20457_v17 = vld [vmem:[#allocation5 + $0x15ac] ss:$44 sps:$4 sm:$0xff]  }
  0xe1   :  { %13860 = vmatprep.mubr.bf16.mxu1 %v23645_v51 }
  0xe2   :  { %13831 = vmatpush1.bf16.msra.mxu1 %v20374_v22  ;;  %v20458_v22 = vld [vmem:[#allocation5 + $0xab0] ss:$44 sps:$4 sm:$0xff]  }
  0xe3   :  { %13421 = vmatpush1.bf16.msra.mxu0 %v20371_v21  ;;  %13832 = vmatprep.subr.bf16.mxu1 %v20382_v24  ;;  %v20455_v21 = vld [vmem:[#allocation5 + $0x15a8] ss:$44 sps:$4 sm:$0xff]   ;;  %v20467_v24 = vld [vmem:[#allocation5 + $0xb0c] ss:$44 sps:$4 sm:$0xff]  }
  0xe4   :  { %13422 = vmatprep.subr.bf16.mxu0 %v20379_v23  ;;  %v20464_v23 = vld [vmem:[#allocation5 + $0x1604] ss:$44 sps:$4 sm:$0xff]  }
  0xe6   :  { %13833 = vmatpush1.bf16.msra.mxu1 %v20380_v26  ;;  %v23679_v26 = vcombine.low %v23667_v19, %v23667_v19  ;;  %v20472_v19 = vld [vmem:[#allocation5 + $0xb60] ss:$44 sps:$4 sm:$0xff]  }
  0xe7   :  { %13423 = vmatpush1.bf16.msra.mxu0 %v20377_v25  ;;  %13834 = vmatprep.subr.bf16.mxu1 %v20388_v28  ;;  %v20462_v25 = vld [vmem:[#allocation5 + $0x1600] ss:$44 sps:$4 sm:$0xff]   ;;  %v20465_v28 = vld [vmem:[#allocation5 + $0xb08] ss:$44 sps:$4 sm:$0xff]  }
  0xe8   :  { %13424 = vmatprep.subr.bf16.mxu0 %v20385_v27  ;;  %v23681_v27 = vld [vmem:[#allocation2 + $0x20] sm:$0xff] }
  0xea   :  { %13835 = vmatpush1.bf16.msra.mxu1 %v20386_v30  ;;  %v20474_v30 = vld [vmem:[#allocation5 + $0xb64] ss:$44 sps:$4 sm:$0xff]  }
  0xeb   :  { %13425 = vmatpush1.bf16.msra.mxu0 %v20383_v29  ;;  %13836 = vmatprep.subr.bf16.mxu1 %v20394_v32  ;;  %v20471_v29 = vld [vmem:[#allocation5 + $0x165c] ss:$44 sps:$4 sm:$0xff]   ;;  %v20469_v32 = vld [vmem:[#allocation5 + $0x1658] ss:$44 sps:$4 sm:$0xff]  }
  0xec   :  { %13426 = vmatprep.subr.bf16.mxu0 %v20391_v31  ;;  %v23685_v31 = vcombine.high %v23681_v27, %v23681_v27 }
  0xee   :  { %13837 = vmatpush1.bf16.msra.mxu1 %v20392_v35  ;;  %v20480_v35 = vld [vmem:[#allocation5 + $0xbbc] ss:$44 sps:$4 sm:$0xff]  }
  0xef   :  { %13427 = vmatpush1.bf16.msra.mxu0 %v20389_v33  ;;  %13838 = vmatprep.subr.bf16.mxu1 %v20400_v37  ;;  %v20477_v33 = vld [vmem:[#allocation5 + $0x16b4] ss:$44 sps:$4 sm:$0xff]   ;;  %v20478_v37 = vld [vmem:[#allocation5 + $0xbb8] ss:$44 sps:$4 sm:$0xff]  }
  0xf0   :  { %13428 = vmatprep.subr.bf16.mxu0 %v20397_v36  ;;  %v20475_v36 = vld [vmem:[#allocation5 + $0x16b0] ss:$44 sps:$4 sm:$0xff]  }
  0xf2   :  { %13839 = vmatpush1.bf16.msra.mxu1 %v20398_v39  ;;  %v20486_v39 = vld [vmem:[#allocation5 + $0xc14] ss:$44 sps:$4 sm:$0xff]  }
  0xf3   :  { %13429 = vmatpush1.bf16.msra.mxu0 %v20395_v38  ;;  %13840 = vmatprep.subr.bf16.mxu1 %v20406_v41  ;;  %v20483_v38 = vld [vmem:[#allocation5 + $0x170c] ss:$44 sps:$4 sm:$0xff]   ;;  %v20484_v41 = vld [vmem:[#allocation5 + $0xc10] ss:$44 sps:$4 sm:$0xff]  }
  0xf4   :  { %13430 = vmatprep.subr.bf16.mxu0 %v20403_v40  ;;  %v20481_v40 = vld [vmem:[#allocation5 + $0x1708] ss:$44 sps:$4 sm:$0xff]  }
  0xf6   :  { %13841 = vmatpush1.bf16.msra.mxu1 %v20404_v43  ;;  %v20492_v43 = vld [vmem:[#allocation5 + $0xc6c] ss:$44 sps:$4 sm:$0xff]  }
  0xf7   :  { %13431 = vmatpush1.bf16.msra.mxu0 %v20401_v42  ;;  %13842 = vmatprep.subr.bf16.mxu1 %v20412_v45  ;;  %v20489_v42 = vld [vmem:[#allocation5 + $0x1764] ss:$44 sps:$4 sm:$0xff]   ;;  %v20490_v45 = vld [vmem:[#allocation5 + $0xc68] ss:$44 sps:$4 sm:$0xff]  }
  0xf8   :  { %13432 = vmatprep.subr.bf16.mxu0 %v20409_v44  ;;  %v20487_v44 = vld [vmem:[#allocation5 + $0x1760] ss:$44 sps:$4 sm:$0xff]  }
  0xfa   :  { %13843 = vmatpush1.bf16.msra.mxu1 %v20410_v48  ;;  %v20498_v48 = vld [vmem:[#allocation5 + $0xcc4] ss:$44 sps:$4 sm:$0xff]  }
  0xfb   :  { %13433 = vmatpush1.bf16.msra.mxu0 %v20407_v46  ;;  %13844 = vmatprep.subr.bf16.mxu1 %v20418_v50  ;;  %v20495_v46 = vld [vmem:[#allocation5 + $0x17bc] ss:$44 sps:$4 sm:$0xff]   ;;  %v20496_v50 = vld [vmem:[#allocation5 + $0xcc0] ss:$44 sps:$4 sm:$0xff]  }
  0xfc   :  { %13434 = vmatprep.subr.bf16.mxu0 %v20415_v49  ;;  %v20493_v49 = vld [vmem:[#allocation5 + $0x17b8] ss:$44 sps:$4 sm:$0xff]  }
  0xfe   :  { %13845 = vmatpush1.bf16.msra.mxu1 %v20416_v53  ;;  %v20504_v53 = vld [vmem:[#allocation5 + $0xd1c] ss:$44 sps:$4 sm:$0xff]  }
  0xff   :  { %13435 = vmatpush1.bf16.msra.mxu0 %v20413_v52  ;;  %13846 = vmatprep.subr.bf16.mxu1 %v20424_v55  ;;  %v20501_v52 = vld [vmem:[#allocation5 + $0x1814] ss:$44 sps:$4 sm:$0xff]   ;;  %v20502_v55 = vld [vmem:[#allocation5 + $0xd18] ss:$44 sps:$4 sm:$0xff]  }
 0x100   :  { %13436 = vmatprep.subr.bf16.mxu0 %v20421_v54  ;;  %v20499_v54 = vld [vmem:[#allocation5 + $0x1810] ss:$44 sps:$4 sm:$0xff]  }
 0x102   :  { %13847 = vmatpush1.bf16.msra.mxu1 %v20422_v57  ;;  %v20510_v57 = vld [vmem:[#allocation5 + $0xd74] ss:$44 sps:$4 sm:$0xff]  }
 0x103   :  { %13437 = vmatpush1.bf16.msra.mxu0 %v20419_v56  ;;  %13848 = vmatprep.subr.bf16.mxu1 %v20430_v59  ;;  %v20507_v56 = vld [vmem:[#allocation5 + $0x186c] ss:$44 sps:$4 sm:$0xff]   ;;  %v20508_v59 = vld [vmem:[#allocation5 + $0xd70] ss:$44 sps:$4 sm:$0xff]  }
 0x104   :  { %13438 = vmatprep.subr.bf16.mxu0 %v20427_v58  ;;  %v20505_v58 = vld [vmem:[#allocation5 + $0x1868] ss:$44 sps:$4 sm:$0xff]  }
 0x106   :  { %13849 = vmatpush1.bf16.msra.mxu1 %v20428_v61  ;;  %v20516_v61 = vld [vmem:[#allocation5 + $0xdcc] ss:$44 sps:$4 sm:$0xff]  }
 0x107   :  { %13439 = vmatpush1.bf16.msra.mxu0 %v20425_v60  ;;  %13850 = vmatprep.subr.bf16.mxu1 %v20436_v63  ;;  %v20513_v60 = vld [vmem:[#allocation5 + $0x18c4] ss:$44 sps:$4 sm:$0xff]   ;;  %v20514_v63 = vld [vmem:[#allocation5 + $0xdc8] ss:$44 sps:$4 sm:$0xff]  }
 0x108   :  { %13440 = vmatprep.subr.bf16.mxu0 %v20433_v62  ;;  %v20511_v62 = vld [vmem:[#allocation5 + $0x18c0] ss:$44 sps:$4 sm:$0xff]  }
 0x10a   :  { %13851 = vmatpush1.bf16.msra.mxu1 %v20434_v1  ;;  %v20522_v1 = vld [vmem:[#allocation5 + $0xe24] ss:$44 sps:$4 sm:$0xff]  }
 0x10b   :  { %13441 = vmatpush1.bf16.msra.mxu0 %v20431_v0  ;;  %13852 = vmatprep.subr.bf16.mxu1 %v20442_v3  ;;  %v20519_v0 = vld [vmem:[#allocation5 + $0x191c] ss:$44 sps:$4 sm:$0xff]   ;;  %v20520_v3 = vld [vmem:[#allocation5 + $0xe20] ss:$44 sps:$4 sm:$0xff]  }
 0x10c   :  { %13442 = vmatprep.subr.bf16.mxu0 %v20439_v2  ;;  %v20517_v2 = vld [vmem:[#allocation5 + $0x1918] ss:$44 sps:$4 sm:$0xff]  }
 0x10e   :  { %13853 = vmatpush1.bf16.msra.mxu1 %v20440_v5  ;;  %v20528_v5 = vld [vmem:[#allocation5 + $0xe7c] ss:$44 sps:$4 sm:$0xff]  }
 0x10f   :  { %13443 = vmatpush1.bf16.msra.mxu0 %v20437_v4  ;;  %13854 = vmatprep.subr.bf16.mxu1 %v20448_v9  ;;  %v20525_v4 = vld [vmem:[#allocation5 + $0x1974] ss:$44 sps:$4 sm:$0xff]   ;;  %v20526_v9 = vld [vmem:[#allocation5 + $0xe78] ss:$44 sps:$4 sm:$0xff]  }
 0x110   :  { %13444 = vmatprep.subr.bf16.mxu0 %v20445_v8  ;;  %v20523_v8 = vld [vmem:[#allocation5 + $0x1970] ss:$44 sps:$4 sm:$0xff]  }
 0x112   :  { %13855 = vmatpush1.bf16.msra.mxu1 %v20446_v11  ;;  %v20534_v11 = vld [vmem:[#allocation5 + $0xed4] ss:$44 sps:$4 sm:$0xff]  }
 0x113   :  { %13445 = vmatpush1.bf16.msra.mxu0 %v20443_v10  ;;  %13856 = vmatprep.subr.bf16.mxu1 %v20454_v13  ;;  %v20531_v10 = vld [vmem:[#allocation5 + $0x19cc] ss:$44 sps:$4 sm:$0xff]   ;;  %v20532_v13 = vld [vmem:[#allocation5 + $0xed0] ss:$44 sps:$4 sm:$0xff]  }
 0x114   :  { %13446 = vmatprep.subr.bf16.mxu0 %v20451_v12  ;;  %v20529_v12 = vld [vmem:[#allocation5 + $0x19c8] ss:$44 sps:$4 sm:$0xff]  }
 0x116   :  { %13857 = vmatpush1.bf16.msra.mxu1 %v20452_v15  ;;  %v20540_v15 = vld [vmem:[#allocation5 + $0xf2c] ss:$44 sps:$4 sm:$0xff]  }
 0x117   :  { %13447 = vmatpush1.bf16.msra.mxu0 %v20449_v14  ;;  %13858 = vmatprep.subr.bf16.mxu1 %v20460_v18  ;;  %v20537_v14 = vld [vmem:[#allocation5 + $0x1a24] ss:$44 sps:$4 sm:$0xff]   ;;  %v20538_v18 = vld [vmem:[#allocation5 + $0xf28] ss:$44 sps:$4 sm:$0xff]  }
 0x118   :  { %13448 = vmatprep.subr.bf16.mxu0 %v20457_v17  ;;  %v20535_v17 = vld [vmem:[#allocation5 + $0x1a20] ss:$44 sps:$4 sm:$0xff]  }
 0x11a   :  { %13859 = vmatpush1.bf16.msra.mxu1 %v20458_v22  ;;  %v20546_v22 = vld [vmem:[#allocation5 + $0xf84] ss:$44 sps:$4 sm:$0xff]  }
 0x11b   :  { %13449 = vmatpush1.bf16.msra.mxu0 %v20455_v21  ;;  %13869 = vmatprep.subr.bf16.mxu1 %v20467_v24  ;;  %v20543_v21 = vld [vmem:[#allocation5 + $0x1a7c] ss:$44 sps:$4 sm:$0xff]   ;;  %v20544_v24 = vld [vmem:[#allocation5 + $0xf80] ss:$44 sps:$4 sm:$0xff]  }
 0x11c   :  { %13459 = vmatprep.subr.bf16.mxu0 %v20464_v23  ;;  %v20541_v23 = vld [vmem:[#allocation5 + $0x1a78] ss:$44 sps:$4 sm:$0xff]  }
 0x11d   :  { %13861 = vmatmul.mubr.bf16.vlgmr.msra.gmra.mrb[4].mxu1 %v23651_v7 }
 0x11e   :  { %13451 = vmatmul.mubr.bf16.vlgmr.msra.gmra.mrb[0].mxu0 %v23679_v26  ;;  %13870 = vmatpush1.bf16.msra.mxu1 %v20465_v28  ;;  %v20552_v28 = vld [vmem:[#allocation5 + $0xfdc] ss:$44 sps:$4 sm:$0xff]  }
 0x11f   :  { %13460 = vmatpush1.bf16.msra.mxu0 %v20462_v25  ;;  %13871 = vmatprep.subr.bf16.mxu1 %v20474_v30  ;;  %v20549_v25 = vld [vmem:[#allocation5 + $0x1ad4] ss:$44 sps:$4 sm:$0xff]   ;;  %v20550_v30 = vld [vmem:[#allocation5 + $0xfd8] ss:$44 sps:$4 sm:$0xff]  }
 0x120   :  { %13461 = vmatprep.subr.bf16.mxu0 %v20471_v29  ;;  %13491 = vmatprep.mubr.bf16.mxu0 %v23685_v31  ;;  %v20547_v29 = vld [vmem:[#allocation5 + $0x1ad0] ss:$44 sps:$4 sm:$0xff]  }
 0x121   :  { %13901 = vmatprep.mubr.bf16.mxu1 %v23660_v34 }
 0x122   :  { %13872 = vmatpush1.bf16.msra.mxu1 %v20472_v19  ;;  %v20558_v19 = vld [vmem:[#allocation5 + $0x1034] ss:$44 sps:$4 sm:$0xff]  }
 0x123   :  { %13462 = vmatpush1.bf16.msra.mxu0 %v20469_v32  ;;  %13873 = vmatprep.subr.bf16.mxu1 %v20480_v35  ;;  %v20555_v32 = vld [vmem:[#allocation5 + $0x1b2c] ss:$44 sps:$4 sm:$0xff]   ;;  %v20556_v35 = vld [vmem:[#allocation5 + $0x1030] ss:$44 sps:$4 sm:$0xff]  }
 0x124   :  { %13463 = vmatprep.subr.bf16.mxu0 %v20477_v33  ;;  %v20553_v33 = vld [vmem:[#allocation5 + $0x1b28] ss:$44 sps:$4 sm:$0xff]  }
 0x126   :  { %13874 = vmatpush1.bf16.msra.mxu1 %v20478_v37  ;;  %v20565_v37 = vld [vmem:[#allocation5 + $0x108c] ss:$44 sps:$4 sm:$0xff]  }
 0x127   :  { %13464 = vmatpush1.bf16.msra.mxu0 %v20475_v36  ;;  %13875 = vmatprep.subr.bf16.mxu1 %v20486_v39  ;;  %v20562_v36 = vld [vmem:[#allocation5 + $0x1b84] ss:$44 sps:$4 sm:$0xff]   ;;  %v23695_v39 = vld [vmem:[#allocation2 + $0x28] sm:$0xff] }
 0x128   :  { %13465 = vmatprep.subr.bf16.mxu0 %v20483_v38  ;;  %v23693_v38 = vcombine.low %v23681_v27, %v23681_v27  ;;  %v20567_v27 = vld [vmem:[#allocation5 + $0x1bd8] ss:$44 sps:$4 sm:$0xff]  }
 0x12a   :  { %13876 = vmatpush1.bf16.msra.mxu1 %v20484_v41  ;;  %v20563_v41 = vld [vmem:[#allocation5 + $0x1088] ss:$44 sps:$4 sm:$0xff]  }
 0x12b   :  { %13466 = vmatpush1.bf16.msra.mxu0 %v20481_v40  ;;  %13877 = vmatprep.subr.bf16.mxu1 %v20492_v43  ;;  %v20560_v40 = vld [vmem:[#allocation5 + $0x1b80] ss:$44 sps:$4 sm:$0xff]   ;;  %v20572_v43 = vld [vmem:[#allocation5 + $0x10e4] ss:$44 sps:$4 sm:$0xff]  }
 0x12c   :  { %13467 = vmatprep.subr.bf16.mxu0 %v20489_v42  ;;  %v20569_v42 = vld [vmem:[#allocation5 + $0x1bdc] ss:$44 sps:$4 sm:$0xff]  }
 0x12e   :  { %13878 = vmatpush1.bf16.msra.mxu1 %v20490_v45  ;;  %v20570_v45 = vld [vmem:[#allocation5 + $0x10e0] ss:$44 sps:$4 sm:$0xff]  }
 0x12f   :  { %13468 = vmatpush1.bf16.msra.mxu0 %v20487_v44  ;;  %13879 = vmatprep.subr.bf16.mxu1 %v20498_v48  ;;  %v23699_v44 = vcombine.high %v23695_v39, %v23695_v39  ;;  %v20578_v48 = vld [vmem:[#allocation5 + $0x113c] ss:$44 sps:$4 sm:$0xff]  }
 0x130   :  { %13469 = vmatprep.subr.bf16.mxu0 %v20495_v46  ;;  %v20575_v46 = vld [vmem:[#allocation5 + $0x1c34] ss:$44 sps:$4 sm:$0xff]  }
 0x132   :  { %13880 = vmatpush1.bf16.msra.mxu1 %v20496_v50  ;;  %v20576_v50 = vld [vmem:[#allocation5 + $0x1138] ss:$44 sps:$4 sm:$0xff]  }
 0x133   :  { %13470 = vmatpush1.bf16.msra.mxu0 %v20493_v49  ;;  %13881 = vmatprep.subr.bf16.mxu1 %v20504_v53  ;;  %v20573_v49 = vld [vmem:[#allocation5 + $0x1c30] ss:$44 sps:$4 sm:$0xff]   ;;  %v20584_v53 = vld [vmem:[#allocation5 + $0x1194] ss:$44 sps:$4 sm:$0xff]  }
 0x134   :  { %13471 = vmatprep.subr.bf16.mxu0 %v20501_v52  ;;  %v20581_v52 = vld [vmem:[#allocation5 + $0x1c8c] ss:$44 sps:$4 sm:$0xff]  }
 0x136   :  { %13882 = vmatpush1.bf16.msra.mxu1 %v20502_v55  ;;  %v20582_v55 = vld [vmem:[#allocation5 + $0x1190] ss:$44 sps:$4 sm:$0xff]  }
 0x137   :  { %13472 = vmatpush1.bf16.msra.mxu0 %v20499_v54  ;;  %13883 = vmatprep.subr.bf16.mxu1 %v20510_v57  ;;  %v20579_v54 = vld [vmem:[#allocation5 + $0x1c88] ss:$44 sps:$4 sm:$0xff]   ;;  %v20590_v57 = vld [vmem:[#allocation5 + $0x11ec] ss:$44 sps:$4 sm:$0xff]  }
 0x138   :  { %13473 = vmatprep.subr.bf16.mxu0 %v20507_v56  ;;  %v20587_v56 = vld [vmem:[#allocation5 + $0x1ce4] ss:$44 sps:$4 sm:$0xff]  }
 0x13a   :  { %13884 = vmatpush1.bf16.msra.mxu1 %v20508_v59  ;;  %v20588_v59 = vld [vmem:[#allocation5 + $0x11e8] ss:$44 sps:$4 sm:$0xff]  }
 0x13b   :  { %13474 = vmatpush1.bf16.msra.mxu0 %v20505_v58  ;;  %13885 = vmatprep.subr.bf16.mxu1 %v20516_v61  ;;  %v20585_v58 = vld [vmem:[#allocation5 + $0x1ce0] ss:$44 sps:$4 sm:$0xff]   ;;  %v20596_v61 = vld [vmem:[#allocation5 + $0x1244] ss:$44 sps:$4 sm:$0xff]  }
 0x13c   :  { %13475 = vmatprep.subr.bf16.mxu0 %v20513_v60  ;;  %v20593_v60 = vld [vmem:[#allocation5 + $0x1d3c] ss:$44 sps:$4 sm:$0xff]  }
 0x13e   :  { %13886 = vmatpush1.bf16.msra.mxu1 %v20514_v63  ;;  %v20594_v63 = vld [vmem:[#allocation5 + $0x1240] ss:$44 sps:$4 sm:$0xff]  }
 0x13f   :  { %13476 = vmatpush1.bf16.msra.mxu0 %v20511_v62  ;;  %13887 = vmatprep.subr.bf16.mxu1 %v20522_v1  ;;  %v20591_v62 = vld [vmem:[#allocation5 + $0x1d38] ss:$44 sps:$4 sm:$0xff]   ;;  %v20602_v1 = vld [vmem:[#allocation5 + $0x129c] ss:$44 sps:$4 sm:$0xff]  }
 0x140   :  { %13477 = vmatprep.subr.bf16.mxu0 %v20519_v0  ;;  %v20599_v0 = vld [vmem:[#allocation5 + $0x1d94] ss:$44 sps:$4 sm:$0xff]  }
 0x142   :  { %13888 = vmatpush1.bf16.msra.mxu1 %v20520_v3  ;;  %v20600_v3 = vld [vmem:[#allocation5 + $0x1298] ss:$44 sps:$4 sm:$0xff]  }
 0x143   :  { %13478 = vmatpush1.bf16.msra.mxu0 %v20517_v2  ;;  %13889 = vmatprep.subr.bf16.mxu1 %v20528_v5  ;;  %v20597_v2 = vld [vmem:[#allocation5 + $0x1d90] ss:$44 sps:$4 sm:$0xff]   ;;  %v20608_v5 = vld [vmem:[#allocation5 + $0x12f4] ss:$44 sps:$4 sm:$0xff]  }
 0x144   :  { %13479 = vmatprep.subr.bf16.mxu0 %v20525_v4  ;;  %v20605_v4 = vld [vmem:[#allocation5 + $0x1dec] ss:$44 sps:$4 sm:$0xff]  }
 0x146   :  { %13890 = vmatpush1.bf16.msra.mxu1 %v20526_v9  ;;  %v20606_v9 = vld [vmem:[#allocation5 + $0x12f0] ss:$44 sps:$4 sm:$0xff]  }
 0x147   :  { %13480 = vmatpush1.bf16.msra.mxu0 %v20523_v8  ;;  %13891 = vmatprep.subr.bf16.mxu1 %v20534_v11  ;;  %v20603_v8 = vld [vmem:[#allocation5 + $0x1de8] ss:$44 sps:$4 sm:$0xff]   ;;  %v20614_v11 = vld [vmem:[#allocation5 + $0x134c] ss:$44 sps:$4 sm:$0xff]  }
 0x148   :  { %13481 = vmatprep.subr.bf16.mxu0 %v20531_v10  ;;  %v20611_v10 = vld [vmem:[#allocation5 + $0x1e44] ss:$44 sps:$4 sm:$0xff]  }
 0x14a   :  { %13892 = vmatpush1.bf16.msra.mxu1 %v20532_v13  ;;  %v20612_v13 = vld [vmem:[#allocation5 + $0x1348] ss:$44 sps:$4 sm:$0xff]  }
 0x14b   :  { %13482 = vmatpush1.bf16.msra.mxu0 %v20529_v12  ;;  %13893 = vmatprep.subr.bf16.mxu1 %v20540_v15  ;;  %v20609_v12 = vld [vmem:[#allocation5 + $0x1e40] ss:$44 sps:$4 sm:$0xff]   ;;  %v20620_v15 = vld [vmem:[#allocation5 + $0x13a4] ss:$44 sps:$4 sm:$0xff]  }
 0x14c   :  { %13483 = vmatprep.subr.bf16.mxu0 %v20537_v14  ;;  %v20617_v14 = vld [vmem:[#allocation5 + $0x1e9c] ss:$44 sps:$4 sm:$0xff]  }
 0x14e   :  { %13894 = vmatpush1.bf16.msra.mxu1 %v20538_v18  ;;  %v20618_v18 = vld [vmem:[#allocation5 + $0x13a0] ss:$44 sps:$4 sm:$0xff]  }
 0x14f   :  { %13484 = vmatpush1.bf16.msra.mxu0 %v20535_v17  ;;  %13895 = vmatprep.subr.bf16.mxu1 %v20546_v22  ;;  %v20615_v17 = vld [vmem:[#allocation5 + $0x1e98] ss:$44 sps:$4 sm:$0xff]   ;;  %v20626_v22 = vld [vmem:[#allocation5 + $0x13fc] ss:$44 sps:$4 sm:$0xff]  }
 0x150   :  { %13485 = vmatprep.subr.bf16.mxu0 %v20543_v21  ;;  %v20623_v21 = vld [vmem:[#allocation5 + $0x1ef4] ss:$44 sps:$4 sm:$0xff]  }
 0x152   :  { %13896 = vmatpush1.bf16.msra.mxu1 %v20544_v24  ;;  %v20624_v24 = vld [vmem:[#allocation5 + $0x13f8] ss:$44 sps:$4 sm:$0xff]  }
 0x153   :  { %13486 = vmatpush1.bf16.msra.mxu0 %v20541_v23  ;;  %13897 = vmatprep.subr.bf16.mxu1 %v20552_v28  ;;  %v20621_v23 = vld [vmem:[#allocation5 + $0x1ef0] ss:$44 sps:$4 sm:$0xff]   ;;  %v20632_v28 = vld [vmem:[#allocation5 + $0x1454] ss:$44 sps:$4 sm:$0xff]  }
 0x154   :  { %13487 = vmatprep.subr.bf16.mxu0 %v20549_v25  ;;  %v20629_v25 = vld [vmem:[#allocation5 + $0x1f4c] ss:$44 sps:$4 sm:$0xff]  }
 0x156   :  { %13898 = vmatpush1.bf16.msra.mxu1 %v20550_v30  ;;  %v20630_v30 = vld [vmem:[#allocation5 + $0x1450] ss:$44 sps:$4 sm:$0xff]  }
 0x157   :  { %13488 = vmatpush1.bf16.msra.mxu0 %v20547_v29  ;;  %13899 = vmatprep.subr.bf16.mxu1 %v20558_v19  ;;  %v20627_v29 = vld [vmem:[#allocation5 + $0x1f48] ss:$44 sps:$4 sm:$0xff]   ;;  %v20638_v19 = vld [vmem:[#allocation5 + $0x14ac] ss:$44 sps:$4 sm:$0xff]  }
 0x158   :  { %13489 = vmatprep.subr.bf16.mxu0 %v20555_v32  ;;  %v20635_v32 = vld [vmem:[#allocation5 + $0x1fa4] ss:$44 sps:$4 sm:$0xff]  }
 0x15a   :  { %13900 = vmatpush1.bf16.msra.mxu1 %v20556_v35  ;;  %v20636_v35 = vld [vmem:[#allocation5 + $0x14a8] ss:$44 sps:$4 sm:$0xff]  }
 0x15b   :  { %13490 = vmatpush1.bf16.msra.mxu0 %v20553_v33  ;;  %13910 = vmatprep.subr.bf16.mxu1 %v20565_v37  ;;  %v20633_v33 = vld [vmem:[#allocation5 + $0x1fa0] ss:$44 sps:$4 sm:$0xff]   ;;  %v20644_v37 = vld [vmem:[#allocation5 + $0x1504] ss:$44 sps:$4 sm:$0xff]  }
 0x15c   :  { %13500 = vmatprep.subr.bf16.mxu0 %v20562_v36  ;;  %v20641_v36 = vld [vmem:[#allocation5 + $0x1ffc] ss:$44 sps:$4 sm:$0xff]  }
 0x15d   :  { %13902 = vmatmul.mubr.bf16.vlgmr.msra.gmra.mrb[4].mxu1 %v23665_v16 }
 0x15e   :  { %13492 = vmatmul.mubr.bf16.vlgmr.msra.gmra.mrb[0].mxu0 %v23693_v38  ;;  %13911 = vmatpush1.bf16.msra.mxu1 %v20563_v41  ;;  %v20642_v41 = vld [vmem:[#allocation5 + $0x1500] ss:$44 sps:$4 sm:$0xff]  }
 0x15f   :  { %13501 = vmatpush1.bf16.msra.mxu0 %v20560_v40  ;;  %13912 = vmatprep.subr.bf16.mxu1 %v20572_v43  ;;  %v20639_v40 = vld [vmem:[#allocation5 + $0x1ff8] ss:$44 sps:$4 sm:$0xff]   ;;  %v20650_v43 = vld [vmem:[#allocation5 + $0x155c] ss:$44 sps:$4 sm:$0xff]  }
 0x160   :  { %13502 = vmatprep.subr.bf16.mxu0 %v20569_v42  ;;  %13532 = vmatprep.mubr.bf16.mxu0 %v23699_v44  ;;  %v20647_v42 = vld [vmem:[#allocation5 + $0x2054] ss:$44 sps:$4 sm:$0xff]  }
 0x161   :  { %13942 = vmatprep.mubr.bf16.mxu1 %v23671_v20 }
 0x162   :  { %13913 = vmatpush1.bf16.msra.mxu1 %v20570_v45  ;;  %v20648_v45 = vld [vmem:[#allocation5 + $0x1558] ss:$44 sps:$4 sm:$0xff]  }
 0x163   :  { %13503 = vmatpush1.bf16.msra.mxu0 %v20567_v27  ;;  %13914 = vmatprep.subr.bf16.mxu1 %v20578_v48  ;;  %v20645_v27 = vld [vmem:[#allocation5 + $0x2050] ss:$44 sps:$4 sm:$0xff]   ;;  %v20656_v48 = vld [vmem:[#allocation5 + $0x15b4] ss:$44 sps:$4 sm:$0xff]  }
 0x164   :  { %13504 = vmatprep.subr.bf16.mxu0 %v20575_v46  ;;  %v20653_v46 = vld [vmem:[#allocation5 + $0x20ac] ss:$44 sps:$4 sm:$0xff]  }
 0x166   :  { %13915 = vmatpush1.bf16.msra.mxu1 %v20576_v50  ;;  %v20654_v50 = vld [vmem:[#allocation5 + $0x15b0] ss:$44 sps:$4 sm:$0xff]  }
 0x167   :  { %13505 = vmatpush1.bf16.msra.mxu0 %v20573_v49  ;;  %13916 = vmatprep.subr.bf16.mxu1 %v20584_v53  ;;  %v20651_v49 = vld [vmem:[#allocation5 + $0x20a8] ss:$44 sps:$4 sm:$0xff]   ;;  %v20663_v53 = vld [vmem:[#allocation5 + $0x160c] ss:$44 sps:$4 sm:$0xff]  }
 0x168   :  { %13506 = vmatprep.subr.bf16.mxu0 %v20581_v52  ;;  %v20660_v52 = vld [vmem:[#allocation5 + $0x2104] ss:$44 sps:$4 sm:$0xff]  }
 0x16a   :  { %13917 = vmatpush1.bf16.msra.mxu1 %v20582_v55  ;;  %v23709_v55 = vcombine.low %v23695_v39, %v23695_v39  ;;  %v20665_v39 = vld [vmem:[#allocation5 + $0x2158] ss:$44 sps:$4 sm:$0xff]  }
 0x16b   :  { %13507 = vmatpush1.bf16.msra.mxu0 %v20579_v54  ;;  %13918 = vmatprep.subr.bf16.mxu1 %v20590_v57  ;;  %v23705_v54 = vld [vmem:[#allocation2 + $0x30] sm:$0xff] }
 0x16c   :  { %13508 = vmatprep.subr.bf16.mxu0 %v20587_v56  ;;  %v20658_v56 = vld [vmem:[#allocation5 + $0x2100] ss:$44 sps:$4 sm:$0xff]   ;;  %v20661_v57 = vld [vmem:[#allocation5 + $0x1608] ss:$44 sps:$4 sm:$0xff]  }
 0x16e   :  { %13919 = vmatpush1.bf16.msra.mxu1 %v20588_v59  ;;  %v20670_v59 = vld [vmem:[#allocation5 + $0x1664] ss:$44 sps:$4 sm:$0xff]  }
 0x16f   :  { %13509 = vmatpush1.bf16.msra.mxu0 %v20585_v58  ;;  %13920 = vmatprep.subr.bf16.mxu1 %v20596_v61  ;;  %v20667_v58 = vld [vmem:[#allocation5 + $0x215c] ss:$44 sps:$4 sm:$0xff]   ;;  %v20668_v61 = vld [vmem:[#allocation5 + $0x1660] ss:$44 sps:$4 sm:$0xff]  }
 0x170   :  { %13510 = vmatprep.subr.bf16.mxu0 %v20593_v60  ;;  %v23713_v60 = vcombine.high %v23705_v54, %v23705_v54 }
 0x172   :  { %13921 = vmatpush1.bf16.msra.mxu1 %v20594_v63  ;;  %v20676_v63 = vld [vmem:[#allocation5 + $0x16bc] ss:$44 sps:$4 sm:$0xff]  }
 0x173   :  { %13511 = vmatpush1.bf16.msra.mxu0 %v20591_v62  ;;  %13922 = vmatprep.subr.bf16.mxu1 %v20602_v1  ;;  %v20673_v62 = vld [vmem:[#allocation5 + $0x21b4] ss:$44 sps:$4 sm:$0xff]   ;;  %v20674_v1 = vld [vmem:[#allocation5 + $0x16b8] ss:$44 sps:$4 sm:$0xff]  }
 0x174   :  { %13512 = vmatprep.subr.bf16.mxu0 %v20599_v0  ;;  %v20671_v0 = vld [vmem:[#allocation5 + $0x21b0] ss:$44 sps:$4 sm:$0xff]  }
 0x176   :  { %13923 = vmatpush1.bf16.msra.mxu1 %v20600_v3  ;;  %v20682_v3 = vld [vmem:[#allocation5 + $0x1714] ss:$44 sps:$4 sm:$0xff]  }
 0x177   :  { %13513 = vmatpush1.bf16.msra.mxu0 %v20597_v2  ;;  %13924 = vmatprep.subr.bf16.mxu1 %v20608_v5  ;;  %v20679_v2 = vld [vmem:[#allocation5 + $0x220c] ss:$44 sps:$4 sm:$0xff]   ;;  %v20680_v5 = vld [vmem:[#allocation5 + $0x1710] ss:$44 sps:$4 sm:$0xff]  }
 0x178   :  { %13514 = vmatprep.subr.bf16.mxu0 %v20605_v4  ;;  %v20677_v4 = vld [vmem:[#allocation5 + $0x2208] ss:$44 sps:$4 sm:$0xff]  }
 0x17a   :  { %13925 = vmatpush1.bf16.msra.mxu1 %v20606_v9  ;;  %v20688_v9 = vld [vmem:[#allocation5 + $0x176c] ss:$44 sps:$4 sm:$0xff]  }
 0x17b   :  { %13515 = vmatpush1.bf16.msra.mxu0 %v20603_v8  ;;  %13926 = vmatprep.subr.bf16.mxu1 %v20614_v11  ;;  %v20685_v8 = vld [vmem:[#allocation5 + $0x2264] ss:$44 sps:$4 sm:$0xff]   ;;  %v20686_v11 = vld [vmem:[#allocation5 + $0x1768] ss:$44 sps:$4 sm:$0xff]  }
 0x17c   :  { %13516 = vmatprep.subr.bf16.mxu0 %v20611_v10  ;;  %v20683_v10 = vld [vmem:[#allocation5 + $0x2260] ss:$44 sps:$4 sm:$0xff]  }
 0x17e   :  { %13927 = vmatpush1.bf16.msra.mxu1 %v20612_v13  ;;  %v20694_v13 = vld [vmem:[#allocation5 + $0x17c4] ss:$44 sps:$4 sm:$0xff]  }
 0x17f   :  { %13517 = vmatpush1.bf16.msra.mxu0 %v20609_v12  ;;  %13928 = vmatprep.subr.bf16.mxu1 %v20620_v15  ;;  %v20691_v12 = vld [vmem:[#allocation5 + $0x22bc] ss:$44 sps:$4 sm:$0xff]   ;;  %v20692_v15 = vld [vmem:[#allocation5 + $0x17c0] ss:$44 sps:$4 sm:$0xff]  }
 0x180   :  { %13518 = vmatprep.subr.bf16.mxu0 %v20617_v14  ;;  %v20689_v14 = vld [vmem:[#allocation5 + $0x22b8] ss:$44 sps:$4 sm:$0xff]  }
 0x182   :  { %13929 = vmatpush1.bf16.msra.mxu1 %v20618_v18  ;;  %v20700_v18 = vld [vmem:[#allocation5 + $0x181c] ss:$44 sps:$4 sm:$0xff]  }
 0x183   :  { %13519 = vmatpush1.bf16.msra.mxu0 %v20615_v17  ;;  %13930 = vmatprep.subr.bf16.mxu1 %v20626_v22  ;;  %v20697_v17 = vld [vmem:[#allocation5 + $0x2314] ss:$44 sps:$4 sm:$0xff]   ;;  %v20698_v22 = vld [vmem:[#allocation5 + $0x1818] ss:$44 sps:$4 sm:$0xff]  }
 0x184   :  { %13520 = vmatprep.subr.bf16.mxu0 %v20623_v21  ;;  %v20695_v21 = vld [vmem:[#allocation5 + $0x2310] ss:$44 sps:$4 sm:$0xff]  }
 0x186   :  { %13931 = vmatpush1.bf16.msra.mxu1 %v20624_v24  ;;  %v20706_v24 = vld [vmem:[#allocation5 + $0x1874] ss:$44 sps:$4 sm:$0xff]  }
 0x187   :  { %13521 = vmatpush1.bf16.msra.mxu0 %v20621_v23  ;;  %13932 = vmatprep.subr.bf16.mxu1 %v20632_v28  ;;  %v20703_v23 = vld [vmem:[#allocation5 + $0x236c] ss:$44 sps:$4 sm:$0xff]   ;;  %v20704_v28 = vld [vmem:[#allocation5 + $0x1870] ss:$44 sps:$4 sm:$0xff]  }
 0x188   :  { %13522 = vmatprep.subr.bf16.mxu0 %v20629_v25  ;;  %v20701_v25 = vld [vmem:[#allocation5 + $0x2368] ss:$44 sps:$4 sm:$0xff]  }
 0x18a   :  { %13933 = vmatpush1.bf16.msra.mxu1 %v20630_v30  ;;  %v20712_v30 = vld [vmem:[#allocation5 + $0x18cc] ss:$44 sps:$4 sm:$0xff]  }
 0x18b   :  { %13523 = vmatpush1.bf16.msra.mxu0 %v20627_v29  ;;  %13934 = vmatprep.subr.bf16.mxu1 %v20638_v19  ;;  %v20709_v29 = vld [vmem:[#allocation5 + $0x23c4] ss:$44 sps:$4 sm:$0xff]   ;;  %v20710_v19 = vld [vmem:[#allocation5 + $0x18c8] ss:$44 sps:$4 sm:$0xff]  }
 0x18c   :  { %13524 = vmatprep.subr.bf16.mxu0 %v20635_v32  ;;  %v20707_v32 = vld [vmem:[#allocation5 + $0x23c0] ss:$44 sps:$4 sm:$0xff]  }
 0x18e   :  { %13935 = vmatpush1.bf16.msra.mxu1 %v20636_v35  ;;  %v20718_v35 = vld [vmem:[#allocation5 + $0x1924] ss:$44 sps:$4 sm:$0xff]  }
 0x18f   :  { %13525 = vmatpush1.bf16.msra.mxu0 %v20633_v33  ;;  %13936 = vmatprep.subr.bf16.mxu1 %v20644_v37  ;;  %v20715_v33 = vld [vmem:[#allocation5 + $0x241c] ss:$44 sps:$4 sm:$0xff]   ;;  %v20716_v37 = vld [vmem:[#allocation5 + $0x1920] ss:$44 sps:$4 sm:$0xff]  }
 0x190   :  { %13526 = vmatprep.subr.bf16.mxu0 %v20641_v36  ;;  %v20713_v36 = vld [vmem:[#allocation5 + $0x2418] ss:$44 sps:$4 sm:$0xff]  }
 0x192   :  { %13937 = vmatpush1.bf16.msra.mxu1 %v20642_v41  ;;  %v20724_v41 = vld [vmem:[#allocation5 + $0x197c] ss:$44 sps:$4 sm:$0xff]  }
 0x193   :  { %13527 = vmatpush1.bf16.msra.mxu0 %v20639_v40  ;;  %13938 = vmatprep.subr.bf16.mxu1 %v20650_v43  ;;  %v20721_v40 = vld [vmem:[#allocation5 + $0x2474] ss:$44 sps:$4 sm:$0xff]   ;;  %v20722_v43 = vld [vmem:[#allocation5 + $0x1978] ss:$44 sps:$4 sm:$0xff]  }
 0x194   :  { %13528 = vmatprep.subr.bf16.mxu0 %v20647_v42  ;;  %v20719_v42 = vld [vmem:[#allocation5 + $0x2470] ss:$44 sps:$4 sm:$0xff]  }
 0x196   :  { %13939 = vmatpush1.bf16.msra.mxu1 %v20648_v45  ;;  %v20730_v45 = vld [vmem:[#allocation5 + $0x19d4] ss:$44 sps:$4 sm:$0xff]  }
 0x197   :  { %13529 = vmatpush1.bf16.msra.mxu0 %v20645_v27  ;;  %13940 = vmatprep.subr.bf16.mxu1 %v20656_v48  ;;  %v20727_v27 = vld [vmem:[#allocation5 + $0x24cc] ss:$44 sps:$4 sm:$0xff]   ;;  %v20728_v48 = vld [vmem:[#allocation5 + $0x19d0] ss:$44 sps:$4 sm:$0xff]  }
 0x198   :  { %13530 = vmatprep.subr.bf16.mxu0 %v20653_v46  ;;  %v20725_v46 = vld [vmem:[#allocation5 + $0x24c8] ss:$44 sps:$4 sm:$0xff]  }
 0x19a   :  { %13941 = vmatpush1.bf16.msra.mxu1 %v20654_v50  ;;  %v20736_v50 = vld [vmem:[#allocation5 + $0x1a2c] ss:$44 sps:$4 sm:$0xff]  }
 0x19b   :  { %13531 = vmatpush1.bf16.msra.mxu0 %v20651_v49  ;;  %13951 = vmatprep.subr.bf16.mxu1 %v20663_v53  ;;  %v20733_v49 = vld [vmem:[#allocation5 + $0x2524] ss:$44 sps:$4 sm:$0xff]   ;;  %v20734_v53 = vld [vmem:[#allocation5 + $0x1a28] ss:$44 sps:$4 sm:$0xff]  }
 0x19c   :  { %13541 = vmatprep.subr.bf16.mxu0 %v20660_v52  ;;  %v20731_v52 = vld [vmem:[#allocation5 + $0x2520] ss:$44 sps:$4 sm:$0xff]  }
 0x19d   :  { %13943 = vmatmul.mubr.bf16.vlgmr.msra.gmra.mrb[4].mxu1 %v23679_v26 }
 0x19e   :  { %13533 = vmatmul.mubr.bf16.vlgmr.msra.gmra.mrb[0].mxu0 %v23709_v55  ;;  %13952 = vmatpush1.bf16.msra.mxu1 %v20661_v57  ;;  %v20742_v57 = vld [vmem:[#allocation5 + $0x1a84] ss:$44 sps:$4 sm:$0xff]  }
 0x19f   :  { %13542 = vmatpush1.bf16.msra.mxu0 %v20658_v56  ;;  %13953 = vmatprep.subr.bf16.mxu1 %v20670_v59  ;;  %v20739_v56 = vld [vmem:[#allocation5 + $0x257c] ss:$44 sps:$4 sm:$0xff]   ;;  %v20740_v59 = vld [vmem:[#allocation5 + $0x1a80] ss:$44 sps:$4 sm:$0xff]  }
 0x1a0   :  { %13543 = vmatprep.subr.bf16.mxu0 %v20667_v58  ;;  %13573 = vmatprep.mubr.bf16.mxu0 %v23713_v60  ;;  %v20737_v58 = vld [vmem:[#allocation5 + $0x2578] ss:$44 sps:$4 sm:$0xff]  }
 0x1a1   :  { %13983 = vmatprep.mubr.bf16.mxu1 %v23685_v31 }
 0x1a2   :  { %13954 = vmatpush1.bf16.msra.mxu1 %v20668_v61  ;;  %v20748_v61 = vld [vmem:[#allocation5 + $0x1adc] ss:$44 sps:$4 sm:$0xff]  }
 0x1a3   :  { %13544 = vmatpush1.bf16.msra.mxu0 %v20665_v39  ;;  %13955 = vmatprep.subr.bf16.mxu1 %v20676_v63  ;;  %v20745_v39 = vld [vmem:[#allocation5 + $0x25d4] ss:$44 sps:$4 sm:$0xff]   ;;  %v20746_v63 = vld [vmem:[#allocation5 + $0x1ad8] ss:$44 sps:$4 sm:$0xff]  }
 0x1a4   :  { %13545 = vmatprep.subr.bf16.mxu0 %v20673_v62  ;;  %v20743_v62 = vld [vmem:[#allocation5 + $0x25d0] ss:$44 sps:$4 sm:$0xff]  }
 0x1a6   :  { %13956 = vmatpush1.bf16.msra.mxu1 %v20674_v1  ;;  %v20754_v1 = vld [vmem:[#allocation5 + $0x1b34] ss:$44 sps:$4 sm:$0xff]  }
 0x1a7   :  { %13546 = vmatpush1.bf16.msra.mxu0 %v20671_v0  ;;  %13957 = vmatprep.subr.bf16.mxu1 %v20682_v3  ;;  %v20751_v0 = vld [vmem:[#allocation5 + $0x262c] ss:$44 sps:$4 sm:$0xff]   ;;  %v20752_v3 = vld [vmem:[#allocation5 + $0x1b30] ss:$44 sps:$4 sm:$0xff]  }
 0x1a8   :  { %13547 = vmatprep.subr.bf16.mxu0 %v20679_v2  ;;  %v20749_v2 = vld [vmem:[#allocation5 + $0x2628] ss:$44 sps:$4 sm:$0xff]  }
 0x1aa   :  { %13958 = vmatpush1.bf16.msra.mxu1 %v20680_v5  ;;  %v20761_v5 = vld [vmem:[#allocation5 + $0x1b8c] ss:$44 sps:$4 sm:$0xff]  }
 0x1ab   :  { %13548 = vmatpush1.bf16.msra.mxu0 %v20677_v4  ;;  %13959 = vmatprep.subr.bf16.mxu1 %v20688_v9  ;;  %v20758_v4 = vld [vmem:[#allocation5 + $0x2684] ss:$44 sps:$4 sm:$0xff]   ;;  %v23723_v9 = vcombine.low %v23705_v54, %v23705_v54 }
 0x1ac   :  { %13549 = vmatprep.subr.bf16.mxu0 %v20685_v8  ;;  %v23719_v8 = vld [vmem:[#allocation2 + $0x38] sm:$0xff] }
 0x1ad   :  { %v20763_v54 = vld [vmem:[#allocation5 + $0x26d8] ss:$44 sps:$4 sm:$0xff]  }
 0x1ae   :  { %13960 = vmatpush1.bf16.msra.mxu1 %v20686_v11  ;;  %v20759_v11 = vld [vmem:[#allocation5 + $0x1b88] ss:$44 sps:$4 sm:$0xff]  }
 0x1af   :  { %13550 = vmatpush1.bf16.msra.mxu0 %v20683_v10  ;;  %13961 = vmatprep.subr.bf16.mxu1 %v20694_v13  ;;  %v20756_v10 = vld [vmem:[#allocation5 + $0x2680] ss:$44 sps:$4 sm:$0xff]   ;;  %v20768_v13 = vld [vmem:[#allocation5 + $0x1be4] ss:$44 sps:$4 sm:$0xff]  }
 0x1b0   :  { %13551 = vmatprep.subr.bf16.mxu0 %v20691_v12  ;;  %v20765_v12 = vld [vmem:[#allocation5 + $0x26dc] ss:$44 sps:$4 sm:$0xff]  }
 0x1b2   :  { %13962 = vmatpush1.bf16.msra.mxu1 %v20692_v15  ;;  %v20766_v15 = vld [vmem:[#allocation5 + $0x1be0] ss:$44 sps:$4 sm:$0xff]  }
 0x1b3   :  { %13552 = vmatpush1.bf16.msra.mxu0 %v20689_v14  ;;  %13963 = vmatprep.subr.bf16.mxu1 %v20700_v18  ;;  %v23727_v14 = vcombine.high %v23719_v8, %v23719_v8  ;;  %v20774_v18 = vld [vmem:[#allocation5 + $0x1c3c] ss:$44 sps:$4 sm:$0xff]  }
 0x1b4   :  { %13553 = vmatprep.subr.bf16.mxu0 %v20697_v17  ;;  %v20771_v17 = vld [vmem:[#allocation5 + $0x2734] ss:$44 sps:$4 sm:$0xff]  }
 0x1b6   :  { %13964 = vmatpush1.bf16.msra.mxu1 %v20698_v22  ;;  %v20772_v22 = vld [vmem:[#allocation5 + $0x1c38] ss:$44 sps:$4 sm:$0xff]  }
 0x1b7   :  { %13554 = vmatpush1.bf16.msra.mxu0 %v20695_v21  ;;  %13965 = vmatprep.subr.bf16.mxu1 %v20706_v24  ;;  %v20769_v21 = vld [vmem:[#allocation5 + $0x2730] ss:$44 sps:$4 sm:$0xff]   ;;  %v20780_v24 = vld [vmem:[#allocation5 + $0x1c94] ss:$44 sps:$4 sm:$0xff]  }
 0x1b8   :  { %13555 = vmatprep.subr.bf16.mxu0 %v20703_v23  ;;  %v20777_v23 = vld [vmem:[#allocation5 + $0x278c] ss:$44 sps:$4 sm:$0xff]  }
 0x1ba   :  { %13966 = vmatpush1.bf16.msra.mxu1 %v20704_v28  ;;  %v20778_v28 = vld [vmem:[#allocation5 + $0x1c90] ss:$44 sps:$4 sm:$0xff]  }
 0x1bb   :  { %13556 = vmatpush1.bf16.msra.mxu0 %v20701_v25  ;;  %13967 = vmatprep.subr.bf16.mxu1 %v20712_v30  ;;  %v20775_v25 = vld [vmem:[#allocation5 + $0x2788] ss:$44 sps:$4 sm:$0xff]   ;;  %v20786_v30 = vld [vmem:[#allocation5 + $0x1cec] ss:$44 sps:$4 sm:$0xff]  }
 0x1bc   :  { %13557 = vmatprep.subr.bf16.mxu0 %v20709_v29  ;;  %v20783_v29 = vld [vmem:[#allocation5 + $0x27e4] ss:$44 sps:$4 sm:$0xff]  }
 0x1be   :  { %13968 = vmatpush1.bf16.msra.mxu1 %v20710_v19  ;;  %v20784_v19 = vld [vmem:[#allocation5 + $0x1ce8] ss:$44 sps:$4 sm:$0xff]  }
 0x1bf   :  { %13558 = vmatpush1.bf16.msra.mxu0 %v20707_v32  ;;  %13969 = vmatprep.subr.bf16.mxu1 %v20718_v35  ;;  %v20781_v32 = vld [vmem:[#allocation5 + $0x27e0] ss:$44 sps:$4 sm:$0xff]   ;;  %v20792_v35 = vld [vmem:[#allocation5 + $0x1d44] ss:$44 sps:$4 sm:$0xff]  }
 0x1c0   :  { %13559 = vmatprep.subr.bf16.mxu0 %v20715_v33  ;;  %v20789_v33 = vld [vmem:[#allocation5 + $0x283c] ss:$44 sps:$4 sm:$0xff]  }
 0x1c2   :  { %13970 = vmatpush1.bf16.msra.mxu1 %v20716_v37  ;;  %v20790_v37 = vld [vmem:[#allocation5 + $0x1d40] ss:$44 sps:$4 sm:$0xff]  }
 0x1c3   :  { %13560 = vmatpush1.bf16.msra.mxu0 %v20713_v36  ;;  %13971 = vmatprep.subr.bf16.mxu1 %v20724_v41  ;;  %v20787_v36 = vld [vmem:[#allocation5 + $0x2838] ss:$44 sps:$4 sm:$0xff]   ;;  %v20798_v41 = vld [vmem:[#allocation5 + $0x1d9c] ss:$44 sps:$4 sm:$0xff]  }
 0x1c4   :  { %13561 = vmatprep.subr.bf16.mxu0 %v20721_v40  ;;  %v20795_v40 = vld [vmem:[#allocation5 + $0x2894] ss:$44 sps:$4 sm:$0xff]  }
 0x1c6   :  { %13972 = vmatpush1.bf16.msra.mxu1 %v20722_v43  ;;  %v20796_v43 = vld [vmem:[#allocation5 + $0x1d98] ss:$44 sps:$4 sm:$0xff]  }
 0x1c7   :  { %13562 = vmatpush1.bf16.msra.mxu0 %v20719_v42  ;;  %13973 = vmatprep.subr.bf16.mxu1 %v20730_v45  ;;  %v20793_v42 = vld [vmem:[#allocation5 + $0x2890] ss:$44 sps:$4 sm:$0xff]   ;;  %v20804_v45 = vld [vmem:[#allocation5 + $0x1df4] ss:$44 sps:$4 sm:$0xff]  }
 0x1c8   :  { %13563 = vmatprep.subr.bf16.mxu0 %v20727_v27  ;;  %v20801_v27 = vld [vmem:[#allocation5 + $0x28ec] ss:$44 sps:$4 sm:$0xff]  }
 0x1ca   :  { %13974 = vmatpush1.bf16.msra.mxu1 %v20728_v48  ;;  %v20802_v48 = vld [vmem:[#allocation5 + $0x1df0] ss:$44 sps:$4 sm:$0xff]  }
 0x1cb   :  { %13564 = vmatpush1.bf16.msra.mxu0 %v20725_v46  ;;  %13975 = vmatprep.subr.bf16.mxu1 %v20736_v50  ;;  %v20799_v46 = vld [vmem:[#allocation5 + $0x28e8] ss:$44 sps:$4 sm:$0xff]   ;;  %v20810_v50 = vld [vmem:[#allocation5 + $0x1e4c] ss:$44 sps:$4 sm:$0xff]  }
 0x1cc   :  { %13565 = vmatprep.subr.bf16.mxu0 %v20733_v49  ;;  %v20807_v49 = vld [vmem:[#allocation5 + $0x2944] ss:$44 sps:$4 sm:$0xff]  }
 0x1ce   :  { %13976 = vmatpush1.bf16.msra.mxu1 %v20734_v53  ;;  %v20808_v53 = vld [vmem:[#allocation5 + $0x1e48] ss:$44 sps:$4 sm:$0xff]  }
 0x1cf   :  { %13566 = vmatpush1.bf16.msra.mxu0 %v20731_v52  ;;  %13977 = vmatprep.subr.bf16.mxu1 %v20742_v57  ;;  %v20805_v52 = vld [vmem:[#allocation5 + $0x2940] ss:$44 sps:$4 sm:$0xff]   ;;  %v20816_v57 = vld [vmem:[#allocation5 + $0x1ea4] ss:$44 sps:$4 sm:$0xff]  }
 0x1d0   :  { %13567 = vmatprep.subr.bf16.mxu0 %v20739_v56  ;;  %v20813_v56 = vld [vmem:[#allocation5 + $0x299c] ss:$44 sps:$4 sm:$0xff]  }
 0x1d2   :  { %13978 = vmatpush1.bf16.msra.mxu1 %v20740_v59  ;;  %v20814_v59 = vld [vmem:[#allocation5 + $0x1ea0] ss:$44 sps:$4 sm:$0xff]  }
 0x1d3   :  { %13568 = vmatpush1.bf16.msra.mxu0 %v20737_v58  ;;  %13979 = vmatprep.subr.bf16.mxu1 %v20748_v61  ;;  %v20811_v58 = vld [vmem:[#allocation5 + $0x2998] ss:$44 sps:$4 sm:$0xff]   ;;  %v20822_v61 = vld [vmem:[#allocation5 + $0x1efc] ss:$44 sps:$4 sm:$0xff]  }
 0x1d4   :  { %13569 = vmatprep.subr.bf16.mxu0 %v20745_v39  ;;  %v20819_v39 = vld [vmem:[#allocation5 + $0x29f4] ss:$44 sps:$4 sm:$0xff]  }
 0x1d6   :  { %13980 = vmatpush1.bf16.msra.mxu1 %v20746_v63  ;;  %v20820_v63 = vld [vmem:[#allocation5 + $0x1ef8] ss:$44 sps:$4 sm:$0xff]  }
 0x1d7   :  { %13570 = vmatpush1.bf16.msra.mxu0 %v20743_v62  ;;  %13981 = vmatprep.subr.bf16.mxu1 %v20754_v1  ;;  %v20817_v62 = vld [vmem:[#allocation5 + $0x29f0] ss:$44 sps:$4 sm:$0xff]   ;;  %v20828_v1 = vld [vmem:[#allocation5 + $0x1f54] ss:$44 sps:$4 sm:$0xff]  }
 0x1d8   :  { %13571 = vmatprep.subr.bf16.mxu0 %v20751_v0  ;;  %v20825_v0 = vld [vmem:[#allocation5 + $0x2a4c] ss:$44 sps:$4 sm:$0xff]  }
 0x1da   :  { %13982 = vmatpush1.bf16.msra.mxu1 %v20752_v3  ;;  %v20826_v3 = vld [vmem:[#allocation5 + $0x1f50] ss:$44 sps:$4 sm:$0xff]  }
 0x1db   :  { %13572 = vmatpush1.bf16.msra.mxu0 %v20749_v2  ;;  %13992 = vmatprep.subr.bf16.mxu1 %v20761_v5  ;;  %v20823_v2 = vld [vmem:[#allocation5 + $0x2a48] ss:$44 sps:$4 sm:$0xff]   ;;  %v20834_v5 = vld [vmem:[#allocation5 + $0x1fac] ss:$44 sps:$4 sm:$0xff]  }
 0x1dc   :  { %13582 = vmatprep.subr.bf16.mxu0 %v20758_v4  ;;  %v20831_v4 = vld [vmem:[#allocation5 + $0x2aa4] ss:$44 sps:$4 sm:$0xff]  }
 0x1dd   :  { %13984 = vmatmul.mubr.bf16.vlgmr.msra.gmra.mrb[4].mxu1 %v23693_v38 }
 0x1de   :  { %13574 = vmatmul.mubr.bf16.vlgmr.msra.gmra.mrb[0].mxu0 %v23723_v9  ;;  %13993 = vmatpush1.bf16.msra.mxu1 %v20759_v11  ;;  %v20832_v11 = vld [vmem:[#allocation5 + $0x1fa8] ss:$44 sps:$4 sm:$0xff]  }
 0x1df   :  { %13583 = vmatpush1.bf16.msra.mxu0 %v20756_v10  ;;  %13994 = vmatprep.subr.bf16.mxu1 %v20768_v13  ;;  %v20829_v10 = vld [vmem:[#allocation5 + $0x2aa0] ss:$44 sps:$4 sm:$0xff]   ;;  %v20837_v13 = vld [vmem:[#allocation5 + $0x2afc] ss:$44 sps:$4 sm:$0xff]  }
 0x1e0   :  { %13584 = vmatprep.subr.bf16.mxu0 %v20765_v12  ;;  %13614 = vmatprep.mubr.bf16.mxu0 %v23727_v14  ;;  %v23733_v12 = vpop.f32.mrb[0].mxu1 }
 0x1e1   :  { %14024 = vmatprep.mubr.bf16.mxu1 %v23699_v44 }
 0x1e2   :  { %13995 = vmatpush1.bf16.msra.mxu1 %v20766_v15  ;;  %v23735_v15 = vpop.f32.mrb[1].mxu1 }
 0x1e3   :  { %13585 = vmatpush1.bf16.msra.mxu0 %v20763_v54  ;;  %13996 = vmatprep.subr.bf16.mxu1 %v20774_v18  ;;  %v20840_v54 = vld [vmem:[#allocation5 + $0x2004] ss:$44 sps:$4 sm:$0xff]  }
 0x1e4   :  { %13586 = vmatprep.subr.bf16.mxu0 %v20771_v17  ;;  %v13333_v17 = vpop.f32.mrb[2].mxu1 }
 0x1e5   :  { %v13334_v18 = vpop.f32.mrb[3].mxu1  ;;  %v20905_v17 = vld [vmem:[#allocation5 + $0x2ec4] ss:$44 sps:$4 sm:$0xff]  }
 0x1e6   :  { %13997 = vmatpush1.bf16.msra.mxu1 %v20772_v22  ;;  %v20838_v22 = vld [vmem:[#allocation5 + $0x2000] ss:$44 sps:$4 sm:$0xff]  }
 0x1e7   :  { %13587 = vmatpush1.bf16.msra.mxu0 %v20769_v21  ;;  %13998 = vmatprep.subr.bf16.mxu1 %v20780_v24  ;;  %v20835_v21 = vld [vmem:[#allocation5 + $0x2af8] ss:$44 sps:$4 sm:$0xff]   ;;  %v20846_v24 = vld [vmem:[#allocation5 + $0x205c] ss:$44 sps:$4 sm:$0xff]  }
 0x1e8   :  { %13588 = vmatprep.subr.bf16.mxu0 %v20777_v23  ;;  %v20843_v23 = vld [vmem:[#allocation5 + $0x2b54] ss:$44 sps:$4 sm:$0xff]   ;;  %v20908_v18 = vld [vmem:[#allocation5 + $0x23cc] ss:$44 sps:$4 sm:$0xff]  }
 0x1ea   :  { %13999 = vmatpush1.bf16.msra.mxu1 %v20778_v28  ;;  %v20844_v28 = vld [vmem:[#allocation5 + $0x2058] ss:$44 sps:$4 sm:$0xff]  }
 0x1eb   :  { %13589 = vmatpush1.bf16.msra.mxu0 %v20775_v25  ;;  %14000 = vmatprep.subr.bf16.mxu1 %v20786_v30  ;;  %v20841_v25 = vld [vmem:[#allocation5 + $0x2b50] ss:$44 sps:$4 sm:$0xff]   ;;  %v20852_v30 = vld [vmem:[#allocation5 + $0x20b4] ss:$44 sps:$4 sm:$0xff]  }
 0x1ec   :  { %13590 = vmatprep.subr.bf16.mxu0 %v20783_v29  ;;  %v20849_v29 = vld [vmem:[#allocation5 + $0x2bac] ss:$44 sps:$4 sm:$0xff]  }
 0x1ee   :  { %14001 = vmatpush1.bf16.msra.mxu1 %v20784_v19  ;;  %v20850_v19 = vld [vmem:[#allocation5 + $0x20b0] ss:$44 sps:$4 sm:$0xff]  }
 0x1ef   :  { %13591 = vmatpush1.bf16.msra.mxu0 %v20781_v32  ;;  %14002 = vmatprep.subr.bf16.mxu1 %v20792_v35  ;;  %v20847_v32 = vld [vmem:[#allocation5 + $0x2ba8] ss:$44 sps:$4 sm:$0xff]   ;;  %v20859_v35 = vld [vmem:[#allocation5 + $0x210c] ss:$44 sps:$4 sm:$0xff]  }
 0x1f0   :  { %13592 = vmatprep.subr.bf16.mxu0 %v20789_v33  ;;  %v20856_v33 = vld [vmem:[#allocation5 + $0x2c04] ss:$44 sps:$4 sm:$0xff]  }
 0x1f2   :  { %14003 = vmatpush1.bf16.msra.mxu1 %v20790_v37  ;;  %v23741_v37 = vcombine.low %v23719_v8, %v23719_v8  ;;  %v20861_v8 = vld [vmem:[#allocation5 + $0x2c58] ss:$44 sps:$4 sm:$0xff]  }
 0x1f3   :  { %13593 = vmatpush1.bf16.msra.mxu0 %v20787_v36  ;;  %14004 = vmatprep.subr.bf16.mxu1 %v20798_v41  ;;  %v23737_v36 = vld [vmem:[#allocation2 + $0x40] sm:$0xff]  ;;  %v20857_v41 = vld [vmem:[#allocation5 + $0x2108] ss:$44 sps:$4 sm:$0xff]  }
 0x1f4   :  { %13594 = vmatprep.subr.bf16.mxu0 %v20795_v40  ;;  %v20854_v40 = vld [vmem:[#allocation5 + $0x2c00] ss:$44 sps:$4 sm:$0xff]  }
 0x1f6   :  { %14005 = vmatpush1.bf16.msra.mxu1 %v20796_v43  ;;  %v20866_v43 = vld [vmem:[#allocation5 + $0x2164] ss:$44 sps:$4 sm:$0xff]  }
 0x1f7   :  { %13595 = vmatpush1.bf16.msra.mxu0 %v20793_v42  ;;  %14006 = vmatprep.subr.bf16.mxu1 %v20804_v45  ;;  %v20863_v42 = vld [vmem:[#allocation5 + $0x2c5c] ss:$44 sps:$4 sm:$0xff]   ;;  %v20864_v45 = vld [vmem:[#allocation5 + $0x2160] ss:$44 sps:$4 sm:$0xff]  }
 0x1f8   :  { %13596 = vmatprep.subr.bf16.mxu0 %v20801_v27  ;;  %v23745_v27 = vcombine.high %v23737_v36, %v23737_v36 }
 0x1fa   :  { %14007 = vmatpush1.bf16.msra.mxu1 %v20802_v48  ;;  %v20872_v48 = vld [vmem:[#allocation5 + $0x21bc] ss:$44 sps:$4 sm:$0xff]  }
 0x1fb   :  { %13597 = vmatpush1.bf16.msra.mxu0 %v20799_v46  ;;  %14008 = vmatprep.subr.bf16.mxu1 %v20810_v50  ;;  %v20869_v46 = vld [vmem:[#allocation5 + $0x2cb4] ss:$44 sps:$4 sm:$0xff]   ;;  %v20870_v50 = vld [vmem:[#allocation5 + $0x21b8] ss:$44 sps:$4 sm:$0xff]  }
 0x1fc   :  { %13598 = vmatprep.subr.bf16.mxu0 %v20807_v49  ;;  %v20867_v49 = vld [vmem:[#allocation5 + $0x2cb0] ss:$44 sps:$4 sm:$0xff]  }
 0x1fe   :  { %14009 = vmatpush1.bf16.msra.mxu1 %v20808_v53  ;;  %v20878_v53 = vld [vmem:[#allocation5 + $0x2214] ss:$44 sps:$4 sm:$0xff]  }
 0x1ff   :  { %13599 = vmatpush1.bf16.msra.mxu0 %v20805_v52  ;;  %14010 = vmatprep.subr.bf16.mxu1 %v20816_v57  ;;  %v20875_v52 = vld [vmem:[#allocation5 + $0x2d0c] ss:$44 sps:$4 sm:$0xff]   ;;  %v20876_v57 = vld [vmem:[#allocation5 + $0x2210] ss:$44 sps:$4 sm:$0xff]  }
 0x200   :  { %13600 = vmatprep.subr.bf16.mxu0 %v20813_v56  ;;  %v20873_v56 = vld [vmem:[#allocation5 + $0x2d08] ss:$44 sps:$4 sm:$0xff]  }
 0x202   :  { %14011 = vmatpush1.bf16.msra.mxu1 %v20814_v59  ;;  %v20884_v59 = vld [vmem:[#allocation5 + $0x226c] ss:$44 sps:$4 sm:$0xff]  }
 0x203   :  { %13601 = vmatpush1.bf16.msra.mxu0 %v20811_v58  ;;  %14012 = vmatprep.subr.bf16.mxu1 %v20822_v61  ;;  %v20881_v58 = vld [vmem:[#allocation5 + $0x2d64] ss:$44 sps:$4 sm:$0xff]   ;;  %v20882_v61 = vld [vmem:[#allocation5 + $0x2268] ss:$44 sps:$4 sm:$0xff]  }
 0x204   :  { %13602 = vmatprep.subr.bf16.mxu0 %v20819_v39  ;;  %v20879_v39 = vld [vmem:[#allocation5 + $0x2d60] ss:$44 sps:$4 sm:$0xff]  }
 0x206   :  { %14013 = vmatpush1.bf16.msra.mxu1 %v20820_v63  ;;  %v20890_v63 = vld [vmem:[#allocation5 + $0x22c4] ss:$44 sps:$4 sm:$0xff]  }
 0x207   :  { %13603 = vmatpush1.bf16.msra.mxu0 %v20817_v62  ;;  %14014 = vmatprep.subr.bf16.mxu1 %v20828_v1  ;;  %v20887_v62 = vld [vmem:[#allocation5 + $0x2dbc] ss:$44 sps:$4 sm:$0xff]   ;;  %v20888_v1 = vld [vmem:[#allocation5 + $0x22c0] ss:$44 sps:$4 sm:$0xff]  }
 0x208   :  { %13604 = vmatprep.subr.bf16.mxu0 %v20825_v0  ;;  %v20885_v0 = vld [vmem:[#allocation5 + $0x2db8] ss:$44 sps:$4 sm:$0xff]  }
 0x20a   :  { %14015 = vmatpush1.bf16.msra.mxu1 %v20826_v3  ;;  %v20896_v3 = vld [vmem:[#allocation5 + $0x231c] ss:$44 sps:$4 sm:$0xff]  }
 0x20b   :  { %13605 = vmatpush1.bf16.msra.mxu0 %v20823_v2  ;;  %14016 = vmatprep.subr.bf16.mxu1 %v20834_v5  ;;  %v20893_v2 = vld [vmem:[#allocation5 + $0x2e14] ss:$44 sps:$4 sm:$0xff]   ;;  %v20894_v5 = vld [vmem:[#allocation5 + $0x2318] ss:$44 sps:$4 sm:$0xff]  }
 0x20c   :  { %13606 = vmatprep.subr.bf16.mxu0 %v20831_v4  ;;  %v20891_v4 = vld [vmem:[#allocation5 + $0x2e10] ss:$44 sps:$4 sm:$0xff]  }
 0x20e   :  { %14017 = vmatpush1.bf16.msra.mxu1 %v20832_v11  ;;  %v20902_v11 = vld [vmem:[#allocation5 + $0x2374] ss:$44 sps:$4 sm:$0xff]  }
 0x20f   :  { %13607 = vmatpush1.bf16.msra.mxu0 %v20829_v10  ;;  %14018 = vmatprep.subr.bf16.mxu1 %v20840_v54  ;;  %v20899_v10 = vld [vmem:[#allocation5 + $0x2e6c] ss:$44 sps:$4 sm:$0xff]   ;;  %v20900_v54 = vld [vmem:[#allocation5 + $0x2370] ss:$44 sps:$4 sm:$0xff]  }
 0x210   :  { %13608 = vmatprep.subr.bf16.mxu0 %v20837_v13  ;;  %v20897_v13 = vld [vmem:[#allocation5 + $0x2e68] ss:$44 sps:$4 sm:$0xff]  }
 0x212   :  { %14019 = vmatpush1.bf16.msra.mxu1 %v20838_v22  ;;  %v20906_v22 = vld [vmem:[#allocation5 + $0x23c8] ss:$44 sps:$4 sm:$0xff]  }
 0x213   :  { %13609 = vmatpush1.bf16.msra.mxu0 %v20835_v21  ;;  %14020 = vmatprep.subr.bf16.mxu1 %v20846_v24  ;;  %v20903_v21 = vld [vmem:[#allocation5 + $0x2ec0] ss:$44 sps:$4 sm:$0xff]   ;;  %v20914_v24 = vld [vmem:[#allocation5 + $0x2424] ss:$44 sps:$4 sm:$0xff]  }
 0x214   :  { %13610 = vmatprep.subr.bf16.mxu0 %v20843_v23  ;;  %v20911_v23 = vld [vmem:[#allocation5 + $0x2f1c] ss:$44 sps:$4 sm:$0xff]  }
 0x216   :  { %14021 = vmatpush1.bf16.msra.mxu1 %v20844_v28  ;;  %v20912_v28 = vld [vmem:[#allocation5 + $0x2420] ss:$44 sps:$4 sm:$0xff]  }
 0x217   :  { %13611 = vmatpush1.bf16.msra.mxu0 %v20841_v25  ;;  %14022 = vmatprep.subr.bf16.mxu1 %v20852_v30  ;;  %v20909_v25 = vld [vmem:[#allocation5 + $0x2f18] ss:$44 sps:$4 sm:$0xff]   ;;  %v20920_v30 = vld [vmem:[#allocation5 + $0x247c] ss:$44 sps:$4 sm:$0xff]  }
 0x218   :  { %13612 = vmatprep.subr.bf16.mxu0 %v20849_v29  ;;  %v20917_v29 = vld [vmem:[#allocation5 + $0x2f74] ss:$44 sps:$4 sm:$0xff]  }
 0x21a   :  { %14023 = vmatpush1.bf16.msra.mxu1 %v20850_v19  ;;  %v20918_v19 = vld [vmem:[#allocation5 + $0x2478] ss:$44 sps:$4 sm:$0xff]  }
 0x21b   :  { %13613 = vmatpush1.bf16.msra.mxu0 %v20847_v32  ;;  %14033 = vmatprep.subr.bf16.mxu1 %v20859_v35  ;;  %v20915_v32 = vld [vmem:[#allocation5 + $0x2f70] ss:$44 sps:$4 sm:$0xff]   ;;  %v20926_v35 = vld [vmem:[#allocation5 + $0x24d4] ss:$44 sps:$4 sm:$0xff]  }
 0x21c   :  { %13623 = vmatprep.subr.bf16.mxu0 %v20856_v33  ;;  %v20923_v33 = vld [vmem:[#allocation5 + $0x2fcc] ss:$44 sps:$4 sm:$0xff]  }
 0x21d   :  { %14025 = vmatmul.mubr.bf16.vlgmr.msra.gmra.mrb[4].mxu1 %v23709_v55 }
 0x21e   :  { %13615 = vmatmul.mubr.bf16.vlgmr.msra.gmra.mrb[0].mxu0 %v23741_v37  ;;  %14034 = vmatpush1.bf16.msra.mxu1 %v20857_v41  ;;  %v20924_v41 = vld [vmem:[#allocation5 + $0x24d0] ss:$44 sps:$4 sm:$0xff]  }
 0x21f   :  { %13624 = vmatpush1.bf16.msra.mxu0 %v20854_v40  ;;  %14035 = vmatprep.subr.bf16.mxu1 %v20866_v43  ;;  %v20921_v40 = vld [vmem:[#allocation5 + $0x2fc8] ss:$44 sps:$4 sm:$0xff]   ;;  %v20932_v43 = vld [vmem:[#allocation5 + $0x252c] ss:$44 sps:$4 sm:$0xff]  }
 0x220   :  { %13625 = vmatprep.subr.bf16.mxu0 %v20863_v42  ;;  %13655 = vmatprep.mubr.bf16.mxu0 %v23745_v27  ;;  %v20929_v42 = vld [vmem:[#allocation5 + $0x3024] ss:$44 sps:$4 sm:$0xff]  }
 0x221   :  { %14065 = vmatprep.mubr.bf16.mxu1 %v23713_v60 }
 0x222   :  { %14036 = vmatpush1.bf16.msra.mxu1 %v20864_v45  ;;  %v20930_v45 = vld [vmem:[#allocation5 + $0x2528] ss:$44 sps:$4 sm:$0xff]  }
 0x223   :  { %13626 = vmatpush1.bf16.msra.mxu0 %v20861_v8  ;;  %14037 = vmatprep.subr.bf16.mxu1 %v20872_v48  ;;  %v20927_v8 = vld [vmem:[#allocation5 + $0x3020] ss:$44 sps:$4 sm:$0xff]   ;;  %v20938_v48 = vld [vmem:[#allocation5 + $0x2584] ss:$44 sps:$4 sm:$0xff]  }
 0x224   :  { %13627 = vmatprep.subr.bf16.mxu0 %v20869_v46  ;;  %v20935_v46 = vld [vmem:[#allocation5 + $0x307c] ss:$44 sps:$4 sm:$0xff]  }
 0x226   :  { %14038 = vmatpush1.bf16.msra.mxu1 %v20870_v50  ;;  %v20936_v50 = vld [vmem:[#allocation5 + $0x2580] ss:$44 sps:$4 sm:$0xff]  }
 0x227   :  { %13628 = vmatpush1.bf16.msra.mxu0 %v20867_v49  ;;  %14039 = vmatprep.subr.bf16.mxu1 %v20878_v53  ;;  %v20933_v49 = vld [vmem:[#allocation5 + $0x3078] ss:$44 sps:$4 sm:$0xff]   ;;  %v20944_v53 = vld [vmem:[#allocation5 + $0x25dc] ss:$44 sps:$4 sm:$0xff]  }
 0x228   :  { %13629 = vmatprep.subr.bf16.mxu0 %v20875_v52  ;;  %v20941_v52 = vld [vmem:[#allocation5 + $0x30d4] ss:$44 sps:$4 sm:$0xff]  }
 0x22a   :  { %14040 = vmatpush1.bf16.msra.mxu1 %v20876_v57  ;;  %v20942_v57 = vld [vmem:[#allocation5 + $0x25d8] ss:$44 sps:$4 sm:$0xff]  }
 0x22b   :  { %13630 = vmatpush1.bf16.msra.mxu0 %v20873_v56  ;;  %14041 = vmatprep.subr.bf16.mxu1 %v20884_v59  ;;  %v20939_v56 = vld [vmem:[#allocation5 + $0x30d0] ss:$44 sps:$4 sm:$0xff]   ;;  %v20950_v59 = vld [vmem:[#allocation5 + $0x2634] ss:$44 sps:$4 sm:$0xff]  }
 0x22c   :  { %13631 = vmatprep.subr.bf16.mxu0 %v20881_v58  ;;  %v20947_v58 = vld [vmem:[#allocation5 + $0x312c] ss:$44 sps:$4 sm:$0xff]  }
 0x22e   :  { %14042 = vmatpush1.bf16.msra.mxu1 %v20882_v61  ;;  %v20948_v61 = vld [vmem:[#allocation5 + $0x2630] ss:$44 sps:$4 sm:$0xff]  }
 0x22f   :  { %13632 = vmatpush1.bf16.msra.mxu0 %v20879_v39  ;;  %14043 = vmatprep.subr.bf16.mxu1 %v20890_v63  ;;  %v20945_v39 = vld [vmem:[#allocation5 + $0x3128] ss:$44 sps:$4 sm:$0xff]   ;;  %v20957_v63 = vld [vmem:[#allocation5 + $0x268c] ss:$44 sps:$4 sm:$0xff]  }
 0x230   :  { %13633 = vmatprep.subr.bf16.mxu0 %v20887_v62  ;;  %v20954_v62 = vld [vmem:[#allocation5 + $0x3184] ss:$44 sps:$4 sm:$0xff]  }
 0x232   :  { %14044 = vmatpush1.bf16.msra.mxu1 %v20888_v1  ;;  %v23755_v1 = vcombine.low %v23737_v36, %v23737_v36  ;;  %v20959_v36 = vld [vmem:[#allocation5 + $0x31d8] ss:$44 sps:$4 sm:$0xff]  }
 0x233   :  { %13634 = vmatpush1.bf16.msra.mxu0 %v20885_v0  ;;  %14045 = vmatprep.subr.bf16.mxu1 %v20896_v3  ;;  %v23751_v0 = vld [vmem:[#allocation2 + $0x48] sm:$0xff] }
 0x234   :  { %13635 = vmatprep.subr.bf16.mxu0 %v20893_v2  ;;  %v20952_v2 = vld [vmem:[#allocation5 + $0x3180] ss:$44 sps:$4 sm:$0xff]   ;;  %v20955_v3 = vld [vmem:[#allocation5 + $0x2688] ss:$44 sps:$4 sm:$0xff]  }
 0x236   :  { %14046 = vmatpush1.bf16.msra.mxu1 %v20894_v5  ;;  %v20964_v5 = vld [vmem:[#allocation5 + $0x26e4] ss:$44 sps:$4 sm:$0xff]  }
 0x237   :  { %13636 = vmatpush1.bf16.msra.mxu0 %v20891_v4  ;;  %14047 = vmatprep.subr.bf16.mxu1 %v20902_v11  ;;  %v20961_v4 = vld [vmem:[#allocation5 + $0x31dc] ss:$44 sps:$4 sm:$0xff]   ;;  %v20962_v11 = vld [vmem:[#allocation5 + $0x26e0] ss:$44 sps:$4 sm:$0xff]  }
 0x238   :  { %13637 = vmatprep.subr.bf16.mxu0 %v20899_v10  ;;  %v23759_v10 = vcombine.high %v23751_v0, %v23751_v0 }
 0x23a   :  { %14048 = vmatpush1.bf16.msra.mxu1 %v20900_v54  ;;  %v20970_v54 = vld [vmem:[#allocation5 + $0x273c] ss:$44 sps:$4 sm:$0xff]  }
 0x23b   :  { %13638 = vmatpush1.bf16.msra.mxu0 %v20897_v13  ;;  %14049 = vmatprep.subr.bf16.mxu1 %v20908_v18  ;;  %v20967_v13 = vld [vmem:[#allocation5 + $0x3234] ss:$44 sps:$4 sm:$0xff]   ;;  %v20968_v18 = vld [vmem:[#allocation5 + $0x2738] ss:$44 sps:$4 sm:$0xff]  }
 0x23c   :  { %13639 = vmatprep.subr.bf16.mxu0 %v20905_v17  ;;  %v20965_v17 = vld [vmem:[#allocation5 + $0x3230] ss:$44 sps:$4 sm:$0xff]  }
 0x23e   :  { %14050 = vmatpush1.bf16.msra.mxu1 %v20906_v22  ;;  %v20976_v22 = vld [vmem:[#allocation5 + $0x2794] ss:$44 sps:$4 sm:$0xff]  }
 0x23f   :  { %13640 = vmatpush1.bf16.msra.mxu0 %v20903_v21  ;;  %14051 = vmatprep.subr.bf16.mxu1 %v20914_v24  ;;  %v20973_v21 = vld [vmem:[#allocation5 + $0x328c] ss:$44 sps:$4 sm:$0xff]   ;;  %v20974_v24 = vld [vmem:[#allocation5 + $0x2790] ss:$44 sps:$4 sm:$0xff]  }
 0x240   :  { %13641 = vmatprep.subr.bf16.mxu0 %v20911_v23  ;;  %v20971_v23 = vld [vmem:[#allocation5 + $0x3288] ss:$44 sps:$4 sm:$0xff]  }
 0x242   :  { %14052 = vmatpush1.bf16.msra.mxu1 %v20912_v28  ;;  %v20982_v28 = vld [vmem:[#allocation5 + $0x27ec] ss:$44 sps:$4 sm:$0xff]  }
 0x243   :  { %13642 = vmatpush1.bf16.msra.mxu0 %v20909_v25  ;;  %14053 = vmatprep.subr.bf16.mxu1 %v20920_v30  ;;  %v20979_v25 = vld [vmem:[#allocation5 + $0x32e4] ss:$44 sps:$4 sm:$0xff]   ;;  %v20980_v30 = vld [vmem:[#allocation5 + $0x27e8] ss:$44 sps:$4 sm:$0xff]  }
 0x244   :  { %13643 = vmatprep.subr.bf16.mxu0 %v20917_v29  ;;  %v20977_v29 = vld [vmem:[#allocation5 + $0x32e0] ss:$44 sps:$4 sm:$0xff]  }
 0x246   :  { %14054 = vmatpush1.bf16.msra.mxu1 %v20918_v19  ;;  %v20988_v19 = vld [vmem:[#allocation5 + $0x2844] ss:$44 sps:$4 sm:$0xff]  }
 0x247   :  { %13644 = vmatpush1.bf16.msra.mxu0 %v20915_v32  ;;  %14055 = vmatprep.subr.bf16.mxu1 %v20926_v35  ;;  %v20985_v32 = vld [vmem:[#allocation5 + $0x333c] ss:$44 sps:$4 sm:$0xff]   ;;  %v20986_v35 = vld [vmem:[#allocation5 + $0x2840] ss:$44 sps:$4 sm:$0xff]  }
 0x248   :  { %13645 = vmatprep.subr.bf16.mxu0 %v20923_v33  ;;  %v20983_v33 = vld [vmem:[#allocation5 + $0x3338] ss:$44 sps:$4 sm:$0xff]  }
 0x24a   :  { %14056 = vmatpush1.bf16.msra.mxu1 %v20924_v41  ;;  %v20994_v41 = vld [vmem:[#allocation5 + $0x289c] ss:$44 sps:$4 sm:$0xff]  }
 0x24b   :  { %13646 = vmatpush1.bf16.msra.mxu0 %v20921_v40  ;;  %14057 = vmatprep.subr.bf16.mxu1 %v20932_v43  ;;  %v20991_v40 = vld [vmem:[#allocation5 + $0x3394] ss:$44 sps:$4 sm:$0xff]   ;;  %v20992_v43 = vld [vmem:[#allocation5 + $0x2898] ss:$44 sps:$4 sm:$0xff]  }
 0x24c   :  { %13647 = vmatprep.subr.bf16.mxu0 %v20929_v42  ;;  %v20989_v42 = vld [vmem:[#allocation5 + $0x3390] ss:$44 sps:$4 sm:$0xff]  }
 0x24e   :  { %14058 = vmatpush1.bf16.msra.mxu1 %v20930_v45  ;;  %v21000_v45 = vld [vmem:[#allocation5 + $0x28f4] ss:$44 sps:$4 sm:$0xff]  }
 0x24f   :  { %13648 = vmatpush1.bf16.msra.mxu0 %v20927_v8  ;;  %14059 = vmatprep.subr.bf16.mxu1 %v20938_v48  ;;  %v20997_v8 = vld [vmem:[#allocation5 + $0x33ec] ss:$44 sps:$4 sm:$0xff]   ;;  %v20998_v48 = vld [vmem:[#allocation5 + $0x28f0] ss:$44 sps:$4 sm:$0xff]  }
 0x250   :  { %13649 = vmatprep.subr.bf16.mxu0 %v20935_v46  ;;  %v20995_v46 = vld [vmem:[#allocation5 + $0x33e8] ss:$44 sps:$4 sm:$0xff]  }
 0x252   :  { %14060 = vmatpush1.bf16.msra.mxu1 %v20936_v50  ;;  %v21006_v50 = vld [vmem:[#allocation5 + $0x294c] ss:$44 sps:$4 sm:$0xff]  }
 0x253   :  { %13650 = vmatpush1.bf16.msra.mxu0 %v20933_v49  ;;  %14061 = vmatprep.subr.bf16.mxu1 %v20944_v53  ;;  %v21003_v49 = vld [vmem:[#allocation5 + $0x3444] ss:$44 sps:$4 sm:$0xff]   ;;  %v21004_v53 = vld [vmem:[#allocation5 + $0x2948] ss:$44 sps:$4 sm:$0xff]  }
 0x254   :  { %13651 = vmatprep.subr.bf16.mxu0 %v20941_v52  ;;  %v21001_v52 = vld [vmem:[#allocation5 + $0x3440] ss:$44 sps:$4 sm:$0xff]  }
 0x256   :  { %14062 = vmatpush1.bf16.msra.mxu1 %v20942_v57  ;;  %v21012_v57 = vld [vmem:[#allocation5 + $0x29a4] ss:$44 sps:$4 sm:$0xff]  }
 0x257   :  { %13652 = vmatpush1.bf16.msra.mxu0 %v20939_v56  ;;  %14063 = vmatprep.subr.bf16.mxu1 %v20950_v59  ;;  %v21009_v56 = vld [vmem:[#allocation5 + $0x349c] ss:$44 sps:$4 sm:$0xff]   ;;  %v21010_v59 = vld [vmem:[#allocation5 + $0x29a0] ss:$44 sps:$4 sm:$0xff]  }
 0x258   :  { %13653 = vmatprep.subr.bf16.mxu0 %v20947_v58  ;;  %v21007_v58 = vld [vmem:[#allocation5 + $0x3498] ss:$44 sps:$4 sm:$0xff]  }
 0x25a   :  { %14064 = vmatpush1.bf16.msra.mxu1 %v20948_v61  ;;  %v21018_v61 = vld [vmem:[#allocation5 + $0x29fc] ss:$44 sps:$4 sm:$0xff]  }
 0x25b   :  { %13654 = vmatpush1.bf16.msra.mxu0 %v20945_v39  ;;  %14074 = vmatprep.subr.bf16.mxu1 %v20957_v63  ;;  %v21015_v39 = vld [vmem:[#allocation5 + $0x34f4] ss:$44 sps:$4 sm:$0xff]   ;;  %v21016_v63 = vld [vmem:[#allocation5 + $0x29f8] ss:$44 sps:$4 sm:$0xff]  }
 0x25c   :  { %13664 = vmatprep.subr.bf16.mxu0 %v20954_v62  ;;  %v21013_v62 = vld [vmem:[#allocation5 + $0x34f0] ss:$44 sps:$4 sm:$0xff]  }
 0x25d   :  { %14066 = vmatmul.mubr.bf16.vlgmr.msra.gmra.mrb[4].mxu1 %v23723_v9 }
 0x25e   :  { %13656 = vmatmul.mubr.bf16.vlgmr.msra.gmra.mrb[0].mxu0 %v23755_v1  ;;  %14075 = vmatpush1.bf16.msra.mxu1 %v20955_v3  ;;  %v21024_v3 = vld [vmem:[#allocation5 + $0x2a54] ss:$44 sps:$4 sm:$0xff]  }
 0x25f   :  { %13665 = vmatpush1.bf16.msra.mxu0 %v20952_v2  ;;  %14076 = vmatprep.subr.bf16.mxu1 %v20964_v5  ;;  %v21021_v2 = vld [vmem:[#allocation5 + $0x354c] ss:$44 sps:$4 sm:$0xff]   ;;  %v21022_v5 = vld [vmem:[#allocation5 + $0x2a50] ss:$44 sps:$4 sm:$0xff]  }
 0x260   :  { %13666 = vmatprep.subr.bf16.mxu0 %v20961_v4  ;;  %13696 = vmatprep.mubr.bf16.mxu0 %v23759_v10  ;;  %v21019_v4 = vld [vmem:[#allocation5 + $0x3548] ss:$44 sps:$4 sm:$0xff]  }
 0x261   :  { %14106 = vmatprep.mubr.bf16.mxu1 %v23727_v14 }
 0x262   :  { %14077 = vmatpush1.bf16.msra.mxu1 %v20962_v11  ;;  %v21030_v11 = vld [vmem:[#allocation5 + $0x2aac] ss:$44 sps:$4 sm:$0xff]  }
 0x263   :  { %13667 = vmatpush1.bf16.msra.mxu0 %v20959_v36  ;;  %14078 = vmatprep.subr.bf16.mxu1 %v20970_v54  ;;  %v21027_v36 = vld [vmem:[#allocation5 + $0x35a4] ss:$44 sps:$4 sm:$0xff]   ;;  %v21028_v54 = vld [vmem:[#allocation5 + $0x2aa8] ss:$44 sps:$4 sm:$0xff]  }
 0x264   :  { %13668 = vmatprep.subr.bf16.mxu0 %v20967_v13  ;;  %v21025_v13 = vld [vmem:[#allocation5 + $0x35a0] ss:$44 sps:$4 sm:$0xff]  }
 0x266   :  { %14079 = vmatpush1.bf16.msra.mxu1 %v20968_v18  ;;  %v21036_v18 = vld [vmem:[#allocation5 + $0x2b04] ss:$44 sps:$4 sm:$0xff]  }
 0x267   :  { %13669 = vmatpush1.bf16.msra.mxu0 %v20965_v17  ;;  %14080 = vmatprep.subr.bf16.mxu1 %v20976_v22  ;;  %v21033_v17 = vld [vmem:[#allocation5 + $0x35fc] ss:$44 sps:$4 sm:$0xff]   ;;  %v21034_v22 = vld [vmem:[#allocation5 + $0x2b00] ss:$44 sps:$4 sm:$0xff]  }
 0x268   :  { %13670 = vmatprep.subr.bf16.mxu0 %v20973_v21  ;;  %v21031_v21 = vld [vmem:[#allocation5 + $0x35f8] ss:$44 sps:$4 sm:$0xff]  }
 0x26a   :  { %14081 = vmatpush1.bf16.msra.mxu1 %v20974_v24  ;;  %v21042_v24 = vld [vmem:[#allocation5 + $0x2b5c] ss:$44 sps:$4 sm:$0xff]  }
 0x26b   :  { %13671 = vmatpush1.bf16.msra.mxu0 %v20971_v23  ;;  %14082 = vmatprep.subr.bf16.mxu1 %v20982_v28  ;;  %v21039_v23 = vld [vmem:[#allocation5 + $0x3654] ss:$44 sps:$4 sm:$0xff]   ;;  %v21040_v28 = vld [vmem:[#allocation5 + $0x2b58] ss:$44 sps:$4 sm:$0xff]  }
 0x26c   :  { %13672 = vmatprep.subr.bf16.mxu0 %v20979_v25  ;;  %v21037_v25 = vld [vmem:[#allocation5 + $0x3650] ss:$44 sps:$4 sm:$0xff]  }
 0x26e   :  { %14083 = vmatpush1.bf16.msra.mxu1 %v20980_v30  ;;  %v21048_v30 = vld [vmem:[#allocation5 + $0x2bb4] ss:$44 sps:$4 sm:$0xff]  }
 0x26f   :  { %13673 = vmatpush1.bf16.msra.mxu0 %v20977_v29  ;;  %14084 = vmatprep.subr.bf16.mxu1 %v20988_v19  ;;  %v21045_v29 = vld [vmem:[#allocation5 + $0x36ac] ss:$44 sps:$4 sm:$0xff]   ;;  %v21046_v19 = vld [vmem:[#allocation5 + $0x2bb0] ss:$44 sps:$4 sm:$0xff]  }
 0x270   :  { %13674 = vmatprep.subr.bf16.mxu0 %v20985_v32  ;;  %v21043_v32 = vld [vmem:[#allocation5 + $0x36a8] ss:$44 sps:$4 sm:$0xff]  }
 0x272   :  { %14085 = vmatpush1.bf16.msra.mxu1 %v20986_v35  ;;  %v21055_v35 = vld [vmem:[#allocation5 + $0x2c0c] ss:$44 sps:$4 sm:$0xff]  }
 0x273   :  { %13675 = vmatpush1.bf16.msra.mxu0 %v20983_v33  ;;  %14086 = vmatprep.subr.bf16.mxu1 %v20994_v41  ;;  %v21052_v33 = vld [vmem:[#allocation5 + $0x3704] ss:$44 sps:$4 sm:$0xff]   ;;  %v21053_v41 = vld [vmem:[#allocation5 + $0x2c08] ss:$44 sps:$4 sm:$0xff]  }
 0x274   :  { %13676 = vmatprep.subr.bf16.mxu0 %v20991_v40  ;;  %v21050_v40 = vld [vmem:[#allocation5 + $0x3700] ss:$44 sps:$4 sm:$0xff]  }
 0x276   :  { %14087 = vmatpush1.bf16.msra.mxu1 %v20992_v43  ;;  %v23769_v43 = vld [vmem:[#allocation2 + $0x50] sm:$0xff] }
 0x277   :  { %13677 = vmatpush1.bf16.msra.mxu0 %v20989_v42  ;;  %14088 = vmatprep.subr.bf16.mxu1 %v21000_v45  ;;  %v23767_v42 = vcombine.low %v23751_v0, %v23751_v0  ;;  %v21062_v45 = vld [vmem:[#allocation5 + $0x2c64] ss:$44 sps:$4 sm:$0xff]  }
 0x278   :  { %13678 = vmatprep.subr.bf16.mxu0 %v20997_v8  ;;  %v21059_v8 = vld [vmem:[#allocation5 + $0x375c] ss:$44 sps:$4 sm:$0xff]   ;;  %v21057_v0 = vld [vmem:[#allocation5 + $0x3758] ss:$44 sps:$4 sm:$0xff]  }
 0x27a   :  { %14089 = vmatpush1.bf16.msra.mxu1 %v20998_v48  ;;  %v21060_v48 = vld [vmem:[#allocation5 + $0x2c60] ss:$44 sps:$4 sm:$0xff]  }
 0x27b   :  { %13679 = vmatpush1.bf16.msra.mxu0 %v20995_v46  ;;  %14090 = vmatprep.subr.bf16.mxu1 %v21006_v50  ;;  %v23773_v46 = vcombine.high %v23769_v43, %v23769_v43  ;;  %v21068_v50 = vld [vmem:[#allocation5 + $0x2cbc] ss:$44 sps:$4 sm:$0xff]  }
 0x27c   :  { %13680 = vmatprep.subr.bf16.mxu0 %v21003_v49  ;;  %v21065_v49 = vld [vmem:[#allocation5 + $0x37b4] ss:$44 sps:$4 sm:$0xff]  }
 0x27e   :  { %14091 = vmatpush1.bf16.msra.mxu1 %v21004_v53  ;;  %v21066_v53 = vld [vmem:[#allocation5 + $0x2cb8] ss:$44 sps:$4 sm:$0xff]  }
 0x27f   :  { %13681 = vmatpush1.bf16.msra.mxu0 %v21001_v52  ;;  %14092 = vmatprep.subr.bf16.mxu1 %v21012_v57  ;;  %v21063_v52 = vld [vmem:[#allocation5 + $0x37b0] ss:$44 sps:$4 sm:$0xff]   ;;  %v21074_v57 = vld [vmem:[#allocation5 + $0x2d14] ss:$44 sps:$4 sm:$0xff]  }
 0x280   :  { %13682 = vmatprep.subr.bf16.mxu0 %v21009_v56  ;;  %v21071_v56 = vld [vmem:[#allocation5 + $0x380c] ss:$44 sps:$4 sm:$0xff]  }
 0x282   :  { %14093 = vmatpush1.bf16.msra.mxu1 %v21010_v59  ;;  %v21072_v59 = vld [vmem:[#allocation5 + $0x2d10] ss:$44 sps:$4 sm:$0xff]  }
 0x283   :  { %13683 = vmatpush1.bf16.msra.mxu0 %v21007_v58  ;;  %14094 = vmatprep.subr.bf16.mxu1 %v21018_v61  ;;  %v21069_v58 = vld [vmem:[#allocation5 + $0x3808] ss:$44 sps:$4 sm:$0xff]   ;;  %v21080_v61 = vld [vmem:[#allocation5 + $0x2d6c] ss:$44 sps:$4 sm:$0xff]  }
 0x284   :  { %13684 = vmatprep.subr.bf16.mxu0 %v21015_v39  ;;  %v21077_v39 = vld [vmem:[#allocation5 + $0x3864] ss:$44 sps:$4 sm:$0xff]  }
 0x286   :  { %14095 = vmatpush1.bf16.msra.mxu1 %v21016_v63  ;;  %v21078_v63 = vld [vmem:[#allocation5 + $0x2d68] ss:$44 sps:$4 sm:$0xff]  }
 0x287   :  { %13685 = vmatpush1.bf16.msra.mxu0 %v21013_v62  ;;  %14096 = vmatprep.subr.bf16.mxu1 %v21024_v3  ;;  %v21075_v62 = vld [vmem:[#allocation5 + $0x3860] ss:$44 sps:$4 sm:$0xff]   ;;  %v21086_v3 = vld [vmem:[#allocation5 + $0x2dc4] ss:$44 sps:$4 sm:$0xff]  }
 0x288   :  { %13686 = vmatprep.subr.bf16.mxu0 %v21021_v2  ;;  %v21083_v2 = vld [vmem:[#allocation5 + $0x38bc] ss:$44 sps:$4 sm:$0xff]  }
 0x28a   :  { %14097 = vmatpush1.bf16.msra.mxu1 %v21022_v5  ;;  %v21084_v5 = vld [vmem:[#allocation5 + $0x2dc0] ss:$44 sps:$4 sm:$0xff]  }
 0x28b   :  { %13687 = vmatpush1.bf16.msra.mxu0 %v21019_v4  ;;  %14098 = vmatprep.subr.bf16.mxu1 %v21030_v11  ;;  %v21081_v4 = vld [vmem:[#allocation5 + $0x38b8] ss:$44 sps:$4 sm:$0xff]   ;;  %v21092_v11 = vld [vmem:[#allocation5 + $0x2e1c] ss:$44 sps:$4 sm:$0xff]  }
 0x28c   :  { %13688 = vmatprep.subr.bf16.mxu0 %v21027_v36  ;;  %v21089_v36 = vld [vmem:[#allocation5 + $0x3914] ss:$44 sps:$4 sm:$0xff]  }
 0x28e   :  { %14099 = vmatpush1.bf16.msra.mxu1 %v21028_v54  ;;  %v21090_v54 = vld [vmem:[#allocation5 + $0x2e18] ss:$44 sps:$4 sm:$0xff]  }
 0x28f   :  { %13689 = vmatpush1.bf16.msra.mxu0 %v21025_v13  ;;  %14100 = vmatprep.subr.bf16.mxu1 %v21036_v18  ;;  %v21087_v13 = vld [vmem:[#allocation5 + $0x3910] ss:$44 sps:$4 sm:$0xff]   ;;  %v21098_v18 = vld [vmem:[#allocation5 + $0x2e74] ss:$44 sps:$4 sm:$0xff]  }
 0x290   :  { %13690 = vmatprep.subr.bf16.mxu0 %v21033_v17  ;;  %v21095_v17 = vld [vmem:[#allocation5 + $0x396c] ss:$44 sps:$4 sm:$0xff]  }
 0x292   :  { %14101 = vmatpush1.bf16.msra.mxu1 %v21034_v22  ;;  %v21096_v22 = vld [vmem:[#allocation5 + $0x2e70] ss:$44 sps:$4 sm:$0xff]  }
 0x293   :  { %13691 = vmatpush1.bf16.msra.mxu0 %v21031_v21  ;;  %14102 = vmatprep.subr.bf16.mxu1 %v21042_v24  ;;  %v21093_v21 = vld [vmem:[#allocation5 + $0x3968] ss:$44 sps:$4 sm:$0xff]   ;;  %v21104_v24 = vld [vmem:[#allocation5 + $0x2ecc] ss:$44 sps:$4 sm:$0xff]  }
 0x294   :  { %13692 = vmatprep.subr.bf16.mxu0 %v21039_v23  ;;  %v21101_v23 = vld [vmem:[#allocation5 + $0x39c4] ss:$44 sps:$4 sm:$0xff]  }
 0x296   :  { %14103 = vmatpush1.bf16.msra.mxu1 %v21040_v28  ;;  %v21102_v28 = vld [vmem:[#allocation5 + $0x2ec8] ss:$44 sps:$4 sm:$0xff]  }
 0x297   :  { %13693 = vmatpush1.bf16.msra.mxu0 %v21037_v25  ;;  %14104 = vmatprep.subr.bf16.mxu1 %v21048_v30  ;;  %v21099_v25 = vld [vmem:[#allocation5 + $0x39c0] ss:$44 sps:$4 sm:$0xff]   ;;  %v21110_v30 = vld [vmem:[#allocation5 + $0x2f24] ss:$44 sps:$4 sm:$0xff]  }
 0x298   :  { %13694 = vmatprep.subr.bf16.mxu0 %v21045_v29  ;;  %v21107_v29 = vld [vmem:[#allocation5 + $0x3a1c] ss:$44 sps:$4 sm:$0xff]  }
 0x29a   :  { %14105 = vmatpush1.bf16.msra.mxu1 %v21046_v19  ;;  %v21108_v19 = vld [vmem:[#allocation5 + $0x2f20] ss:$44 sps:$4 sm:$0xff]  }
 0x29b   :  { %13695 = vmatpush1.bf16.msra.mxu0 %v21043_v32  ;;  %14115 = vmatprep.subr.bf16.mxu1 %v21055_v35  ;;  %v21105_v32 = vld [vmem:[#allocation5 + $0x3a18] ss:$44 sps:$4 sm:$0xff]   ;;  %v21116_v35 = vld [vmem:[#allocation5 + $0x2f7c] ss:$44 sps:$4 sm:$0xff]  }
 0x29c   :  { %13705 = vmatprep.subr.bf16.mxu0 %v21052_v33  ;;  %v21113_v33 = vld [vmem:[#allocation5 + $0x3a74] ss:$44 sps:$4 sm:$0xff]  }
 0x29d   :  { %14107 = vmatmul.mubr.bf16.vlgmr.msra.gmra.mrb[4].mxu1 %v23741_v37 }
 0x29e   :  { %13697 = vmatmul.mubr.bf16.vlgmr.msra.gmra.mrb[0].mxu0 %v23767_v42  ;;  %14116 = vmatpush1.bf16.msra.mxu1 %v21053_v41  ;;  %v21114_v41 = vld [vmem:[#allocation5 + $0x2f78] ss:$44 sps:$4 sm:$0xff]  }
 0x29f   :  { %13706 = vmatpush1.bf16.msra.mxu0 %v21050_v40  ;;  %14117 = vmatprep.subr.bf16.mxu1 %v21062_v45  ;;  %v21111_v40 = vld [vmem:[#allocation5 + $0x3a70] ss:$44 sps:$4 sm:$0xff]   ;;  %v21122_v45 = vld [vmem:[#allocation5 + $0x2fd4] ss:$44 sps:$4 sm:$0xff]  }
 0x2a0   :  { %13707 = vmatprep.subr.bf16.mxu0 %v21059_v8  ;;  %13737 = vmatprep.mubr.bf16.mxu0 %v23773_v46  ;;  %v21119_v8 = vld [vmem:[#allocation5 + $0x3acc] ss:$44 sps:$4 sm:$0xff]  }
 0x2a1   :  { %14147 = vmatprep.mubr.bf16.mxu1 %v23745_v27 }
 0x2a2   :  { %14118 = vmatpush1.bf16.msra.mxu1 %v21060_v48  ;;  %v21120_v48 = vld [vmem:[#allocation5 + $0x2fd0] ss:$44 sps:$4 sm:$0xff]  }
 0x2a3   :  { %13708 = vmatpush1.bf16.msra.mxu0 %v21057_v0  ;;  %14119 = vmatprep.subr.bf16.mxu1 %v21068_v50  ;;  %v21117_v0 = vld [vmem:[#allocation5 + $0x3ac8] ss:$44 sps:$4 sm:$0xff]   ;;  %v21128_v50 = vld [vmem:[#allocation5 + $0x302c] ss:$44 sps:$4 sm:$0xff]  }
 0x2a4   :  { %13709 = vmatprep.subr.bf16.mxu0 %v21065_v49  ;;  %v21125_v49 = vld [vmem:[#allocation5 + $0x3b24] ss:$44 sps:$4 sm:$0xff]  }
 0x2a6   :  { %14120 = vmatpush1.bf16.msra.mxu1 %v21066_v53  ;;  %v21126_v53 = vld [vmem:[#allocation5 + $0x3028] ss:$44 sps:$4 sm:$0xff]  }
 0x2a7   :  { %13710 = vmatpush1.bf16.msra.mxu0 %v21063_v52  ;;  %14121 = vmatprep.subr.bf16.mxu1 %v21074_v57  ;;  %v21123_v52 = vld [vmem:[#allocation5 + $0x3b20] ss:$44 sps:$4 sm:$0xff]   ;;  %v21134_v57 = vld [vmem:[#allocation5 + $0x3084] ss:$44 sps:$4 sm:$0xff]  }
 0x2a8   :  { %13711 = vmatprep.subr.bf16.mxu0 %v21071_v56  ;;  %v21131_v56 = vld [vmem:[#allocation5 + $0x3b7c] ss:$44 sps:$4 sm:$0xff]  }
 0x2aa   :  { %14122 = vmatpush1.bf16.msra.mxu1 %v21072_v59  ;;  %v21132_v59 = vld [vmem:[#allocation5 + $0x3080] ss:$44 sps:$4 sm:$0xff]  }
 0x2ab   :  { %13712 = vmatpush1.bf16.msra.mxu0 %v21069_v58  ;;  %14123 = vmatprep.subr.bf16.mxu1 %v21080_v61  ;;  %v21129_v58 = vld [vmem:[#allocation5 + $0x3b78] ss:$44 sps:$4 sm:$0xff]   ;;  %v21140_v61 = vld [vmem:[#allocation5 + $0x30dc] ss:$44 sps:$4 sm:$0xff]  }
 0x2ac   :  { %13713 = vmatprep.subr.bf16.mxu0 %v21077_v39  ;;  %v21137_v39 = vld [vmem:[#allocation5 + $0x3bd4] ss:$44 sps:$4 sm:$0xff]  }
 0x2ae   :  { %14124 = vmatpush1.bf16.msra.mxu1 %v21078_v63  ;;  %v21138_v63 = vld [vmem:[#allocation5 + $0x30d8] ss:$44 sps:$4 sm:$0xff]  }
 0x2af   :  { %13714 = vmatpush1.bf16.msra.mxu0 %v21075_v62  ;;  %14125 = vmatprep.subr.bf16.mxu1 %v21086_v3  ;;  %v21135_v62 = vld [vmem:[#allocation5 + $0x3bd0] ss:$44 sps:$4 sm:$0xff]   ;;  %v21146_v3 = vld [vmem:[#allocation5 + $0x3134] ss:$44 sps:$4 sm:$0xff]  }
 0x2b0   :  { %13715 = vmatprep.subr.bf16.mxu0 %v21083_v2  ;;  %v21143_v2 = vld [vmem:[#allocation5 + $0x3c2c] ss:$44 sps:$4 sm:$0xff]  }
 0x2b2   :  { %14126 = vmatpush1.bf16.msra.mxu1 %v21084_v5  ;;  %v21144_v5 = vld [vmem:[#allocation5 + $0x3130] ss:$44 sps:$4 sm:$0xff]  }
 0x2b3   :  { %13716 = vmatpush1.bf16.msra.mxu0 %v21081_v4  ;;  %14127 = vmatprep.subr.bf16.mxu1 %v21092_v11  ;;  %v21141_v4 = vld [vmem:[#allocation5 + $0x3c28] ss:$44 sps:$4 sm:$0xff]   ;;  %v21153_v11 = vld [vmem:[#allocation5 + $0x318c] ss:$44 sps:$4 sm:$0xff]  }
 0x2b4   :  { %13717 = vmatprep.subr.bf16.mxu0 %v21089_v36  ;;  %v21150_v36 = vld [vmem:[#allocation5 + $0x3c84] ss:$44 sps:$4 sm:$0xff]  }
 0x2b6   :  { %14128 = vmatpush1.bf16.msra.mxu1 %v21090_v54  ;;  %v23783_v54 = vcombine.low %v23769_v43, %v23769_v43  ;;  %v21155_v43 = vld [vmem:[#allocation5 + $0x3cd8] ss:$44 sps:$4 sm:$0xff]  }
 0x2b7   :  { %13718 = vmatpush1.bf16.msra.mxu0 %v21087_v13  ;;  %14129 = vmatprep.subr.bf16.mxu1 %v21098_v18  ;;  %v23779_v13 = vld [vmem:[#allocation2 + $0x58] sm:$0xff]  ;;  %v21151_v18 = vld [vmem:[#allocation5 + $0x3188] ss:$44 sps:$4 sm:$0xff]  }
 0x2b8   :  { %13719 = vmatprep.subr.bf16.mxu0 %v21095_v17  ;;  %v21148_v17 = vld [vmem:[#allocation5 + $0x3c80] ss:$44 sps:$4 sm:$0xff]  }
 0x2ba   :  { %14130 = vmatpush1.bf16.msra.mxu1 %v21096_v22  ;;  %v21160_v22 = vld [vmem:[#allocation5 + $0x31e4] ss:$44 sps:$4 sm:$0xff]  }
 0x2bb   :  { %13720 = vmatpush1.bf16.msra.mxu0 %v21093_v21  ;;  %14131 = vmatprep.subr.bf16.mxu1 %v21104_v24  ;;  %v21157_v21 = vld [vmem:[#allocation5 + $0x3cdc] ss:$44 sps:$4 sm:$0xff]   ;;  %v21158_v24 = vld [vmem:[#allocation5 + $0x31e0] ss:$44 sps:$4 sm:$0xff]  }
 0x2bc   :  { %13721 = vmatprep.subr.bf16.mxu0 %v21101_v23  ;;  %v23787_v23 = vcombine.high %v23779_v13, %v23779_v13 }
 0x2be   :  { %14132 = vmatpush1.bf16.msra.mxu1 %v21102_v28  ;;  %v21166_v28 = vld [vmem:[#allocation5 + $0x323c] ss:$44 sps:$4 sm:$0xff]  }
 0x2bf   :  { %13722 = vmatpush1.bf16.msra.mxu0 %v21099_v25  ;;  %14133 = vmatprep.subr.bf16.mxu1 %v21110_v30  ;;  %v21163_v25 = vld [vmem:[#allocation5 + $0x3d34] ss:$44 sps:$4 sm:$0xff]   ;;  %v21164_v30 = vld [vmem:[#allocation5 + $0x3238] ss:$44 sps:$4 sm:$0xff]  }
 0x2c0   :  { %13723 = vmatprep.subr.bf16.mxu0 %v21107_v29  ;;  %v21161_v29 = vld [vmem:[#allocation5 + $0x3d30] ss:$44 sps:$4 sm:$0xff]  }
 0x2c2   :  { %14134 = vmatpush1.bf16.msra.mxu1 %v21108_v19  ;;  %v21172_v19 = vld [vmem:[#allocation5 + $0x3294] ss:$44 sps:$4 sm:$0xff]  }
 0x2c3   :  { %13724 = vmatpush1.bf16.msra.mxu0 %v21105_v32  ;;  %14135 = vmatprep.subr.bf16.mxu1 %v21116_v35  ;;  %v21169_v32 = vld [vmem:[#allocation5 + $0x3d8c] ss:$44 sps:$4 sm:$0xff]   ;;  %v21170_v35 = vld [vmem:[#allocation5 + $0x3290] ss:$44 sps:$4 sm:$0xff]  }
 0x2c4   :  { %13725 = vmatprep.subr.bf16.mxu0 %v21113_v33  ;;  %v21167_v33 = vld [vmem:[#allocation5 + $0x3d88] ss:$44 sps:$4 sm:$0xff]  }
 0x2c6   :  { %14136 = vmatpush1.bf16.msra.mxu1 %v21114_v41  ;;  %v21178_v41 = vld [vmem:[#allocation5 + $0x32ec] ss:$44 sps:$4 sm:$0xff]  }
 0x2c7   :  { %13726 = vmatpush1.bf16.msra.mxu0 %v21111_v40  ;;  %14137 = vmatprep.subr.bf16.mxu1 %v21122_v45  ;;  %v21175_v40 = vld [vmem:[#allocation5 + $0x3de4] ss:$44 sps:$4 sm:$0xff]   ;;  %v21176_v45 = vld [vmem:[#allocation5 + $0x32e8] ss:$44 sps:$4 sm:$0xff]  }
 0x2c8   :  { %13727 = vmatprep.subr.bf16.mxu0 %v21119_v8  ;;  %v21173_v8 = vld [vmem:[#allocation5 + $0x3de0] ss:$44 sps:$4 sm:$0xff]  }
 0x2ca   :  { %14138 = vmatpush1.bf16.msra.mxu1 %v21120_v48  ;;  %v21184_v48 = vld [vmem:[#allocation5 + $0x3344] ss:$44 sps:$4 sm:$0xff]  }
 0x2cb   :  { %13728 = vmatpush1.bf16.msra.mxu0 %v21117_v0  ;;  %14139 = vmatprep.subr.bf16.mxu1 %v21128_v50  ;;  %v21181_v0 = vld [vmem:[#allocation5 + $0x3e3c] ss:$44 sps:$4 sm:$0xff]   ;;  %v21182_v50 = vld [vmem:[#allocation5 + $0x3340] ss:$44 sps:$4 sm:$0xff]  }
 0x2cc   :  { %13729 = vmatprep.subr.bf16.mxu0 %v21125_v49  ;;  %v21179_v49 = vld [vmem:[#allocation5 + $0x3e38] ss:$44 sps:$4 sm:$0xff]  }
 0x2ce   :  { %14140 = vmatpush1.bf16.msra.mxu1 %v21126_v53  ;;  %v21190_v53 = vld [vmem:[#allocation5 + $0x339c] ss:$44 sps:$4 sm:$0xff]  }
 0x2cf   :  { %13730 = vmatpush1.bf16.msra.mxu0 %v21123_v52  ;;  %14141 = vmatprep.subr.bf16.mxu1 %v21134_v57  ;;  %v21187_v52 = vld [vmem:[#allocation5 + $0x3e94] ss:$44 sps:$4 sm:$0xff]   ;;  %v21188_v57 = vld [vmem:[#allocation5 + $0x3398] ss:$44 sps:$4 sm:$0xff]  }
 0x2d0   :  { %13731 = vmatprep.subr.bf16.mxu0 %v21131_v56  ;;  %v21185_v56 = vld [vmem:[#allocation5 + $0x3e90] ss:$44 sps:$4 sm:$0xff]  }
 0x2d2   :  { %14142 = vmatpush1.bf16.msra.mxu1 %v21132_v59  ;;  %v21196_v59 = vld [vmem:[#allocation5 + $0x33f4] ss:$44 sps:$4 sm:$0xff]  }
 0x2d3   :  { %13732 = vmatpush1.bf16.msra.mxu0 %v21129_v58  ;;  %14143 = vmatprep.subr.bf16.mxu1 %v21140_v61  ;;  %v21193_v58 = vld [vmem:[#allocation5 + $0x3eec] ss:$44 sps:$4 sm:$0xff]   ;;  %v21194_v61 = vld [vmem:[#allocation5 + $0x33f0] ss:$44 sps:$4 sm:$0xff]  }
 0x2d4   :  { %13733 = vmatprep.subr.bf16.mxu0 %v21137_v39  ;;  %v21191_v39 = vld [vmem:[#allocation5 + $0x3ee8] ss:$44 sps:$4 sm:$0xff]  }
 0x2d6   :  { %14144 = vmatpush1.bf16.msra.mxu1 %v21138_v63  ;;  %v21202_v63 = vld [vmem:[#allocation5 + $0x344c] ss:$44 sps:$4 sm:$0xff]  }
 0x2d7   :  { %13734 = vmatpush1.bf16.msra.mxu0 %v21135_v62  ;;  %14145 = vmatprep.subr.bf16.mxu1 %v21146_v3  ;;  %v21199_v62 = vld [vmem:[#allocation5 + $0x3f44] ss:$44 sps:$4 sm:$0xff]   ;;  %v21200_v3 = vld [vmem:[#allocation5 + $0x3448] ss:$44 sps:$4 sm:$0xff]  }
 0x2d8   :  { %13735 = vmatprep.subr.bf16.mxu0 %v21143_v2  ;;  %v21197_v2 = vld [vmem:[#allocation5 + $0x3f40] ss:$44 sps:$4 sm:$0xff]  }
 0x2da   :  { %14146 = vmatpush1.bf16.msra.mxu1 %v21144_v5  ;;  %v21208_v5 = vld [vmem:[#allocation5 + $0x34a4] ss:$44 sps:$4 sm:$0xff]  }
 0x2db   :  { %13736 = vmatpush1.bf16.msra.mxu0 %v21141_v4  ;;  %14156 = vmatprep.subr.bf16.mxu1 %v21153_v11  ;;  %v21205_v4 = vld [vmem:[#allocation5 + $0x3f9c] ss:$44 sps:$4 sm:$0xff]   ;;  %v21206_v11 = vld [vmem:[#allocation5 + $0x34a0] ss:$44 sps:$4 sm:$0xff]  }
 0x2dc   :  { %13746 = vmatprep.subr.bf16.mxu0 %v21150_v36  ;;  %v21203_v36 = vld [vmem:[#allocation5 + $0x3f98] ss:$44 sps:$4 sm:$0xff]  }
 0x2dd   :  { %14148 = vmatmul.mubr.bf16.vlgmr.msra.gmra.mrb[4].mxu1 %v23755_v1 }
 0x2de   :  { %13738 = vmatmul.mubr.bf16.vlgmr.msra.gmra.mrb[0].mxu0 %v23783_v54  ;;  %14157 = vmatpush1.bf16.msra.mxu1 %v21151_v18  ;;  %v21214_v18 = vld [vmem:[#allocation5 + $0x34fc] ss:$44 sps:$4 sm:$0xff]  }
 0x2df   :  { %13747 = vmatpush1.bf16.msra.mxu0 %v21148_v17  ;;  %14158 = vmatprep.subr.bf16.mxu1 %v21160_v22  ;;  %v21211_v17 = vld [vmem:[#allocation5 + $0x3ff4] ss:$44 sps:$4 sm:$0xff]   ;;  %v21212_v22 = vld [vmem:[#allocation5 + $0x34f8] ss:$44 sps:$4 sm:$0xff]  }
 0x2e0   :  { %13748 = vmatprep.subr.bf16.mxu0 %v21157_v21  ;;  %13778 = vmatprep.mubr.bf16.mxu0 %v23787_v23  ;;  %v21209_v21 = vld [vmem:[#allocation5 + $0x3ff0] ss:$44 sps:$4 sm:$0xff]  }
 0x2e1   :  { %14188 = vmatprep.mubr.bf16.mxu1 %v23759_v10 }
 0x2e2   :  { %14159 = vmatpush1.bf16.msra.mxu1 %v21158_v24  ;;  %v21220_v24 = vld [vmem:[#allocation5 + $0x3554] ss:$44 sps:$4 sm:$0xff]  }
 0x2e3   :  { %13749 = vmatpush1.bf16.msra.mxu0 %v21155_v43  ;;  %14160 = vmatprep.subr.bf16.mxu1 %v21166_v28  ;;  %v21217_v43 = vld [vmem:[#allocation5 + $0x404c] ss:$44 sps:$4 sm:$0xff]   ;;  %v21218_v28 = vld [vmem:[#allocation5 + $0x3550] ss:$44 sps:$4 sm:$0xff]  }
 0x2e4   :  { %13750 = vmatprep.subr.bf16.mxu0 %v21163_v25  ;;  %v21215_v25 = vld [vmem:[#allocation5 + $0x4048] ss:$44 sps:$4 sm:$0xff]  }
 0x2e6   :  { %14161 = vmatpush1.bf16.msra.mxu1 %v21164_v30  ;;  %v21226_v30 = vld [vmem:[#allocation5 + $0x35ac] ss:$44 sps:$4 sm:$0xff]  }
 0x2e7   :  { %13751 = vmatpush1.bf16.msra.mxu0 %v21161_v29  ;;  %14162 = vmatprep.subr.bf16.mxu1 %v21172_v19  ;;  %v21223_v29 = vld [vmem:[#allocation5 + $0x40a4] ss:$44 sps:$4 sm:$0xff]   ;;  %v21224_v19 = vld [vmem:[#allocation5 + $0x35a8] ss:$44 sps:$4 sm:$0xff]  }
 0x2e8   :  { %13752 = vmatprep.subr.bf16.mxu0 %v21169_v32  ;;  %v21221_v32 = vld [vmem:[#allocation5 + $0x40a0] ss:$44 sps:$4 sm:$0xff]  }
 0x2ea   :  { %14163 = vmatpush1.bf16.msra.mxu1 %v21170_v35  ;;  %v21232_v35 = vld [vmem:[#allocation5 + $0x3604] ss:$44 sps:$4 sm:$0xff]  }
 0x2eb   :  { %13753 = vmatpush1.bf16.msra.mxu0 %v21167_v33  ;;  %14164 = vmatprep.subr.bf16.mxu1 %v21178_v41  ;;  %v21229_v33 = vld [vmem:[#allocation5 + $0x40fc] ss:$44 sps:$4 sm:$0xff]   ;;  %v21230_v41 = vld [vmem:[#allocation5 + $0x3600] ss:$44 sps:$4 sm:$0xff]  }
 0x2ec   :  { %13754 = vmatprep.subr.bf16.mxu0 %v21175_v40  ;;  %v21227_v40 = vld [vmem:[#allocation5 + $0x40f8] ss:$44 sps:$4 sm:$0xff]  }
 0x2ee   :  { %14165 = vmatpush1.bf16.msra.mxu1 %v21176_v45  ;;  %v21238_v45 = vld [vmem:[#allocation5 + $0x365c] ss:$44 sps:$4 sm:$0xff]  }
 0x2ef   :  { %13755 = vmatpush1.bf16.msra.mxu0 %v21173_v8  ;;  %14166 = vmatprep.subr.bf16.mxu1 %v21184_v48  ;;  %v21235_v8 = vld [vmem:[#allocation5 + $0x4154] ss:$44 sps:$4 sm:$0xff]   ;;  %v21236_v48 = vld [vmem:[#allocation5 + $0x3658] ss:$44 sps:$4 sm:$0xff]  }
 0x2f0   :  { %13756 = vmatprep.subr.bf16.mxu0 %v21181_v0  ;;  %v21233_v0 = vld [vmem:[#allocation5 + $0x4150] ss:$44 sps:$4 sm:$0xff]  }
 0x2f2   :  { %14167 = vmatpush1.bf16.msra.mxu1 %v21182_v50  ;;  %v21244_v50 = vld [vmem:[#allocation5 + $0x36b4] ss:$44 sps:$4 sm:$0xff]  }
 0x2f3   :  { %13757 = vmatpush1.bf16.msra.mxu0 %v21179_v49  ;;  %14168 = vmatprep.subr.bf16.mxu1 %v21190_v53  ;;  %v21241_v49 = vld [vmem:[#allocation5 + $0x41ac] ss:$44 sps:$4 sm:$0xff]   ;;  %v21242_v53 = vld [vmem:[#allocation5 + $0x36b0] ss:$44 sps:$4 sm:$0xff]  }
 0x2f4   :  { %13758 = vmatprep.subr.bf16.mxu0 %v21187_v52  ;;  %v21239_v52 = vld [vmem:[#allocation5 + $0x41a8] ss:$44 sps:$4 sm:$0xff]  }
 0x2f6   :  { %14169 = vmatpush1.bf16.msra.mxu1 %v21188_v57  ;;  %v21252_v57 = vld [vmem:[#allocation5 + $0x14] ss:$44 sps:$4 sm:$0xff]  }
 0x2f7   :  { %13759 = vmatpush1.bf16.msra.mxu0 %v21185_v56  ;;  %14170 = vmatprep.subr.bf16.mxu1 %v21196_v59  ;;  %v21249_v56 = vld [vmem:[#allocation5 + $0x370c] ss:$44 sps:$4 sm:$0xff]   ;;  %v21250_v59 = vld [vmem:[#allocation5 + $0x10] ss:$44 sps:$4 sm:$0xff]  }
 0x2f8   :  { %13760 = vmatprep.subr.bf16.mxu0 %v21193_v58  ;;  %v21247_v58 = vld [vmem:[#allocation5 + $0x3708] ss:$44 sps:$4 sm:$0xff]  }
 0x2fa   :  { %14171 = vmatpush1.bf16.msra.mxu1 %v21194_v61  ;;  %v21255_v61 = vld [vmem:[#allocation5 + $0x3764] ss:$44 sps:$4 sm:$0xff]  }
 0x2fb   :  { %13761 = vmatpush1.bf16.msra.mxu0 %v21191_v39  ;;  %14172 = vmatprep.subr.bf16.mxu1 %v21202_v63  ;;  %v23795_v39 = vcombine.low %v23779_v13, %v23779_v13  ;;  %v21253_v63 = vld [vmem:[#allocation5 + $0x3760] ss:$44 sps:$4 sm:$0xff]   ;;  %v21259_v13 = vld [vmem:[#allocation5 + $0x37b8] ss:$44 sps:$4 sm:$0xff]  }
 0x2fc   :  { %13762 = vmatprep.subr.bf16.mxu0 %v21199_v62  ;;  %v21258_v62 = vld [vmem:[#allocation5 + $0x6c] ss:$44 sps:$4 sm:$0xff]  }
 0x2fe   :  { %14173 = vmatpush1.bf16.msra.mxu1 %v21200_v3  ;;  %v21261_v3 = vld [vmem:[#allocation5 + $0x37bc] ss:$44 sps:$4 sm:$0xff]  }
 0x2ff   :  { %13763 = vmatpush1.bf16.msra.mxu0 %v21197_v2  ;;  %14174 = vmatprep.subr.bf16.mxu1 %v21208_v5  ;;  %v21256_v2 = vld [vmem:[#allocation5 + $0x68] ss:$44 sps:$4 sm:$0xff]   ;;  %v21262_v5 = vld [vmem:[#allocation5 + $0xc0] ss:$44 sps:$4 sm:$0xff]  }
 0x300   :  { %13764 = vmatprep.subr.bf16.mxu0 %v21205_v4  ;;  %v21264_v4 = vld [vmem:[#allocation5 + $0xc4] ss:$44 sps:$4 sm:$0xff]  }
 0x302   :  { %14175 = vmatpush1.bf16.msra.mxu1 %v21206_v11  ;;  %v21270_v11 = vld [vmem:[#allocation5 + $0x11c] ss:$44 sps:$4 sm:$0xff]  }
 0x303   :  { %13765 = vmatpush1.bf16.msra.mxu0 %v21203_v36  ;;  %14176 = vmatprep.subr.bf16.mxu1 %v21214_v18  ;;  %v21267_v36 = vld [vmem:[#allocation5 + $0x3814] ss:$44 sps:$4 sm:$0xff]   ;;  %v21268_v18 = vld [vmem:[#allocation5 + $0x118] ss:$44 sps:$4 sm:$0xff]  }
 0x304   :  { %13766 = vmatprep.subr.bf16.mxu0 %v21211_v17  ;;  %v21265_v17 = vld [vmem:[#allocation5 + $0x3810] ss:$44 sps:$4 sm:$0xff]  }
 0x306   :  { %14177 = vmatpush1.bf16.msra.mxu1 %v21212_v22  ;;  %v21276_v22 = vld [vmem:[#allocation5 + $0x174] ss:$44 sps:$4 sm:$0xff]  }
 0x307   :  { %13767 = vmatpush1.bf16.msra.mxu0 %v21209_v21  ;;  %14178 = vmatprep.subr.bf16.mxu1 %v21220_v24  ;;  %v21273_v21 = vld [vmem:[#allocation5 + $0x386c] ss:$44 sps:$4 sm:$0xff]   ;;  %v21274_v24 = vld [vmem:[#allocation5 + $0x170] ss:$44 sps:$4 sm:$0xff]  }
 0x308   :  { %13768 = vmatprep.subr.bf16.mxu0 %v21217_v43  ;;  %v21271_v43 = vld [vmem:[#allocation5 + $0x3868] ss:$44 sps:$4 sm:$0xff]  }
 0x30a   :  { %14179 = vmatpush1.bf16.msra.mxu1 %v21218_v28  ;;  %v21282_v28 = vld [vmem:[#allocation5 + $0x1cc] ss:$44 sps:$4 sm:$0xff]  }
 0x30b   :  { %13769 = vmatpush1.bf16.msra.mxu0 %v21215_v25  ;;  %14180 = vmatprep.subr.bf16.mxu1 %v21226_v30  ;;  %v21279_v25 = vld [vmem:[#allocation5 + $0x38c4] ss:$44 sps:$4 sm:$0xff]   ;;  %v21280_v30 = vld [vmem:[#allocation5 + $0x1c8] ss:$44 sps:$4 sm:$0xff]  }
 0x30c   :  { %13770 = vmatprep.subr.bf16.mxu0 %v21223_v29  ;;  %v21277_v29 = vld [vmem:[#allocation5 + $0x38c0] ss:$44 sps:$4 sm:$0xff]  }
 0x30e   :  { %14181 = vmatpush1.bf16.msra.mxu1 %v21224_v19  ;;  %v21288_v19 = vld [vmem:[#allocation5 + $0x224] ss:$44 sps:$4 sm:$0xff]  }
 0x30f   :  { %13771 = vmatpush1.bf16.msra.mxu0 %v21221_v32  ;;  %14182 = vmatprep.subr.bf16.mxu1 %v21232_v35  ;;  %v21285_v32 = vld [vmem:[#allocation5 + $0x391c] ss:$44 sps:$4 sm:$0xff]   ;;  %v21286_v35 = vld [vmem:[#allocation5 + $0x220] ss:$44 sps:$4 sm:$0xff]  }
 0x310   :  { %13772 = vmatprep.subr.bf16.mxu0 %v21229_v33  ;;  %v21283_v33 = vld [vmem:[#allocation5 + $0x3918] ss:$44 sps:$4 sm:$0xff]  }
 0x312   :  { %14183 = vmatpush1.bf16.msra.mxu1 %v21230_v41  ;;  %v21294_v41 = vld [vmem:[#allocation5 + $0x27c] ss:$44 sps:$4 sm:$0xff]  }
 0x313   :  { %13773 = vmatpush1.bf16.msra.mxu0 %v21227_v40  ;;  %14184 = vmatprep.subr.bf16.mxu1 %v21238_v45  ;;  %v21291_v40 = vld [vmem:[#allocation5 + $0x3974] ss:$44 sps:$4 sm:$0xff]   ;;  %v21292_v45 = vld [vmem:[#allocation5 + $0x278] ss:$44 sps:$4 sm:$0xff]  }
 0x314   :  { %13774 = vmatprep.subr.bf16.mxu0 %v21235_v8  ;;  %v21289_v8 = vld [vmem:[#allocation5 + $0x3970] ss:$44 sps:$4 sm:$0xff]  }
 0x316   :  { %14185 = vmatpush1.bf16.msra.mxu1 %v21236_v48  ;;  %v21300_v48 = vld [vmem:[#allocation5 + $0x2d4] ss:$44 sps:$4 sm:$0xff]  }
 0x317   :  { %13775 = vmatpush1.bf16.msra.mxu0 %v21233_v0  ;;  %14186 = vmatprep.subr.bf16.mxu1 %v21244_v50  ;;  %v21297_v0 = vld [vmem:[#allocation5 + $0x39cc] ss:$44 sps:$4 sm:$0xff]   ;;  %v21298_v50 = vld [vmem:[#allocation5 + $0x2d0] ss:$44 sps:$4 sm:$0xff]  }
 0x318   :  { %13776 = vmatprep.subr.bf16.mxu0 %v21241_v49  ;;  %v21295_v49 = vld [vmem:[#allocation5 + $0x39c8] ss:$44 sps:$4 sm:$0xff]  }
 0x31a   :  { %14187 = vmatpush1.bf16.msra.mxu1 %v21242_v53  ;;  %v21306_v53 = vld [vmem:[#allocation5 + $0x32c] ss:$44 sps:$4 sm:$0xff]  }
 0x31b   :  { %13777 = vmatpush1.bf16.msra.mxu0 %v21239_v52  ;;  %14197 = vmatprep.subr.bf16.mxu1 %v21249_v56  ;;  %v21303_v52 = vld [vmem:[#allocation5 + $0x3a24] ss:$44 sps:$4 sm:$0xff]   ;;  %v21301_v56 = vld [vmem:[#allocation5 + $0x3a20] ss:$44 sps:$4 sm:$0xff]  }
 0x31c   :  { %14279 = vmatprep.subr.bf16.mxu0 %v21252_v57  ;;  %v21304_v57 = vld [vmem:[#allocation5 + $0x328] ss:$44 sps:$4 sm:$0xff]  }
 0x31d   :  { %14189 = vmatmul.mubr.bf16.vlgmr.msra.gmra.mrb[4].mxu1 %v23767_v42 }
 0x31e   :  { %13779 = vmatmul.mubr.bf16.vlgmr.msra.gmra.mrb[0].mxu0 %v23795_v39  ;;  %14198 = vmatpush1.bf16.msra.mxu1 %v21247_v58  ;;  %v21309_v58 = vld [vmem:[#allocation5 + $0x3a7c] ss:$44 sps:$4 sm:$0xff]  }
 0x31f   :  { %14280 = vmatpush1.bf16.msra.mxu0 %v21250_v59  ;;  %14199 = vmatprep.subr.bf16.mxu1 %v21255_v61  ;;  %v21312_v59 = vld [vmem:[#allocation5 + $0x384] ss:$44 sps:$4 sm:$0xff]  }
 0x320   :  { %14281 = vmatprep.subr.bf16.mxu0 %v21258_v62  ;;  %14229 = vmatprep.mubr.bf16.mxu1 %v23773_v46  ;;  %v21307_v61 = vld [vmem:[#allocation5 + $0x3a78] ss:$44 sps:$4 sm:$0xff]   ;;  %v21310_v62 = vld [vmem:[#allocation5 + $0x380] ss:$44 sps:$4 sm:$0xff]  }
 0x321   :  { %14311 = vmatprep.mubr.bf16.mxu0 %v23643_v47 }
 0x322   :  { %14200 = vmatpush1.bf16.msra.mxu1 %v21253_v63  ;;  %v21315_v63 = vld [vmem:[#allocation5 + $0x3ad4] ss:$44 sps:$4 sm:$0xff]  }
 0x323   :  { %14282 = vmatpush1.bf16.msra.mxu0 %v21256_v2  ;;  %14201 = vmatprep.subr.bf16.mxu1 %v21261_v3  ;;  %v21318_v2 = vld [vmem:[#allocation5 + $0x3dc] ss:$44 sps:$4 sm:$0xff]  }
 0x324   :  { %14283 = vmatprep.subr.bf16.mxu0 %v21264_v4  ;;  %v21313_v3 = vld [vmem:[#allocation5 + $0x3ad0] ss:$44 sps:$4 sm:$0xff]   ;;  %v21316_v4 = vld [vmem:[#allocation5 + $0x3d8] ss:$44 sps:$4 sm:$0xff]  }
 0x326   :  { %14202 = vmatpush1.bf16.msra.mxu1 %v21259_v13  ;;  %v21321_v13 = vld [vmem:[#allocation5 + $0x3b2c] ss:$44 sps:$4 sm:$0xff]  }
 0x327   :  { %14284 = vmatpush1.bf16.msra.mxu0 %v21262_v5  ;;  %14203 = vmatprep.subr.bf16.mxu1 %v21267_v36  ;;  %v21324_v5 = vld [vmem:[#allocation5 + $0x434] ss:$44 sps:$4 sm:$0xff]  }
 0x328   :  { %14285 = vmatprep.subr.bf16.mxu0 %v21270_v11  ;;  %v21319_v36 = vld [vmem:[#allocation5 + $0x3b28] ss:$44 sps:$4 sm:$0xff]   ;;  %v21322_v11 = vld [vmem:[#allocation5 + $0x430] ss:$44 sps:$4 sm:$0xff]  }
 0x32a   :  { %14204 = vmatpush1.bf16.msra.mxu1 %v21265_v17  ;;  %v21327_v17 = vld [vmem:[#allocation5 + $0x3b84] ss:$44 sps:$4 sm:$0xff]  }
 0x32b   :  { %14286 = vmatpush1.bf16.msra.mxu0 %v21268_v18  ;;  %14205 = vmatprep.subr.bf16.mxu1 %v21273_v21  ;;  %v21330_v18 = vld [vmem:[#allocation5 + $0x48c] ss:$44 sps:$4 sm:$0xff]  }
 0x32c   :  { %14287 = vmatprep.subr.bf16.mxu0 %v21276_v22  ;;  %v21325_v21 = vld [vmem:[#allocation5 + $0x3b80] ss:$44 sps:$4 sm:$0xff]   ;;  %v21328_v22 = vld [vmem:[#allocation5 + $0x488] ss:$44 sps:$4 sm:$0xff]  }
 0x32e   :  { %14206 = vmatpush1.bf16.msra.mxu1 %v21271_v43  ;;  %v21333_v43 = vld [vmem:[#allocation5 + $0x3bdc] ss:$44 sps:$4 sm:$0xff]  }
 0x32f   :  { %14288 = vmatpush1.bf16.msra.mxu0 %v21274_v24  ;;  %14207 = vmatprep.subr.bf16.mxu1 %v21279_v25  ;;  %v21336_v24 = vld [vmem:[#allocation5 + $0x4e4] ss:$44 sps:$4 sm:$0xff]  }
 0x330   :  { %14289 = vmatprep.subr.bf16.mxu0 %v21282_v28  ;;  %v21331_v25 = vld [vmem:[#allocation5 + $0x3bd8] ss:$44 sps:$4 sm:$0xff]   ;;  %v21334_v28 = vld [vmem:[#allocation5 + $0x4e0] ss:$44 sps:$4 sm:$0xff]  }
 0x332   :  { %14208 = vmatpush1.bf16.msra.mxu1 %v21277_v29  ;;  %v21339_v29 = vld [vmem:[#allocation5 + $0x3c34] ss:$44 sps:$4 sm:$0xff]  }
 0x333   :  { %14290 = vmatpush1.bf16.msra.mxu0 %v21280_v30  ;;  %14209 = vmatprep.subr.bf16.mxu1 %v21285_v32  ;;  %v21342_v30 = vld [vmem:[#allocation5 + $0x53c] ss:$44 sps:$4 sm:$0xff]  }
 0x334   :  { %14291 = vmatprep.subr.bf16.mxu0 %v21288_v19  ;;  %v21337_v32 = vld [vmem:[#allocation5 + $0x3c30] ss:$44 sps:$4 sm:$0xff]   ;;  %v21340_v19 = vld [vmem:[#allocation5 + $0x538] ss:$44 sps:$4 sm:$0xff]  }
 0x336   :  { %14210 = vmatpush1.bf16.msra.mxu1 %v21283_v33  ;;  %v21345_v33 = vld [vmem:[#allocation5 + $0x3c8c] ss:$44 sps:$4 sm:$0xff]  }
 0x337   :  { %14292 = vmatpush1.bf16.msra.mxu0 %v21286_v35  ;;  %14211 = vmatprep.subr.bf16.mxu1 %v21291_v40  ;;  %v21348_v35 = vld [vmem:[#allocation5 + $0x594] ss:$44 sps:$4 sm:$0xff]  }
 0x338   :  { %14293 = vmatprep.subr.bf16.mxu0 %v21294_v41  ;;  %v21343_v40 = vld [vmem:[#allocation5 + $0x3c88] ss:$44 sps:$4 sm:$0xff]   ;;  %v21346_v41 = vld [vmem:[#allocation5 + $0x590] ss:$44 sps:$4 sm:$0xff]  }
 0x33a   :  { %14212 = vmatpush1.bf16.msra.mxu1 %v21289_v8  ;;  %v21351_v8 = vld [vmem:[#allocation5 + $0x3ce4] ss:$44 sps:$4 sm:$0xff]  }
 0x33b   :  { %14294 = vmatpush1.bf16.msra.mxu0 %v21292_v45  ;;  %14213 = vmatprep.subr.bf16.mxu1 %v21297_v0  ;;  %v21354_v45 = vld [vmem:[#allocation5 + $0x5ec] ss:$44 sps:$4 sm:$0xff]  }
 0x33c   :  { %14295 = vmatprep.subr.bf16.mxu0 %v21300_v48  ;;  %v21349_v0 = vld [vmem:[#allocation5 + $0x3ce0] ss:$44 sps:$4 sm:$0xff]   ;;  %v21352_v48 = vld [vmem:[#allocation5 + $0x5e8] ss:$44 sps:$4 sm:$0xff]  }
 0x33e   :  { %14214 = vmatpush1.bf16.msra.mxu1 %v21295_v49  ;;  %v21357_v49 = vld [vmem:[#allocation5 + $0x3d3c] ss:$44 sps:$4 sm:$0xff]  }
 0x33f   :  { %14296 = vmatpush1.bf16.msra.mxu0 %v21298_v50  ;;  %14215 = vmatprep.subr.bf16.mxu1 %v21303_v52  ;;  %v21360_v50 = vld [vmem:[#allocation5 + $0x644] ss:$44 sps:$4 sm:$0xff]  }
 0x340   :  { %14297 = vmatprep.subr.bf16.mxu0 %v21306_v53  ;;  %v21355_v52 = vld [vmem:[#allocation5 + $0x3d38] ss:$44 sps:$4 sm:$0xff]   ;;  %v21358_v53 = vld [vmem:[#allocation5 + $0x640] ss:$44 sps:$4 sm:$0xff]  }
 0x342   :  { %14216 = vmatpush1.bf16.msra.mxu1 %v21301_v56  ;;  %v21363_v56 = vld [vmem:[#allocation5 + $0x3d94] ss:$44 sps:$4 sm:$0xff]  }
 0x343   :  { %14298 = vmatpush1.bf16.msra.mxu0 %v21304_v57  ;;  %14217 = vmatprep.subr.bf16.mxu1 %v21309_v58  ;;  %v21366_v57 = vld [vmem:[#allocation5 + $0x69c] ss:$44 sps:$4 sm:$0xff]  }
 0x344   :  { %14299 = vmatprep.subr.bf16.mxu0 %v21312_v59  ;;  %v21361_v58 = vld [vmem:[#allocation5 + $0x3d90] ss:$44 sps:$4 sm:$0xff]   ;;  %v21364_v59 = vld [vmem:[#allocation5 + $0x698] ss:$44 sps:$4 sm:$0xff]  }
 0x346   :  { %14218 = vmatpush1.bf16.msra.mxu1 %v21307_v61  ;;  %v21369_v61 = vld [vmem:[#allocation5 + $0x3dec] ss:$44 sps:$4 sm:$0xff]  }
 0x347   :  { %14300 = vmatpush1.bf16.msra.mxu0 %v21310_v62  ;;  %14219 = vmatprep.subr.bf16.mxu1 %v21315_v63  ;;  %v21372_v62 = vld [vmem:[#allocation5 + $0x6f4] ss:$44 sps:$4 sm:$0xff]  }
 0x348   :  { %14301 = vmatprep.subr.bf16.mxu0 %v21318_v2  ;;  %v21367_v63 = vld [vmem:[#allocation5 + $0x3de8] ss:$44 sps:$4 sm:$0xff]   ;;  %v21370_v2 = vld [vmem:[#allocation5 + $0x6f0] ss:$44 sps:$4 sm:$0xff]  }
 0x34a   :  { %14220 = vmatpush1.bf16.msra.mxu1 %v21313_v3  ;;  %v21375_v3 = vld [vmem:[#allocation5 + $0x3e44] ss:$44 sps:$4 sm:$0xff]  }
 0x34b   :  { %14302 = vmatpush1.bf16.msra.mxu0 %v21316_v4  ;;  %14221 = vmatprep.subr.bf16.mxu1 %v21321_v13  ;;  %v21378_v4 = vld [vmem:[#allocation5 + $0x74c] ss:$44 sps:$4 sm:$0xff]  }
 0x34c   :  { %14303 = vmatprep.subr.bf16.mxu0 %v21324_v5  ;;  %v21373_v13 = vld [vmem:[#allocation5 + $0x3e40] ss:$44 sps:$4 sm:$0xff]   ;;  %v21376_v5 = vld [vmem:[#allocation5 + $0x748] ss:$44 sps:$4 sm:$0xff]  }
 0x34e   :  { %14222 = vmatpush1.bf16.msra.mxu1 %v21319_v36  ;;  %v21381_v36 = vld [vmem:[#allocation5 + $0x3e9c] ss:$44 sps:$4 sm:$0xff]  }
 0x34f   :  { %14304 = vmatpush1.bf16.msra.mxu0 %v21322_v11  ;;  %14223 = vmatprep.subr.bf16.mxu1 %v21327_v17  ;;  %v21384_v11 = vld [vmem:[#allocation5 + $0x7a4] ss:$44 sps:$4 sm:$0xff]  }
 0x350   :  { %14305 = vmatprep.subr.bf16.mxu0 %v21330_v18  ;;  %v21379_v17 = vld [vmem:[#allocation5 + $0x3e98] ss:$44 sps:$4 sm:$0xff]   ;;  %v21382_v18 = vld [vmem:[#allocation5 + $0x7a0] ss:$44 sps:$4 sm:$0xff]  }
 0x352   :  { %14224 = vmatpush1.bf16.msra.mxu1 %v21325_v21  ;;  %v21387_v21 = vld [vmem:[#allocation5 + $0x3ef4] ss:$44 sps:$4 sm:$0xff]  }
 0x353   :  { %14306 = vmatpush1.bf16.msra.mxu0 %v21328_v22  ;;  %14225 = vmatprep.subr.bf16.mxu1 %v21333_v43  ;;  %v21390_v22 = vld [vmem:[#allocation5 + $0x7fc] ss:$44 sps:$4 sm:$0xff]  }
 0x354   :  { %14307 = vmatprep.subr.bf16.mxu0 %v21336_v24  ;;  %v21385_v43 = vld [vmem:[#allocation5 + $0x3ef0] ss:$44 sps:$4 sm:$0xff]   ;;  %v21388_v24 = vld [vmem:[#allocation5 + $0x7f8] ss:$44 sps:$4 sm:$0xff]  }
 0x356   :  { %14226 = vmatpush1.bf16.msra.mxu1 %v21331_v25  ;;  %v21393_v25 = vld [vmem:[#allocation5 + $0x3f4c] ss:$44 sps:$4 sm:$0xff]  }
 0x357   :  { %14308 = vmatpush1.bf16.msra.mxu0 %v21334_v28  ;;  %14227 = vmatprep.subr.bf16.mxu1 %v21339_v29  ;;  %v21396_v28 = vld [vmem:[#allocation5 + $0x854] ss:$44 sps:$4 sm:$0xff]  }
 0x358   :  { %14309 = vmatprep.subr.bf16.mxu0 %v21342_v30  ;;  %v21391_v29 = vld [vmem:[#allocation5 + $0x3f48] ss:$44 sps:$4 sm:$0xff]   ;;  %v21394_v30 = vld [vmem:[#allocation5 + $0x850] ss:$44 sps:$4 sm:$0xff]  }
 0x35a   :  { %14228 = vmatpush1.bf16.msra.mxu1 %v21337_v32  ;;  %v21399_v32 = vld [vmem:[#allocation5 + $0x3fa4] ss:$44 sps:$4 sm:$0xff]  }
 0x35b   :  { %14310 = vmatpush1.bf16.msra.mxu0 %v21340_v19  ;;  %14238 = vmatprep.subr.bf16.mxu1 %v21345_v33  ;;  %v21402_v19 = vld [vmem:[#allocation5 + $0x8ac] ss:$44 sps:$4 sm:$0xff]  }
 0x35c   :  { %14320 = vmatprep.subr.bf16.mxu0 %v21348_v35  ;;  %v21397_v33 = vld [vmem:[#allocation5 + $0x3fa0] ss:$44 sps:$4 sm:$0xff]   ;;  %v21400_v35 = vld [vmem:[#allocation5 + $0x8a8] ss:$44 sps:$4 sm:$0xff]  }
 0x35d   :  { %14230 = vmatmul.mubr.bf16.vlgmr.msra.gmra.mrb[4].mxu1 %v23783_v54 }
 0x35e   :  { %14312 = vmatmul.mubr.bf16.vlgmr.msra.gmra.mrb[4].mxu0 %v23649_v6  ;;  %14239 = vmatpush1.bf16.msra.mxu1 %v21343_v40  ;;  %v21405_v40 = vld [vmem:[#allocation5 + $0x3ffc] ss:$44 sps:$4 sm:$0xff]  }
 0x35f   :  { %14321 = vmatpush1.bf16.msra.mxu0 %v21346_v41  ;;  %14240 = vmatprep.subr.bf16.mxu1 %v21351_v8  ;;  %v21408_v41 = vld [vmem:[#allocation5 + $0x904] ss:$44 sps:$4 sm:$0xff]  }
 0x360   :  { %14322 = vmatprep.subr.bf16.mxu0 %v21354_v45  ;;  %14270 = vmatprep.mubr.bf16.mxu1 %v23787_v23  ;;  %v21403_v8 = vld [vmem:[#allocation5 + $0x3ff8] ss:$44 sps:$4 sm:$0xff]   ;;  %v21406_v45 = vld [vmem:[#allocation5 + $0x900] ss:$44 sps:$4 sm:$0xff]  }
 0x361   :  { %14352 = vmatprep.mubr.bf16.mxu0 %v23645_v51 }
 0x362   :  { %14241 = vmatpush1.bf16.msra.mxu1 %v21349_v0  ;;  %v21411_v0 = vld [vmem:[#allocation5 + $0x4054] ss:$44 sps:$4 sm:$0xff]  }
 0x363   :  { %14323 = vmatpush1.bf16.msra.mxu0 %v21352_v48  ;;  %14242 = vmatprep.subr.bf16.mxu1 %v21357_v49  ;;  %v21414_v48 = vld [vmem:[#allocation5 + $0x95c] ss:$44 sps:$4 sm:$0xff]  }
 0x364   :  { %14324 = vmatprep.subr.bf16.mxu0 %v21360_v50  ;;  %v21409_v49 = vld [vmem:[#allocation5 + $0x4050] ss:$44 sps:$4 sm:$0xff]   ;;  %v21412_v50 = vld [vmem:[#allocation5 + $0x958] ss:$44 sps:$4 sm:$0xff]  }
 0x366   :  { %14243 = vmatpush1.bf16.msra.mxu1 %v21355_v52  ;;  %v21417_v52 = vld [vmem:[#allocation5 + $0x40ac] ss:$44 sps:$4 sm:$0xff]  }
 0x367   :  { %14325 = vmatpush1.bf16.msra.mxu0 %v21358_v53  ;;  %14244 = vmatprep.subr.bf16.mxu1 %v21363_v56  ;;  %v21420_v53 = vld [vmem:[#allocation5 + $0x9b4] ss:$44 sps:$4 sm:$0xff]  }
 0x368   :  { %14326 = vmatprep.subr.bf16.mxu0 %v21366_v57  ;;  %v21415_v56 = vld [vmem:[#allocation5 + $0x40a8] ss:$44 sps:$4 sm:$0xff]   ;;  %v21418_v57 = vld [vmem:[#allocation5 + $0x9b0] ss:$44 sps:$4 sm:$0xff]  }
 0x36a   :  { %14245 = vmatpush1.bf16.msra.mxu1 %v21361_v58  ;;  %v21423_v58 = vld [vmem:[#allocation5 + $0x4104] ss:$44 sps:$4 sm:$0xff]  }
 0x36b   :  { %14327 = vmatpush1.bf16.msra.mxu0 %v21364_v59  ;;  %14246 = vmatprep.subr.bf16.mxu1 %v21369_v61  ;;  %v21426_v59 = vld [vmem:[#allocation5 + $0xa0c] ss:$44 sps:$4 sm:$0xff]  }
 0x36c   :  { %14328 = vmatprep.subr.bf16.mxu0 %v21372_v62  ;;  %v21421_v61 = vld [vmem:[#allocation5 + $0x4100] ss:$44 sps:$4 sm:$0xff]   ;;  %v21424_v62 = vld [vmem:[#allocation5 + $0xa08] ss:$44 sps:$4 sm:$0xff]  }
 0x36e   :  { %14247 = vmatpush1.bf16.msra.mxu1 %v21367_v63  ;;  %v21429_v63 = vld [vmem:[#allocation5 + $0x415c] ss:$44 sps:$4 sm:$0xff]  }
 0x36f   :  { %14329 = vmatpush1.bf16.msra.mxu0 %v21370_v2  ;;  %14248 = vmatprep.subr.bf16.mxu1 %v21375_v3  ;;  %v21432_v2 = vld [vmem:[#allocation5 + $0xa64] ss:$44 sps:$4 sm:$0xff]  }
 0x370   :  { %14330 = vmatprep.subr.bf16.mxu0 %v21378_v4  ;;  %v21427_v3 = vld [vmem:[#allocation5 + $0x4158] ss:$44 sps:$4 sm:$0xff]   ;;  %v21430_v4 = vld [vmem:[#allocation5 + $0xa60] ss:$44 sps:$4 sm:$0xff]  }
 0x372   :  { %14249 = vmatpush1.bf16.msra.mxu1 %v21373_v13  ;;  %v21435_v13 = vld [vmem:[#allocation5 + $0x41b4] ss:$44 sps:$4 sm:$0xff]  }
 0x373   :  { %14331 = vmatpush1.bf16.msra.mxu0 %v21376_v5  ;;  %14250 = vmatprep.subr.bf16.mxu1 %v21381_v36  ;;  %v21438_v5 = vld [vmem:[#allocation5 + $0xabc] ss:$44 sps:$4 sm:$0xff]  }
 0x374   :  { %14332 = vmatprep.subr.bf16.mxu0 %v21384_v11  ;;  %v21433_v36 = vld [vmem:[#allocation5 + $0x41b0] ss:$44 sps:$4 sm:$0xff]   ;;  %v21436_v11 = vld [vmem:[#allocation5 + $0xab8] ss:$44 sps:$4 sm:$0xff]  }
 0x376   :  { %14251 = vmatpush1.bf16.msra.mxu1 %v21379_v17  ;;  %v21441_v17 = vld [vmem:[#allocation5 + $0xb14] ss:$44 sps:$4 sm:$0xff]  }
 0x377   :  { %14333 = vmatpush1.bf16.msra.mxu0 %v21382_v18  ;;  %14252 = vmatprep.subr.bf16.mxu1 %v21387_v21  ;;  %v21444_v18 = vld [vmem:[#allocation5 + $0x1c] ss:$44 sps:$4 sm:$0xff]  }
 0x378   :  { %14334 = vmatprep.subr.bf16.mxu0 %v21390_v22  ;;  %v21439_v21 = vld [vmem:[#allocation5 + $0xb10] ss:$44 sps:$4 sm:$0xff]   ;;  %v21442_v22 = vld [vmem:[#allocation5 + $0x18] ss:$44 sps:$4 sm:$0xff]  }
 0x37a   :  { %14253 = vmatpush1.bf16.msra.mxu1 %v21385_v43  ;;  %v21447_v43 = vld [vmem:[#allocation5 + $0xb6c] ss:$44 sps:$4 sm:$0xff]  }
 0x37b   :  { %14335 = vmatpush1.bf16.msra.mxu0 %v21388_v24  ;;  %14254 = vmatprep.subr.bf16.mxu1 %v21393_v25  ;;  %v21450_v24 = vld [vmem:[#allocation5 + $0x74] ss:$44 sps:$4 sm:$0xff]  }
 0x37c   :  { %14336 = vmatprep.subr.bf16.mxu0 %v21396_v28  ;;  %v21445_v25 = vld [vmem:[#allocation5 + $0xb68] ss:$44 sps:$4 sm:$0xff]   ;;  %v21448_v28 = vld [vmem:[#allocation5 + $0x70] ss:$44 sps:$4 sm:$0xff]  }
 0x37e   :  { %14255 = vmatpush1.bf16.msra.mxu1 %v21391_v29  ;;  %v21453_v29 = vld [vmem:[#allocation5 + $0xbc4] ss:$44 sps:$4 sm:$0xff]  }
 0x37f   :  { %14337 = vmatpush1.bf16.msra.mxu0 %v21394_v30  ;;  %14256 = vmatprep.subr.bf16.mxu1 %v21399_v32  ;;  %v21456_v30 = vld [vmem:[#allocation5 + $0xcc] ss:$44 sps:$4 sm:$0xff]  }
 0x380   :  { %14338 = vmatprep.subr.bf16.mxu0 %v21402_v19  ;;  %v21451_v32 = vld [vmem:[#allocation5 + $0xbc0] ss:$44 sps:$4 sm:$0xff]   ;;  %v21454_v19 = vld [vmem:[#allocation5 + $0xc8] ss:$44 sps:$4 sm:$0xff]  }
 0x382   :  { %14257 = vmatpush1.bf16.msra.mxu1 %v21397_v33  ;;  %v21459_v33 = vld [vmem:[#allocation5 + $0xc1c] ss:$44 sps:$4 sm:$0xff]  }
 0x383   :  { %14339 = vmatpush1.bf16.msra.mxu0 %v21400_v35  ;;  %14258 = vmatprep.subr.bf16.mxu1 %v21405_v40  ;;  %v21462_v35 = vld [vmem:[#allocation5 + $0x124] ss:$44 sps:$4 sm:$0xff]  }
 0x384   :  { %14340 = vmatprep.subr.bf16.mxu0 %v21408_v41  ;;  %v21457_v40 = vld [vmem:[#allocation5 + $0xc18] ss:$44 sps:$4 sm:$0xff]   ;;  %v21460_v41 = vld [vmem:[#allocation5 + $0x120] ss:$44 sps:$4 sm:$0xff]  }
 0x386   :  { %14259 = vmatpush1.bf16.msra.mxu1 %v21403_v8  ;;  %v21465_v8 = vld [vmem:[#allocation5 + $0xc74] ss:$44 sps:$4 sm:$0xff]  }
 0x387   :  { %14341 = vmatpush1.bf16.msra.mxu0 %v21406_v45  ;;  %14260 = vmatprep.subr.bf16.mxu1 %v21411_v0  ;;  %v21468_v45 = vld [vmem:[#allocation5 + $0x17c] ss:$44 sps:$4 sm:$0xff]  }
 0x388   :  { %14342 = vmatprep.subr.bf16.mxu0 %v21414_v48  ;;  %v21463_v0 = vld [vmem:[#allocation5 + $0xc70] ss:$44 sps:$4 sm:$0xff]   ;;  %v21466_v48 = vld [vmem:[#allocation5 + $0x178] ss:$44 sps:$4 sm:$0xff]  }
 0x38a   :  { %14261 = vmatpush1.bf16.msra.mxu1 %v21409_v49  ;;  %v21471_v49 = vld [vmem:[#allocation5 + $0xccc] ss:$44 sps:$4 sm:$0xff]  }
 0x38b   :  { %14343 = vmatpush1.bf16.msra.mxu0 %v21412_v50  ;;  %14262 = vmatprep.subr.bf16.mxu1 %v21417_v52  ;;  %v21474_v50 = vld [vmem:[#allocation5 + $0x1d4] ss:$44 sps:$4 sm:$0xff]  }
 0x38c   :  { %14344 = vmatprep.subr.bf16.mxu0 %v21420_v53  ;;  %v21469_v52 = vld [vmem:[#allocation5 + $0xcc8] ss:$44 sps:$4 sm:$0xff]   ;;  %v21472_v53 = vld [vmem:[#allocation5 + $0x1d0] ss:$44 sps:$4 sm:$0xff]  }
 0x38e   :  { %14263 = vmatpush1.bf16.msra.mxu1 %v21415_v56  ;;  %v21477_v56 = vld [vmem:[#allocation5 + $0xd24] ss:$44 sps:$4 sm:$0xff]  }
 0x38f   :  { %14345 = vmatpush1.bf16.msra.mxu0 %v21418_v57  ;;  %14264 = vmatprep.subr.bf16.mxu1 %v21423_v58  ;;  %v21480_v57 = vld [vmem:[#allocation5 + $0x22c] ss:$44 sps:$4 sm:$0xff]  }
 0x390   :  { %14346 = vmatprep.subr.bf16.mxu0 %v21426_v59  ;;  %v21475_v58 = vld [vmem:[#allocation5 + $0xd20] ss:$44 sps:$4 sm:$0xff]   ;;  %v21478_v59 = vld [vmem:[#allocation5 + $0x228] ss:$44 sps:$4 sm:$0xff]  }
 0x392   :  { %14265 = vmatpush1.bf16.msra.mxu1 %v21421_v61  ;;  %v21483_v61 = vld [vmem:[#allocation5 + $0xd7c] ss:$44 sps:$4 sm:$0xff]  }
 0x393   :  { %14347 = vmatpush1.bf16.msra.mxu0 %v21424_v62  ;;  %14266 = vmatprep.subr.bf16.mxu1 %v21429_v63  ;;  %v21486_v62 = vld [vmem:[#allocation5 + $0x284] ss:$44 sps:$4 sm:$0xff]  }
 0x394   :  { %14348 = vmatprep.subr.bf16.mxu0 %v21432_v2  ;;  %v21481_v63 = vld [vmem:[#allocation5 + $0xd78] ss:$44 sps:$4 sm:$0xff]   ;;  %v21484_v2 = vld [vmem:[#allocation5 + $0x280] ss:$44 sps:$4 sm:$0xff]  }
 0x396   :  { %14267 = vmatpush1.bf16.msra.mxu1 %v21427_v3  ;;  %v21489_v3 = vld [vmem:[#allocation5 + $0xdd4] ss:$44 sps:$4 sm:$0xff]  }
 0x397   :  { %14349 = vmatpush1.bf16.msra.mxu0 %v21430_v4  ;;  %14268 = vmatprep.subr.bf16.mxu1 %v21435_v13  ;;  %v21492_v4 = vld [vmem:[#allocation5 + $0x2dc] ss:$44 sps:$4 sm:$0xff]  }
 0x398   :  { %14350 = vmatprep.subr.bf16.mxu0 %v21438_v5  ;;  %v21487_v13 = vld [vmem:[#allocation5 + $0xdd0] ss:$44 sps:$4 sm:$0xff]   ;;  %v21490_v5 = vld [vmem:[#allocation5 + $0x2d8] ss:$44 sps:$4 sm:$0xff]  }
 0x39a   :  { %14269 = vmatpush1.bf16.msra.mxu1 %v21433_v36  ;;  %v21495_v36 = vld [vmem:[#allocation5 + $0xe2c] ss:$44 sps:$4 sm:$0xff]  }
 0x39b   :  { %14351 = vmatpush1.bf16.msra.mxu0 %v21436_v11  ;;  %14771 = vmatprep.subr.bf16.mxu1 %v21444_v18  ;;  %v21498_v11 = vld [vmem:[#allocation5 + $0x334] ss:$44 sps:$4 sm:$0xff]   ;;  %v21496_v18 = vld [vmem:[#allocation5 + $0x330] ss:$44 sps:$4 sm:$0xff]  }
 0x39c   :  { %14361 = vmatprep.subr.bf16.mxu0 %v21441_v17  ;;  %v21493_v17 = vld [vmem:[#allocation5 + $0xe28] ss:$44 sps:$4 sm:$0xff]  }
 0x39d   :  { %14271 = vmatmul.mubr.bf16.vlgmr.msra.gmra.mrb[4].mxu1 %v23795_v39 }
 0x39e   :  { %14353 = vmatmul.mubr.bf16.vlgmr.msra.gmra.mrb[4].mxu0 %v23651_v7  ;;  %14772 = vmatpush1.bf16.msra.mxu1 %v21442_v22  ;;  %v21504_v22 = vld [vmem:[#allocation5 + $0x38c] ss:$44 sps:$4 sm:$0xff]  }
 0x39f   :  { %14362 = vmatpush1.bf16.msra.mxu0 %v21439_v21  ;;  %14773 = vmatprep.subr.bf16.mxu1 %v21450_v24  ;;  %v21501_v21 = vld [vmem:[#allocation5 + $0xe84] ss:$44 sps:$4 sm:$0xff]   ;;  %v21502_v24 = vld [vmem:[#allocation5 + $0x388] ss:$44 sps:$4 sm:$0xff]  }
 0x3a0   :  { %14363 = vmatprep.subr.bf16.mxu0 %v21447_v43  ;;  %14393 = vmatprep.mubr.bf16.mxu0 %v23660_v34  ;;  %v21499_v43 = vld [vmem:[#allocation5 + $0xe80] ss:$44 sps:$4 sm:$0xff]  }
 0x3a1   :  { %14803 = vmatprep.mubr.bf16.mxu1 %v23643_v47 }
 0x3a2   :  { %14774 = vmatpush1.bf16.msra.mxu1 %v21448_v28  ;;  %v21510_v28 = vld [vmem:[#allocation5 + $0x3e4] ss:$44 sps:$4 sm:$0xff]  }
 0x3a3   :  { %14364 = vmatpush1.bf16.msra.mxu0 %v21445_v25  ;;  %14775 = vmatprep.subr.bf16.mxu1 %v21456_v30  ;;  %v21507_v25 = vld [vmem:[#allocation5 + $0xedc] ss:$44 sps:$4 sm:$0xff]   ;;  %v21508_v30 = vld [vmem:[#allocation5 + $0x3e0] ss:$44 sps:$4 sm:$0xff]  }
 0x3a4   :  { %14365 = vmatprep.subr.bf16.mxu0 %v21453_v29  ;;  %v21505_v29 = vld [vmem:[#allocation5 + $0xed8] ss:$44 sps:$4 sm:$0xff]  }
 0x3a6   :  { %14776 = vmatpush1.bf16.msra.mxu1 %v21454_v19  ;;  %v21516_v19 = vld [vmem:[#allocation5 + $0x43c] ss:$44 sps:$4 sm:$0xff]  }
 0x3a7   :  { %14366 = vmatpush1.bf16.msra.mxu0 %v21451_v32  ;;  %14777 = vmatprep.subr.bf16.mxu1 %v21462_v35  ;;  %v21513_v32 = vld [vmem:[#allocation5 + $0xf34] ss:$44 sps:$4 sm:$0xff]   ;;  %v21514_v35 = vld [vmem:[#allocation5 + $0x438] ss:$44 sps:$4 sm:$0xff]  }
 0x3a8   :  { %14367 = vmatprep.subr.bf16.mxu0 %v21459_v33  ;;  %v21511_v33 = vld [vmem:[#allocation5 + $0xf30] ss:$44 sps:$4 sm:$0xff]  }
 0x3aa   :  { %14778 = vmatpush1.bf16.msra.mxu1 %v21460_v41  ;;  %v21522_v41 = vld [vmem:[#allocation5 + $0x494] ss:$44 sps:$4 sm:$0xff]  }
 0x3ab   :  { %14368 = vmatpush1.bf16.msra.mxu0 %v21457_v40  ;;  %14779 = vmatprep.subr.bf16.mxu1 %v21468_v45  ;;  %v21519_v40 = vld [vmem:[#allocation5 + $0xf8c] ss:$44 sps:$4 sm:$0xff]   ;;  %v21520_v45 = vld [vmem:[#allocation5 + $0x490] ss:$44 sps:$4 sm:$0xff]  }
 0x3ac   :  { %14369 = vmatprep.subr.bf16.mxu0 %v21465_v8  ;;  %v21517_v8 = vld [vmem:[#allocation5 + $0xf88] ss:$44 sps:$4 sm:$0xff]  }
 0x3ae   :  { %14780 = vmatpush1.bf16.msra.mxu1 %v21466_v48  ;;  %v21528_v48 = vld [vmem:[#allocation5 + $0x4ec] ss:$44 sps:$4 sm:$0xff]  }
 0x3af   :  { %14370 = vmatpush1.bf16.msra.mxu0 %v21463_v0  ;;  %14781 = vmatprep.subr.bf16.mxu1 %v21474_v50  ;;  %v21525_v0 = vld [vmem:[#allocation5 + $0xfe4] ss:$44 sps:$4 sm:$0xff]   ;;  %v21526_v50 = vld [vmem:[#allocation5 + $0x4e8] ss:$44 sps:$4 sm:$0xff]  }
 0x3b0   :  { %14371 = vmatprep.subr.bf16.mxu0 %v21471_v49  ;;  %v21523_v49 = vld [vmem:[#allocation5 + $0xfe0] ss:$44 sps:$4 sm:$0xff]  }
 0x3b2   :  { %14782 = vmatpush1.bf16.msra.mxu1 %v21472_v53  ;;  %v21534_v53 = vld [vmem:[#allocation5 + $0x544] ss:$44 sps:$4 sm:$0xff]  }
 0x3b3   :  { %14372 = vmatpush1.bf16.msra.mxu0 %v21469_v52  ;;  %14783 = vmatprep.subr.bf16.mxu1 %v21480_v57  ;;  %v21531_v52 = vld [vmem:[#allocation5 + $0x103c] ss:$44 sps:$4 sm:$0xff]   ;;  %v21532_v57 = vld [vmem:[#allocation5 + $0x540] ss:$44 sps:$4 sm:$0xff]  }
 0x3b4   :  { %14373 = vmatprep.subr.bf16.mxu0 %v21477_v56  ;;  %v21529_v56 = vld [vmem:[#allocation5 + $0x1038] ss:$44 sps:$4 sm:$0xff]  }
 0x3b6   :  { %14784 = vmatpush1.bf16.msra.mxu1 %v21478_v59  ;;  %v21540_v59 = vld [vmem:[#allocation5 + $0x59c] ss:$44 sps:$4 sm:$0xff]  }
 0x3b7   :  { %14374 = vmatpush1.bf16.msra.mxu0 %v21475_v58  ;;  %14785 = vmatprep.subr.bf16.mxu1 %v21486_v62  ;;  %v21537_v58 = vld [vmem:[#allocation5 + $0x1094] ss:$44 sps:$4 sm:$0xff]   ;;  %v21538_v62 = vld [vmem:[#allocation5 + $0x598] ss:$44 sps:$4 sm:$0xff]  }
 0x3b8   :  { %14375 = vmatprep.subr.bf16.mxu0 %v21483_v61  ;;  %v21535_v61 = vld [vmem:[#allocation5 + $0x1090] ss:$44 sps:$4 sm:$0xff]  }
 0x3ba   :  { %14786 = vmatpush1.bf16.msra.mxu1 %v21484_v2  ;;  %v21546_v2 = vld [vmem:[#allocation5 + $0x5f4] ss:$44 sps:$4 sm:$0xff]  }
 0x3bb   :  { %14376 = vmatpush1.bf16.msra.mxu0 %v21481_v63  ;;  %14787 = vmatprep.subr.bf16.mxu1 %v21492_v4  ;;  %v21543_v63 = vld [vmem:[#allocation5 + $0x10ec] ss:$44 sps:$4 sm:$0xff]   ;;  %v21541_v4 = vld [vmem:[#allocation5 + $0x10e8] ss:$44 sps:$4 sm:$0xff]  }
 0x3bc   :  { %14377 = vmatprep.subr.bf16.mxu0 %v21489_v3  ;;  %v2404_v3 = vlaneseq }
 0x3be   :  { %14788 = vmatpush1.bf16.msra.mxu1 %v21490_v5  ;;  %v21549_v5 = vld [vmem:[#allocation5 + $0x1144] ss:$44 sps:$4 sm:$0xff]  }
 0x3bf   :  { %14378 = vmatpush1.bf16.msra.mxu0 %v21487_v13  ;;  %14789 = vmatprep.subr.bf16.mxu1 %v21498_v11  ;;  %v21544_v13 = vld [vmem:[#allocation5 + $0x5f0] ss:$44 sps:$4 sm:$0xff]   ;;  %v23811_v11 = vshrl.u32 %v2404_v3, 7  ;;  %v21577_v3 = vld [vmem:[#allocation5 + $0x12f8] ss:$44 sps:$4 sm:$0xff]  }
 0x3c0   :  { %14379 = vmatprep.subr.bf16.mxu0 %v21495_v36  ;;  %v21552_v36 = vld [vmem:[#allocation5 + $0x64c] ss:$44 sps:$4 sm:$0xff]  }
 0x3c2   :  { %14790 = vmatpush1.bf16.msra.mxu1 %v21496_v18  ;;  %v21550_v18 = vld [vmem:[#allocation5 + $0x648] ss:$44 sps:$4 sm:$0xff]  }
 0x3c3   :  { %14380 = vmatpush1.bf16.msra.mxu0 %v21493_v17  ;;  %14791 = vmatprep.subr.bf16.mxu1 %v21504_v22  ;;  %v21547_v17 = vld [vmem:[#allocation5 + $0x1140] ss:$44 sps:$4 sm:$0xff]   ;;  %v21558_v22 = vld [vmem:[#allocation5 + $0x6a4] ss:$44 sps:$4 sm:$0xff]  }
 0x3c4   :  { %14381 = vmatprep.subr.bf16.mxu0 %v21501_v21  ;;  %v21555_v21 = vld [vmem:[#allocation5 + $0x119c] ss:$44 sps:$4 sm:$0xff]  }
 0x3c6   :  { %14792 = vmatpush1.bf16.msra.mxu1 %v21502_v24  ;;  %v2400_v24 = vld [vmem:[#allocation7] sm:$0xff] }
 0x3c7   :  { %14382 = vmatpush1.bf16.msra.mxu0 %v21499_v43  ;;  %14793 = vmatprep.subr.bf16.mxu1 %v21510_v28  ;;  %v2406_v43 = vsub.s32 0, %v23811_v11  ;;  %v21556_v28 = vld [vmem:[#allocation5 + $0x6a0] ss:$44 sps:$4 sm:$0xff]  }
 0x3c8   :  { %14383 = vmatprep.subr.bf16.mxu0 %v21507_v25  ;;  %v21553_v25 = vld [vmem:[#allocation5 + $0x1198] ss:$44 sps:$4 sm:$0xff]  }
 0x3ca   :  { %14794 = vmatpush1.bf16.msra.mxu1 %v21508_v30  ;;  %v21564_v30 = vld [vmem:[#allocation5 + $0x6fc] ss:$44 sps:$4 sm:$0xff]  }
 0x3cb   :  { %14384 = vmatpush1.bf16.msra.mxu0 %v21505_v29  ;;  %14795 = vmatprep.subr.bf16.mxu1 %v21516_v19  ;;  %v21561_v29 = vld [vmem:[#allocation5 + $0x11f4] ss:$44 sps:$4 sm:$0xff]   ;;  %v21559_v19 = vld [vmem:[#allocation5 + $0x11f0] ss:$44 sps:$4 sm:$0xff]  }
 0x3cc   :  { %14385 = vmatprep.subr.bf16.mxu0 %v21513_v32  ;;  %v2410_v32 = vsub.s32 1, %v23811_v11 }
 0x3ce   :  { %14796 = vmatpush1.bf16.msra.mxu1 %v21514_v35  ;;  %v2407_v35 = vrot.slane %v2400_v24, %v2406_v43 }
 0x3cf   :  { %14386 = vmatpush1.bf16.msra.mxu0 %v21511_v33  ;;  %14797 = vmatprep.subr.bf16.mxu1 %v21522_v41  ;;  %v21562_v33 = vld [vmem:[#allocation5 + $0x6f8] ss:$44 sps:$4 sm:$0xff]   ;;  %v21570_v41 = vld [vmem:[#allocation5 + $0x754] ss:$44 sps:$4 sm:$0xff]  }
 0x3d0   :  { %14387 = vmatprep.subr.bf16.mxu0 %v21519_v40  ;;  %v21567_v40 = vld [vmem:[#allocation5 + $0x124c] ss:$44 sps:$4 sm:$0xff]  }
 0x3d2   :  { %14798 = vmatpush1.bf16.msra.mxu1 %v21520_v45  ;;  %v21565_v45 = vld [vmem:[#allocation5 + $0x1248] ss:$44 sps:$4 sm:$0xff]  }
 0x3d3   :  { %14388 = vmatpush1.bf16.msra.mxu0 %v21517_v8  ;;  %14799 = vmatprep.subr.bf16.mxu1 %v21528_v48  ;;  %v2411_v8 = vrot.slane %v2400_v24, %v2410_v32  ;;  %v13330_v48 = vadd.f32 %v23733_v12, %v2407_v35  ;;  %v21579_v12 = vld [vmem:[#allocation5 + $0x12fc] ss:$44 sps:$4 sm:$0xff]   ;;  %v21597_v24 = vld [vmem:[#allocation5 + $0x1404] ss:$44 sps:$4 sm:$0xff]   ;;  %v21604_v35 = vld [vmem:[#allocation5 + $0x960] ss:$44 sps:$4 sm:$0xff]  }
 0x3d4   :  { %14389 = vmatprep.subr.bf16.mxu0 %v21525_v0  ;;  %v21568_v0 = vld [vmem:[#allocation5 + $0x750] ss:$44 sps:$4 sm:$0xff]  }
 0x3d6   :  { %14800 = vmatpush1.bf16.msra.mxu1 %v21526_v50  ;;  %v21576_v50 = vld [vmem:[#allocation5 + $0x7ac] ss:$44 sps:$4 sm:$0xff]  }
 0x3d7   :  { %14390 = vmatpush1.bf16.msra.mxu0 %v21523_v49  ;;  %14801 = vmatprep.subr.bf16.mxu1 %v21534_v53  ;;  %v21573_v49 = vld [vmem:[#allocation5 + $0x12a4] ss:$44 sps:$4 sm:$0xff]  }
 0x3d8   :  { %14391 = vmatprep.subr.bf16.mxu0 %v21531_v52  ;;  %v13332_v52 = vadd.f32 %v23735_v15, %v2411_v8  ;;  %v21585_v15 = vld [vmem:[#allocation5 + $0x1354] ss:$44 sps:$4 sm:$0xff]   ;;  %v21607_v8 = vld [vmem:[#allocation5 + $0x14b0] ss:$44 sps:$4 sm:$0xff]  }
 0x3da   :  { %14802 = vmatpush1.bf16.msra.mxu1 %v21532_v57  ;;  %v21574_v57 = vld [vmem:[#allocation5 + $0x7a8] ss:$44 sps:$4 sm:$0xff]  }
 0x3db   :  { %14392 = vmatpush1.bf16.msra.mxu0 %v21529_v56  ;;  %14812 = vmatprep.subr.bf16.mxu1 %v21540_v59  ;;  %v21571_v56 = vld [vmem:[#allocation5 + $0x12a0] ss:$44 sps:$4 sm:$0xff]  }
 0x3dc   :  { %14402 = vmatprep.subr.bf16.mxu0 %v21537_v58 }
 0x3dd   :  { %14804 = vmatmul.mubr.bf16.vlgmr.msra.gmra.mrb[8].mxu1 %v23649_v6 }
 0x3de   :  { %14394 = vmatmul.mubr.bf16.vlgmr.msra.gmra.mrb[4].mxu0 %v23665_v16  ;;  %14813 = vmatpush1.bf16.msra.mxu1 %v21538_v62 }
 0x3df   :  { %14403 = vmatpush1.bf16.msra.mxu0 %v21535_v61  ;;  %14814 = vmatprep.subr.bf16.mxu1 %v21546_v2  ;;  %v21582_v2 = vld [vmem:[#allocation5 + $0x804] ss:$44 sps:$4 sm:$0xff]  }
 0x3e0   :  { %14404 = vmatprep.subr.bf16.mxu0 %v21543_v63  ;;  %14434 = vmatprep.mubr.bf16.mxu0 %v23671_v20 }
 0x3e1   :  { %14844 = vmatprep.mubr.bf16.mxu1 %v23645_v51 }
 0x3e2   :  { %14815 = vmatpush1.bf16.msra.mxu1 %v21544_v13  ;;  %v21588_v13 = vld [vmem:[#allocation5 + $0x85c] ss:$44 sps:$4 sm:$0xff]  }
 0x3e3   :  { %14405 = vmatpush1.bf16.msra.mxu0 %v21541_v4  ;;  %14816 = vmatprep.subr.bf16.mxu1 %v21552_v36  ;;  %v21580_v4 = vld [vmem:[#allocation5 + $0x800] ss:$44 sps:$4 sm:$0xff]   ;;  %v21586_v36 = vld [vmem:[#allocation5 + $0x858] ss:$44 sps:$4 sm:$0xff]  }
 0x3e4   :  { %14406 = vmatprep.subr.bf16.mxu0 %v21549_v5  ;;  %v21583_v5 = vld [vmem:[#allocation5 + $0x1350] ss:$44 sps:$4 sm:$0xff]  }
 0x3e6   :  { %14817 = vmatpush1.bf16.msra.mxu1 %v21550_v18  ;;  %v21594_v18 = vld [vmem:[#allocation5 + $0x8b4] ss:$44 sps:$4 sm:$0xff]  }
 0x3e7   :  { %14407 = vmatpush1.bf16.msra.mxu0 %v21547_v17  ;;  %14818 = vmatprep.subr.bf16.mxu1 %v21558_v22  ;;  %v21591_v17 = vld [vmem:[#allocation5 + $0x13ac] ss:$44 sps:$4 sm:$0xff]   ;;  %v21592_v22 = vld [vmem:[#allocation5 + $0x8b0] ss:$44 sps:$4 sm:$0xff]  }
 0x3e8   :  { %14408 = vmatprep.subr.bf16.mxu0 %v21555_v21  ;;  %v21589_v21 = vld [vmem:[#allocation5 + $0x13a8] ss:$44 sps:$4 sm:$0xff]  }
 0x3ea   :  { %14819 = vmatpush1.bf16.msra.mxu1 %v21556_v28  ;;  %v21595_v28 = vld [vmem:[#allocation5 + $0x1400] ss:$44 sps:$4 sm:$0xff]  }
 0x3eb   :  { %14409 = vmatpush1.bf16.msra.mxu0 %v21553_v25  ;;  %14820 = vmatprep.subr.bf16.mxu1 %v21564_v30  ;;  %v21600_v25 = vld [vmem:[#allocation5 + $0x90c] ss:$44 sps:$4 sm:$0xff]   ;;  %v21603_v30 = vld [vmem:[#allocation5 + $0x145c] ss:$44 sps:$4 sm:$0xff]  }
 0x3ec   :  { %14410 = vmatprep.subr.bf16.mxu0 %v21561_v29  ;;  %v21598_v29 = vld [vmem:[#allocation5 + $0x908] ss:$44 sps:$4 sm:$0xff]  }
 0x3ee   :  { %14821 = vmatpush1.bf16.msra.mxu1 %v21562_v33  ;;  %v21601_v33 = vld [vmem:[#allocation5 + $0x1458] ss:$44 sps:$4 sm:$0xff]  }
 0x3ef   :  { %14411 = vmatpush1.bf16.msra.mxu0 %v21559_v19  ;;  %14822 = vmatprep.subr.bf16.mxu1 %v21570_v41  ;;  %v21606_v19 = vld [vmem:[#allocation5 + $0x964] ss:$44 sps:$4 sm:$0xff]   ;;  %v21612_v41 = vld [vmem:[#allocation5 + $0x9bc] ss:$44 sps:$4 sm:$0xff]  }
 0x3f0   :  { %14412 = vmatprep.subr.bf16.mxu0 %v21567_v40  ;;  %v21609_v40 = vld [vmem:[#allocation5 + $0x14b4] ss:$44 sps:$4 sm:$0xff]  }
 0x3f1   :  { %v13780_v53 = vpop.f32.mrb[0].mxu0 }
 0x3f2   :  { %v23823_v58 = vadd.f32 %v13780_v53, %v13330_v48  ;;  %v13782_v59 = vpop.f32.mrb[1].mxu0  ;;  %14823 = vmatpush1.bf16.msra.mxu1 %v21568_v0  ;;  %v21615_v0 = vld [vmem:[#allocation5 + $0x150c] ss:$44 sps:$4 sm:$0xff]   ;;  %v21618_v48 = vld [vmem:[#allocation5 + $0xa14] ss:$44 sps:$4 sm:$0xff]  }
 0x3f3   :  { %v23825_v61 = vadd.f32 %v13782_v59, %v13332_v52  ;;  %v13784_v62 = vpop.f32.mrb[2].mxu0  ;;  %14413 = vmatpush1.bf16.msra.mxu0 %v21565_v45  ;;  %14824 = vmatprep.subr.bf16.mxu1 %v21576_v50  ;;  %v21610_v45 = vld [vmem:[#allocation5 + $0x9b8] ss:$44 sps:$4 sm:$0xff]   ;;  %v21616_v50 = vld [vmem:[#allocation5 + $0xa10] ss:$44 sps:$4 sm:$0xff]  }
 0x3f4   :  { %v13785_v63 = vpop.f32.mrb[3].mxu0  ;;  %14414 = vmatprep.subr.bf16.mxu0 %v21573_v49  ;;  %v21613_v49 = vld [vmem:[#allocation5 + $0x1508] ss:$44 sps:$4 sm:$0xff]   ;;  %v21621_v52 = vld [vmem:[#allocation5 + $0x1564] ss:$44 sps:$4 sm:$0xff]  }
 0x3f5   :  { %v21624_v53 = vld [vmem:[#allocation5 + $0xa6c] ss:$44 sps:$4 sm:$0xff]   ;;  %v21627_v59 = vld [vmem:[#allocation5 + $0x15bc] ss:$44 sps:$4 sm:$0xff]   ;;  %v21630_v62 = vld [vmem:[#allocation5 + $0xac4] ss:$44 sps:$4 sm:$0xff]  }
 0x3f6   :  { %14825 = vmatpush1.bf16.msra.mxu1 %v21574_v57  ;;  %v21622_v57 = vld [vmem:[#allocation5 + $0xa68] ss:$44 sps:$4 sm:$0xff]   ;;  %v21625_v63 = vld [vmem:[#allocation5 + $0x15b8] ss:$44 sps:$4 sm:$0xff]  }
 0x3f7   :  { %14415 = vmatpush1.bf16.msra.mxu0 %v21571_v56  ;;  %14826 = vmatprep.subr.bf16.mxu1 %v21582_v2  ;;  %v21619_v56 = vld [vmem:[#allocation5 + $0x1560] ss:$44 sps:$4 sm:$0xff]  }
 0x3f8   :  { %14416 = vmatprep.subr.bf16.mxu0 %v21579_v12  ;;  %v21628_v12 = vld [vmem:[#allocation5 + $0xac0] ss:$44 sps:$4 sm:$0xff]  }
 0x3f9   :  { %v21633_v2 = vld [vmem:[#allocation5 + $0x1614] ss:$44 sps:$4 sm:$0xff]  }
 0x3fa   :  { %14827 = vmatpush1.bf16.msra.mxu1 %v21580_v4  ;;  %v21631_v4 = vld [vmem:[#allocation5 + $0x1610] ss:$44 sps:$4 sm:$0xff]  }
 0x3fb   :  { %14417 = vmatpush1.bf16.msra.mxu0 %v21577_v3  ;;  %14828 = vmatprep.subr.bf16.mxu1 %v21588_v13  ;;  %v21636_v3 = vld [vmem:[#allocation5 + $0xb1c] ss:$44 sps:$4 sm:$0xff]   ;;  %v21639_v13 = vld [vmem:[#allocation5 + $0x166c] ss:$44 sps:$4 sm:$0xff]  }
 0x3fc   :  { %14418 = vmatprep.subr.bf16.mxu0 %v21585_v15  ;;  %v21634_v15 = vld [vmem:[#allocation5 + $0xb18] ss:$44 sps:$4 sm:$0xff]  }
 0x3fe   :  { %14829 = vmatpush1.bf16.msra.mxu1 %v21586_v36  ;;  %v21637_v36 = vld [vmem:[#allocation5 + $0x1668] ss:$44 sps:$4 sm:$0xff]  }
 0x3ff   :  { %14419 = vmatpush1.bf16.msra.mxu0 %v21583_v5  ;;  %14830 = vmatprep.subr.bf16.mxu1 %v21594_v18  ;;  %v21642_v5 = vld [vmem:[#allocation5 + $0xb74] ss:$44 sps:$4 sm:$0xff]   ;;  %v21645_v18 = vld [vmem:[#allocation5 + $0x16c4] ss:$44 sps:$4 sm:$0xff]  }
 0x400   :  { %14420 = vmatprep.subr.bf16.mxu0 %v21591_v17  ;;  %v21640_v17 = vld [vmem:[#allocation5 + $0xb70] ss:$44 sps:$4 sm:$0xff]  }
 0x402   :  { %14831 = vmatpush1.bf16.msra.mxu1 %v21592_v22  ;;  %v21643_v22 = vld [vmem:[#allocation5 + $0x16c0] ss:$44 sps:$4 sm:$0xff]  }
 0x403   :  { %14421 = vmatpush1.bf16.msra.mxu0 %v21589_v21  ;;  %14832 = vmatprep.subr.bf16.mxu1 %v21600_v25  ;;  %v21648_v21 = vld [vmem:[#allocation5 + $0xbcc] ss:$44 sps:$4 sm:$0xff]   ;;  %v21651_v25 = vld [vmem:[#allocation5 + $0x171c] ss:$44 sps:$4 sm:$0xff]  }
 0x404   :  { %14422 = vmatprep.subr.bf16.mxu0 %v21597_v24  ;;  %v21646_v24 = vld [vmem:[#allocation5 + $0xbc8] ss:$44 sps:$4 sm:$0xff]  }
 0x406   :  { %14833 = vmatpush1.bf16.msra.mxu1 %v21598_v29  ;;  %v21649_v29 = vld [vmem:[#allocation5 + $0x1718] ss:$44 sps:$4 sm:$0xff]  }
 0x407   :  { %14423 = vmatpush1.bf16.msra.mxu0 %v21595_v28  ;;  %14834 = vmatprep.subr.bf16.mxu1 %v21606_v19  ;;  %v21654_v28 = vld [vmem:[#allocation5 + $0xc24] ss:$44 sps:$4 sm:$0xff]   ;;  %v21657_v19 = vld [vmem:[#allocation5 + $0x1774] ss:$44 sps:$4 sm:$0xff]  }
 0x408   :  { %14424 = vmatprep.subr.bf16.mxu0 %v21603_v30  ;;  %v21652_v30 = vld [vmem:[#allocation5 + $0xc20] ss:$44 sps:$4 sm:$0xff]  }
 0x40a   :  { %14835 = vmatpush1.bf16.msra.mxu1 %v21604_v35  ;;  %v21655_v35 = vld [vmem:[#allocation5 + $0x1770] ss:$44 sps:$4 sm:$0xff]  }
 0x40b   :  { %14425 = vmatpush1.bf16.msra.mxu0 %v21601_v33  ;;  %14836 = vmatprep.subr.bf16.mxu1 %v21612_v41  ;;  %v21660_v33 = vld [vmem:[#allocation5 + $0xc7c] ss:$44 sps:$4 sm:$0xff]   ;;  %v21663_v41 = vld [vmem:[#allocation5 + $0x17cc] ss:$44 sps:$4 sm:$0xff]  }
 0x40c   :  { %14426 = vmatprep.subr.bf16.mxu0 %v21609_v40  ;;  %v21658_v40 = vld [vmem:[#allocation5 + $0xc78] ss:$44 sps:$4 sm:$0xff]  }
 0x40e   :  { %14837 = vmatpush1.bf16.msra.mxu1 %v21610_v45  ;;  %v21661_v45 = vld [vmem:[#allocation5 + $0x17c8] ss:$44 sps:$4 sm:$0xff]  }
 0x40f   :  { %14427 = vmatpush1.bf16.msra.mxu0 %v21607_v8  ;;  %14838 = vmatprep.subr.bf16.mxu1 %v21618_v48  ;;  %v21666_v8 = vld [vmem:[#allocation5 + $0xcd4] ss:$44 sps:$4 sm:$0xff]   ;;  %v21669_v48 = vld [vmem:[#allocation5 + $0x1824] ss:$44 sps:$4 sm:$0xff]  }
 0x410   :  { %14428 = vmatprep.subr.bf16.mxu0 %v21615_v0  ;;  %v21664_v0 = vld [vmem:[#allocation5 + $0xcd0] ss:$44 sps:$4 sm:$0xff]  }
 0x412   :  { %14839 = vmatpush1.bf16.msra.mxu1 %v21616_v50  ;;  %v21667_v50 = vld [vmem:[#allocation5 + $0x1820] ss:$44 sps:$4 sm:$0xff]  }
 0x413   :  { %14429 = vmatpush1.bf16.msra.mxu0 %v21613_v49  ;;  %14840 = vmatprep.subr.bf16.mxu1 %v21624_v53  ;;  %v21672_v49 = vld [vmem:[#allocation5 + $0xd2c] ss:$44 sps:$4 sm:$0xff]   ;;  %v21675_v53 = vld [vmem:[#allocation5 + $0x187c] ss:$44 sps:$4 sm:$0xff]  }
 0x414   :  { %14430 = vmatprep.subr.bf16.mxu0 %v21621_v52  ;;  %v21670_v52 = vld [vmem:[#allocation5 + $0xd28] ss:$44 sps:$4 sm:$0xff]  }
 0x416   :  { %14841 = vmatpush1.bf16.msra.mxu1 %v21622_v57  ;;  %v21673_v57 = vld [vmem:[#allocation5 + $0x1878] ss:$44 sps:$4 sm:$0xff]  }
 0x417   :  { %14431 = vmatpush1.bf16.msra.mxu0 %v21619_v56  ;;  %14842 = vmatprep.subr.bf16.mxu1 %v21630_v62  ;;  %v21678_v56 = vld [vmem:[#allocation5 + $0xd84] ss:$44 sps:$4 sm:$0xff]   ;;  %v21681_v62 = vld [vmem:[#allocation5 + $0x18d4] ss:$44 sps:$4 sm:$0xff]  }
 0x418   :  { %14432 = vmatprep.subr.bf16.mxu0 %v21627_v59  ;;  %v21676_v59 = vld [vmem:[#allocation5 + $0xd80] ss:$44 sps:$4 sm:$0xff]  }
 0x41a   :  { %14843 = vmatpush1.bf16.msra.mxu1 %v21628_v12  ;;  %v21679_v12 = vld [vmem:[#allocation5 + $0x18d0] ss:$44 sps:$4 sm:$0xff]  }
 0x41b   :  { %14433 = vmatpush1.bf16.msra.mxu0 %v21625_v63  ;;  %14853 = vmatprep.subr.bf16.mxu1 %v21636_v3  ;;  %v21684_v63 = vld [vmem:[#allocation5 + $0xddc] ss:$44 sps:$4 sm:$0xff]   ;;  %v21687_v3 = vld [vmem:[#allocation5 + $0x192c] ss:$44 sps:$4 sm:$0xff]  }
 0x41c   :  { %14443 = vmatprep.subr.bf16.mxu0 %v21633_v2  ;;  %v21682_v2 = vld [vmem:[#allocation5 + $0xdd8] ss:$44 sps:$4 sm:$0xff]  }
 0x41d   :  { %14845 = vmatmul.mubr.bf16.vlgmr.msra.gmra.mrb[8].mxu1 %v23651_v7 }
 0x41e   :  { %14435 = vmatmul.mubr.bf16.vlgmr.msra.gmra.mrb[4].mxu0 %v23679_v26  ;;  %14854 = vmatpush1.bf16.msra.mxu1 %v21634_v15  ;;  %v21685_v15 = vld [vmem:[#allocation5 + $0x1928] ss:$44 sps:$4 sm:$0xff]  }
 0x41f   :  { %14444 = vmatpush1.bf16.msra.mxu0 %v21631_v4  ;;  %14855 = vmatprep.subr.bf16.mxu1 %v21642_v5  ;;  %v21690_v4 = vld [vmem:[#allocation5 + $0xe34] ss:$44 sps:$4 sm:$0xff]   ;;  %v21693_v5 = vld [vmem:[#allocation5 + $0x1984] ss:$44 sps:$4 sm:$0xff]  }
 0x420   :  { %14445 = vmatprep.subr.bf16.mxu0 %v21639_v13  ;;  %14475 = vmatprep.mubr.bf16.mxu0 %v23685_v31  ;;  %v21688_v13 = vld [vmem:[#allocation5 + $0xe30] ss:$44 sps:$4 sm:$0xff]  }
 0x421   :  { %14885 = vmatprep.mubr.bf16.mxu1 %v23660_v34 }
 0x422   :  { %14856 = vmatpush1.bf16.msra.mxu1 %v21640_v17  ;;  %v21691_v17 = vld [vmem:[#allocation5 + $0x1980] ss:$44 sps:$4 sm:$0xff]  }
 0x423   :  { %14446 = vmatpush1.bf16.msra.mxu0 %v21637_v36  ;;  %14857 = vmatprep.subr.bf16.mxu1 %v21648_v21  ;;  %v21696_v36 = vld [vmem:[#allocation5 + $0xe8c] ss:$44 sps:$4 sm:$0xff]   ;;  %v21699_v21 = vld [vmem:[#allocation5 + $0x19dc] ss:$44 sps:$4 sm:$0xff]  }
 0x424   :  { %14447 = vmatprep.subr.bf16.mxu0 %v21645_v18  ;;  %v21694_v18 = vld [vmem:[#allocation5 + $0xe88] ss:$44 sps:$4 sm:$0xff]  }
 0x426   :  { %14858 = vmatpush1.bf16.msra.mxu1 %v21646_v24  ;;  %v21697_v24 = vld [vmem:[#allocation5 + $0x19d8] ss:$44 sps:$4 sm:$0xff]  }
 0x427   :  { %14448 = vmatpush1.bf16.msra.mxu0 %v21643_v22  ;;  %14859 = vmatprep.subr.bf16.mxu1 %v21654_v28  ;;  %v21702_v22 = vld [vmem:[#allocation5 + $0xee4] ss:$44 sps:$4 sm:$0xff]   ;;  %v21705_v28 = vld [vmem:[#allocation5 + $0x1a34] ss:$44 sps:$4 sm:$0xff]  }
 0x428   :  { %14449 = vmatprep.subr.bf16.mxu0 %v21651_v25  ;;  %v21700_v25 = vld [vmem:[#allocation5 + $0xee0] ss:$44 sps:$4 sm:$0xff]  }
 0x42a   :  { %14860 = vmatpush1.bf16.msra.mxu1 %v21652_v30  ;;  %v21703_v30 = vld [vmem:[#allocation5 + $0x1a30] ss:$44 sps:$4 sm:$0xff]  }
 0x42b   :  { %14450 = vmatpush1.bf16.msra.mxu0 %v21649_v29  ;;  %14861 = vmatprep.subr.bf16.mxu1 %v21660_v33  ;;  %v21708_v29 = vld [vmem:[#allocation5 + $0xf3c] ss:$44 sps:$4 sm:$0xff]   ;;  %v21711_v33 = vld [vmem:[#allocation5 + $0x1a8c] ss:$44 sps:$4 sm:$0xff]  }
 0x42c   :  { %14451 = vmatprep.subr.bf16.mxu0 %v21657_v19  ;;  %v21706_v19 = vld [vmem:[#allocation5 + $0xf38] ss:$44 sps:$4 sm:$0xff]  }
 0x42e   :  { %14862 = vmatpush1.bf16.msra.mxu1 %v21658_v40  ;;  %v21709_v40 = vld [vmem:[#allocation5 + $0x1a88] ss:$44 sps:$4 sm:$0xff]  }
 0x42f   :  { %14452 = vmatpush1.bf16.msra.mxu0 %v21655_v35  ;;  %14863 = vmatprep.subr.bf16.mxu1 %v21666_v8  ;;  %v21714_v35 = vld [vmem:[#allocation5 + $0xf94] ss:$44 sps:$4 sm:$0xff]   ;;  %v21717_v8 = vld [vmem:[#allocation5 + $0x1ae4] ss:$44 sps:$4 sm:$0xff]  }
 0x430   :  { %14453 = vmatprep.subr.bf16.mxu0 %v21663_v41  ;;  %v21712_v41 = vld [vmem:[#allocation5 + $0xf90] ss:$44 sps:$4 sm:$0xff]  }
 0x432   :  { %14864 = vmatpush1.bf16.msra.mxu1 %v21664_v0  ;;  %v21715_v0 = vld [vmem:[#allocation5 + $0x1ae0] ss:$44 sps:$4 sm:$0xff]  }
 0x433   :  { %14454 = vmatpush1.bf16.msra.mxu0 %v21661_v45  ;;  %14865 = vmatprep.subr.bf16.mxu1 %v21672_v49  ;;  %v21720_v45 = vld [vmem:[#allocation5 + $0xfec] ss:$44 sps:$4 sm:$0xff]   ;;  %v21723_v49 = vld [vmem:[#allocation5 + $0x1b3c] ss:$44 sps:$4 sm:$0xff]  }
 0x434   :  { %14455 = vmatprep.subr.bf16.mxu0 %v21669_v48  ;;  %v21718_v48 = vld [vmem:[#allocation5 + $0xfe8] ss:$44 sps:$4 sm:$0xff]  }
 0x436   :  { %14866 = vmatpush1.bf16.msra.mxu1 %v21670_v52  ;;  %v21721_v52 = vld [vmem:[#allocation5 + $0x1b38] ss:$44 sps:$4 sm:$0xff]  }
 0x437   :  { %14456 = vmatpush1.bf16.msra.mxu0 %v21667_v50  ;;  %14867 = vmatprep.subr.bf16.mxu1 %v21678_v56  ;;  %v21726_v50 = vld [vmem:[#allocation5 + $0x1044] ss:$44 sps:$4 sm:$0xff]   ;;  %v21729_v56 = vld [vmem:[#allocation5 + $0x1b94] ss:$44 sps:$4 sm:$0xff]  }
 0x438   :  { %14457 = vmatprep.subr.bf16.mxu0 %v21675_v53  ;;  %v21724_v53 = vld [vmem:[#allocation5 + $0x1040] ss:$44 sps:$4 sm:$0xff]  }
 0x43a   :  { %14868 = vmatpush1.bf16.msra.mxu1 %v21676_v59  ;;  %v21727_v59 = vld [vmem:[#allocation5 + $0x1b90] ss:$44 sps:$4 sm:$0xff]  }
 0x43b   :  { %14458 = vmatpush1.bf16.msra.mxu0 %v21673_v57  ;;  %14869 = vmatprep.subr.bf16.mxu1 %v21684_v63  ;;  %v21732_v57 = vld [vmem:[#allocation5 + $0x109c] ss:$44 sps:$4 sm:$0xff]   ;;  %v21735_v63 = vld [vmem:[#allocation5 + $0x1bec] ss:$44 sps:$4 sm:$0xff]  }
 0x43c   :  { %14459 = vmatprep.subr.bf16.mxu0 %v21681_v62  ;;  %v21730_v62 = vld [vmem:[#allocation5 + $0x1098] ss:$44 sps:$4 sm:$0xff]  }
 0x43e   :  { %14870 = vmatpush1.bf16.msra.mxu1 %v21682_v2  ;;  %v21733_v2 = vld [vmem:[#allocation5 + $0x1be8] ss:$44 sps:$4 sm:$0xff]  }
 0x43f   :  { %14460 = vmatpush1.bf16.msra.mxu0 %v21679_v12  ;;  %14871 = vmatprep.subr.bf16.mxu1 %v21690_v4  ;;  %v21738_v12 = vld [vmem:[#allocation5 + $0x10f4] ss:$44 sps:$4 sm:$0xff]   ;;  %v21741_v4 = vld [vmem:[#allocation5 + $0x1c44] ss:$44 sps:$4 sm:$0xff]  }
 0x440   :  { %14461 = vmatprep.subr.bf16.mxu0 %v21687_v3  ;;  %v21736_v3 = vld [vmem:[#allocation5 + $0x10f0] ss:$44 sps:$4 sm:$0xff]  }
 0x442   :  { %14872 = vmatpush1.bf16.msra.mxu1 %v21688_v13  ;;  %v21739_v13 = vld [vmem:[#allocation5 + $0x1c40] ss:$44 sps:$4 sm:$0xff]  }
 0x443   :  { %14462 = vmatpush1.bf16.msra.mxu0 %v21685_v15  ;;  %14873 = vmatprep.subr.bf16.mxu1 %v21696_v36  ;;  %v21744_v15 = vld [vmem:[#allocation5 + $0x114c] ss:$44 sps:$4 sm:$0xff]   ;;  %v21747_v36 = vld [vmem:[#allocation5 + $0x1c9c] ss:$44 sps:$4 sm:$0xff]  }
 0x444   :  { %14463 = vmatprep.subr.bf16.mxu0 %v21693_v5  ;;  %v21742_v5 = vld [vmem:[#allocation5 + $0x1148] ss:$44 sps:$4 sm:$0xff]  }
 0x446   :  { %14874 = vmatpush1.bf16.msra.mxu1 %v21694_v18  ;;  %v21745_v18 = vld [vmem:[#allocation5 + $0x1c98] ss:$44 sps:$4 sm:$0xff]  }
 0x447   :  { %14464 = vmatpush1.bf16.msra.mxu0 %v21691_v17  ;;  %14875 = vmatprep.subr.bf16.mxu1 %v21702_v22  ;;  %v21750_v17 = vld [vmem:[#allocation5 + $0x11a4] ss:$44 sps:$4 sm:$0xff]   ;;  %v21753_v22 = vld [vmem:[#allocation5 + $0x1cf4] ss:$44 sps:$4 sm:$0xff]  }
 0x448   :  { %14465 = vmatprep.subr.bf16.mxu0 %v21699_v21  ;;  %v21748_v21 = vld [vmem:[#allocation5 + $0x11a0] ss:$44 sps:$4 sm:$0xff]  }
 0x44a   :  { %14876 = vmatpush1.bf16.msra.mxu1 %v21700_v25  ;;  %v21751_v25 = vld [vmem:[#allocation5 + $0x1cf0] ss:$44 sps:$4 sm:$0xff]  }
 0x44b   :  { %14466 = vmatpush1.bf16.msra.mxu0 %v21697_v24  ;;  %14877 = vmatprep.subr.bf16.mxu1 %v21708_v29  ;;  %v21756_v24 = vld [vmem:[#allocation5 + $0x11fc] ss:$44 sps:$4 sm:$0xff]   ;;  %v21759_v29 = vld [vmem:[#allocation5 + $0x1d4c] ss:$44 sps:$4 sm:$0xff]  }
 0x44c   :  { %14467 = vmatprep.subr.bf16.mxu0 %v21705_v28  ;;  %v21754_v28 = vld [vmem:[#allocation5 + $0x11f8] ss:$44 sps:$4 sm:$0xff]  }
 0x44e   :  { %14878 = vmatpush1.bf16.msra.mxu1 %v21706_v19  ;;  %v21757_v19 = vld [vmem:[#allocation5 + $0x1d48] ss:$44 sps:$4 sm:$0xff]  }
 0x44f   :  { %14468 = vmatpush1.bf16.msra.mxu0 %v21703_v30  ;;  %14879 = vmatprep.subr.bf16.mxu1 %v21714_v35  ;;  %v21762_v30 = vld [vmem:[#allocation5 + $0x1254] ss:$44 sps:$4 sm:$0xff]   ;;  %v21765_v35 = vld [vmem:[#allocation5 + $0x1da4] ss:$44 sps:$4 sm:$0xff]  }
 0x450   :  { %14469 = vmatprep.subr.bf16.mxu0 %v21711_v33  ;;  %v21760_v33 = vld [vmem:[#allocation5 + $0x1250] ss:$44 sps:$4 sm:$0xff]  }
 0x452   :  { %14880 = vmatpush1.bf16.msra.mxu1 %v21712_v41 }
 0x453   :  { %14470 = vmatpush1.bf16.msra.mxu0 %v21709_v40  ;;  %14881 = vmatprep.subr.bf16.mxu1 %v21720_v45  ;;  %v21768_v40 = vld [vmem:[#allocation5 + $0x12ac] ss:$44 sps:$4 sm:$0xff]  }
 0x454   :  { %14471 = vmatprep.subr.bf16.mxu0 %v21717_v8 }
 0x456   :  { %14882 = vmatpush1.bf16.msra.mxu1 %v21718_v48  ;;  %v21766_v48 = vld [vmem:[#allocation5 + $0x12a8] ss:$44 sps:$4 sm:$0xff]  }
 0x457   :  { %14472 = vmatpush1.bf16.msra.mxu0 %v21715_v0  ;;  %14883 = vmatprep.subr.bf16.mxu1 %v21726_v50  ;;  %v21763_v0 = vld [vmem:[#allocation5 + $0x1da0] ss:$44 sps:$4 sm:$0xff]   ;;  %v21771_v50 = vld [vmem:[#allocation5 + $0x1dfc] ss:$44 sps:$4 sm:$0xff]  }
 0x458   :  { %14473 = vmatprep.subr.bf16.mxu0 %v21723_v49 }
 0x45a   :  { %14884 = vmatpush1.bf16.msra.mxu1 %v21724_v53  ;;  %v21769_v53 = vld [vmem:[#allocation5 + $0x1df8] ss:$44 sps:$4 sm:$0xff]  }
 0x45b   :  { %14474 = vmatpush1.bf16.msra.mxu0 %v21721_v52  ;;  %14894 = vmatprep.subr.bf16.mxu1 %v21732_v57  ;;  %v21774_v52 = vld [vmem:[#allocation5 + $0x1304] ss:$44 sps:$4 sm:$0xff]   ;;  %v21777_v57 = vld [vmem:[#allocation5 + $0x1e54] ss:$44 sps:$4 sm:$0xff]  }
 0x45c   :  { %14484 = vmatprep.subr.bf16.mxu0 %v21729_v56  ;;  %v21772_v56 = vld [vmem:[#allocation5 + $0x1300] ss:$44 sps:$4 sm:$0xff]  }
 0x45d   :  { %14886 = vmatmul.mubr.bf16.vlgmr.msra.gmra.mrb[8].mxu1 %v23665_v16 }
 0x45e   :  { %14476 = vmatmul.mubr.bf16.vlgmr.msra.gmra.mrb[4].mxu0 %v23693_v38  ;;  %14895 = vmatpush1.bf16.msra.mxu1 %v21730_v62  ;;  %v21775_v62 = vld [vmem:[#allocation5 + $0x1e50] ss:$44 sps:$4 sm:$0xff]  }
 0x45f   :  { %14485 = vmatpush1.bf16.msra.mxu0 %v21727_v59  ;;  %14896 = vmatprep.subr.bf16.mxu1 %v21738_v12  ;;  %v21780_v59 = vld [vmem:[#allocation5 + $0x135c] ss:$44 sps:$4 sm:$0xff]   ;;  %v21783_v12 = vld [vmem:[#allocation5 + $0x1eac] ss:$44 sps:$4 sm:$0xff]  }
 0x460   :  { %14486 = vmatprep.subr.bf16.mxu0 %v21735_v63  ;;  %14516 = vmatprep.mubr.bf16.mxu0 %v23699_v44  ;;  %v21778_v63 = vld [vmem:[#allocation5 + $0x1358] ss:$44 sps:$4 sm:$0xff]  }
 0x461   :  { %14926 = vmatprep.mubr.bf16.mxu1 %v23671_v20 }
 0x462   :  { %14897 = vmatpush1.bf16.msra.mxu1 %v21736_v3  ;;  %v21781_v3 = vld [vmem:[#allocation5 + $0x1ea8] ss:$44 sps:$4 sm:$0xff]  }
 0x463   :  { %14487 = vmatpush1.bf16.msra.mxu0 %v21733_v2  ;;  %14898 = vmatprep.subr.bf16.mxu1 %v21744_v15  ;;  %v21786_v2 = vld [vmem:[#allocation5 + $0x13b4] ss:$44 sps:$4 sm:$0xff]   ;;  %v21789_v15 = vld [vmem:[#allocation5 + $0x1f04] ss:$44 sps:$4 sm:$0xff]  }
 0x464   :  { %14488 = vmatprep.subr.bf16.mxu0 %v21741_v4  ;;  %v21784_v4 = vld [vmem:[#allocation5 + $0x13b0] ss:$44 sps:$4 sm:$0xff]  }
 0x466   :  { %14899 = vmatpush1.bf16.msra.mxu1 %v21742_v5  ;;  %v21787_v5 = vld [vmem:[#allocation5 + $0x1f00] ss:$44 sps:$4 sm:$0xff]  }
 0x467   :  { %14489 = vmatpush1.bf16.msra.mxu0 %v21739_v13  ;;  %14900 = vmatprep.subr.bf16.mxu1 %v21750_v17  ;;  %v21792_v13 = vld [vmem:[#allocation5 + $0x140c] ss:$44 sps:$4 sm:$0xff]   ;;  %v21795_v17 = vld [vmem:[#allocation5 + $0x1f5c] ss:$44 sps:$4 sm:$0xff]  }
 0x468   :  { %14490 = vmatprep.subr.bf16.mxu0 %v21747_v36  ;;  %v21790_v36 = vld [vmem:[#allocation5 + $0x1408] ss:$44 sps:$4 sm:$0xff]  }
 0x46a   :  { %14901 = vmatpush1.bf16.msra.mxu1 %v21748_v21  ;;  %v21793_v21 = vld [vmem:[#allocation5 + $0x1f58] ss:$44 sps:$4 sm:$0xff]  }
 0x46b   :  { %14491 = vmatpush1.bf16.msra.mxu0 %v21745_v18  ;;  %14902 = vmatprep.subr.bf16.mxu1 %v21756_v24  ;;  %v21798_v18 = vld [vmem:[#allocation5 + $0x1464] ss:$44 sps:$4 sm:$0xff]   ;;  %v21801_v24 = vld [vmem:[#allocation5 + $0x1fb4] ss:$44 sps:$4 sm:$0xff]  }
 0x46c   :  { %14492 = vmatprep.subr.bf16.mxu0 %v21753_v22  ;;  %v21796_v22 = vld [vmem:[#allocation5 + $0x1460] ss:$44 sps:$4 sm:$0xff]  }
 0x46e   :  { %14903 = vmatpush1.bf16.msra.mxu1 %v21754_v28  ;;  %v21799_v28 = vld [vmem:[#allocation5 + $0x1fb0] ss:$44 sps:$4 sm:$0xff]  }
 0x46f   :  { %14493 = vmatpush1.bf16.msra.mxu0 %v21751_v25  ;;  %14904 = vmatprep.subr.bf16.mxu1 %v21762_v30  ;;  %v21804_v25 = vld [vmem:[#allocation5 + $0x14bc] ss:$44 sps:$4 sm:$0xff]   ;;  %v21807_v30 = vld [vmem:[#allocation5 + $0x200c] ss:$44 sps:$4 sm:$0xff]  }
 0x470   :  { %14494 = vmatprep.subr.bf16.mxu0 %v21759_v29  ;;  %v23835_v41 = vpop.f32.mrb[4].mxu1  ;;  %v21802_v29 = vld [vmem:[#allocation5 + $0x14b8] ss:$44 sps:$4 sm:$0xff]  }
 0x471   :  { %v23837_v8 = vpop.f32.mrb[5].mxu1 }
 0x472   :  { %v14276_v45 = vpop.f32.mrb[6].mxu1  ;;  %14905 = vmatpush1.bf16.msra.mxu1 %v21760_v33  ;;  %v21805_v33 = vld [vmem:[#allocation5 + $0x2008] ss:$44 sps:$4 sm:$0xff]  }
 0x473   :  { %14495 = vmatpush1.bf16.msra.mxu0 %v21757_v19  ;;  %v14277_v49 = vpop.f32.mrb[7].mxu1  ;;  %14906 = vmatprep.subr.bf16.mxu1 %v21768_v40  ;;  %v21810_v19 = vld [vmem:[#allocation5 + $0x1514] ss:$44 sps:$4 sm:$0xff]   ;;  %v21813_v40 = vld [vmem:[#allocation5 + $0x2064] ss:$44 sps:$4 sm:$0xff]  }
 0x474   :  { %14496 = vmatprep.subr.bf16.mxu0 %v21765_v35  ;;  %v21808_v35 = vld [vmem:[#allocation5 + $0x1510] ss:$44 sps:$4 sm:$0xff]   ;;  %v21816_v45 = vld [vmem:[#allocation5 + $0x156c] ss:$44 sps:$4 sm:$0xff]  }
 0x475   :  { %v21819_v49 = vld [vmem:[#allocation5 + $0x20bc] ss:$44 sps:$4 sm:$0xff]  }
 0x476   :  { %14907 = vmatpush1.bf16.msra.mxu1 %v21766_v48  ;;  %v21814_v48 = vld [vmem:[#allocation5 + $0x1568] ss:$44 sps:$4 sm:$0xff]  }
 0x477   :  { %14497 = vmatpush1.bf16.msra.mxu0 %v21763_v0  ;;  %14908 = vmatprep.subr.bf16.mxu1 %v21774_v52  ;;  %v21811_v0 = vld [vmem:[#allocation5 + $0x2060] ss:$44 sps:$4 sm:$0xff]   ;;  %v21817_v52 = vld [vmem:[#allocation5 + $0x20b8] ss:$44 sps:$4 sm:$0xff]  }
 0x478   :  { %14498 = vmatprep.subr.bf16.mxu0 %v21771_v50  ;;  %v21822_v50 = vld [vmem:[#allocation5 + $0x15c4] ss:$44 sps:$4 sm:$0xff]  }
 0x47a   :  { %14909 = vmatpush1.bf16.msra.mxu1 %v21772_v56  ;;  %v21825_v56 = vld [vmem:[#allocation5 + $0x2114] ss:$44 sps:$4 sm:$0xff]  }
 0x47b   :  { %14499 = vmatpush1.bf16.msra.mxu0 %v21769_v53  ;;  %14910 = vmatprep.subr.bf16.mxu1 %v21780_v59  ;;  %v21820_v53 = vld [vmem:[#allocation5 + $0x15c0] ss:$44 sps:$4 sm:$0xff]   ;;  %v21823_v59 = vld [vmem:[#allocation5 + $0x2110] ss:$44 sps:$4 sm:$0xff]  }
 0x47c   :  { %14500 = vmatprep.subr.bf16.mxu0 %v21777_v57  ;;  %v21828_v57 = vld [vmem:[#allocation5 + $0x161c] ss:$44 sps:$4 sm:$0xff]  }
 0x47e   :  { %14911 = vmatpush1.bf16.msra.mxu1 %v21778_v63  ;;  %v21831_v63 = vld [vmem:[#allocation5 + $0x216c] ss:$44 sps:$4 sm:$0xff]  }
 0x47f   :  { %14501 = vmatpush1.bf16.msra.mxu0 %v21775_v62  ;;  %14912 = vmatprep.subr.bf16.mxu1 %v21786_v2  ;;  %v21826_v62 = vld [vmem:[#allocation5 + $0x1618] ss:$44 sps:$4 sm:$0xff]   ;;  %v21829_v2 = vld [vmem:[#allocation5 + $0x2168] ss:$44 sps:$4 sm:$0xff]  }
 0x480   :  { %14502 = vmatprep.subr.bf16.mxu0 %v21783_v12  ;;  %v21834_v12 = vld [vmem:[#allocation5 + $0x1674] ss:$44 sps:$4 sm:$0xff]  }
 0x482   :  { %14913 = vmatpush1.bf16.msra.mxu1 %v21784_v4  ;;  %v21837_v4 = vld [vmem:[#allocation5 + $0x21c4] ss:$44 sps:$4 sm:$0xff]  }
 0x483   :  { %14503 = vmatpush1.bf16.msra.mxu0 %v21781_v3  ;;  %14914 = vmatprep.subr.bf16.mxu1 %v21792_v13  ;;  %v21832_v3 = vld [vmem:[#allocation5 + $0x1670] ss:$44 sps:$4 sm:$0xff]   ;;  %v21835_v13 = vld [vmem:[#allocation5 + $0x21c0] ss:$44 sps:$4 sm:$0xff]  }
 0x484   :  { %14504 = vmatprep.subr.bf16.mxu0 %v21789_v15  ;;  %v21840_v15 = vld [vmem:[#allocation5 + $0x16cc] ss:$44 sps:$4 sm:$0xff]  }
 0x486   :  { %14915 = vmatpush1.bf16.msra.mxu1 %v21790_v36  ;;  %v21843_v36 = vld [vmem:[#allocation5 + $0x221c] ss:$44 sps:$4 sm:$0xff]  }
 0x487   :  { %14505 = vmatpush1.bf16.msra.mxu0 %v21787_v5  ;;  %14916 = vmatprep.subr.bf16.mxu1 %v21798_v18  ;;  %v21838_v5 = vld [vmem:[#allocation5 + $0x16c8] ss:$44 sps:$4 sm:$0xff]   ;;  %v21841_v18 = vld [vmem:[#allocation5 + $0x2218] ss:$44 sps:$4 sm:$0xff]  }
 0x488   :  { %14506 = vmatprep.subr.bf16.mxu0 %v21795_v17  ;;  %v21846_v17 = vld [vmem:[#allocation5 + $0x1724] ss:$44 sps:$4 sm:$0xff]  }
 0x48a   :  { %14917 = vmatpush1.bf16.msra.mxu1 %v21796_v22  ;;  %v21849_v22 = vld [vmem:[#allocation5 + $0x2274] ss:$44 sps:$4 sm:$0xff]  }
 0x48b   :  { %14507 = vmatpush1.bf16.msra.mxu0 %v21793_v21  ;;  %14918 = vmatprep.subr.bf16.mxu1 %v21804_v25  ;;  %v21844_v21 = vld [vmem:[#allocation5 + $0x1720] ss:$44 sps:$4 sm:$0xff]   ;;  %v21847_v25 = vld [vmem:[#allocation5 + $0x2270] ss:$44 sps:$4 sm:$0xff]  }
 0x48c   :  { %14508 = vmatprep.subr.bf16.mxu0 %v21801_v24  ;;  %v21852_v24 = vld [vmem:[#allocation5 + $0x177c] ss:$44 sps:$4 sm:$0xff]  }
 0x48e   :  { %14919 = vmatpush1.bf16.msra.mxu1 %v21802_v29  ;;  %v21855_v29 = vld [vmem:[#allocation5 + $0x22cc] ss:$44 sps:$4 sm:$0xff]  }
 0x48f   :  { %14509 = vmatpush1.bf16.msra.mxu0 %v21799_v28  ;;  %14920 = vmatprep.subr.bf16.mxu1 %v21810_v19  ;;  %v21850_v28 = vld [vmem:[#allocation5 + $0x1778] ss:$44 sps:$4 sm:$0xff]   ;;  %v21853_v19 = vld [vmem:[#allocation5 + $0x22c8] ss:$44 sps:$4 sm:$0xff]  }
 0x490   :  { %14510 = vmatprep.subr.bf16.mxu0 %v21807_v30  ;;  %v21858_v30 = vld [vmem:[#allocation5 + $0x17d4] ss:$44 sps:$4 sm:$0xff]  }
 0x492   :  { %14921 = vmatpush1.bf16.msra.mxu1 %v21808_v35  ;;  %v21861_v35 = vld [vmem:[#allocation5 + $0x2324] ss:$44 sps:$4 sm:$0xff]  }
 0x493   :  { %14511 = vmatpush1.bf16.msra.mxu0 %v21805_v33  ;;  %14922 = vmatprep.subr.bf16.mxu1 %v21816_v45  ;;  %v21856_v33 = vld [vmem:[#allocation5 + $0x17d0] ss:$44 sps:$4 sm:$0xff]   ;;  %v21859_v45 = vld [vmem:[#allocation5 + $0x2320] ss:$44 sps:$4 sm:$0xff]  }
 0x494   :  { %14512 = vmatprep.subr.bf16.mxu0 %v21813_v40  ;;  %v21864_v40 = vld [vmem:[#allocation5 + $0x182c] ss:$44 sps:$4 sm:$0xff]  }
 0x496   :  { %14923 = vmatpush1.bf16.msra.mxu1 %v21814_v48  ;;  %v21867_v48 = vld [vmem:[#allocation5 + $0x237c] ss:$44 sps:$4 sm:$0xff]  }
 0x497   :  { %14513 = vmatpush1.bf16.msra.mxu0 %v21811_v0  ;;  %14924 = vmatprep.subr.bf16.mxu1 %v21822_v50  ;;  %v21862_v0 = vld [vmem:[#allocation5 + $0x1828] ss:$44 sps:$4 sm:$0xff]   ;;  %v21865_v50 = vld [vmem:[#allocation5 + $0x2378] ss:$44 sps:$4 sm:$0xff]  }
 0x498   :  { %14514 = vmatprep.subr.bf16.mxu0 %v21819_v49  ;;  %v21870_v49 = vld [vmem:[#allocation5 + $0x1884] ss:$44 sps:$4 sm:$0xff]  }
 0x49a   :  { %14925 = vmatpush1.bf16.msra.mxu1 %v21820_v53  ;;  %v21873_v53 = vld [vmem:[#allocation5 + $0x23d4] ss:$44 sps:$4 sm:$0xff]  }
 0x49b   :  { %14515 = vmatpush1.bf16.msra.mxu0 %v21817_v52  ;;  %14935 = vmatprep.subr.bf16.mxu1 %v21828_v57  ;;  %v21868_v52 = vld [vmem:[#allocation5 + $0x1880] ss:$44 sps:$4 sm:$0xff]   ;;  %v21871_v57 = vld [vmem:[#allocation5 + $0x23d0] ss:$44 sps:$4 sm:$0xff]  }
 0x49c   :  { %14525 = vmatprep.subr.bf16.mxu0 %v21825_v56  ;;  %v21876_v56 = vld [vmem:[#allocation5 + $0x18dc] ss:$44 sps:$4 sm:$0xff]  }
 0x49d   :  { %14927 = vmatmul.mubr.bf16.vlgmr.msra.gmra.mrb[8].mxu1 %v23679_v26 }
 0x49e   :  { %14517 = vmatmul.mubr.bf16.vlgmr.msra.gmra.mrb[4].mxu0 %v23709_v55  ;;  %14936 = vmatpush1.bf16.msra.mxu1 %v21826_v62  ;;  %v21879_v62 = vld [vmem:[#allocation5 + $0x242c] ss:$44 sps:$4 sm:$0xff]  }
 0x49f   :  { %14526 = vmatpush1.bf16.msra.mxu0 %v21823_v59  ;;  %14937 = vmatprep.subr.bf16.mxu1 %v21834_v12  ;;  %v21874_v59 = vld [vmem:[#allocation5 + $0x18d8] ss:$44 sps:$4 sm:$0xff]   ;;  %v21877_v12 = vld [vmem:[#allocation5 + $0x2428] ss:$44 sps:$4 sm:$0xff]  }
 0x4a0   :  { %14527 = vmatprep.subr.bf16.mxu0 %v21831_v63  ;;  %14557 = vmatprep.mubr.bf16.mxu0 %v23713_v60  ;;  %v21882_v63 = vld [vmem:[#allocation5 + $0x1934] ss:$44 sps:$4 sm:$0xff]  }
 0x4a1   :  { %14967 = vmatprep.mubr.bf16.mxu1 %v23685_v31 }
 0x4a2   :  { %14938 = vmatpush1.bf16.msra.mxu1 %v21832_v3  ;;  %v21885_v3 = vld [vmem:[#allocation5 + $0x2484] ss:$44 sps:$4 sm:$0xff]  }
 0x4a3   :  { %14528 = vmatpush1.bf16.msra.mxu0 %v21829_v2  ;;  %14939 = vmatprep.subr.bf16.mxu1 %v21840_v15  ;;  %v21880_v2 = vld [vmem:[#allocation5 + $0x1930] ss:$44 sps:$4 sm:$0xff]   ;;  %v21883_v15 = vld [vmem:[#allocation5 + $0x2480] ss:$44 sps:$4 sm:$0xff]  }
 0x4a4   :  { %14529 = vmatprep.subr.bf16.mxu0 %v21837_v4  ;;  %v21888_v4 = vld [vmem:[#allocation5 + $0x198c] ss:$44 sps:$4 sm:$0xff]  }
 0x4a6   :  { %14940 = vmatpush1.bf16.msra.mxu1 %v21838_v5  ;;  %v21891_v5 = vld [vmem:[#allocation5 + $0x24dc] ss:$44 sps:$4 sm:$0xff]  }
 0x4a7   :  { %14530 = vmatpush1.bf16.msra.mxu0 %v21835_v13  ;;  %14941 = vmatprep.subr.bf16.mxu1 %v21846_v17  ;;  %v21886_v13 = vld [vmem:[#allocation5 + $0x1988] ss:$44 sps:$4 sm:$0xff]   ;;  %v21889_v17 = vld [vmem:[#allocation5 + $0x24d8] ss:$44 sps:$4 sm:$0xff]  }
 0x4a8   :  { %14531 = vmatprep.subr.bf16.mxu0 %v21843_v36  ;;  %v21894_v36 = vld [vmem:[#allocation5 + $0x19e4] ss:$44 sps:$4 sm:$0xff]  }
 0x4aa   :  { %14942 = vmatpush1.bf16.msra.mxu1 %v21844_v21  ;;  %v21897_v21 = vld [vmem:[#allocation5 + $0x2534] ss:$44 sps:$4 sm:$0xff]  }
 0x4ab   :  { %14532 = vmatpush1.bf16.msra.mxu0 %v21841_v18  ;;  %14943 = vmatprep.subr.bf16.mxu1 %v21852_v24  ;;  %v21892_v18 = vld [vmem:[#allocation5 + $0x19e0] ss:$44 sps:$4 sm:$0xff]   ;;  %v21895_v24 = vld [vmem:[#allocation5 + $0x2530] ss:$44 sps:$4 sm:$0xff]  }
 0x4ac   :  { %14533 = vmatprep.subr.bf16.mxu0 %v21849_v22  ;;  %v21900_v22 = vld [vmem:[#allocation5 + $0x1a3c] ss:$44 sps:$4 sm:$0xff]  }
 0x4ae   :  { %14944 = vmatpush1.bf16.msra.mxu1 %v21850_v28  ;;  %v21903_v28 = vld [vmem:[#allocation5 + $0x258c] ss:$44 sps:$4 sm:$0xff]  }
 0x4af   :  { %14534 = vmatpush1.bf16.msra.mxu0 %v21847_v25  ;;  %14945 = vmatprep.subr.bf16.mxu1 %v21858_v30  ;;  %v21898_v25 = vld [vmem:[#allocation5 + $0x1a38] ss:$44 sps:$4 sm:$0xff]   ;;  %v21901_v30 = vld [vmem:[#allocation5 + $0x2588] ss:$44 sps:$4 sm:$0xff]  }
 0x4b0   :  { %14535 = vmatprep.subr.bf16.mxu0 %v21855_v29  ;;  %v21906_v29 = vld [vmem:[#allocation5 + $0x1a94] ss:$44 sps:$4 sm:$0xff]  }
 0x4b2   :  { %14946 = vmatpush1.bf16.msra.mxu1 %v21856_v33  ;;  %v21909_v33 = vld [vmem:[#allocation5 + $0x25e4] ss:$44 sps:$4 sm:$0xff]  }
 0x4b3   :  { %14536 = vmatpush1.bf16.msra.mxu0 %v21853_v19  ;;  %14947 = vmatprep.subr.bf16.mxu1 %v21864_v40  ;;  %v21904_v19 = vld [vmem:[#allocation5 + $0x1a90] ss:$44 sps:$4 sm:$0xff]   ;;  %v21907_v40 = vld [vmem:[#allocation5 + $0x25e0] ss:$44 sps:$4 sm:$0xff]  }
 0x4b4   :  { %14537 = vmatprep.subr.bf16.mxu0 %v21861_v35  ;;  %v21912_v35 = vld [vmem:[#allocation5 + $0x1aec] ss:$44 sps:$4 sm:$0xff]  }
 0x4b6   :  { %14948 = vmatpush1.bf16.msra.mxu1 %v21862_v0  ;;  %v21915_v0 = vld [vmem:[#allocation5 + $0x263c] ss:$44 sps:$4 sm:$0xff]  }
 0x4b7   :  { %14538 = vmatpush1.bf16.msra.mxu0 %v21859_v45  ;;  %14949 = vmatprep.subr.bf16.mxu1 %v21870_v49  ;;  %v21910_v45 = vld [vmem:[#allocation5 + $0x1ae8] ss:$44 sps:$4 sm:$0xff]   ;;  %v21913_v49 = vld [vmem:[#allocation5 + $0x2638] ss:$44 sps:$4 sm:$0xff]  }
 0x4b8   :  { %14539 = vmatprep.subr.bf16.mxu0 %v21867_v48  ;;  %v21918_v48 = vld [vmem:[#allocation5 + $0x1b44] ss:$44 sps:$4 sm:$0xff]  }
 0x4ba   :  { %14950 = vmatpush1.bf16.msra.mxu1 %v21868_v52  ;;  %v21921_v52 = vld [vmem:[#allocation5 + $0x2694] ss:$44 sps:$4 sm:$0xff]  }
 0x4bb   :  { %14540 = vmatpush1.bf16.msra.mxu0 %v21865_v50  ;;  %14951 = vmatprep.subr.bf16.mxu1 %v21876_v56  ;;  %v21916_v50 = vld [vmem:[#allocation5 + $0x1b40] ss:$44 sps:$4 sm:$0xff]   ;;  %v21919_v56 = vld [vmem:[#allocation5 + $0x2690] ss:$44 sps:$4 sm:$0xff]  }
 0x4bc   :  { %14541 = vmatprep.subr.bf16.mxu0 %v21873_v53  ;;  %v21924_v53 = vld [vmem:[#allocation5 + $0x1b9c] ss:$44 sps:$4 sm:$0xff]  }
 0x4be   :  { %14952 = vmatpush1.bf16.msra.mxu1 %v21874_v59  ;;  %v21927_v59 = vld [vmem:[#allocation5 + $0x26ec] ss:$44 sps:$4 sm:$0xff]  }
 0x4bf   :  { %14542 = vmatpush1.bf16.msra.mxu0 %v21871_v57  ;;  %14953 = vmatprep.subr.bf16.mxu1 %v21882_v63  ;;  %v21922_v57 = vld [vmem:[#allocation5 + $0x1b98] ss:$44 sps:$4 sm:$0xff]   ;;  %v21925_v63 = vld [vmem:[#allocation5 + $0x26e8] ss:$44 sps:$4 sm:$0xff]  }
 0x4c0   :  { %14543 = vmatprep.subr.bf16.mxu0 %v21879_v62  ;;  %v21930_v62 = vld [vmem:[#allocation5 + $0x1bf4] ss:$44 sps:$4 sm:$0xff]  }
 0x4c2   :  { %14954 = vmatpush1.bf16.msra.mxu1 %v21880_v2  ;;  %v21933_v2 = vld [vmem:[#allocation5 + $0x2744] ss:$44 sps:$4 sm:$0xff]  }
 0x4c3   :  { %14544 = vmatpush1.bf16.msra.mxu0 %v21877_v12  ;;  %14955 = vmatprep.subr.bf16.mxu1 %v21888_v4  ;;  %v21928_v12 = vld [vmem:[#allocation5 + $0x1bf0] ss:$44 sps:$4 sm:$0xff]   ;;  %v21931_v4 = vld [vmem:[#allocation5 + $0x2740] ss:$44 sps:$4 sm:$0xff]  }
 0x4c4   :  { %14545 = vmatprep.subr.bf16.mxu0 %v21885_v3  ;;  %v21936_v3 = vld [vmem:[#allocation5 + $0x1c4c] ss:$44 sps:$4 sm:$0xff]  }
 0x4c6   :  { %14956 = vmatpush1.bf16.msra.mxu1 %v21886_v13  ;;  %v21939_v13 = vld [vmem:[#allocation5 + $0x279c] ss:$44 sps:$4 sm:$0xff]  }
 0x4c7   :  { %14546 = vmatpush1.bf16.msra.mxu0 %v21883_v15  ;;  %14957 = vmatprep.subr.bf16.mxu1 %v21894_v36  ;;  %v21934_v15 = vld [vmem:[#allocation5 + $0x1c48] ss:$44 sps:$4 sm:$0xff]   ;;  %v21937_v36 = vld [vmem:[#allocation5 + $0x2798] ss:$44 sps:$4 sm:$0xff]  }
 0x4c8   :  { %14547 = vmatprep.subr.bf16.mxu0 %v21891_v5  ;;  %v21942_v5 = vld [vmem:[#allocation5 + $0x1ca4] ss:$44 sps:$4 sm:$0xff]  }
 0x4ca   :  { %14958 = vmatpush1.bf16.msra.mxu1 %v21892_v18  ;;  %v21945_v18 = vld [vmem:[#allocation5 + $0x27f4] ss:$44 sps:$4 sm:$0xff]  }
 0x4cb   :  { %14548 = vmatpush1.bf16.msra.mxu0 %v21889_v17  ;;  %14959 = vmatprep.subr.bf16.mxu1 %v21900_v22  ;;  %v21940_v17 = vld [vmem:[#allocation5 + $0x1ca0] ss:$44 sps:$4 sm:$0xff]   ;;  %v21943_v22 = vld [vmem:[#allocation5 + $0x27f0] ss:$44 sps:$4 sm:$0xff]  }
 0x4cc   :  { %14549 = vmatprep.subr.bf16.mxu0 %v21897_v21  ;;  %v21948_v21 = vld [vmem:[#allocation5 + $0x1cfc] ss:$44 sps:$4 sm:$0xff]  }
 0x4ce   :  { %14960 = vmatpush1.bf16.msra.mxu1 %v21898_v25  ;;  %v21951_v25 = vld [vmem:[#allocation5 + $0x284c] ss:$44 sps:$4 sm:$0xff]  }
 0x4cf   :  { %14550 = vmatpush1.bf16.msra.mxu0 %v21895_v24  ;;  %14961 = vmatprep.subr.bf16.mxu1 %v21906_v29  ;;  %v21946_v24 = vld [vmem:[#allocation5 + $0x1cf8] ss:$44 sps:$4 sm:$0xff]   ;;  %v21949_v29 = vld [vmem:[#allocation5 + $0x2848] ss:$44 sps:$4 sm:$0xff]  }
 0x4d0   :  { %14551 = vmatprep.subr.bf16.mxu0 %v21903_v28  ;;  %v21954_v28 = vld [vmem:[#allocation5 + $0x1d54] ss:$44 sps:$4 sm:$0xff]  }
 0x4d2   :  { %14962 = vmatpush1.bf16.msra.mxu1 %v21904_v19  ;;  %v21957_v19 = vld [vmem:[#allocation5 + $0x28a4] ss:$44 sps:$4 sm:$0xff]  }
 0x4d3   :  { %14552 = vmatpush1.bf16.msra.mxu0 %v21901_v30  ;;  %14963 = vmatprep.subr.bf16.mxu1 %v21912_v35  ;;  %v21952_v30 = vld [vmem:[#allocation5 + $0x1d50] ss:$44 sps:$4 sm:$0xff]   ;;  %v21955_v35 = vld [vmem:[#allocation5 + $0x28a0] ss:$44 sps:$4 sm:$0xff]  }
 0x4d4   :  { %14553 = vmatprep.subr.bf16.mxu0 %v21909_v33  ;;  %v21960_v33 = vld [vmem:[#allocation5 + $0x1dac] ss:$44 sps:$4 sm:$0xff]  }
 0x4d6   :  { %14964 = vmatpush1.bf16.msra.mxu1 %v21910_v45  ;;  %v21963_v45 = vld [vmem:[#allocation5 + $0x28fc] ss:$44 sps:$4 sm:$0xff]  }
 0x4d7   :  { %14554 = vmatpush1.bf16.msra.mxu0 %v21907_v40  ;;  %14965 = vmatprep.subr.bf16.mxu1 %v21918_v48  ;;  %v21958_v40 = vld [vmem:[#allocation5 + $0x1da8] ss:$44 sps:$4 sm:$0xff]   ;;  %v21961_v48 = vld [vmem:[#allocation5 + $0x28f8] ss:$44 sps:$4 sm:$0xff]  }
 0x4d8   :  { %14555 = vmatprep.subr.bf16.mxu0 %v21915_v0  ;;  %v21966_v0 = vld [vmem:[#allocation5 + $0x1e04] ss:$44 sps:$4 sm:$0xff]  }
 0x4da   :  { %14966 = vmatpush1.bf16.msra.mxu1 %v21916_v50  ;;  %v21969_v50 = vld [vmem:[#allocation5 + $0x2954] ss:$44 sps:$4 sm:$0xff]  }
 0x4db   :  { %14556 = vmatpush1.bf16.msra.mxu0 %v21913_v49  ;;  %14976 = vmatprep.subr.bf16.mxu1 %v21924_v53  ;;  %v21964_v49 = vld [vmem:[#allocation5 + $0x1e00] ss:$44 sps:$4 sm:$0xff]   ;;  %v21967_v53 = vld [vmem:[#allocation5 + $0x2950] ss:$44 sps:$4 sm:$0xff]  }
 0x4dc   :  { %14566 = vmatprep.subr.bf16.mxu0 %v21921_v52  ;;  %v21972_v52 = vld [vmem:[#allocation5 + $0x1e5c] ss:$44 sps:$4 sm:$0xff]  }
 0x4dd   :  { %14968 = vmatmul.mubr.bf16.vlgmr.msra.gmra.mrb[8].mxu1 %v23693_v38 }
 0x4de   :  { %14558 = vmatmul.mubr.bf16.vlgmr.msra.gmra.mrb[4].mxu0 %v23723_v9  ;;  %14977 = vmatpush1.bf16.msra.mxu1 %v21922_v57  ;;  %v21975_v57 = vld [vmem:[#allocation5 + $0x29ac] ss:$44 sps:$4 sm:$0xff]  }
 0x4df   :  { %14567 = vmatpush1.bf16.msra.mxu0 %v21919_v56  ;;  %14978 = vmatprep.subr.bf16.mxu1 %v21930_v62  ;;  %v21970_v56 = vld [vmem:[#allocation5 + $0x1e58] ss:$44 sps:$4 sm:$0xff]   ;;  %v21973_v62 = vld [vmem:[#allocation5 + $0x29a8] ss:$44 sps:$4 sm:$0xff]  }
 0x4e0   :  { %14568 = vmatprep.subr.bf16.mxu0 %v21927_v59  ;;  %14598 = vmatprep.mubr.bf16.mxu0 %v23727_v14  ;;  %v21978_v59 = vld [vmem:[#allocation5 + $0x1eb4] ss:$44 sps:$4 sm:$0xff]  }
 0x4e1   :  { %15008 = vmatprep.mubr.bf16.mxu1 %v23699_v44 }
 0x4e2   :  { %14979 = vmatpush1.bf16.msra.mxu1 %v21928_v12  ;;  %v21981_v12 = vld [vmem:[#allocation5 + $0x2a04] ss:$44 sps:$4 sm:$0xff]  }
 0x4e3   :  { %14569 = vmatpush1.bf16.msra.mxu0 %v21925_v63  ;;  %14980 = vmatprep.subr.bf16.mxu1 %v21936_v3  ;;  %v21976_v63 = vld [vmem:[#allocation5 + $0x1eb0] ss:$44 sps:$4 sm:$0xff]   ;;  %v21979_v3 = vld [vmem:[#allocation5 + $0x2a00] ss:$44 sps:$4 sm:$0xff]  }
 0x4e4   :  { %14570 = vmatprep.subr.bf16.mxu0 %v21933_v2  ;;  %v21984_v2 = vld [vmem:[#allocation5 + $0x1f0c] ss:$44 sps:$4 sm:$0xff]  }
 0x4e6   :  { %14981 = vmatpush1.bf16.msra.mxu1 %v21934_v15  ;;  %v21987_v15 = vld [vmem:[#allocation5 + $0x2a5c] ss:$44 sps:$4 sm:$0xff]  }
 0x4e7   :  { %14571 = vmatpush1.bf16.msra.mxu0 %v21931_v4  ;;  %14982 = vmatprep.subr.bf16.mxu1 %v21942_v5  ;;  %v21982_v4 = vld [vmem:[#allocation5 + $0x1f08] ss:$44 sps:$4 sm:$0xff]   ;;  %v21985_v5 = vld [vmem:[#allocation5 + $0x2a58] ss:$44 sps:$4 sm:$0xff]  }
 0x4e8   :  { %14572 = vmatprep.subr.bf16.mxu0 %v21939_v13  ;;  %v21990_v13 = vld [vmem:[#allocation5 + $0x1f64] ss:$44 sps:$4 sm:$0xff]  }
 0x4ea   :  { %14983 = vmatpush1.bf16.msra.mxu1 %v21940_v17  ;;  %v21993_v17 = vld [vmem:[#allocation5 + $0x2ab4] ss:$44 sps:$4 sm:$0xff]  }
 0x4eb   :  { %14573 = vmatpush1.bf16.msra.mxu0 %v21937_v36  ;;  %14984 = vmatprep.subr.bf16.mxu1 %v21948_v21  ;;  %v21988_v36 = vld [vmem:[#allocation5 + $0x1f60] ss:$44 sps:$4 sm:$0xff]   ;;  %v21991_v21 = vld [vmem:[#allocation5 + $0x2ab0] ss:$44 sps:$4 sm:$0xff]  }
 0x4ec   :  { %14574 = vmatprep.subr.bf16.mxu0 %v21945_v18  ;;  %v21996_v18 = vld [vmem:[#allocation5 + $0x1fbc] ss:$44 sps:$4 sm:$0xff]  }
 0x4ee   :  { %14985 = vmatpush1.bf16.msra.mxu1 %v21946_v24  ;;  %v21999_v24 = vld [vmem:[#allocation5 + $0x2b0c] ss:$44 sps:$4 sm:$0xff]  }
 0x4ef   :  { %14575 = vmatpush1.bf16.msra.mxu0 %v21943_v22  ;;  %14986 = vmatprep.subr.bf16.mxu1 %v21954_v28  ;;  %v21994_v22 = vld [vmem:[#allocation5 + $0x1fb8] ss:$44 sps:$4 sm:$0xff]   ;;  %v21997_v28 = vld [vmem:[#allocation5 + $0x2b08] ss:$44 sps:$4 sm:$0xff]  }
 0x4f0   :  { %14576 = vmatprep.subr.bf16.mxu0 %v21951_v25  ;;  %v22002_v25 = vld [vmem:[#allocation5 + $0x2014] ss:$44 sps:$4 sm:$0xff]  }
 0x4f2   :  { %14987 = vmatpush1.bf16.msra.mxu1 %v21952_v30  ;;  %v22005_v30 = vld [vmem:[#allocation5 + $0x2b64] ss:$44 sps:$4 sm:$0xff]  }
 0x4f3   :  { %14577 = vmatpush1.bf16.msra.mxu0 %v21949_v29  ;;  %14988 = vmatprep.subr.bf16.mxu1 %v21960_v33  ;;  %v22000_v29 = vld [vmem:[#allocation5 + $0x2010] ss:$44 sps:$4 sm:$0xff]   ;;  %v22003_v33 = vld [vmem:[#allocation5 + $0x2b60] ss:$44 sps:$4 sm:$0xff]  }
 0x4f4   :  { %14578 = vmatprep.subr.bf16.mxu0 %v21957_v19  ;;  %v22008_v19 = vld [vmem:[#allocation5 + $0x206c] ss:$44 sps:$4 sm:$0xff]  }
 0x4f6   :  { %14989 = vmatpush1.bf16.msra.mxu1 %v21958_v40  ;;  %v22011_v40 = vld [vmem:[#allocation5 + $0x2bbc] ss:$44 sps:$4 sm:$0xff]  }
 0x4f7   :  { %14579 = vmatpush1.bf16.msra.mxu0 %v21955_v35  ;;  %14990 = vmatprep.subr.bf16.mxu1 %v21966_v0  ;;  %v22006_v35 = vld [vmem:[#allocation5 + $0x2068] ss:$44 sps:$4 sm:$0xff]   ;;  %v22009_v0 = vld [vmem:[#allocation5 + $0x2bb8] ss:$44 sps:$4 sm:$0xff]  }
 0x4f8   :  { %14580 = vmatprep.subr.bf16.mxu0 %v21963_v45  ;;  %v22014_v45 = vld [vmem:[#allocation5 + $0x20c4] ss:$44 sps:$4 sm:$0xff]  }
 0x4fa   :  { %14991 = vmatpush1.bf16.msra.mxu1 %v21964_v49  ;;  %v22017_v49 = vld [vmem:[#allocation5 + $0x2c14] ss:$44 sps:$4 sm:$0xff]  }
 0x4fb   :  { %14581 = vmatpush1.bf16.msra.mxu0 %v21961_v48  ;;  %14992 = vmatprep.subr.bf16.mxu1 %v21972_v52  ;;  %v22012_v48 = vld [vmem:[#allocation5 + $0x20c0] ss:$44 sps:$4 sm:$0xff]   ;;  %v22015_v52 = vld [vmem:[#allocation5 + $0x2c10] ss:$44 sps:$4 sm:$0xff]  }
 0x4fc   :  { %14582 = vmatprep.subr.bf16.mxu0 %v21969_v50  ;;  %v22020_v50 = vld [vmem:[#allocation5 + $0x211c] ss:$44 sps:$4 sm:$0xff]  }
 0x4fe   :  { %14993 = vmatpush1.bf16.msra.mxu1 %v21970_v56  ;;  %v22023_v56 = vld [vmem:[#allocation5 + $0x2c6c] ss:$44 sps:$4 sm:$0xff]  }
 0x4ff   :  { %14583 = vmatpush1.bf16.msra.mxu0 %v21967_v53  ;;  %14994 = vmatprep.subr.bf16.mxu1 %v21978_v59  ;;  %v22018_v53 = vld [vmem:[#allocation5 + $0x2118] ss:$44 sps:$4 sm:$0xff]   ;;  %v22021_v59 = vld [vmem:[#allocation5 + $0x2c68] ss:$44 sps:$4 sm:$0xff]  }
 0x500   :  { %14584 = vmatprep.subr.bf16.mxu0 %v21975_v57  ;;  %v22026_v57 = vld [vmem:[#allocation5 + $0x2174] ss:$44 sps:$4 sm:$0xff]  }
 0x502   :  { %14995 = vmatpush1.bf16.msra.mxu1 %v21976_v63  ;;  %v22029_v63 = vld [vmem:[#allocation5 + $0x2cc4] ss:$44 sps:$4 sm:$0xff]  }
 0x503   :  { %14585 = vmatpush1.bf16.msra.mxu0 %v21973_v62  ;;  %14996 = vmatprep.subr.bf16.mxu1 %v21984_v2  ;;  %v22024_v62 = vld [vmem:[#allocation5 + $0x2170] ss:$44 sps:$4 sm:$0xff]   ;;  %v22027_v2 = vld [vmem:[#allocation5 + $0x2cc0] ss:$44 sps:$4 sm:$0xff]  }
 0x504   :  { %14586 = vmatprep.subr.bf16.mxu0 %v21981_v12  ;;  %v22032_v12 = vld [vmem:[#allocation5 + $0x21cc] ss:$44 sps:$4 sm:$0xff]  }
 0x506   :  { %14997 = vmatpush1.bf16.msra.mxu1 %v21982_v4  ;;  %v22035_v4 = vld [vmem:[#allocation5 + $0x2d1c] ss:$44 sps:$4 sm:$0xff]  }
 0x507   :  { %14587 = vmatpush1.bf16.msra.mxu0 %v21979_v3  ;;  %14998 = vmatprep.subr.bf16.mxu1 %v21990_v13  ;;  %v22030_v3 = vld [vmem:[#allocation5 + $0x21c8] ss:$44 sps:$4 sm:$0xff]   ;;  %v22033_v13 = vld [vmem:[#allocation5 + $0x2d18] ss:$44 sps:$4 sm:$0xff]  }
 0x508   :  { %14588 = vmatprep.subr.bf16.mxu0 %v21987_v15  ;;  %v22038_v15 = vld [vmem:[#allocation5 + $0x2224] ss:$44 sps:$4 sm:$0xff]  }
 0x50a   :  { %14999 = vmatpush1.bf16.msra.mxu1 %v21988_v36  ;;  %v22041_v36 = vld [vmem:[#allocation5 + $0x2d74] ss:$44 sps:$4 sm:$0xff]  }
 0x50b   :  { %14589 = vmatpush1.bf16.msra.mxu0 %v21985_v5  ;;  %15000 = vmatprep.subr.bf16.mxu1 %v21996_v18  ;;  %v22036_v5 = vld [vmem:[#allocation5 + $0x2220] ss:$44 sps:$4 sm:$0xff]   ;;  %v22039_v18 = vld [vmem:[#allocation5 + $0x2d70] ss:$44 sps:$4 sm:$0xff]  }
 0x50c   :  { %14590 = vmatprep.subr.bf16.mxu0 %v21993_v17  ;;  %v22044_v17 = vld [vmem:[#allocation5 + $0x227c] ss:$44 sps:$4 sm:$0xff]  }
 0x50e   :  { %15001 = vmatpush1.bf16.msra.mxu1 %v21994_v22  ;;  %v22047_v22 = vld [vmem:[#allocation5 + $0x2dcc] ss:$44 sps:$4 sm:$0xff]  }
 0x50f   :  { %14591 = vmatpush1.bf16.msra.mxu0 %v21991_v21  ;;  %15002 = vmatprep.subr.bf16.mxu1 %v22002_v25  ;;  %v22042_v21 = vld [vmem:[#allocation5 + $0x2278] ss:$44 sps:$4 sm:$0xff]   ;;  %v22045_v25 = vld [vmem:[#allocation5 + $0x2dc8] ss:$44 sps:$4 sm:$0xff]  }
 0x510   :  { %14592 = vmatprep.subr.bf16.mxu0 %v21999_v24  ;;  %v22050_v24 = vld [vmem:[#allocation5 + $0x22d4] ss:$44 sps:$4 sm:$0xff]  }
 0x512   :  { %15003 = vmatpush1.bf16.msra.mxu1 %v22000_v29  ;;  %v22053_v29 = vld [vmem:[#allocation5 + $0x2e24] ss:$44 sps:$4 sm:$0xff]  }
 0x513   :  { %14593 = vmatpush1.bf16.msra.mxu0 %v21997_v28  ;;  %15004 = vmatprep.subr.bf16.mxu1 %v22008_v19  ;;  %v22048_v28 = vld [vmem:[#allocation5 + $0x22d0] ss:$44 sps:$4 sm:$0xff]   ;;  %v22051_v19 = vld [vmem:[#allocation5 + $0x2e20] ss:$44 sps:$4 sm:$0xff]  }
 0x514   :  { %14594 = vmatprep.subr.bf16.mxu0 %v22005_v30  ;;  %v22056_v30 = vld [vmem:[#allocation5 + $0x232c] ss:$44 sps:$4 sm:$0xff]  }
 0x516   :  { %15005 = vmatpush1.bf16.msra.mxu1 %v22006_v35  ;;  %v22059_v35 = vld [vmem:[#allocation5 + $0x2e7c] ss:$44 sps:$4 sm:$0xff]  }
 0x517   :  { %14595 = vmatpush1.bf16.msra.mxu0 %v22003_v33  ;;  %15006 = vmatprep.subr.bf16.mxu1 %v22014_v45  ;;  %v22054_v33 = vld [vmem:[#allocation5 + $0x2328] ss:$44 sps:$4 sm:$0xff]   ;;  %v22057_v45 = vld [vmem:[#allocation5 + $0x2e78] ss:$44 sps:$4 sm:$0xff]  }
 0x518   :  { %14596 = vmatprep.subr.bf16.mxu0 %v22011_v40  ;;  %v22062_v40 = vld [vmem:[#allocation5 + $0x2384] ss:$44 sps:$4 sm:$0xff]  }
 0x51a   :  { %15007 = vmatpush1.bf16.msra.mxu1 %v22012_v48  ;;  %v22065_v48 = vld [vmem:[#allocation5 + $0x2ed4] ss:$44 sps:$4 sm:$0xff]  }
 0x51b   :  { %14597 = vmatpush1.bf16.msra.mxu0 %v22009_v0  ;;  %15017 = vmatprep.subr.bf16.mxu1 %v22020_v50  ;;  %v22060_v0 = vld [vmem:[#allocation5 + $0x2380] ss:$44 sps:$4 sm:$0xff]   ;;  %v22063_v50 = vld [vmem:[#allocation5 + $0x2ed0] ss:$44 sps:$4 sm:$0xff]  }
 0x51c   :  { %14607 = vmatprep.subr.bf16.mxu0 %v22017_v49  ;;  %v22068_v49 = vld [vmem:[#allocation5 + $0x23dc] ss:$44 sps:$4 sm:$0xff]  }
 0x51d   :  { %15009 = vmatmul.mubr.bf16.vlgmr.msra.gmra.mrb[8].mxu1 %v23709_v55 }
 0x51e   :  { %14599 = vmatmul.mubr.bf16.vlgmr.msra.gmra.mrb[4].mxu0 %v23741_v37  ;;  %15018 = vmatpush1.bf16.msra.mxu1 %v22018_v53  ;;  %v22071_v53 = vld [vmem:[#allocation5 + $0x2f2c] ss:$44 sps:$4 sm:$0xff]  }
 0x51f   :  { %14608 = vmatpush1.bf16.msra.mxu0 %v22015_v52  ;;  %15019 = vmatprep.subr.bf16.mxu1 %v22026_v57  ;;  %v22066_v52 = vld [vmem:[#allocation5 + $0x23d8] ss:$44 sps:$4 sm:$0xff]   ;;  %v22069_v57 = vld [vmem:[#allocation5 + $0x2f28] ss:$44 sps:$4 sm:$0xff]  }
 0x520   :  { %14609 = vmatprep.subr.bf16.mxu0 %v22023_v56  ;;  %14639 = vmatprep.mubr.bf16.mxu0 %v23745_v27  ;;  %v22074_v56 = vld [vmem:[#allocation5 + $0x2434] ss:$44 sps:$4 sm:$0xff]  }
 0x521   :  { %15049 = vmatprep.mubr.bf16.mxu1 %v23713_v60 }
 0x522   :  { %15020 = vmatpush1.bf16.msra.mxu1 %v22024_v62  ;;  %v22077_v62 = vld [vmem:[#allocation5 + $0x2f84] ss:$44 sps:$4 sm:$0xff]  }
 0x523   :  { %14610 = vmatpush1.bf16.msra.mxu0 %v22021_v59  ;;  %15021 = vmatprep.subr.bf16.mxu1 %v22032_v12  ;;  %v22072_v59 = vld [vmem:[#allocation5 + $0x2430] ss:$44 sps:$4 sm:$0xff]   ;;  %v22075_v12 = vld [vmem:[#allocation5 + $0x2f80] ss:$44 sps:$4 sm:$0xff]  }
 0x524   :  { %14611 = vmatprep.subr.bf16.mxu0 %v22029_v63  ;;  %v22080_v63 = vld [vmem:[#allocation5 + $0x248c] ss:$44 sps:$4 sm:$0xff]  }
 0x526   :  { %15022 = vmatpush1.bf16.msra.mxu1 %v22030_v3  ;;  %v22083_v3 = vld [vmem:[#allocation5 + $0x2fdc] ss:$44 sps:$4 sm:$0xff]  }
 0x527   :  { %14612 = vmatpush1.bf16.msra.mxu0 %v22027_v2  ;;  %15023 = vmatprep.subr.bf16.mxu1 %v22038_v15  ;;  %v22078_v2 = vld [vmem:[#allocation5 + $0x2488] ss:$44 sps:$4 sm:$0xff]   ;;  %v22081_v15 = vld [vmem:[#allocation5 + $0x2fd8] ss:$44 sps:$4 sm:$0xff]  }
 0x528   :  { %14613 = vmatprep.subr.bf16.mxu0 %v22035_v4  ;;  %v22086_v4 = vld [vmem:[#allocation5 + $0x24e4] ss:$44 sps:$4 sm:$0xff]  }
 0x52a   :  { %15024 = vmatpush1.bf16.msra.mxu1 %v22036_v5  ;;  %v22089_v5 = vld [vmem:[#allocation5 + $0x3034] ss:$44 sps:$4 sm:$0xff]  }
 0x52b   :  { %14614 = vmatpush1.bf16.msra.mxu0 %v22033_v13  ;;  %15025 = vmatprep.subr.bf16.mxu1 %v22044_v17  ;;  %v22084_v13 = vld [vmem:[#allocation5 + $0x24e0] ss:$44 sps:$4 sm:$0xff]   ;;  %v22087_v17 = vld [vmem:[#allocation5 + $0x3030] ss:$44 sps:$4 sm:$0xff]  }
 0x52c   :  { %14615 = vmatprep.subr.bf16.mxu0 %v22041_v36  ;;  %v22092_v36 = vld [vmem:[#allocation5 + $0x253c] ss:$44 sps:$4 sm:$0xff]  }
 0x52e   :  { %15026 = vmatpush1.bf16.msra.mxu1 %v22042_v21  ;;  %v22095_v21 = vld [vmem:[#allocation5 + $0x308c] ss:$44 sps:$4 sm:$0xff]  }
 0x52f   :  { %14616 = vmatpush1.bf16.msra.mxu0 %v22039_v18  ;;  %15027 = vmatprep.subr.bf16.mxu1 %v22050_v24  ;;  %v22090_v18 = vld [vmem:[#allocation5 + $0x2538] ss:$44 sps:$4 sm:$0xff]   ;;  %v22093_v24 = vld [vmem:[#allocation5 + $0x3088] ss:$44 sps:$4 sm:$0xff]  }
 0x530   :  { %14617 = vmatprep.subr.bf16.mxu0 %v22047_v22  ;;  %v22098_v22 = vld [vmem:[#allocation5 + $0x2594] ss:$44 sps:$4 sm:$0xff]  }
 0x532   :  { %15028 = vmatpush1.bf16.msra.mxu1 %v22048_v28  ;;  %v22101_v28 = vld [vmem:[#allocation5 + $0x30e4] ss:$44 sps:$4 sm:$0xff]  }
 0x533   :  { %14618 = vmatpush1.bf16.msra.mxu0 %v22045_v25  ;;  %15029 = vmatprep.subr.bf16.mxu1 %v22056_v30  ;;  %v22096_v25 = vld [vmem:[#allocation5 + $0x2590] ss:$44 sps:$4 sm:$0xff]   ;;  %v22099_v30 = vld [vmem:[#allocation5 + $0x30e0] ss:$44 sps:$4 sm:$0xff]  }
 0x534   :  { %14619 = vmatprep.subr.bf16.mxu0 %v22053_v29  ;;  %v22104_v29 = vld [vmem:[#allocation5 + $0x25ec] ss:$44 sps:$4 sm:$0xff]  }
 0x536   :  { %15030 = vmatpush1.bf16.msra.mxu1 %v22054_v33  ;;  %v22107_v33 = vld [vmem:[#allocation5 + $0x313c] ss:$44 sps:$4 sm:$0xff]  }
 0x537   :  { %14620 = vmatpush1.bf16.msra.mxu0 %v22051_v19  ;;  %15031 = vmatprep.subr.bf16.mxu1 %v22062_v40  ;;  %v22102_v19 = vld [vmem:[#allocation5 + $0x25e8] ss:$44 sps:$4 sm:$0xff]   ;;  %v22105_v40 = vld [vmem:[#allocation5 + $0x3138] ss:$44 sps:$4 sm:$0xff]  }
 0x538   :  { %14621 = vmatprep.subr.bf16.mxu0 %v22059_v35  ;;  %v22110_v35 = vld [vmem:[#allocation5 + $0x2644] ss:$44 sps:$4 sm:$0xff]  }
 0x53a   :  { %15032 = vmatpush1.bf16.msra.mxu1 %v22060_v0  ;;  %v22113_v0 = vld [vmem:[#allocation5 + $0x3194] ss:$44 sps:$4 sm:$0xff]  }
 0x53b   :  { %14622 = vmatpush1.bf16.msra.mxu0 %v22057_v45  ;;  %15033 = vmatprep.subr.bf16.mxu1 %v22068_v49  ;;  %v22108_v45 = vld [vmem:[#allocation5 + $0x2640] ss:$44 sps:$4 sm:$0xff]   ;;  %v22111_v49 = vld [vmem:[#allocation5 + $0x3190] ss:$44 sps:$4 sm:$0xff]  }
 0x53c   :  { %14623 = vmatprep.subr.bf16.mxu0 %v22065_v48  ;;  %v22116_v48 = vld [vmem:[#allocation5 + $0x269c] ss:$44 sps:$4 sm:$0xff]  }
 0x53e   :  { %15034 = vmatpush1.bf16.msra.mxu1 %v22066_v52  ;;  %v22119_v52 = vld [vmem:[#allocation5 + $0x31ec] ss:$44 sps:$4 sm:$0xff]  }
 0x53f   :  { %14624 = vmatpush1.bf16.msra.mxu0 %v22063_v50  ;;  %15035 = vmatprep.subr.bf16.mxu1 %v22074_v56  ;;  %v22114_v50 = vld [vmem:[#allocation5 + $0x2698] ss:$44 sps:$4 sm:$0xff]   ;;  %v22117_v56 = vld [vmem:[#allocation5 + $0x31e8] ss:$44 sps:$4 sm:$0xff]  }
 0x540   :  { %14625 = vmatprep.subr.bf16.mxu0 %v22071_v53  ;;  %v22122_v53 = vld [vmem:[#allocation5 + $0x26f4] ss:$44 sps:$4 sm:$0xff]  }
 0x542   :  { %15036 = vmatpush1.bf16.msra.mxu1 %v22072_v59  ;;  %v22125_v59 = vld [vmem:[#allocation5 + $0x3244] ss:$44 sps:$4 sm:$0xff]  }
 0x543   :  { %14626 = vmatpush1.bf16.msra.mxu0 %v22069_v57  ;;  %15037 = vmatprep.subr.bf16.mxu1 %v22080_v63  ;;  %v22120_v57 = vld [vmem:[#allocation5 + $0x26f0] ss:$44 sps:$4 sm:$0xff]   ;;  %v22123_v63 = vld [vmem:[#allocation5 + $0x3240] ss:$44 sps:$4 sm:$0xff]  }
 0x544   :  { %14627 = vmatprep.subr.bf16.mxu0 %v22077_v62  ;;  %v22128_v62 = vld [vmem:[#allocation5 + $0x274c] ss:$44 sps:$4 sm:$0xff]  }
 0x546   :  { %15038 = vmatpush1.bf16.msra.mxu1 %v22078_v2  ;;  %v22131_v2 = vld [vmem:[#allocation5 + $0x329c] ss:$44 sps:$4 sm:$0xff]  }
 0x547   :  { %14628 = vmatpush1.bf16.msra.mxu0 %v22075_v12  ;;  %15039 = vmatprep.subr.bf16.mxu1 %v22086_v4  ;;  %v22126_v12 = vld [vmem:[#allocation5 + $0x2748] ss:$44 sps:$4 sm:$0xff]   ;;  %v22129_v4 = vld [vmem:[#allocation5 + $0x3298] ss:$44 sps:$4 sm:$0xff]  }
 0x548   :  { %14629 = vmatprep.subr.bf16.mxu0 %v22083_v3  ;;  %v22134_v3 = vld [vmem:[#allocation5 + $0x27a4] ss:$44 sps:$4 sm:$0xff]  }
 0x54a   :  { %15040 = vmatpush1.bf16.msra.mxu1 %v22084_v13  ;;  %v22137_v13 = vld [vmem:[#allocation5 + $0x32f4] ss:$44 sps:$4 sm:$0xff]  }
 0x54b   :  { %14630 = vmatpush1.bf16.msra.mxu0 %v22081_v15  ;;  %15041 = vmatprep.subr.bf16.mxu1 %v22092_v36  ;;  %v22132_v15 = vld [vmem:[#allocation5 + $0x27a0] ss:$44 sps:$4 sm:$0xff]   ;;  %v22135_v36 = vld [vmem:[#allocation5 + $0x32f0] ss:$44 sps:$4 sm:$0xff]  }
 0x54c   :  { %14631 = vmatprep.subr.bf16.mxu0 %v22089_v5  ;;  %v22140_v5 = vld [vmem:[#allocation5 + $0x27fc] ss:$44 sps:$4 sm:$0xff]  }
 0x54e   :  { %15042 = vmatpush1.bf16.msra.mxu1 %v22090_v18  ;;  %v22143_v18 = vld [vmem:[#allocation5 + $0x334c] ss:$44 sps:$4 sm:$0xff]  }
 0x54f   :  { %14632 = vmatpush1.bf16.msra.mxu0 %v22087_v17  ;;  %15043 = vmatprep.subr.bf16.mxu1 %v22098_v22  ;;  %v22138_v17 = vld [vmem:[#allocation5 + $0x27f8] ss:$44 sps:$4 sm:$0xff]   ;;  %v22141_v22 = vld [vmem:[#allocation5 + $0x3348] ss:$44 sps:$4 sm:$0xff]  }
 0x550   :  { %14633 = vmatprep.subr.bf16.mxu0 %v22095_v21  ;;  %v22146_v21 = vld [vmem:[#allocation5 + $0x2854] ss:$44 sps:$4 sm:$0xff]  }
 0x552   :  { %15044 = vmatpush1.bf16.msra.mxu1 %v22096_v25  ;;  %v22149_v25 = vld [vmem:[#allocation5 + $0x33a4] ss:$44 sps:$4 sm:$0xff]  }
 0x553   :  { %14634 = vmatpush1.bf16.msra.mxu0 %v22093_v24  ;;  %15045 = vmatprep.subr.bf16.mxu1 %v22104_v29  ;;  %v22144_v24 = vld [vmem:[#allocation5 + $0x2850] ss:$44 sps:$4 sm:$0xff]   ;;  %v22147_v29 = vld [vmem:[#allocation5 + $0x33a0] ss:$44 sps:$4 sm:$0xff]  }
 0x554   :  { %14635 = vmatprep.subr.bf16.mxu0 %v22101_v28  ;;  %v22152_v28 = vld [vmem:[#allocation5 + $0x28ac] ss:$44 sps:$4 sm:$0xff]  }
 0x556   :  { %15046 = vmatpush1.bf16.msra.mxu1 %v22102_v19  ;;  %v22155_v19 = vld [vmem:[#allocation5 + $0x33fc] ss:$44 sps:$4 sm:$0xff]  }
 0x557   :  { %14636 = vmatpush1.bf16.msra.mxu0 %v22099_v30  ;;  %15047 = vmatprep.subr.bf16.mxu1 %v22110_v35  ;;  %v22150_v30 = vld [vmem:[#allocation5 + $0x28a8] ss:$44 sps:$4 sm:$0xff]   ;;  %v22153_v35 = vld [vmem:[#allocation5 + $0x33f8] ss:$44 sps:$4 sm:$0xff]  }
 0x558   :  { %14637 = vmatprep.subr.bf16.mxu0 %v22107_v33  ;;  %v22158_v33 = vld [vmem:[#allocation5 + $0x2904] ss:$44 sps:$4 sm:$0xff]  }
 0x55a   :  { %15048 = vmatpush1.bf16.msra.mxu1 %v22108_v45  ;;  %v22161_v45 = vld [vmem:[#allocation5 + $0x3454] ss:$44 sps:$4 sm:$0xff]  }
 0x55b   :  { %14638 = vmatpush1.bf16.msra.mxu0 %v22105_v40  ;;  %15058 = vmatprep.subr.bf16.mxu1 %v22116_v48  ;;  %v22156_v40 = vld [vmem:[#allocation5 + $0x2900] ss:$44 sps:$4 sm:$0xff]   ;;  %v22159_v48 = vld [vmem:[#allocation5 + $0x3450] ss:$44 sps:$4 sm:$0xff]  }
 0x55c   :  { %14648 = vmatprep.subr.bf16.mxu0 %v22113_v0  ;;  %v22164_v0 = vld [vmem:[#allocation5 + $0x295c] ss:$44 sps:$4 sm:$0xff]  }
 0x55d   :  { %15050 = vmatmul.mubr.bf16.vlgmr.msra.gmra.mrb[8].mxu1 %v23723_v9 }
 0x55e   :  { %14640 = vmatmul.mubr.bf16.vlgmr.msra.gmra.mrb[4].mxu0 %v23755_v1  ;;  %15059 = vmatpush1.bf16.msra.mxu1 %v22114_v50  ;;  %v22167_v50 = vld [vmem:[#allocation5 + $0x34ac] ss:$44 sps:$4 sm:$0xff]  }
 0x55f   :  { %14649 = vmatpush1.bf16.msra.mxu0 %v22111_v49  ;;  %15060 = vmatprep.subr.bf16.mxu1 %v22122_v53  ;;  %v22162_v49 = vld [vmem:[#allocation5 + $0x2958] ss:$44 sps:$4 sm:$0xff]   ;;  %v22165_v53 = vld [vmem:[#allocation5 + $0x34a8] ss:$44 sps:$4 sm:$0xff]  }
 0x560   :  { %14650 = vmatprep.subr.bf16.mxu0 %v22119_v52  ;;  %14680 = vmatprep.mubr.bf16.mxu0 %v23759_v10  ;;  %v22170_v52 = vld [vmem:[#allocation5 + $0x29b4] ss:$44 sps:$4 sm:$0xff]  }
 0x561   :  { %15090 = vmatprep.mubr.bf16.mxu1 %v23727_v14 }
 0x562   :  { %15061 = vmatpush1.bf16.msra.mxu1 %v22120_v57  ;;  %v22173_v57 = vld [vmem:[#allocation5 + $0x3504] ss:$44 sps:$4 sm:$0xff]  }
 0x563   :  { %14651 = vmatpush1.bf16.msra.mxu0 %v22117_v56  ;;  %15062 = vmatprep.subr.bf16.mxu1 %v22128_v62  ;;  %v22168_v56 = vld [vmem:[#allocation5 + $0x29b0] ss:$44 sps:$4 sm:$0xff]   ;;  %v22171_v62 = vld [vmem:[#allocation5 + $0x3500] ss:$44 sps:$4 sm:$0xff]  }
 0x564   :  { %14652 = vmatprep.subr.bf16.mxu0 %v22125_v59  ;;  %v22176_v59 = vld [vmem:[#allocation5 + $0x2a0c] ss:$44 sps:$4 sm:$0xff]  }
 0x566   :  { %15063 = vmatpush1.bf16.msra.mxu1 %v22126_v12  ;;  %v22179_v12 = vld [vmem:[#allocation5 + $0x355c] ss:$44 sps:$4 sm:$0xff]  }
 0x567   :  { %14653 = vmatpush1.bf16.msra.mxu0 %v22123_v63  ;;  %15064 = vmatprep.subr.bf16.mxu1 %v22134_v3  ;;  %v22174_v63 = vld [vmem:[#allocation5 + $0x2a08] ss:$44 sps:$4 sm:$0xff]   ;;  %v22177_v3 = vld [vmem:[#allocation5 + $0x3558] ss:$44 sps:$4 sm:$0xff]  }
 0x568   :  { %14654 = vmatprep.subr.bf16.mxu0 %v22131_v2  ;;  %v22182_v2 = vld [vmem:[#allocation5 + $0x2a64] ss:$44 sps:$4 sm:$0xff]  }
 0x56a   :  { %15065 = vmatpush1.bf16.msra.mxu1 %v22132_v15  ;;  %v22185_v15 = vld [vmem:[#allocation5 + $0x35b4] ss:$44 sps:$4 sm:$0xff]  }
 0x56b   :  { %14655 = vmatpush1.bf16.msra.mxu0 %v22129_v4  ;;  %15066 = vmatprep.subr.bf16.mxu1 %v22140_v5  ;;  %v22180_v4 = vld [vmem:[#allocation5 + $0x2a60] ss:$44 sps:$4 sm:$0xff]   ;;  %v22183_v5 = vld [vmem:[#allocation5 + $0x35b0] ss:$44 sps:$4 sm:$0xff]  }
 0x56c   :  { %14656 = vmatprep.subr.bf16.mxu0 %v22137_v13  ;;  %v22188_v13 = vld [vmem:[#allocation5 + $0x2abc] ss:$44 sps:$4 sm:$0xff]  }
 0x56e   :  { %15067 = vmatpush1.bf16.msra.mxu1 %v22138_v17  ;;  %v22191_v17 = vld [vmem:[#allocation5 + $0x360c] ss:$44 sps:$4 sm:$0xff]  }
 0x56f   :  { %14657 = vmatpush1.bf16.msra.mxu0 %v22135_v36  ;;  %15068 = vmatprep.subr.bf16.mxu1 %v22146_v21  ;;  %v22186_v36 = vld [vmem:[#allocation5 + $0x2ab8] ss:$44 sps:$4 sm:$0xff]   ;;  %v22189_v21 = vld [vmem:[#allocation5 + $0x3608] ss:$44 sps:$4 sm:$0xff]  }
 0x570   :  { %14658 = vmatprep.subr.bf16.mxu0 %v22143_v18  ;;  %v22194_v18 = vld [vmem:[#allocation5 + $0x2b14] ss:$44 sps:$4 sm:$0xff]  }
 0x572   :  { %15069 = vmatpush1.bf16.msra.mxu1 %v22144_v24  ;;  %v22197_v24 = vld [vmem:[#allocation5 + $0x3664] ss:$44 sps:$4 sm:$0xff]  }
 0x573   :  { %14659 = vmatpush1.bf16.msra.mxu0 %v22141_v22  ;;  %15070 = vmatprep.subr.bf16.mxu1 %v22152_v28  ;;  %v22192_v22 = vld [vmem:[#allocation5 + $0x2b10] ss:$44 sps:$4 sm:$0xff]   ;;  %v22195_v28 = vld [vmem:[#allocation5 + $0x3660] ss:$44 sps:$4 sm:$0xff]  }
 0x574   :  { %14660 = vmatprep.subr.bf16.mxu0 %v22149_v25  ;;  %v22200_v25 = vld [vmem:[#allocation5 + $0x2b6c] ss:$44 sps:$4 sm:$0xff]  }
 0x576   :  { %15071 = vmatpush1.bf16.msra.mxu1 %v22150_v30  ;;  %v22203_v30 = vld [vmem:[#allocation5 + $0x36bc] ss:$44 sps:$4 sm:$0xff]  }
 0x577   :  { %14661 = vmatpush1.bf16.msra.mxu0 %v22147_v29  ;;  %15072 = vmatprep.subr.bf16.mxu1 %v22158_v33  ;;  %v22198_v29 = vld [vmem:[#allocation5 + $0x2b68] ss:$44 sps:$4 sm:$0xff]   ;;  %v22201_v33 = vld [vmem:[#allocation5 + $0x36b8] ss:$44 sps:$4 sm:$0xff]  }
 0x578   :  { %14662 = vmatprep.subr.bf16.mxu0 %v22155_v19  ;;  %v22206_v19 = vld [vmem:[#allocation5 + $0x2bc4] ss:$44 sps:$4 sm:$0xff]  }
 0x57a   :  { %15073 = vmatpush1.bf16.msra.mxu1 %v22156_v40  ;;  %v22209_v40 = vld [vmem:[#allocation5 + $0x3714] ss:$44 sps:$4 sm:$0xff]  }
 0x57b   :  { %14663 = vmatpush1.bf16.msra.mxu0 %v22153_v35  ;;  %15074 = vmatprep.subr.bf16.mxu1 %v22164_v0  ;;  %v22204_v35 = vld [vmem:[#allocation5 + $0x2bc0] ss:$44 sps:$4 sm:$0xff]   ;;  %v22207_v0 = vld [vmem:[#allocation5 + $0x3710] ss:$44 sps:$4 sm:$0xff]  }
 0x57c   :  { %14664 = vmatprep.subr.bf16.mxu0 %v22161_v45  ;;  %v22212_v45 = vld [vmem:[#allocation5 + $0x2c1c] ss:$44 sps:$4 sm:$0xff]  }
 0x57e   :  { %15075 = vmatpush1.bf16.msra.mxu1 %v22162_v49  ;;  %v22215_v49 = vld [vmem:[#allocation5 + $0x376c] ss:$44 sps:$4 sm:$0xff]  }
 0x57f   :  { %14665 = vmatpush1.bf16.msra.mxu0 %v22159_v48  ;;  %15076 = vmatprep.subr.bf16.mxu1 %v22170_v52  ;;  %v22210_v48 = vld [vmem:[#allocation5 + $0x2c18] ss:$44 sps:$4 sm:$0xff]   ;;  %v22213_v52 = vld [vmem:[#allocation5 + $0x3768] ss:$44 sps:$4 sm:$0xff]  }
 0x580   :  { %14666 = vmatprep.subr.bf16.mxu0 %v22167_v50  ;;  %v22218_v50 = vld [vmem:[#allocation5 + $0x2c74] ss:$44 sps:$4 sm:$0xff]  }
 0x582   :  { %15077 = vmatpush1.bf16.msra.mxu1 %v22168_v56  ;;  %v22221_v56 = vld [vmem:[#allocation5 + $0x37c4] ss:$44 sps:$4 sm:$0xff]  }
 0x583   :  { %14667 = vmatpush1.bf16.msra.mxu0 %v22165_v53  ;;  %15078 = vmatprep.subr.bf16.mxu1 %v22176_v59  ;;  %v22216_v53 = vld [vmem:[#allocation5 + $0x2c70] ss:$44 sps:$4 sm:$0xff]   ;;  %v22219_v59 = vld [vmem:[#allocation5 + $0x37c0] ss:$44 sps:$4 sm:$0xff]  }
 0x584   :  { %14668 = vmatprep.subr.bf16.mxu0 %v22173_v57  ;;  %v22224_v57 = vld [vmem:[#allocation5 + $0x2ccc] ss:$44 sps:$4 sm:$0xff]  }
 0x586   :  { %15079 = vmatpush1.bf16.msra.mxu1 %v22174_v63  ;;  %v22227_v63 = vld [vmem:[#allocation5 + $0x381c] ss:$44 sps:$4 sm:$0xff]  }
 0x587   :  { %14669 = vmatpush1.bf16.msra.mxu0 %v22171_v62  ;;  %15080 = vmatprep.subr.bf16.mxu1 %v22182_v2  ;;  %v22222_v62 = vld [vmem:[#allocation5 + $0x2cc8] ss:$44 sps:$4 sm:$0xff]   ;;  %v22225_v2 = vld [vmem:[#allocation5 + $0x3818] ss:$44 sps:$4 sm:$0xff]  }
 0x588   :  { %14670 = vmatprep.subr.bf16.mxu0 %v22179_v12  ;;  %v22230_v12 = vld [vmem:[#allocation5 + $0x2d24] ss:$44 sps:$4 sm:$0xff]  }
 0x58a   :  { %15081 = vmatpush1.bf16.msra.mxu1 %v22180_v4  ;;  %v22233_v4 = vld [vmem:[#allocation5 + $0x3874] ss:$44 sps:$4 sm:$0xff]  }
 0x58b   :  { %14671 = vmatpush1.bf16.msra.mxu0 %v22177_v3  ;;  %15082 = vmatprep.subr.bf16.mxu1 %v22188_v13  ;;  %v22228_v3 = vld [vmem:[#allocation5 + $0x2d20] ss:$44 sps:$4 sm:$0xff]   ;;  %v22231_v13 = vld [vmem:[#allocation5 + $0x3870] ss:$44 sps:$4 sm:$0xff]  }
 0x58c   :  { %14672 = vmatprep.subr.bf16.mxu0 %v22185_v15  ;;  %v22236_v15 = vld [vmem:[#allocation5 + $0x2d7c] ss:$44 sps:$4 sm:$0xff]  }
 0x58e   :  { %15083 = vmatpush1.bf16.msra.mxu1 %v22186_v36  ;;  %v22239_v36 = vld [vmem:[#allocation5 + $0x38cc] ss:$44 sps:$4 sm:$0xff]  }
 0x58f   :  { %14673 = vmatpush1.bf16.msra.mxu0 %v22183_v5  ;;  %15084 = vmatprep.subr.bf16.mxu1 %v22194_v18  ;;  %v22234_v5 = vld [vmem:[#allocation5 + $0x2d78] ss:$44 sps:$4 sm:$0xff]   ;;  %v22237_v18 = vld [vmem:[#allocation5 + $0x38c8] ss:$44 sps:$4 sm:$0xff]  }
 0x590   :  { %14674 = vmatprep.subr.bf16.mxu0 %v22191_v17  ;;  %v22242_v17 = vld [vmem:[#allocation5 + $0x2dd4] ss:$44 sps:$4 sm:$0xff]  }
 0x592   :  { %15085 = vmatpush1.bf16.msra.mxu1 %v22192_v22  ;;  %v22245_v22 = vld [vmem:[#allocation5 + $0x3924] ss:$44 sps:$4 sm:$0xff]  }
 0x593   :  { %14675 = vmatpush1.bf16.msra.mxu0 %v22189_v21  ;;  %15086 = vmatprep.subr.bf16.mxu1 %v22200_v25  ;;  %v22240_v21 = vld [vmem:[#allocation5 + $0x2dd0] ss:$44 sps:$4 sm:$0xff]   ;;  %v22243_v25 = vld [vmem:[#allocation5 + $0x3920] ss:$44 sps:$4 sm:$0xff]  }
 0x594   :  { %14676 = vmatprep.subr.bf16.mxu0 %v22197_v24  ;;  %v22248_v24 = vld [vmem:[#allocation5 + $0x2e2c] ss:$44 sps:$4 sm:$0xff]  }
 0x596   :  { %15087 = vmatpush1.bf16.msra.mxu1 %v22198_v29  ;;  %v22251_v29 = vld [vmem:[#allocation5 + $0x397c] ss:$44 sps:$4 sm:$0xff]  }
 0x597   :  { %14677 = vmatpush1.bf16.msra.mxu0 %v22195_v28  ;;  %15088 = vmatprep.subr.bf16.mxu1 %v22206_v19  ;;  %v22246_v28 = vld [vmem:[#allocation5 + $0x2e28] ss:$44 sps:$4 sm:$0xff]   ;;  %v22249_v19 = vld [vmem:[#allocation5 + $0x3978] ss:$44 sps:$4 sm:$0xff]  }
 0x598   :  { %14678 = vmatprep.subr.bf16.mxu0 %v22203_v30  ;;  %v22254_v30 = vld [vmem:[#allocation5 + $0x2e84] ss:$44 sps:$4 sm:$0xff]  }
 0x59a   :  { %15089 = vmatpush1.bf16.msra.mxu1 %v22204_v35  ;;  %v22257_v35 = vld [vmem:[#allocation5 + $0x39d4] ss:$44 sps:$4 sm:$0xff]  }
 0x59b   :  { %14679 = vmatpush1.bf16.msra.mxu0 %v22201_v33  ;;  %15099 = vmatprep.subr.bf16.mxu1 %v22212_v45  ;;  %v22252_v33 = vld [vmem:[#allocation5 + $0x2e80] ss:$44 sps:$4 sm:$0xff]   ;;  %v22255_v45 = vld [vmem:[#allocation5 + $0x39d0] ss:$44 sps:$4 sm:$0xff]  }
 0x59c   :  { %14689 = vmatprep.subr.bf16.mxu0 %v22209_v40  ;;  %v22260_v40 = vld [vmem:[#allocation5 + $0x2edc] ss:$44 sps:$4 sm:$0xff]  }
 0x59d   :  { %15091 = vmatmul.mubr.bf16.vlgmr.msra.gmra.mrb[8].mxu1 %v23741_v37 }
 0x59e   :  { %14681 = vmatmul.mubr.bf16.vlgmr.msra.gmra.mrb[4].mxu0 %v23767_v42  ;;  %15100 = vmatpush1.bf16.msra.mxu1 %v22210_v48  ;;  %v22263_v48 = vld [vmem:[#allocation5 + $0x3a2c] ss:$44 sps:$4 sm:$0xff]  }
 0x59f   :  { %14690 = vmatpush1.bf16.msra.mxu0 %v22207_v0  ;;  %15101 = vmatprep.subr.bf16.mxu1 %v22218_v50  ;;  %v22258_v0 = vld [vmem:[#allocation5 + $0x2ed8] ss:$44 sps:$4 sm:$0xff]   ;;  %v22261_v50 = vld [vmem:[#allocation5 + $0x3a28] ss:$44 sps:$4 sm:$0xff]  }
 0x5a0   :  { %14691 = vmatprep.subr.bf16.mxu0 %v22215_v49  ;;  %14721 = vmatprep.mubr.bf16.mxu0 %v23773_v46  ;;  %v22266_v49 = vld [vmem:[#allocation5 + $0x2f34] ss:$44 sps:$4 sm:$0xff]  }
 0x5a1   :  { %15131 = vmatprep.mubr.bf16.mxu1 %v23745_v27 }
 0x5a2   :  { %15102 = vmatpush1.bf16.msra.mxu1 %v22216_v53  ;;  %v22269_v53 = vld [vmem:[#allocation5 + $0x3a84] ss:$44 sps:$4 sm:$0xff]  }
 0x5a3   :  { %14692 = vmatpush1.bf16.msra.mxu0 %v22213_v52  ;;  %15103 = vmatprep.subr.bf16.mxu1 %v22224_v57  ;;  %v22264_v52 = vld [vmem:[#allocation5 + $0x2f30] ss:$44 sps:$4 sm:$0xff]   ;;  %v22267_v57 = vld [vmem:[#allocation5 + $0x3a80] ss:$44 sps:$4 sm:$0xff]  }
 0x5a4   :  { %14693 = vmatprep.subr.bf16.mxu0 %v22221_v56  ;;  %v22272_v56 = vld [vmem:[#allocation5 + $0x2f8c] ss:$44 sps:$4 sm:$0xff]  }
 0x5a6   :  { %15104 = vmatpush1.bf16.msra.mxu1 %v22222_v62  ;;  %v22275_v62 = vld [vmem:[#allocation5 + $0x3adc] ss:$44 sps:$4 sm:$0xff]  }
 0x5a7   :  { %14694 = vmatpush1.bf16.msra.mxu0 %v22219_v59  ;;  %15105 = vmatprep.subr.bf16.mxu1 %v22230_v12  ;;  %v22270_v59 = vld [vmem:[#allocation5 + $0x2f88] ss:$44 sps:$4 sm:$0xff]   ;;  %v22273_v12 = vld [vmem:[#allocation5 + $0x3ad8] ss:$44 sps:$4 sm:$0xff]  }
 0x5a8   :  { %14695 = vmatprep.subr.bf16.mxu0 %v22227_v63  ;;  %v22278_v63 = vld [vmem:[#allocation5 + $0x2fe4] ss:$44 sps:$4 sm:$0xff]  }
 0x5aa   :  { %15106 = vmatpush1.bf16.msra.mxu1 %v22228_v3  ;;  %v22281_v3 = vld [vmem:[#allocation5 + $0x3b34] ss:$44 sps:$4 sm:$0xff]  }
 0x5ab   :  { %14696 = vmatpush1.bf16.msra.mxu0 %v22225_v2  ;;  %15107 = vmatprep.subr.bf16.mxu1 %v22236_v15  ;;  %v22276_v2 = vld [vmem:[#allocation5 + $0x2fe0] ss:$44 sps:$4 sm:$0xff]   ;;  %v22279_v15 = vld [vmem:[#allocation5 + $0x3b30] ss:$44 sps:$4 sm:$0xff]  }
 0x5ac   :  { %14697 = vmatprep.subr.bf16.mxu0 %v22233_v4  ;;  %v22284_v4 = vld [vmem:[#allocation5 + $0x303c] ss:$44 sps:$4 sm:$0xff]  }
 0x5ae   :  { %15108 = vmatpush1.bf16.msra.mxu1 %v22234_v5  ;;  %v22287_v5 = vld [vmem:[#allocation5 + $0x3b8c] ss:$44 sps:$4 sm:$0xff]  }
 0x5af   :  { %14698 = vmatpush1.bf16.msra.mxu0 %v22231_v13  ;;  %15109 = vmatprep.subr.bf16.mxu1 %v22242_v17  ;;  %v22282_v13 = vld [vmem:[#allocation5 + $0x3038] ss:$44 sps:$4 sm:$0xff]   ;;  %v22285_v17 = vld [vmem:[#allocation5 + $0x3b88] ss:$44 sps:$4 sm:$0xff]  }
 0x5b0   :  { %14699 = vmatprep.subr.bf16.mxu0 %v22239_v36  ;;  %v22290_v36 = vld [vmem:[#allocation5 + $0x3094] ss:$44 sps:$4 sm:$0xff]  }
 0x5b2   :  { %15110 = vmatpush1.bf16.msra.mxu1 %v22240_v21  ;;  %v22293_v21 = vld [vmem:[#allocation5 + $0x3be4] ss:$44 sps:$4 sm:$0xff]  }
 0x5b3   :  { %14700 = vmatpush1.bf16.msra.mxu0 %v22237_v18  ;;  %15111 = vmatprep.subr.bf16.mxu1 %v22248_v24  ;;  %v22288_v18 = vld [vmem:[#allocation5 + $0x3090] ss:$44 sps:$4 sm:$0xff]   ;;  %v22291_v24 = vld [vmem:[#allocation5 + $0x3be0] ss:$44 sps:$4 sm:$0xff]  }
 0x5b4   :  { %14701 = vmatprep.subr.bf16.mxu0 %v22245_v22  ;;  %v22296_v22 = vld [vmem:[#allocation5 + $0x30ec] ss:$44 sps:$4 sm:$0xff]  }
 0x5b6   :  { %15112 = vmatpush1.bf16.msra.mxu1 %v22246_v28  ;;  %v22299_v28 = vld [vmem:[#allocation5 + $0x3c3c] ss:$44 sps:$4 sm:$0xff]  }
 0x5b7   :  { %14702 = vmatpush1.bf16.msra.mxu0 %v22243_v25  ;;  %15113 = vmatprep.subr.bf16.mxu1 %v22254_v30  ;;  %v22294_v25 = vld [vmem:[#allocation5 + $0x30e8] ss:$44 sps:$4 sm:$0xff]   ;;  %v22297_v30 = vld [vmem:[#allocation5 + $0x3c38] ss:$44 sps:$4 sm:$0xff]  }
 0x5b8   :  { %14703 = vmatprep.subr.bf16.mxu0 %v22251_v29  ;;  %v22302_v29 = vld [vmem:[#allocation5 + $0x3144] ss:$44 sps:$4 sm:$0xff]  }
 0x5ba   :  { %15114 = vmatpush1.bf16.msra.mxu1 %v22252_v33  ;;  %v22305_v33 = vld [vmem:[#allocation5 + $0x3c94] ss:$44 sps:$4 sm:$0xff]  }
 0x5bb   :  { %14704 = vmatpush1.bf16.msra.mxu0 %v22249_v19  ;;  %15115 = vmatprep.subr.bf16.mxu1 %v22260_v40  ;;  %v22300_v19 = vld [vmem:[#allocation5 + $0x3140] ss:$44 sps:$4 sm:$0xff]   ;;  %v22303_v40 = vld [vmem:[#allocation5 + $0x3c90] ss:$44 sps:$4 sm:$0xff]  }
 0x5bc   :  { %14705 = vmatprep.subr.bf16.mxu0 %v22257_v35  ;;  %v22308_v35 = vld [vmem:[#allocation5 + $0x319c] ss:$44 sps:$4 sm:$0xff]  }
 0x5be   :  { %15116 = vmatpush1.bf16.msra.mxu1 %v22258_v0  ;;  %v22311_v0 = vld [vmem:[#allocation5 + $0x3cec] ss:$44 sps:$4 sm:$0xff]  }
 0x5bf   :  { %14706 = vmatpush1.bf16.msra.mxu0 %v22255_v45  ;;  %15117 = vmatprep.subr.bf16.mxu1 %v22266_v49  ;;  %v22306_v45 = vld [vmem:[#allocation5 + $0x3198] ss:$44 sps:$4 sm:$0xff]   ;;  %v22309_v49 = vld [vmem:[#allocation5 + $0x3ce8] ss:$44 sps:$4 sm:$0xff]  }
 0x5c0   :  { %14707 = vmatprep.subr.bf16.mxu0 %v22263_v48  ;;  %v22314_v48 = vld [vmem:[#allocation5 + $0x31f4] ss:$44 sps:$4 sm:$0xff]  }
 0x5c2   :  { %15118 = vmatpush1.bf16.msra.mxu1 %v22264_v52  ;;  %v22317_v52 = vld [vmem:[#allocation5 + $0x3d44] ss:$44 sps:$4 sm:$0xff]  }
 0x5c3   :  { %14708 = vmatpush1.bf16.msra.mxu0 %v22261_v50  ;;  %15119 = vmatprep.subr.bf16.mxu1 %v22272_v56  ;;  %v22312_v50 = vld [vmem:[#allocation5 + $0x31f0] ss:$44 sps:$4 sm:$0xff]   ;;  %v22315_v56 = vld [vmem:[#allocation5 + $0x3d40] ss:$44 sps:$4 sm:$0xff]  }
 0x5c4   :  { %14709 = vmatprep.subr.bf16.mxu0 %v22269_v53  ;;  %v22320_v53 = vld [vmem:[#allocation5 + $0x324c] ss:$44 sps:$4 sm:$0xff]  }
 0x5c6   :  { %15120 = vmatpush1.bf16.msra.mxu1 %v22270_v59  ;;  %v22323_v59 = vld [vmem:[#allocation5 + $0x3d9c] ss:$44 sps:$4 sm:$0xff]  }
 0x5c7   :  { %14710 = vmatpush1.bf16.msra.mxu0 %v22267_v57  ;;  %15121 = vmatprep.subr.bf16.mxu1 %v22278_v63  ;;  %v22318_v57 = vld [vmem:[#allocation5 + $0x3248] ss:$44 sps:$4 sm:$0xff]   ;;  %v22321_v63 = vld [vmem:[#allocation5 + $0x3d98] ss:$44 sps:$4 sm:$0xff]  }
 0x5c8   :  { %14711 = vmatprep.subr.bf16.mxu0 %v22275_v62  ;;  %v22326_v62 = vld [vmem:[#allocation5 + $0x32a4] ss:$44 sps:$4 sm:$0xff]  }
 0x5ca   :  { %15122 = vmatpush1.bf16.msra.mxu1 %v22276_v2  ;;  %v22329_v2 = vld [vmem:[#allocation5 + $0x3df4] ss:$44 sps:$4 sm:$0xff]  }
 0x5cb   :  { %14712 = vmatpush1.bf16.msra.mxu0 %v22273_v12  ;;  %15123 = vmatprep.subr.bf16.mxu1 %v22284_v4  ;;  %v22324_v12 = vld [vmem:[#allocation5 + $0x32a0] ss:$44 sps:$4 sm:$0xff]   ;;  %v22327_v4 = vld [vmem:[#allocation5 + $0x3df0] ss:$44 sps:$4 sm:$0xff]  }
 0x5cc   :  { %14713 = vmatprep.subr.bf16.mxu0 %v22281_v3  ;;  %v22332_v3 = vld [vmem:[#allocation5 + $0x32fc] ss:$44 sps:$4 sm:$0xff]  }
 0x5ce   :  { %15124 = vmatpush1.bf16.msra.mxu1 %v22282_v13  ;;  %v22335_v13 = vld [vmem:[#allocation5 + $0x3e4c] ss:$44 sps:$4 sm:$0xff]  }
 0x5cf   :  { %14714 = vmatpush1.bf16.msra.mxu0 %v22279_v15  ;;  %15125 = vmatprep.subr.bf16.mxu1 %v22290_v36  ;;  %v22330_v15 = vld [vmem:[#allocation5 + $0x32f8] ss:$44 sps:$4 sm:$0xff]   ;;  %v22333_v36 = vld [vmem:[#allocation5 + $0x3e48] ss:$44 sps:$4 sm:$0xff]  }
 0x5d0   :  { %14715 = vmatprep.subr.bf16.mxu0 %v22287_v5  ;;  %v22338_v5 = vld [vmem:[#allocation5 + $0x3354] ss:$44 sps:$4 sm:$0xff]  }
 0x5d2   :  { %15126 = vmatpush1.bf16.msra.mxu1 %v22288_v18  ;;  %v22341_v18 = vld [vmem:[#allocation5 + $0x3ea4] ss:$44 sps:$4 sm:$0xff]  }
 0x5d3   :  { %14716 = vmatpush1.bf16.msra.mxu0 %v22285_v17  ;;  %15127 = vmatprep.subr.bf16.mxu1 %v22296_v22  ;;  %v22336_v17 = vld [vmem:[#allocation5 + $0x3350] ss:$44 sps:$4 sm:$0xff]   ;;  %v22339_v22 = vld [vmem:[#allocation5 + $0x3ea0] ss:$44 sps:$4 sm:$0xff]  }
 0x5d4   :  { %14717 = vmatprep.subr.bf16.mxu0 %v22293_v21  ;;  %v22344_v21 = vld [vmem:[#allocation5 + $0x33ac] ss:$44 sps:$4 sm:$0xff]  }
 0x5d6   :  { %15128 = vmatpush1.bf16.msra.mxu1 %v22294_v25  ;;  %v22347_v25 = vld [vmem:[#allocation5 + $0x3efc] ss:$44 sps:$4 sm:$0xff]  }
 0x5d7   :  { %14718 = vmatpush1.bf16.msra.mxu0 %v22291_v24  ;;  %15129 = vmatprep.subr.bf16.mxu1 %v22302_v29  ;;  %v22342_v24 = vld [vmem:[#allocation5 + $0x33a8] ss:$44 sps:$4 sm:$0xff]   ;;  %v22345_v29 = vld [vmem:[#allocation5 + $0x3ef8] ss:$44 sps:$4 sm:$0xff]  }
 0x5d8   :  { %14719 = vmatprep.subr.bf16.mxu0 %v22299_v28  ;;  %v22350_v28 = vld [vmem:[#allocation5 + $0x3404] ss:$44 sps:$4 sm:$0xff]  }
 0x5da   :  { %15130 = vmatpush1.bf16.msra.mxu1 %v22300_v19  ;;  %v22353_v19 = vld [vmem:[#allocation5 + $0x3f54] ss:$44 sps:$4 sm:$0xff]  }
 0x5db   :  { %14720 = vmatpush1.bf16.msra.mxu0 %v22297_v30  ;;  %15140 = vmatprep.subr.bf16.mxu1 %v22308_v35  ;;  %v22348_v30 = vld [vmem:[#allocation5 + $0x3400] ss:$44 sps:$4 sm:$0xff]   ;;  %v22351_v35 = vld [vmem:[#allocation5 + $0x3f50] ss:$44 sps:$4 sm:$0xff]  }
 0x5dc   :  { %14730 = vmatprep.subr.bf16.mxu0 %v22305_v33  ;;  %v22356_v33 = vld [vmem:[#allocation5 + $0x345c] ss:$44 sps:$4 sm:$0xff]  }
 0x5dd   :  { %15132 = vmatmul.mubr.bf16.vlgmr.msra.gmra.mrb[8].mxu1 %v23755_v1 }
 0x5de   :  { %14722 = vmatmul.mubr.bf16.vlgmr.msra.gmra.mrb[4].mxu0 %v23783_v54  ;;  %15141 = vmatpush1.bf16.msra.mxu1 %v22306_v45  ;;  %v22359_v45 = vld [vmem:[#allocation5 + $0x3fac] ss:$44 sps:$4 sm:$0xff]  }
 0x5df   :  { %14731 = vmatpush1.bf16.msra.mxu0 %v22303_v40  ;;  %15142 = vmatprep.subr.bf16.mxu1 %v22314_v48  ;;  %v22354_v40 = vld [vmem:[#allocation5 + $0x3458] ss:$44 sps:$4 sm:$0xff]   ;;  %v22357_v48 = vld [vmem:[#allocation5 + $0x3fa8] ss:$44 sps:$4 sm:$0xff]  }
 0x5e0   :  { %14732 = vmatprep.subr.bf16.mxu0 %v22311_v0  ;;  %14762 = vmatprep.mubr.bf16.mxu0 %v23787_v23  ;;  %v22362_v0 = vld [vmem:[#allocation5 + $0x34b4] ss:$44 sps:$4 sm:$0xff]  }
 0x5e1   :  { %15172 = vmatprep.mubr.bf16.mxu1 %v23759_v10 }
 0x5e2   :  { %15143 = vmatpush1.bf16.msra.mxu1 %v22312_v50  ;;  %v22365_v50 = vld [vmem:[#allocation5 + $0x4004] ss:$44 sps:$4 sm:$0xff]  }
 0x5e3   :  { %14733 = vmatpush1.bf16.msra.mxu0 %v22309_v49  ;;  %15144 = vmatprep.subr.bf16.mxu1 %v22320_v53  ;;  %v22360_v49 = vld [vmem:[#allocation5 + $0x34b0] ss:$44 sps:$4 sm:$0xff]   ;;  %v22363_v53 = vld [vmem:[#allocation5 + $0x4000] ss:$44 sps:$4 sm:$0xff]  }
 0x5e4   :  { %14734 = vmatprep.subr.bf16.mxu0 %v22317_v52  ;;  %v22368_v52 = vld [vmem:[#allocation5 + $0x350c] ss:$44 sps:$4 sm:$0xff]  }
 0x5e6   :  { %15145 = vmatpush1.bf16.msra.mxu1 %v22318_v57  ;;  %v22371_v57 = vld [vmem:[#allocation5 + $0x405c] ss:$44 sps:$4 sm:$0xff]  }
 0x5e7   :  { %14735 = vmatpush1.bf16.msra.mxu0 %v22315_v56  ;;  %15146 = vmatprep.subr.bf16.mxu1 %v22326_v62  ;;  %v22366_v56 = vld [vmem:[#allocation5 + $0x3508] ss:$44 sps:$4 sm:$0xff]   ;;  %v22369_v62 = vld [vmem:[#allocation5 + $0x4058] ss:$44 sps:$4 sm:$0xff]  }
 0x5e8   :  { %14736 = vmatprep.subr.bf16.mxu0 %v22323_v59  ;;  %v22374_v59 = vld [vmem:[#allocation5 + $0x3564] ss:$44 sps:$4 sm:$0xff]  }
 0x5ea   :  { %15147 = vmatpush1.bf16.msra.mxu1 %v22324_v12  ;;  %v22377_v12 = vld [vmem:[#allocation5 + $0x40b4] ss:$44 sps:$4 sm:$0xff]  }
 0x5eb   :  { %14737 = vmatpush1.bf16.msra.mxu0 %v22321_v63  ;;  %15148 = vmatprep.subr.bf16.mxu1 %v22332_v3  ;;  %v22372_v63 = vld [vmem:[#allocation5 + $0x3560] ss:$44 sps:$4 sm:$0xff]   ;;  %v22375_v3 = vld [vmem:[#allocation5 + $0x40b0] ss:$44 sps:$4 sm:$0xff]  }
 0x5ec   :  { %14738 = vmatprep.subr.bf16.mxu0 %v22329_v2  ;;  %v22380_v2 = vld [vmem:[#allocation5 + $0x35bc] ss:$44 sps:$4 sm:$0xff]  }
 0x5ee   :  { %15149 = vmatpush1.bf16.msra.mxu1 %v22330_v15  ;;  %v22383_v15 = vld [vmem:[#allocation5 + $0x410c] ss:$44 sps:$4 sm:$0xff]  }
 0x5ef   :  { %14739 = vmatpush1.bf16.msra.mxu0 %v22327_v4  ;;  %15150 = vmatprep.subr.bf16.mxu1 %v22338_v5  ;;  %v22378_v4 = vld [vmem:[#allocation5 + $0x35b8] ss:$44 sps:$4 sm:$0xff]   ;;  %v22381_v5 = vld [vmem:[#allocation5 + $0x4108] ss:$44 sps:$4 sm:$0xff]  }
 0x5f0   :  { %14740 = vmatprep.subr.bf16.mxu0 %v22335_v13  ;;  %v22386_v13 = vld [vmem:[#allocation5 + $0x3614] ss:$44 sps:$4 sm:$0xff]  }
 0x5f2   :  { %15151 = vmatpush1.bf16.msra.mxu1 %v22336_v17  ;;  %v22389_v17 = vld [vmem:[#allocation5 + $0x4164] ss:$44 sps:$4 sm:$0xff]  }
 0x5f3   :  { %14741 = vmatpush1.bf16.msra.mxu0 %v22333_v36  ;;  %15152 = vmatprep.subr.bf16.mxu1 %v22344_v21  ;;  %v22384_v36 = vld [vmem:[#allocation5 + $0x3610] ss:$44 sps:$4 sm:$0xff]   ;;  %v22387_v21 = vld [vmem:[#allocation5 + $0x4160] ss:$44 sps:$4 sm:$0xff]  }
 0x5f4   :  { %14742 = vmatprep.subr.bf16.mxu0 %v22341_v18  ;;  %v22392_v18 = vld [vmem:[#allocation5 + $0x366c] ss:$44 sps:$4 sm:$0xff]  }
 0x5f6   :  { %15153 = vmatpush1.bf16.msra.mxu1 %v22342_v24  ;;  %v22395_v24 = vld [vmem:[#allocation5 + $0x41bc] ss:$44 sps:$4 sm:$0xff]  }
 0x5f7   :  { %14743 = vmatpush1.bf16.msra.mxu0 %v22339_v22  ;;  %15154 = vmatprep.subr.bf16.mxu1 %v22350_v28  ;;  %v22390_v22 = vld [vmem:[#allocation5 + $0x3668] ss:$44 sps:$4 sm:$0xff]   ;;  %v22393_v28 = vld [vmem:[#allocation5 + $0x41b8] ss:$44 sps:$4 sm:$0xff]  }
 0x5f8   :  { %14744 = vmatprep.subr.bf16.mxu0 %v22347_v25  ;;  %v22398_v25 = vld [vmem:[#allocation5 + $0x36c4] ss:$44 sps:$4 sm:$0xff]  }
 0x5fa   :  { %15155 = vmatpush1.bf16.msra.mxu1 %v22348_v30  ;;  %v22401_v30 = vld [vmem:[#allocation5 + $0x371c] ss:$44 sps:$4 sm:$0xff]  }
 0x5fb   :  { %14745 = vmatpush1.bf16.msra.mxu0 %v22345_v29  ;;  %15156 = vmatprep.subr.bf16.mxu1 %v22356_v33  ;;  %v22396_v29 = vld [vmem:[#allocation5 + $0x36c0] ss:$44 sps:$4 sm:$0xff]   ;;  %v22399_v33 = vld [vmem:[#allocation5 + $0x3718] ss:$44 sps:$4 sm:$0xff]  }
 0x5fc   :  { %14746 = vmatprep.subr.bf16.mxu0 %v22353_v19  ;;  %v22404_v19 = vld [vmem:[#allocation5 + $0x24] ss:$44 sps:$4 sm:$0xff]  }
 0x5fe   :  { %15157 = vmatpush1.bf16.msra.mxu1 %v22354_v40  ;;  %v22407_v40 = vld [vmem:[#allocation5 + $0x3774] ss:$44 sps:$4 sm:$0xff]  }
 0x5ff   :  { %14747 = vmatpush1.bf16.msra.mxu0 %v22351_v35  ;;  %15158 = vmatprep.subr.bf16.mxu1 %v22362_v0  ;;  %v22402_v35 = vld [vmem:[#allocation5 + $0x20] ss:$44 sps:$4 sm:$0xff]   ;;  %v22405_v0 = vld [vmem:[#allocation5 + $0x3770] ss:$44 sps:$4 sm:$0xff]  }
 0x600   :  { %14748 = vmatprep.subr.bf16.mxu0 %v22359_v45  ;;  %v22410_v45 = vld [vmem:[#allocation5 + $0x7c] ss:$44 sps:$4 sm:$0xff]  }
 0x602   :  { %15159 = vmatpush1.bf16.msra.mxu1 %v22360_v49  ;;  %v22413_v49 = vld [vmem:[#allocation5 + $0x37cc] ss:$44 sps:$4 sm:$0xff]  }
 0x603   :  { %14749 = vmatpush1.bf16.msra.mxu0 %v22357_v48  ;;  %15160 = vmatprep.subr.bf16.mxu1 %v22368_v52  ;;  %v22408_v48 = vld [vmem:[#allocation5 + $0x78] ss:$44 sps:$4 sm:$0xff]   ;;  %v22411_v52 = vld [vmem:[#allocation5 + $0x37c8] ss:$44 sps:$4 sm:$0xff]  }
 0x604   :  { %14750 = vmatprep.subr.bf16.mxu0 %v22365_v50  ;;  %v22416_v50 = vld [vmem:[#allocation5 + $0xd4] ss:$44 sps:$4 sm:$0xff]  }
 0x606   :  { %15161 = vmatpush1.bf16.msra.mxu1 %v22366_v56  ;;  %v22419_v56 = vld [vmem:[#allocation5 + $0x3824] ss:$44 sps:$4 sm:$0xff]  }
 0x607   :  { %14751 = vmatpush1.bf16.msra.mxu0 %v22363_v53  ;;  %15162 = vmatprep.subr.bf16.mxu1 %v22374_v59  ;;  %v22414_v53 = vld [vmem:[#allocation5 + $0xd0] ss:$44 sps:$4 sm:$0xff]   ;;  %v22417_v59 = vld [vmem:[#allocation5 + $0x3820] ss:$44 sps:$4 sm:$0xff]  }
 0x608   :  { %14752 = vmatprep.subr.bf16.mxu0 %v22371_v57  ;;  %v22422_v57 = vld [vmem:[#allocation5 + $0x12c] ss:$44 sps:$4 sm:$0xff]  }
 0x60a   :  { %15163 = vmatpush1.bf16.msra.mxu1 %v22372_v63  ;;  %v22425_v63 = vld [vmem:[#allocation5 + $0x387c] ss:$44 sps:$4 sm:$0xff]  }
 0x60b   :  { %14753 = vmatpush1.bf16.msra.mxu0 %v22369_v62  ;;  %15164 = vmatprep.subr.bf16.mxu1 %v22380_v2  ;;  %v22420_v62 = vld [vmem:[#allocation5 + $0x128] ss:$44 sps:$4 sm:$0xff]   ;;  %v22423_v2 = vld [vmem:[#allocation5 + $0x3878] ss:$44 sps:$4 sm:$0xff]  }
 0x60c   :  { %14754 = vmatprep.subr.bf16.mxu0 %v22377_v12  ;;  %v22428_v12 = vld [vmem:[#allocation5 + $0x184] ss:$44 sps:$4 sm:$0xff]  }
 0x60e   :  { %15165 = vmatpush1.bf16.msra.mxu1 %v22378_v4  ;;  %v22431_v4 = vld [vmem:[#allocation5 + $0x38d4] ss:$44 sps:$4 sm:$0xff]  }
 0x60f   :  { %14755 = vmatpush1.bf16.msra.mxu0 %v22375_v3  ;;  %15166 = vmatprep.subr.bf16.mxu1 %v22386_v13  ;;  %v22426_v3 = vld [vmem:[#allocation5 + $0x180] ss:$44 sps:$4 sm:$0xff]   ;;  %v22429_v13 = vld [vmem:[#allocation5 + $0x38d0] ss:$44 sps:$4 sm:$0xff]  }
 0x610   :  { %14756 = vmatprep.subr.bf16.mxu0 %v22383_v15  ;;  %v22434_v15 = vld [vmem:[#allocation5 + $0x1dc] ss:$44 sps:$4 sm:$0xff]  }
 0x612   :  { %15167 = vmatpush1.bf16.msra.mxu1 %v22384_v36  ;;  %v22437_v36 = vld [vmem:[#allocation5 + $0x392c] ss:$44 sps:$4 sm:$0xff]  }
 0x613   :  { %14757 = vmatpush1.bf16.msra.mxu0 %v22381_v5  ;;  %15168 = vmatprep.subr.bf16.mxu1 %v22392_v18  ;;  %v22432_v5 = vld [vmem:[#allocation5 + $0x1d8] ss:$44 sps:$4 sm:$0xff]   ;;  %v22435_v18 = vld [vmem:[#allocation5 + $0x3928] ss:$44 sps:$4 sm:$0xff]  }
 0x614   :  { %14758 = vmatprep.subr.bf16.mxu0 %v22389_v17  ;;  %v22440_v17 = vld [vmem:[#allocation5 + $0x234] ss:$44 sps:$4 sm:$0xff]  }
 0x616   :  { %15169 = vmatpush1.bf16.msra.mxu1 %v22390_v22  ;;  %v22443_v22 = vld [vmem:[#allocation5 + $0x3984] ss:$44 sps:$4 sm:$0xff]  }
 0x617   :  { %14759 = vmatpush1.bf16.msra.mxu0 %v22387_v21  ;;  %15170 = vmatprep.subr.bf16.mxu1 %v22398_v25  ;;  %v22438_v21 = vld [vmem:[#allocation5 + $0x230] ss:$44 sps:$4 sm:$0xff]   ;;  %v22441_v25 = vld [vmem:[#allocation5 + $0x3980] ss:$44 sps:$4 sm:$0xff]  }
 0x618   :  { %14760 = vmatprep.subr.bf16.mxu0 %v22395_v24  ;;  %v22446_v24 = vld [vmem:[#allocation5 + $0x28c] ss:$44 sps:$4 sm:$0xff]  }
 0x61a   :  { %15171 = vmatpush1.bf16.msra.mxu1 %v22396_v29  ;;  %v22449_v29 = vld [vmem:[#allocation5 + $0x39dc] ss:$44 sps:$4 sm:$0xff]  }
 0x61b   :  { %14761 = vmatpush1.bf16.msra.mxu0 %v22393_v28  ;;  %15181 = vmatprep.subr.bf16.mxu1 %v22401_v30  ;;  %v22444_v28 = vld [vmem:[#allocation5 + $0x288] ss:$44 sps:$4 sm:$0xff]   ;;  %v22452_v30 = vld [vmem:[#allocation5 + $0x2e4] ss:$44 sps:$4 sm:$0xff]  }
 0x61c   :  { %15263 = vmatprep.subr.bf16.mxu0 %v22404_v19  ;;  %v22447_v19 = vld [vmem:[#allocation5 + $0x39d8] ss:$44 sps:$4 sm:$0xff]  }
 0x61d   :  { %15173 = vmatmul.mubr.bf16.vlgmr.msra.gmra.mrb[8].mxu1 %v23767_v42 }
 0x61e   :  { %14763 = vmatmul.mubr.bf16.vlgmr.msra.gmra.mrb[4].mxu0 %v23795_v39  ;;  %15182 = vmatpush1.bf16.msra.mxu1 %v22399_v33  ;;  %v22450_v33 = vld [vmem:[#allocation5 + $0x2e0] ss:$44 sps:$4 sm:$0xff]  }
 0x61f   :  { %15264 = vmatpush1.bf16.msra.mxu0 %v22402_v35  ;;  %15183 = vmatprep.subr.bf16.mxu1 %v22407_v40  ;;  %v22455_v35 = vld [vmem:[#allocation5 + $0x3a34] ss:$44 sps:$4 sm:$0xff]   ;;  %v22458_v40 = vld [vmem:[#allocation5 + $0x33c] ss:$44 sps:$4 sm:$0xff]  }
 0x620   :  { %15265 = vmatprep.subr.bf16.mxu0 %v22410_v45  ;;  %15213 = vmatprep.mubr.bf16.mxu1 %v23773_v46  ;;  %v22453_v45 = vld [vmem:[#allocation5 + $0x3a30] ss:$44 sps:$4 sm:$0xff]  }
 0x621   :  { %15295 = vmatprep.mubr.bf16.mxu0 %v23643_v47 }
 0x622   :  { %15184 = vmatpush1.bf16.msra.mxu1 %v22405_v0  ;;  %v22456_v0 = vld [vmem:[#allocation5 + $0x338] ss:$44 sps:$4 sm:$0xff]  }
 0x623   :  { %15266 = vmatpush1.bf16.msra.mxu0 %v22408_v48  ;;  %15185 = vmatprep.subr.bf16.mxu1 %v22413_v49  ;;  %v22461_v48 = vld [vmem:[#allocation5 + $0x3a8c] ss:$44 sps:$4 sm:$0xff]   ;;  %v22464_v49 = vld [vmem:[#allocation5 + $0x394] ss:$44 sps:$4 sm:$0xff]  }
 0x624   :  { %15267 = vmatprep.subr.bf16.mxu0 %v22416_v50  ;;  %v22459_v50 = vld [vmem:[#allocation5 + $0x3a88] ss:$44 sps:$4 sm:$0xff]  }
 0x626   :  { %15186 = vmatpush1.bf16.msra.mxu1 %v22411_v52  ;;  %v22462_v52 = vld [vmem:[#allocation5 + $0x390] ss:$44 sps:$4 sm:$0xff]  }
 0x627   :  { %15268 = vmatpush1.bf16.msra.mxu0 %v22414_v53  ;;  %15187 = vmatprep.subr.bf16.mxu1 %v22419_v56  ;;  %v22467_v53 = vld [vmem:[#allocation5 + $0x3ae4] ss:$44 sps:$4 sm:$0xff]   ;;  %v22470_v56 = vld [vmem:[#allocation5 + $0x3ec] ss:$44 sps:$4 sm:$0xff]  }
 0x628   :  { %15269 = vmatprep.subr.bf16.mxu0 %v22422_v57  ;;  %v22465_v57 = vld [vmem:[#allocation5 + $0x3ae0] ss:$44 sps:$4 sm:$0xff]  }
 0x62a   :  { %15188 = vmatpush1.bf16.msra.mxu1 %v22417_v59  ;;  %v22468_v59 = vld [vmem:[#allocation5 + $0x3e8] ss:$44 sps:$4 sm:$0xff]  }
 0x62b   :  { %15270 = vmatpush1.bf16.msra.mxu0 %v22420_v62  ;;  %15189 = vmatprep.subr.bf16.mxu1 %v22425_v63  ;;  %v22473_v62 = vld [vmem:[#allocation5 + $0x3b3c] ss:$44 sps:$4 sm:$0xff]   ;;  %v22476_v63 = vld [vmem:[#allocation5 + $0x444] ss:$44 sps:$4 sm:$0xff]  }
 0x62c   :  { %15271 = vmatprep.subr.bf16.mxu0 %v22428_v12  ;;  %v22471_v12 = vld [vmem:[#allocation5 + $0x3b38] ss:$44 sps:$4 sm:$0xff]  }
 0x62e   :  { %15190 = vmatpush1.bf16.msra.mxu1 %v22423_v2  ;;  %v22474_v2 = vld [vmem:[#allocation5 + $0x440] ss:$44 sps:$4 sm:$0xff]  }
 0x62f   :  { %15272 = vmatpush1.bf16.msra.mxu0 %v22426_v3  ;;  %15191 = vmatprep.subr.bf16.mxu1 %v22431_v4  ;;  %v22479_v3 = vld [vmem:[#allocation5 + $0x3b94] ss:$44 sps:$4 sm:$0xff]   ;;  %v22482_v4 = vld [vmem:[#allocation5 + $0x49c] ss:$44 sps:$4 sm:$0xff]  }
 0x630   :  { %15273 = vmatprep.subr.bf16.mxu0 %v22434_v15  ;;  %v22477_v15 = vld [vmem:[#allocation5 + $0x3b90] ss:$44 sps:$4 sm:$0xff]  }
 0x632   :  { %15192 = vmatpush1.bf16.msra.mxu1 %v22429_v13  ;;  %v22480_v13 = vld [vmem:[#allocation5 + $0x498] ss:$44 sps:$4 sm:$0xff]  }
 0x633   :  { %15274 = vmatpush1.bf16.msra.mxu0 %v22432_v5  ;;  %15193 = vmatprep.subr.bf16.mxu1 %v22437_v36  ;;  %v22485_v5 = vld [vmem:[#allocation5 + $0x3bec] ss:$44 sps:$4 sm:$0xff]   ;;  %v22488_v36 = vld [vmem:[#allocation5 + $0x4f4] ss:$44 sps:$4 sm:$0xff]  }
 0x634   :  { %15275 = vmatprep.subr.bf16.mxu0 %v22440_v17  ;;  %v22483_v17 = vld [vmem:[#allocation5 + $0x3be8] ss:$44 sps:$4 sm:$0xff]  }
 0x636   :  { %15194 = vmatpush1.bf16.msra.mxu1 %v22435_v18  ;;  %v22486_v18 = vld [vmem:[#allocation5 + $0x4f0] ss:$44 sps:$4 sm:$0xff]  }
 0x637   :  { %15276 = vmatpush1.bf16.msra.mxu0 %v22438_v21  ;;  %15195 = vmatprep.subr.bf16.mxu1 %v22443_v22  ;;  %v22491_v21 = vld [vmem:[#allocation5 + $0x3c44] ss:$44 sps:$4 sm:$0xff]   ;;  %v22494_v22 = vld [vmem:[#allocation5 + $0x54c] ss:$44 sps:$4 sm:$0xff]  }
 0x638   :  { %15277 = vmatprep.subr.bf16.mxu0 %v22446_v24  ;;  %v22489_v24 = vld [vmem:[#allocation5 + $0x3c40] ss:$44 sps:$4 sm:$0xff]  }
 0x63a   :  { %15196 = vmatpush1.bf16.msra.mxu1 %v22441_v25  ;;  %v22492_v25 = vld [vmem:[#allocation5 + $0x548] ss:$44 sps:$4 sm:$0xff]  }
 0x63b   :  { %15278 = vmatpush1.bf16.msra.mxu0 %v22444_v28  ;;  %15197 = vmatprep.subr.bf16.mxu1 %v22449_v29  ;;  %v22497_v28 = vld [vmem:[#allocation5 + $0x3c9c] ss:$44 sps:$4 sm:$0xff]   ;;  %v22500_v29 = vld [vmem:[#allocation5 + $0x5a4] ss:$44 sps:$4 sm:$0xff]  }
 0x63c   :  { %15279 = vmatprep.subr.bf16.mxu0 %v22452_v30  ;;  %v22495_v30 = vld [vmem:[#allocation5 + $0x3c98] ss:$44 sps:$4 sm:$0xff]  }
 0x63e   :  { %15198 = vmatpush1.bf16.msra.mxu1 %v22447_v19  ;;  %v22498_v19 = vld [vmem:[#allocation5 + $0x5a0] ss:$44 sps:$4 sm:$0xff]  }
 0x63f   :  { %15280 = vmatpush1.bf16.msra.mxu0 %v22450_v33  ;;  %15199 = vmatprep.subr.bf16.mxu1 %v22455_v35  ;;  %v22503_v33 = vld [vmem:[#allocation5 + $0x3cf4] ss:$44 sps:$4 sm:$0xff]   ;;  %v22506_v35 = vld [vmem:[#allocation5 + $0x5fc] ss:$44 sps:$4 sm:$0xff]  }
 0x640   :  { %15281 = vmatprep.subr.bf16.mxu0 %v22458_v40  ;;  %v22501_v40 = vld [vmem:[#allocation5 + $0x3cf0] ss:$44 sps:$4 sm:$0xff]  }
 0x642   :  { %15200 = vmatpush1.bf16.msra.mxu1 %v22453_v45  ;;  %v22504_v45 = vld [vmem:[#allocation5 + $0x5f8] ss:$44 sps:$4 sm:$0xff]  }
 0x643   :  { %15282 = vmatpush1.bf16.msra.mxu0 %v22456_v0  ;;  %15201 = vmatprep.subr.bf16.mxu1 %v22461_v48  ;;  %v22509_v0 = vld [vmem:[#allocation5 + $0x3d4c] ss:$44 sps:$4 sm:$0xff]   ;;  %v22512_v48 = vld [vmem:[#allocation5 + $0x654] ss:$44 sps:$4 sm:$0xff]  }
 0x644   :  { %15283 = vmatprep.subr.bf16.mxu0 %v22464_v49  ;;  %v22507_v49 = vld [vmem:[#allocation5 + $0x3d48] ss:$44 sps:$4 sm:$0xff]  }
 0x646   :  { %15202 = vmatpush1.bf16.msra.mxu1 %v22459_v50  ;;  %v22510_v50 = vld [vmem:[#allocation5 + $0x650] ss:$44 sps:$4 sm:$0xff]  }
 0x647   :  { %15284 = vmatpush1.bf16.msra.mxu0 %v22462_v52  ;;  %15203 = vmatprep.subr.bf16.mxu1 %v22467_v53  ;;  %v22515_v52 = vld [vmem:[#allocation5 + $0x3da4] ss:$44 sps:$4 sm:$0xff]   ;;  %v22518_v53 = vld [vmem:[#allocation5 + $0x6ac] ss:$44 sps:$4 sm:$0xff]  }
 0x648   :  { %15285 = vmatprep.subr.bf16.mxu0 %v22470_v56  ;;  %v22513_v56 = vld [vmem:[#allocation5 + $0x3da0] ss:$44 sps:$4 sm:$0xff]  }
 0x64a   :  { %15204 = vmatpush1.bf16.msra.mxu1 %v22465_v57  ;;  %v22516_v57 = vld [vmem:[#allocation5 + $0x6a8] ss:$44 sps:$4 sm:$0xff]  }
 0x64b   :  { %15286 = vmatpush1.bf16.msra.mxu0 %v22468_v59  ;;  %15205 = vmatprep.subr.bf16.mxu1 %v22473_v62  ;;  %v22521_v59 = vld [vmem:[#allocation5 + $0x3dfc] ss:$44 sps:$4 sm:$0xff]   ;;  %v22524_v62 = vld [vmem:[#allocation5 + $0x704] ss:$44 sps:$4 sm:$0xff]  }
 0x64c   :  { %15287 = vmatprep.subr.bf16.mxu0 %v22476_v63  ;;  %v22519_v63 = vld [vmem:[#allocation5 + $0x3df8] ss:$44 sps:$4 sm:$0xff]  }
 0x64e   :  { %15206 = vmatpush1.bf16.msra.mxu1 %v22471_v12  ;;  %v22522_v12 = vld [vmem:[#allocation5 + $0x700] ss:$44 sps:$4 sm:$0xff]  }
 0x64f   :  { %15288 = vmatpush1.bf16.msra.mxu0 %v22474_v2  ;;  %15207 = vmatprep.subr.bf16.mxu1 %v22479_v3  ;;  %v22527_v2 = vld [vmem:[#allocation5 + $0x3e54] ss:$44 sps:$4 sm:$0xff]   ;;  %v22530_v3 = vld [vmem:[#allocation5 + $0x75c] ss:$44 sps:$4 sm:$0xff]  }
 0x650   :  { %15289 = vmatprep.subr.bf16.mxu0 %v22482_v4  ;;  %v22525_v4 = vld [vmem:[#allocation5 + $0x3e50] ss:$44 sps:$4 sm:$0xff]  }
 0x652   :  { %15208 = vmatpush1.bf16.msra.mxu1 %v22477_v15  ;;  %v22528_v15 = vld [vmem:[#allocation5 + $0x758] ss:$44 sps:$4 sm:$0xff]  }
 0x653   :  { %15290 = vmatpush1.bf16.msra.mxu0 %v22480_v13  ;;  %15209 = vmatprep.subr.bf16.mxu1 %v22485_v5  ;;  %v22533_v13 = vld [vmem:[#allocation5 + $0x3eac] ss:$44 sps:$4 sm:$0xff]   ;;  %v22536_v5 = vld [vmem:[#allocation5 + $0x7b4] ss:$44 sps:$4 sm:$0xff]  }
 0x654   :  { %15291 = vmatprep.subr.bf16.mxu0 %v22488_v36  ;;  %v22531_v36 = vld [vmem:[#allocation5 + $0x3ea8] ss:$44 sps:$4 sm:$0xff]  }
 0x656   :  { %15210 = vmatpush1.bf16.msra.mxu1 %v22483_v17  ;;  %v22534_v17 = vld [vmem:[#allocation5 + $0x7b0] ss:$44 sps:$4 sm:$0xff]  }
 0x657   :  { %15292 = vmatpush1.bf16.msra.mxu0 %v22486_v18  ;;  %15211 = vmatprep.subr.bf16.mxu1 %v22491_v21  ;;  %v22539_v18 = vld [vmem:[#allocation5 + $0x3f04] ss:$44 sps:$4 sm:$0xff]   ;;  %v22542_v21 = vld [vmem:[#allocation5 + $0x80c] ss:$44 sps:$4 sm:$0xff]  }
 0x658   :  { %15293 = vmatprep.subr.bf16.mxu0 %v22494_v22  ;;  %v22537_v22 = vld [vmem:[#allocation5 + $0x3f00] ss:$44 sps:$4 sm:$0xff]  }
 0x65a   :  { %15212 = vmatpush1.bf16.msra.mxu1 %v22489_v24  ;;  %v22540_v24 = vld [vmem:[#allocation5 + $0x808] ss:$44 sps:$4 sm:$0xff]  }
 0x65b   :  { %15294 = vmatpush1.bf16.msra.mxu0 %v22492_v25  ;;  %15222 = vmatprep.subr.bf16.mxu1 %v22497_v28  ;;  %v22545_v25 = vld [vmem:[#allocation5 + $0x3f5c] ss:$44 sps:$4 sm:$0xff]   ;;  %v22548_v28 = vld [vmem:[#allocation5 + $0x864] ss:$44 sps:$4 sm:$0xff]  }
 0x65c   :  { %15304 = vmatprep.subr.bf16.mxu0 %v22500_v29  ;;  %v22543_v29 = vld [vmem:[#allocation5 + $0x3f58] ss:$44 sps:$4 sm:$0xff]  }
 0x65d   :  { %15214 = vmatmul.mubr.bf16.vlgmr.msra.gmra.mrb[8].mxu1 %v23783_v54 }
 0x65e   :  { %15296 = vmatmul.mubr.bf16.vlgmr.msra.gmra.mrb[8].mxu0 %v23649_v6  ;;  %15223 = vmatpush1.bf16.msra.mxu1 %v22495_v30  ;;  %v22546_v30 = vld [vmem:[#allocation5 + $0x860] ss:$44 sps:$4 sm:$0xff]  }
 0x65f   :  { %15305 = vmatpush1.bf16.msra.mxu0 %v22498_v19  ;;  %15224 = vmatprep.subr.bf16.mxu1 %v22503_v33  ;;  %v22551_v19 = vld [vmem:[#allocation5 + $0x3fb4] ss:$44 sps:$4 sm:$0xff]   ;;  %v22554_v33 = vld [vmem:[#allocation5 + $0x8bc] ss:$44 sps:$4 sm:$0xff]  }
 0x660   :  { %15306 = vmatprep.subr.bf16.mxu0 %v22506_v35  ;;  %15254 = vmatprep.mubr.bf16.mxu1 %v23787_v23  ;;  %v22549_v35 = vld [vmem:[#allocation5 + $0x3fb0] ss:$44 sps:$4 sm:$0xff]  }
 0x661   :  { %15336 = vmatprep.mubr.bf16.mxu0 %v23645_v51 }
 0x662   :  { %15225 = vmatpush1.bf16.msra.mxu1 %v22501_v40  ;;  %v22552_v40 = vld [vmem:[#allocation5 + $0x8b8] ss:$44 sps:$4 sm:$0xff]  }
 0x663   :  { %15307 = vmatpush1.bf16.msra.mxu0 %v22504_v45  ;;  %15226 = vmatprep.subr.bf16.mxu1 %v22509_v0  ;;  %v22557_v45 = vld [vmem:[#allocation5 + $0x400c] ss:$44 sps:$4 sm:$0xff]   ;;  %v22560_v0 = vld [vmem:[#allocation5 + $0x914] ss:$44 sps:$4 sm:$0xff]  }
 0x664   :  { %15308 = vmatprep.subr.bf16.mxu0 %v22512_v48  ;;  %v22555_v48 = vld [vmem:[#allocation5 + $0x4008] ss:$44 sps:$4 sm:$0xff]  }
 0x666   :  { %15227 = vmatpush1.bf16.msra.mxu1 %v22507_v49  ;;  %v22558_v49 = vld [vmem:[#allocation5 + $0x910] ss:$44 sps:$4 sm:$0xff]  }
 0x667   :  { %15309 = vmatpush1.bf16.msra.mxu0 %v22510_v50  ;;  %15228 = vmatprep.subr.bf16.mxu1 %v22515_v52  ;;  %v22563_v50 = vld [vmem:[#allocation5 + $0x4064] ss:$44 sps:$4 sm:$0xff]   ;;  %v22566_v52 = vld [vmem:[#allocation5 + $0x96c] ss:$44 sps:$4 sm:$0xff]  }
 0x668   :  { %15310 = vmatprep.subr.bf16.mxu0 %v22518_v53  ;;  %v22561_v53 = vld [vmem:[#allocation5 + $0x4060] ss:$44 sps:$4 sm:$0xff]  }
 0x66a   :  { %15229 = vmatpush1.bf16.msra.mxu1 %v22513_v56  ;;  %v22564_v56 = vld [vmem:[#allocation5 + $0x968] ss:$44 sps:$4 sm:$0xff]  }
 0x66b   :  { %15311 = vmatpush1.bf16.msra.mxu0 %v22516_v57  ;;  %15230 = vmatprep.subr.bf16.mxu1 %v22521_v59  ;;  %v22569_v57 = vld [vmem:[#allocation5 + $0x40bc] ss:$44 sps:$4 sm:$0xff]   ;;  %v22572_v59 = vld [vmem:[#allocation5 + $0x9c4] ss:$44 sps:$4 sm:$0xff]  }
 0x66c   :  { %15312 = vmatprep.subr.bf16.mxu0 %v22524_v62  ;;  %v22567_v62 = vld [vmem:[#allocation5 + $0x40b8] ss:$44 sps:$4 sm:$0xff]  }
 0x66e   :  { %15231 = vmatpush1.bf16.msra.mxu1 %v22519_v63  ;;  %v22570_v63 = vld [vmem:[#allocation5 + $0x9c0] ss:$44 sps:$4 sm:$0xff]  }
 0x66f   :  { %15313 = vmatpush1.bf16.msra.mxu0 %v22522_v12  ;;  %15232 = vmatprep.subr.bf16.mxu1 %v22527_v2  ;;  %v22575_v12 = vld [vmem:[#allocation5 + $0x4114] ss:$44 sps:$4 sm:$0xff]   ;;  %v22578_v2 = vld [vmem:[#allocation5 + $0xa1c] ss:$44 sps:$4 sm:$0xff]  }
 0x670   :  { %15314 = vmatprep.subr.bf16.mxu0 %v22530_v3  ;;  %v22573_v3 = vld [vmem:[#allocation5 + $0x4110] ss:$44 sps:$4 sm:$0xff]  }
 0x672   :  { %15233 = vmatpush1.bf16.msra.mxu1 %v22525_v4  ;;  %v22576_v4 = vld [vmem:[#allocation5 + $0xa18] ss:$44 sps:$4 sm:$0xff]  }
 0x673   :  { %15315 = vmatpush1.bf16.msra.mxu0 %v22528_v15  ;;  %15234 = vmatprep.subr.bf16.mxu1 %v22533_v13  ;;  %v22581_v15 = vld [vmem:[#allocation5 + $0x416c] ss:$44 sps:$4 sm:$0xff]   ;;  %v22584_v13 = vld [vmem:[#allocation5 + $0xa74] ss:$44 sps:$4 sm:$0xff]  }
 0x674   :  { %15316 = vmatprep.subr.bf16.mxu0 %v22536_v5  ;;  %v22579_v5 = vld [vmem:[#allocation5 + $0x4168] ss:$44 sps:$4 sm:$0xff]  }
 0x676   :  { %15235 = vmatpush1.bf16.msra.mxu1 %v22531_v36  ;;  %v22582_v36 = vld [vmem:[#allocation5 + $0xa70] ss:$44 sps:$4 sm:$0xff]  }
 0x677   :  { %15317 = vmatpush1.bf16.msra.mxu0 %v22534_v17  ;;  %15236 = vmatprep.subr.bf16.mxu1 %v22539_v18  ;;  %v22587_v17 = vld [vmem:[#allocation5 + $0x41c4] ss:$44 sps:$4 sm:$0xff]   ;;  %v22590_v18 = vld [vmem:[#allocation5 + $0xacc] ss:$44 sps:$4 sm:$0xff]  }
 0x678   :  { %15318 = vmatprep.subr.bf16.mxu0 %v22542_v21  ;;  %v22585_v21 = vld [vmem:[#allocation5 + $0x41c0] ss:$44 sps:$4 sm:$0xff]  }
 0x67a   :  { %15237 = vmatpush1.bf16.msra.mxu1 %v22537_v22  ;;  %v22588_v22 = vld [vmem:[#allocation5 + $0xac8] ss:$44 sps:$4 sm:$0xff]  }
 0x67b   :  { %15319 = vmatpush1.bf16.msra.mxu0 %v22540_v24  ;;  %15238 = vmatprep.subr.bf16.mxu1 %v22545_v25  ;;  %v22593_v24 = vld [vmem:[#allocation5 + $0xb24] ss:$44 sps:$4 sm:$0xff]   ;;  %v22594_v25 = vld [vmem:[#allocation5 + $0x2e8] ss:$44 sps:$4 sm:$0xff]  }
 0x67c   :  { %15320 = vmatprep.subr.bf16.mxu0 %v22548_v28  ;;  %v22591_v28 = vld [vmem:[#allocation5 + $0xb20] ss:$44 sps:$4 sm:$0xff]  }
 0x67e   :  { %15239 = vmatpush1.bf16.msra.mxu1 %v22543_v29  ;;  %v22595_v29 = vld [vmem:[#allocation5 + $0x28] ss:$44 sps:$4 sm:$0xff]  }
 0x67f   :  { %15321 = vmatpush1.bf16.msra.mxu0 %v22546_v30  ;;  %15240 = vmatprep.subr.bf16.mxu1 %v22551_v19  ;;  %v22598_v30 = vld [vmem:[#allocation5 + $0xb7c] ss:$44 sps:$4 sm:$0xff]   ;;  %v22599_v19 = vld [vmem:[#allocation5 + $0x340] ss:$44 sps:$4 sm:$0xff]  }
 0x680   :  { %15322 = vmatprep.subr.bf16.mxu0 %v22554_v33  ;;  %v22596_v33 = vld [vmem:[#allocation5 + $0xb78] ss:$44 sps:$4 sm:$0xff]  }
 0x682   :  { %15241 = vmatpush1.bf16.msra.mxu1 %v22549_v35  ;;  %v22600_v35 = vld [vmem:[#allocation5 + $0x80] ss:$44 sps:$4 sm:$0xff]  }
 0x683   :  { %15323 = vmatpush1.bf16.msra.mxu0 %v22552_v40  ;;  %15242 = vmatprep.subr.bf16.mxu1 %v22557_v45  ;;  %v22603_v40 = vld [vmem:[#allocation5 + $0xbd4] ss:$44 sps:$4 sm:$0xff]   ;;  %v22604_v45 = vld [vmem:[#allocation5 + $0x398] ss:$44 sps:$4 sm:$0xff]  }
 0x684   :  { %15324 = vmatprep.subr.bf16.mxu0 %v22560_v0  ;;  %v22601_v0 = vld [vmem:[#allocation5 + $0xbd0] ss:$44 sps:$4 sm:$0xff]  }
 0x686   :  { %15243 = vmatpush1.bf16.msra.mxu1 %v22555_v48  ;;  %v22605_v48 = vld [vmem:[#allocation5 + $0xd8] ss:$44 sps:$4 sm:$0xff]  }
 0x687   :  { %15325 = vmatpush1.bf16.msra.mxu0 %v22558_v49  ;;  %15244 = vmatprep.subr.bf16.mxu1 %v22563_v50  ;;  %v22608_v49 = vld [vmem:[#allocation5 + $0xc2c] ss:$44 sps:$4 sm:$0xff]   ;;  %v22609_v50 = vld [vmem:[#allocation5 + $0x3f0] ss:$44 sps:$4 sm:$0xff]  }
 0x688   :  { %15326 = vmatprep.subr.bf16.mxu0 %v22566_v52  ;;  %v22606_v52 = vld [vmem:[#allocation5 + $0xc28] ss:$44 sps:$4 sm:$0xff]  }
 0x68a   :  { %15245 = vmatpush1.bf16.msra.mxu1 %v22561_v53  ;;  %v22610_v53 = vld [vmem:[#allocation5 + $0x130] ss:$44 sps:$4 sm:$0xff]  }
 0x68b   :  { %15327 = vmatpush1.bf16.msra.mxu0 %v22564_v56  ;;  %15246 = vmatprep.subr.bf16.mxu1 %v22569_v57  ;;  %v22613_v56 = vld [vmem:[#allocation5 + $0xc84] ss:$44 sps:$4 sm:$0xff]   ;;  %v22614_v57 = vld [vmem:[#allocation5 + $0x448] ss:$44 sps:$4 sm:$0xff]  }
 0x68c   :  { %15328 = vmatprep.subr.bf16.mxu0 %v22572_v59  ;;  %v22615_v59 = vld [vmem:[#allocation5 + $0x188] ss:$44 sps:$4 sm:$0xff]  }
 0x68e   :  { %15247 = vmatpush1.bf16.msra.mxu1 %v22567_v62  ;;  %v22618_v62 = vld [vmem:[#allocation5 + $0xcdc] ss:$44 sps:$4 sm:$0xff]  }
 0x68f   :  { %15329 = vmatpush1.bf16.msra.mxu0 %v22570_v63  ;;  %15248 = vmatprep.subr.bf16.mxu1 %v22575_v12  ;;  %v22619_v63 = vld [vmem:[#allocation5 + $0x4a0] ss:$44 sps:$4 sm:$0xff]   ;;  %v22616_v12 = vld [vmem:[#allocation5 + $0xcd8] ss:$44 sps:$4 sm:$0xff]  }
 0x690   :  { %15330 = vmatprep.subr.bf16.mxu0 %v22578_v2  ;;  %v22620_v2 = vld [vmem:[#allocation5 + $0x1e0] ss:$44 sps:$4 sm:$0xff]  }
 0x692   :  { %15249 = vmatpush1.bf16.msra.mxu1 %v22573_v3  ;;  %v22623_v3 = vld [vmem:[#allocation5 + $0xd34] ss:$44 sps:$4 sm:$0xff]  }
 0x693   :  { %15331 = vmatpush1.bf16.msra.mxu0 %v22576_v4  ;;  %15250 = vmatprep.subr.bf16.mxu1 %v22581_v15  ;;  %v22624_v4 = vld [vmem:[#allocation5 + $0x4f8] ss:$44 sps:$4 sm:$0xff]   ;;  %v22621_v15 = vld [vmem:[#allocation5 + $0xd30] ss:$44 sps:$4 sm:$0xff]  }
 0x694   :  { %15332 = vmatprep.subr.bf16.mxu0 %v22584_v13  ;;  %v22625_v13 = vld [vmem:[#allocation5 + $0x238] ss:$44 sps:$4 sm:$0xff]  }
 0x696   :  { %15251 = vmatpush1.bf16.msra.mxu1 %v22579_v5  ;;  %v22628_v5 = vld [vmem:[#allocation5 + $0xd8c] ss:$44 sps:$4 sm:$0xff]  }
 0x697   :  { %15333 = vmatpush1.bf16.msra.mxu0 %v22582_v36  ;;  %15252 = vmatprep.subr.bf16.mxu1 %v22587_v17  ;;  %v22629_v36 = vld [vmem:[#allocation5 + $0x550] ss:$44 sps:$4 sm:$0xff]   ;;  %v22626_v17 = vld [vmem:[#allocation5 + $0xd88] ss:$44 sps:$4 sm:$0xff]  }
 0x698   :  { %15334 = vmatprep.subr.bf16.mxu0 %v22590_v18  ;;  %v22630_v18 = vld [vmem:[#allocation5 + $0x290] ss:$44 sps:$4 sm:$0xff]  }
 0x69a   :  { %15253 = vmatpush1.bf16.msra.mxu1 %v22585_v21  ;;  %v22633_v21 = vld [vmem:[#allocation5 + $0xde4] ss:$44 sps:$4 sm:$0xff]  }
 0x69b   :  { %15335 = vmatpush1.bf16.msra.mxu0 %v22588_v22  ;;  %19524 = vmatprep.subr.bf16.mxu1 %v22594_v25  ;;  %v22634_v22 = vld [vmem:[#allocation5 + $0x868] ss:$44 sps:$4 sm:$0xff]  }
 0x69c   :  { %15345 = vmatprep.subr.bf16.mxu0 %v22593_v24  ;;  %v22631_v24 = vld [vmem:[#allocation5 + $0xde0] ss:$44 sps:$4 sm:$0xff]   ;;  %v22635_v25 = vld [vmem:[#allocation5 + $0x5a8] ss:$44 sps:$4 sm:$0xff]  }
 0x69d   :  { %15255 = vmatmul.mubr.bf16.vlgmr.msra.gmra.mrb[8].mxu1 %v23795_v39 }
 0x69e   :  { %15337 = vmatmul.mubr.bf16.vlgmr.msra.gmra.mrb[8].mxu0 %v23651_v7  ;;  %19525 = vmatpush3.bf16.msra.mxu1 %v22595_v29  ;;  %v22639_v29 = vld [vmem:[#allocation5 + $0x8c0] ss:$44 sps:$4 sm:$0xff]  }
 0x69f   :  { %15346 = vmatpush1.bf16.msra.mxu0 %v22591_v28  ;;  %19526 = vmatprep.subr.bf16.mxu1 %v22599_v19  ;;  %v22638_v28 = vld [vmem:[#allocation5 + $0xe3c] ss:$44 sps:$4 sm:$0xff]   ;;  %v22640_v19 = vld [vmem:[#allocation5 + $0x600] ss:$44 sps:$4 sm:$0xff]  }
 0x6a0   :  { %15347 = vmatprep.subr.bf16.mxu0 %v22598_v30  ;;  %15787 = vmatprep.mubr.bf16.mxu1 %v23643_v47  ;;  %v22611_v47 = vld [vmem:[#allocation5 + $0xc80] ss:$44 sps:$4 sm:$0xff]   ;;  %v22636_v30 = vld [vmem:[#allocation5 + $0xe38] ss:$44 sps:$4 sm:$0xff]  }
 0x6a1   :  { %15377 = vmatprep.mubr.bf16.mxu0 %v23660_v34 }
 0x6a2   :  { %19527 = vmatpush3.bf16.msra.mxu1 %v22600_v35  ;;  %v22644_v35 = vld [vmem:[#allocation5 + $0x918] ss:$44 sps:$4 sm:$0xff]  }
 0x6a3   :  { %15348 = vmatpush1.bf16.msra.mxu0 %v22596_v33  ;;  %19528 = vmatprep.subr.bf16.mxu1 %v22604_v45  ;;  %v22643_v33 = vld [vmem:[#allocation5 + $0xe94] ss:$44 sps:$4 sm:$0xff]   ;;  %v22645_v45 = vld [vmem:[#allocation5 + $0x658] ss:$44 sps:$4 sm:$0xff]  }
 0x6a4   :  { %15349 = vmatprep.subr.bf16.mxu0 %v22603_v40  ;;  %v22641_v40 = vld [vmem:[#allocation5 + $0xe90] ss:$44 sps:$4 sm:$0xff]  }
 0x6a6   :  { %19529 = vmatpush3.bf16.msra.mxu1 %v22605_v48  ;;  %v22649_v48 = vld [vmem:[#allocation5 + $0x970] ss:$44 sps:$4 sm:$0xff]  }
 0x6a7   :  { %15350 = vmatpush1.bf16.msra.mxu0 %v22601_v0  ;;  %19530 = vmatprep.subr.bf16.mxu1 %v22609_v50  ;;  %v22648_v0 = vld [vmem:[#allocation5 + $0xeec] ss:$44 sps:$4 sm:$0xff]   ;;  %v22653_v50 = vld [vmem:[#allocation5 + $0xf44] ss:$44 sps:$4 sm:$0xff]  }
 0x6a8   :  { %15351 = vmatprep.subr.bf16.mxu0 %v22608_v49  ;;  %v22650_v49 = vld [vmem:[#allocation5 + $0x6b0] ss:$44 sps:$4 sm:$0xff]  }
 0x6aa   :  { %19531 = vmatpush3.bf16.msra.mxu1 %v22610_v53  ;;  %v22651_v53 = vld [vmem:[#allocation5 + $0xf40] ss:$44 sps:$4 sm:$0xff]  }
 0x6ab   :  { %15352 = vmatpush1.bf16.msra.mxu0 %v22606_v52  ;;  %19532 = vmatprep.subr.bf16.mxu1 %v22614_v57  ;;  %v22654_v52 = vld [vmem:[#allocation5 + $0x9c8] ss:$44 sps:$4 sm:$0xff]   ;;  %v22659_v57 = vld [vmem:[#allocation5 + $0xa20] ss:$44 sps:$4 sm:$0xff]  }
 0x6ac   :  { %15353 = vmatprep.subr.bf16.mxu0 %v22613_v56  ;;  %v22658_v56 = vld [vmem:[#allocation5 + $0xf9c] ss:$44 sps:$4 sm:$0xff]  }
 0x6ae   :  { %19533 = vmatpush3.bf16.msra.mxu1 %v22615_v59  ;;  %v22660_v59 = vld [vmem:[#allocation5 + $0x760] ss:$44 sps:$4 sm:$0xff]  }
 0x6af   :  { %15354 = vmatpush1.bf16.msra.mxu0 %v22611_v47  ;;  %19534 = vmatprep.subr.bf16.mxu1 %v22619_v63  ;;  %v22656_v47 = vld [vmem:[#allocation5 + $0xf98] ss:$44 sps:$4 sm:$0xff]  }
 0x6b0   :  { %15355 = vmatprep.subr.bf16.mxu0 %v22618_v62  ;;  %v22663_v62 = vld [vmem:[#allocation5 + $0xff4] ss:$44 sps:$4 sm:$0xff]   ;;  %v22664_v63 = vld [vmem:[#allocation5 + $0xa78] ss:$44 sps:$4 sm:$0xff]  }
 0x6b2   :  { %19535 = vmatpush3.bf16.msra.mxu1 %v22620_v2  ;;  %v22665_v2 = vld [vmem:[#allocation5 + $0x7b8] ss:$44 sps:$4 sm:$0xff]  }
 0x6b3   :  { %15356 = vmatpush1.bf16.msra.mxu0 %v22616_v12  ;;  %19536 = vmatprep.subr.bf16.mxu1 %v22624_v4  ;;  %v22661_v12 = vld [vmem:[#allocation5 + $0xff0] ss:$44 sps:$4 sm:$0xff]  }
 0x6b4   :  { %15357 = vmatprep.subr.bf16.mxu0 %v22623_v3  ;;  %v22668_v3 = vld [vmem:[#allocation5 + $0x104c] ss:$44 sps:$4 sm:$0xff]   ;;  %v22669_v4 = vld [vmem:[#allocation5 + $0xad0] ss:$44 sps:$4 sm:$0xff]  }
 0x6b6   :  { %19537 = vmatpush3.bf16.msra.mxu1 %v22625_v13  ;;  %v22670_v13 = vld [vmem:[#allocation5 + $0x810] ss:$44 sps:$4 sm:$0xff]  }
 0x6b7   :  { %15358 = vmatpush1.bf16.msra.mxu0 %v22621_v15  ;;  %19538 = vmatprep.subr.bf16.mxu1 %v22629_v36  ;;  %v22666_v15 = vld [vmem:[#allocation5 + $0x1048] ss:$44 sps:$4 sm:$0xff]  }
 0x6b8   :  { %15359 = vmatprep.subr.bf16.mxu0 %v22628_v5  ;;  %v22673_v5 = vld [vmem:[#allocation5 + $0x10a4] ss:$44 sps:$4 sm:$0xff]   ;;  %v22674_v36 = vld [vmem:[#allocation5 + $0xde8] ss:$44 sps:$4 sm:$0xff]  }
 0x6ba   :  { %19539 = vmatpush3.bf16.msra.mxu1 %v22630_v18  ;;  %v22675_v18 = vld [vmem:[#allocation5 + $0xb28] ss:$44 sps:$4 sm:$0xff]  }
 0x6bb   :  { %15360 = vmatpush1.bf16.msra.mxu0 %v22626_v17  ;;  %19546 = vmatprep.subr.bf16.mxu1 %v22634_v22  ;;  %v22671_v17 = vld [vmem:[#allocation5 + $0x10a0] ss:$44 sps:$4 sm:$0xff]  }
 0x6bc   :  { %15361 = vmatprep.subr.bf16.mxu0 %v22633_v21  ;;  %v22678_v21 = vld [vmem:[#allocation5 + $0x10fc] ss:$44 sps:$4 sm:$0xff]   ;;  %v22679_v22 = vld [vmem:[#allocation5 + $0xe40] ss:$44 sps:$4 sm:$0xff]  }
 0x6bd   :  { %15788 = vmatmul.mubr.bf16.vlgmr.msra.gmra.mrb[12].mxu1 %v23649_v6  ;;  %v22646_v6 = vld [vmem:[#allocation5 + $0xee8] ss:$44 sps:$4 sm:$0xff]  }
 0x6be   :  { %19547 = vmatpush3.bf16.msra.mxu1 %v22635_v25  ;;  %15827 = vmatprep.mubr.bf16.mxu1 %v23645_v51  ;;  %v22655_v51 = vld [vmem:[#allocation5 + $0x708] ss:$44 sps:$4 sm:$0xff]   ;;  %v22680_v25 = vld [vmem:[#allocation5 + $0xb80] ss:$44 sps:$4 sm:$0xff]  }
 0x6bf   :  { %15362 = vmatpush1.bf16.msra.mxu0 %v22631_v24  ;;  %19548 = vmatprep.subr.bf16.mxu1 %v22639_v29  ;;  %v22676_v24 = vld [vmem:[#allocation5 + $0x10f8] ss:$44 sps:$4 sm:$0xff]  }
 0x6c0   :  { %15363 = vmatprep.subr.bf16.mxu0 %v22638_v28  ;;  %v22683_v28 = vld [vmem:[#allocation5 + $0x1154] ss:$44 sps:$4 sm:$0xff]   ;;  %v22684_v29 = vld [vmem:[#allocation5 + $0xe98] ss:$44 sps:$4 sm:$0xff]  }
 0x6c2   :  { %19549 = vmatpush3.bf16.msra.mxu1 %v22640_v19  ;;  %v22685_v19 = vld [vmem:[#allocation5 + $0xbd8] ss:$44 sps:$4 sm:$0xff]  }
 0x6c3   :  { %15364 = vmatpush1.bf16.msra.mxu0 %v22636_v30  ;;  %19550 = vmatprep.subr.bf16.mxu1 %v22644_v35  ;;  %v22681_v30 = vld [vmem:[#allocation5 + $0x1150] ss:$44 sps:$4 sm:$0xff]   ;;  %v22686_v35 = vld [vmem:[#allocation5 + $0x11a8] ss:$44 sps:$4 sm:$0xff]  }
 0x6c4   :  { %15365 = vmatprep.subr.bf16.mxu0 %v22643_v33  ;;  %v22688_v33 = vld [vmem:[#allocation5 + $0x11ac] ss:$44 sps:$4 sm:$0xff]  }
 0x6c6   :  { %19551 = vmatpush3.bf16.msra.mxu1 %v22645_v45  ;;  %v22693_v45 = vld [vmem:[#allocation5 + $0x1204] ss:$44 sps:$4 sm:$0xff]  }
 0x6c7   :  { %15366 = vmatpush1.bf16.msra.mxu0 %v22641_v40  ;;  %19552 = vmatprep.subr.bf16.mxu1 %v22649_v48  ;;  %v22690_v40 = vld [vmem:[#allocation5 + $0xc30] ss:$44 sps:$4 sm:$0xff]   ;;  %v22695_v48 = vld [vmem:[#allocation5 + $0xc88] ss:$44 sps:$4 sm:$0xff]  }
 0x6c8   :  { %15367 = vmatprep.subr.bf16.mxu0 %v22648_v0  ;;  %v22694_v0 = vld [vmem:[#allocation5 + $0xf48] ss:$44 sps:$4 sm:$0xff]  }
 0x6ca   :  { %19553 = vmatpush3.bf16.msra.mxu1 %v22650_v49  ;;  %v22699_v49 = vld [vmem:[#allocation5 + $0xfa0] ss:$44 sps:$4 sm:$0xff]  }
 0x6cb   :  { %15368 = vmatpush1.bf16.msra.mxu0 %v22646_v6  ;;  %19554 = vmatprep.subr.bf16.mxu1 %v22654_v52  ;;  %v22698_v6 = vld [vmem:[#allocation5 + $0x125c] ss:$44 sps:$4 sm:$0xff]   ;;  %v22700_v52 = vld [vmem:[#allocation5 + $0xce0] ss:$44 sps:$4 sm:$0xff]  }
 0x6cc   :  { %15369 = vmatprep.subr.bf16.mxu0 %v22653_v50  ;;  %v22696_v50 = vld [vmem:[#allocation5 + $0x1258] ss:$44 sps:$4 sm:$0xff]  }
 0x6ce   :  { %19555 = vmatpush3.bf16.msra.mxu1 %v22655_v51  ;;  %v22704_v51 = vld [vmem:[#allocation5 + $0xff8] ss:$44 sps:$4 sm:$0xff]  }
 0x6cf   :  { %15370 = vmatpush1.bf16.msra.mxu0 %v22651_v53  ;;  %19556 = vmatprep.subr.bf16.mxu1 %v22659_v57  ;;  %v22703_v53 = vld [vmem:[#allocation5 + $0x12b4] ss:$44 sps:$4 sm:$0xff]  }
 0x6d0   :  { %15371 = vmatprep.subr.bf16.mxu0 %v22658_v56 }
 0x6d2   :  { %19557 = vmatpush3.bf16.msra.mxu1 %v22660_v59  ;;  %v22701_v59 = vld [vmem:[#allocation5 + $0x12b0] ss:$44 sps:$4 sm:$0xff]  }
 0x6d3   :  { %15372 = vmatpush1.bf16.msra.mxu0 %v22656_v47  ;;  %19558 = vmatprep.subr.bf16.mxu1 %v22664_v63 }
 0x6d4   :  { %15373 = vmatprep.subr.bf16.mxu0 %v22663_v62  ;;  %v22705_v62 = vld [vmem:[#allocation5 + $0xd38] ss:$44 sps:$4 sm:$0xff]  }
 0x6d6   :  { %19559 = vmatpush3.bf16.msra.mxu1 %v22665_v2  ;;  %v22709_v2 = vld [vmem:[#allocation5 + $0x1050] ss:$44 sps:$4 sm:$0xff]  }
 0x6d7   :  { %15374 = vmatpush1.bf16.msra.mxu0 %v22661_v12  ;;  %19560 = vmatprep.subr.bf16.mxu1 %v22669_v4  ;;  %v22708_v12 = vld [vmem:[#allocation5 + $0x130c] ss:$44 sps:$4 sm:$0xff]   ;;  %v22710_v4 = vld [vmem:[#allocation5 + $0xd90] ss:$44 sps:$4 sm:$0xff]  }
 0x6d8   :  { %15375 = vmatprep.subr.bf16.mxu0 %v22668_v3  ;;  %v22706_v3 = vld [vmem:[#allocation5 + $0x1308] ss:$44 sps:$4 sm:$0xff]  }
 0x6da   :  { %19561 = vmatpush3.bf16.msra.mxu1 %v22670_v13  ;;  %v22714_v13 = vld [vmem:[#allocation5 + $0x1368] ss:$44 sps:$4 sm:$0xff]  }
 0x6db   :  { %15376 = vmatpush1.bf16.msra.mxu0 %v22666_v15  ;;  %19568 = vmatprep.subr.bf16.mxu1 %v22674_v36  ;;  %v22713_v15 = vld [vmem:[#allocation5 + $0x1364] ss:$44 sps:$4 sm:$0xff]   ;;  %v22715_v36 = vld [vmem:[#allocation5 + $0x10a8] ss:$44 sps:$4 sm:$0xff]  }
 0x6dc   :  { %15386 = vmatprep.subr.bf16.mxu0 %v22673_v5  ;;  %v22711_v5 = vld [vmem:[#allocation5 + $0x1360] ss:$44 sps:$4 sm:$0xff]  }
 0x6dd   :  { %15828 = vmatmul.mubr.bf16.vlgmr.msra.gmra.mrb[16].mxu1 %v23651_v7  ;;  %v22689_v7 = vld [vmem:[#allocation5 + $0xef0] ss:$44 sps:$4 sm:$0xff]  }
 0x6de   :  { %15378 = vmatmul.mubr.bf16.vlgmr.msra.gmra.mrb[8].mxu0 %v23665_v16  ;;  %19569 = vmatpush3.bf16.msra.mxu1 %v22675_v18  ;;  %v22719_v18 = vld [vmem:[#allocation5 + $0x13c0] ss:$44 sps:$4 sm:$0xff]  }
 0x6df   :  { %15387 = vmatpush1.bf16.msra.mxu0 %v22671_v17  ;;  %19570 = vmatprep.subr.bf16.mxu1 %v22679_v22  ;;  %v22718_v17 = vld [vmem:[#allocation5 + $0x13bc] ss:$44 sps:$4 sm:$0xff]   ;;  %v22720_v22 = vld [vmem:[#allocation5 + $0x1100] ss:$44 sps:$4 sm:$0xff]  }
 0x6e0   :  { %15388 = vmatprep.subr.bf16.mxu0 %v22678_v21  ;;  %15867 = vmatprep.mubr.bf16.mxu1 %v23660_v34  ;;  %v22691_v34 = vld [vmem:[#allocation5 + $0x1200] ss:$44 sps:$4 sm:$0xff]   ;;  %v22716_v21 = vld [vmem:[#allocation5 + $0x13b8] ss:$44 sps:$4 sm:$0xff]  }
 0x6e1   :  { %15418 = vmatprep.mubr.bf16.mxu0 %v23671_v20 }
 0x6e2   :  { %19571 = vmatpush3.bf16.msra.mxu1 %v22680_v25  ;;  %v22724_v25 = vld [vmem:[#allocation5 + $0x1418] ss:$44 sps:$4 sm:$0xff]  }
 0x6e3   :  { %15389 = vmatpush1.bf16.msra.mxu0 %v22676_v24  ;;  %19572 = vmatprep.subr.bf16.mxu1 %v22684_v29  ;;  %v22723_v24 = vld [vmem:[#allocation5 + $0x1414] ss:$44 sps:$4 sm:$0xff]   ;;  %v22725_v29 = vld [vmem:[#allocation5 + $0x1158] ss:$44 sps:$4 sm:$0xff]  }
 0x6e4   :  { %15390 = vmatprep.subr.bf16.mxu0 %v22683_v28  ;;  %v22721_v28 = vld [vmem:[#allocation5 + $0x1410] ss:$44 sps:$4 sm:$0xff]  }
 0x6e6   :  { %19573 = vmatpush3.bf16.msra.mxu1 %v22685_v19  ;;  %v22729_v19 = vld [vmem:[#allocation5 + $0x1470] ss:$44 sps:$4 sm:$0xff]  }
 0x6e7   :  { %15391 = vmatpush1.bf16.msra.mxu0 %v22681_v30  ;;  %19574 = vmatprep.subr.bf16.mxu1 %v22689_v7  ;;  %v22728_v30 = vld [vmem:[#allocation5 + $0x146c] ss:$44 sps:$4 sm:$0xff]   ;;  %v22733_v7 = vld [vmem:[#allocation5 + $0x14c4] ss:$44 sps:$4 sm:$0xff]  }
 0x6e8   :  { %15392 = vmatprep.subr.bf16.mxu0 %v22688_v33  ;;  %v22730_v33 = vld [vmem:[#allocation5 + $0x11b0] ss:$44 sps:$4 sm:$0xff]  }
 0x6ea   :  { %19575 = vmatpush3.bf16.msra.mxu1 %v22690_v40  ;;  %v22731_v40 = vld [vmem:[#allocation5 + $0x14c0] ss:$44 sps:$4 sm:$0xff]  }
 0x6eb   :  { %15393 = vmatpush1.bf16.msra.mxu0 %v22686_v35  ;;  %19576 = vmatprep.subr.bf16.mxu1 %v22694_v0  ;;  %v22734_v35 = vld [vmem:[#allocation5 + $0x14c8] ss:$44 sps:$4 sm:$0xff]   ;;  %v22739_v0 = vld [vmem:[#allocation5 + $0x1520] ss:$44 sps:$4 sm:$0xff]  }
 0x6ec   :  { %15394 = vmatprep.subr.bf16.mxu0 %v22693_v45  ;;  %v22738_v45 = vld [vmem:[#allocation5 + $0x151c] ss:$44 sps:$4 sm:$0xff]  }
 0x6ee   :  { %19577 = vmatpush3.bf16.msra.mxu1 %v22695_v48  ;;  %v22740_v48 = vld [vmem:[#allocation5 + $0x1260] ss:$44 sps:$4 sm:$0xff]  }
 0x6ef   :  { %15395 = vmatpush1.bf16.msra.mxu0 %v22691_v34  ;;  %19578 = vmatprep.subr.bf16.mxu1 %v22699_v49  ;;  %v22736_v34 = vld [vmem:[#allocation5 + $0x1518] ss:$44 sps:$4 sm:$0xff]  }
 0x6f0   :  { %15396 = vmatprep.subr.bf16.mxu0 %v22698_v6  ;;  %v22743_v6 = vld [vmem:[#allocation5 + $0x1574] ss:$44 sps:$4 sm:$0xff]   ;;  %v22744_v49 = vld [vmem:[#allocation5 + $0x1578] ss:$44 sps:$4 sm:$0xff]  }
 0x6f1   :  { %v23881_v56 = vpop.f32.mrb[4].mxu0 }
 0x6f2   :  { %v23883_v57 = vpop.f32.mrb[5].mxu0  ;;  %19579 = vmatpush3.bf16.msra.mxu1 %v22700_v52  ;;  %v22745_v52 = vld [vmem:[#allocation5 + $0x12b8] ss:$44 sps:$4 sm:$0xff]  }
 0x6f3   :  { %v14768_v47 = vpop.f32.mrb[6].mxu0  ;;  %15397 = vmatpush1.bf16.msra.mxu0 %v22696_v50  ;;  %19580 = vmatprep.subr.bf16.mxu1 %v22704_v51  ;;  %v22741_v50 = vld [vmem:[#allocation5 + $0x1570] ss:$44 sps:$4 sm:$0xff]  }
 0x6f4   :  { %v14769_v63 = vpop.f32.mrb[7].mxu0  ;;  %15398 = vmatprep.subr.bf16.mxu0 %v22703_v53  ;;  %v22748_v53 = vld [vmem:[#allocation5 + $0x15cc] ss:$44 sps:$4 sm:$0xff]   ;;  %v22749_v51 = vld [vmem:[#allocation5 + $0x15d0] ss:$44 sps:$4 sm:$0xff]  }
 0x6f5   :  { %v22746_v47 = vld [vmem:[#allocation5 + $0x15c8] ss:$44 sps:$4 sm:$0xff]  }
 0x6f6   :  { %19581 = vmatpush3.bf16.msra.mxu1 %v22705_v62  ;;  %v22753_v62 = vld [vmem:[#allocation5 + $0x1624] ss:$44 sps:$4 sm:$0xff]   ;;  %v22754_v63 = vld [vmem:[#allocation5 + $0x18e8] ss:$44 sps:$4 sm:$0xff]  }
 0x6f7   :  { %15399 = vmatpush1.bf16.msra.mxu0 %v22701_v59  ;;  %19582 = vmatprep.subr.bf16.mxu1 %v22709_v2  ;;  %v22750_v59 = vld [vmem:[#allocation5 + $0x1310] ss:$44 sps:$4 sm:$0xff]   ;;  %v22755_v2 = vld [vmem:[#allocation5 + $0x1628] ss:$44 sps:$4 sm:$0xff]  }
 0x6f8   :  { %15400 = vmatprep.subr.bf16.mxu0 %v22708_v12  ;;  %v22751_v12 = vld [vmem:[#allocation5 + $0x1620] ss:$44 sps:$4 sm:$0xff]  }
 0x6fa   :  { %19583 = vmatpush3.bf16.msra.mxu1 %v22710_v4  ;;  %v22759_v4 = vld [vmem:[#allocation5 + $0x1940] ss:$44 sps:$4 sm:$0xff]  }
 0x6fb   :  { %15401 = vmatpush1.bf16.msra.mxu0 %v22706_v3  ;;  %19590 = vmatprep.subr.bf16.mxu1 %v22714_v13  ;;  %v22758_v3 = vld [vmem:[#allocation5 + $0x167c] ss:$44 sps:$4 sm:$0xff]   ;;  %v22760_v13 = vld [vmem:[#allocation5 + $0x1680] ss:$44 sps:$4 sm:$0xff]  }
 0x6fc   :  { %15402 = vmatprep.subr.bf16.mxu0 %v22713_v15  ;;  %v22756_v15 = vld [vmem:[#allocation5 + $0x1678] ss:$44 sps:$4 sm:$0xff]  }
 0x6fd   :  { %15868 = vmatmul.mubr.bf16.vlgmr.msra.gmra.mrb[20].mxu1 %v23665_v16  ;;  %v22726_v16 = vld [vmem:[#allocation5 + $0x1468] ss:$44 sps:$4 sm:$0xff]  }
 0x6fe   :  { %19591 = vmatpush3.bf16.msra.mxu1 %v22715_v36  ;;  %15907 = vmatprep.mubr.bf16.mxu1 %v23671_v20  ;;  %v22735_v20 = vld [vmem:[#allocation5 + $0x1208] ss:$44 sps:$4 sm:$0xff]   ;;  %v22764_v36 = vld [vmem:[#allocation5 + $0x1998] ss:$44 sps:$4 sm:$0xff]  }
 0x6ff   :  { %15403 = vmatpush1.bf16.msra.mxu0 %v22711_v5  ;;  %19592 = vmatprep.subr.bf16.mxu1 %v22719_v18  ;;  %v22763_v5 = vld [vmem:[#allocation5 + $0x16d4] ss:$44 sps:$4 sm:$0xff]   ;;  %v22765_v18 = vld [vmem:[#allocation5 + $0x16d8] ss:$44 sps:$4 sm:$0xff]  }
 0x700   :  { %15404 = vmatprep.subr.bf16.mxu0 %v22718_v17  ;;  %v22761_v17 = vld [vmem:[#allocation5 + $0x16d0] ss:$44 sps:$4 sm:$0xff]  }
 0x702   :  { %19593 = vmatpush3.bf16.msra.mxu1 %v22720_v22  ;;  %v22766_v22 = vld [vmem:[#allocation5 + $0x1728] ss:$44 sps:$4 sm:$0xff]  }
 0x703   :  { %15405 = vmatpush1.bf16.msra.mxu0 %v22716_v21  ;;  %19594 = vmatprep.subr.bf16.mxu1 %v22724_v25  ;;  %v22768_v21 = vld [vmem:[#allocation5 + $0x172c] ss:$44 sps:$4 sm:$0xff]   ;;  %v22773_v25 = vld [vmem:[#allocation5 + $0x1784] ss:$44 sps:$4 sm:$0xff]  }
 0x704   :  { %15406 = vmatprep.subr.bf16.mxu0 %v22723_v24  ;;  %v22770_v24 = vld [vmem:[#allocation5 + $0x1730] ss:$44 sps:$4 sm:$0xff]  }
 0x706   :  { %19595 = vmatpush3.bf16.msra.mxu1 %v22725_v29  ;;  %v22771_v29 = vld [vmem:[#allocation5 + $0x1780] ss:$44 sps:$4 sm:$0xff]  }
 0x707   :  { %15407 = vmatpush1.bf16.msra.mxu0 %v22721_v28  ;;  %19596 = vmatprep.subr.bf16.mxu1 %v22729_v19  ;;  %v22774_v28 = vld [vmem:[#allocation5 + $0x1a48] ss:$44 sps:$4 sm:$0xff]   ;;  %v22779_v19 = vld [vmem:[#allocation5 + $0x1aa0] ss:$44 sps:$4 sm:$0xff]  }
 0x708   :  { %15408 = vmatprep.subr.bf16.mxu0 %v22728_v30  ;;  %v22778_v30 = vld [vmem:[#allocation5 + $0x17dc] ss:$44 sps:$4 sm:$0xff]  }
 0x70a   :  { %19597 = vmatpush3.bf16.msra.mxu1 %v22730_v33  ;;  %v22780_v33 = vld [vmem:[#allocation5 + $0x17e0] ss:$44 sps:$4 sm:$0xff]  }
 0x70b   :  { %15409 = vmatpush1.bf16.msra.mxu0 %v22726_v16  ;;  %19598 = vmatprep.subr.bf16.mxu1 %v22734_v35  ;;  %v22776_v16 = vld [vmem:[#allocation5 + $0x17d8] ss:$44 sps:$4 sm:$0xff]  }
 0x70c   :  { %15410 = vmatprep.subr.bf16.mxu0 %v22733_v7  ;;  %v22783_v7 = vld [vmem:[#allocation5 + $0x1834] ss:$44 sps:$4 sm:$0xff]   ;;  %v22784_v35 = vld [vmem:[#allocation5 + $0x1af8] ss:$44 sps:$4 sm:$0xff]  }
 0x70e   :  { %19599 = vmatpush3.bf16.msra.mxu1 %v22735_v20  ;;  %v22785_v20 = vld [vmem:[#allocation5 + $0x1838] ss:$44 sps:$4 sm:$0xff]  }
 0x70f   :  { %15411 = vmatpush1.bf16.msra.mxu0 %v22731_v40  ;;  %19600 = vmatprep.subr.bf16.mxu1 %v22739_v0  ;;  %v22781_v40 = vld [vmem:[#allocation5 + $0x1830] ss:$44 sps:$4 sm:$0xff]  }
 0x710   :  { %15412 = vmatprep.subr.bf16.mxu0 %v22738_v45  ;;  %v22788_v45 = vld [vmem:[#allocation5 + $0x188c] ss:$44 sps:$4 sm:$0xff]   ;;  %v22789_v0 = vld [vmem:[#allocation5 + $0x1b50] ss:$44 sps:$4 sm:$0xff]  }
 0x712   :  { %19601 = vmatpush3.bf16.msra.mxu1 %v22740_v48  ;;  %v22790_v48 = vld [vmem:[#allocation5 + $0x1890] ss:$44 sps:$4 sm:$0xff]  }
 0x713   :  { %15413 = vmatpush1.bf16.msra.mxu0 %v22736_v34  ;;  %19602 = vmatprep.subr.bf16.mxu1 %v22744_v49  ;;  %v22786_v34 = vld [vmem:[#allocation5 + $0x1888] ss:$44 sps:$4 sm:$0xff]  }
 0x714   :  { %15414 = vmatprep.subr.bf16.mxu0 %v22743_v6  ;;  %v22793_v6 = vld [vmem:[#allocation5 + $0x18e4] ss:$44 sps:$4 sm:$0xff]   ;;  %v22794_v49 = vld [vmem:[#allocation5 + $0x1e68] ss:$44 sps:$4 sm:$0xff]  }
 0x716   :  { %19603 = vmatpush3.bf16.msra.mxu1 %v22745_v52  ;;  %v22795_v52 = vld [vmem:[#allocation5 + $0x1ba8] ss:$44 sps:$4 sm:$0xff]  }
 0x717   :  { %15415 = vmatpush1.bf16.msra.mxu0 %v22741_v50  ;;  %19604 = vmatprep.subr.bf16.mxu1 %v22749_v51  ;;  %v22791_v50 = vld [vmem:[#allocation5 + $0x18e0] ss:$44 sps:$4 sm:$0xff]  }
 0x718   :  { %15416 = vmatprep.subr.bf16.mxu0 %v22748_v53  ;;  %v22798_v53 = vld [vmem:[#allocation5 + $0x193c] ss:$44 sps:$4 sm:$0xff]   ;;  %v22799_v51 = vld [vmem:[#allocation5 + $0x1ec0] ss:$44 sps:$4 sm:$0xff]  }
 0x71a   :  { %19605 = vmatpush3.bf16.msra.mxu1 %v22750_v59  ;;  %v22800_v59 = vld [vmem:[#allocation5 + $0x1c00] ss:$44 sps:$4 sm:$0xff]  }
 0x71b   :  { %15417 = vmatpush1.bf16.msra.mxu0 %v22746_v47  ;;  %19612 = vmatprep.subr.bf16.mxu1 %v22754_v63  ;;  %v22796_v47 = vld [vmem:[#allocation5 + $0x1938] ss:$44 sps:$4 sm:$0xff]  }
 0x71c   :  { %15427 = vmatprep.subr.bf16.mxu0 %v22753_v62  ;;  %v22803_v62 = vld [vmem:[#allocation5 + $0x1994] ss:$44 sps:$4 sm:$0xff]   ;;  %v22804_v63 = vld [vmem:[#allocation5 + $0x1f18] ss:$44 sps:$4 sm:$0xff]  }
 0x71d   :  { %15908 = vmatmul.mubr.bf16.vlgmr.msra.gmra.mrb[24].mxu1 %v23679_v26 }
 0x71e   :  { %15419 = vmatmul.mubr.bf16.vlgmr.msra.gmra.mrb[8].mxu0 %v23679_v26  ;;  %19613 = vmatpush3.bf16.msra.mxu1 %v22755_v2  ;;  %v22769_v26 = vld [vmem:[#allocation5 + $0x19f0] ss:$44 sps:$4 sm:$0xff]   ;;  %v22805_v2 = vld [vmem:[#allocation5 + $0x1c58] ss:$44 sps:$4 sm:$0xff]  }
 0x71f   :  { %15428 = vmatpush1.bf16.msra.mxu0 %v22751_v12  ;;  %19614 = vmatprep.subr.bf16.mxu1 %v22759_v4  ;;  %v22801_v12 = vld [vmem:[#allocation5 + $0x1990] ss:$44 sps:$4 sm:$0xff]  }
 0x720   :  { %15429 = vmatprep.subr.bf16.mxu0 %v22758_v3  ;;  %15947 = vmatprep.mubr.bf16.mxu1 %v23685_v31  ;;  %v22808_v3 = vld [vmem:[#allocation5 + $0x19ec] ss:$44 sps:$4 sm:$0xff]   ;;  %v22809_v4 = vld [vmem:[#allocation5 + $0x1f70] ss:$44 sps:$4 sm:$0xff]  }
 0x721   :  { %15459 = vmatprep.mubr.bf16.mxu0 %v23685_v31  ;;  %v22775_v31 = vld [vmem:[#allocation5 + $0x1788] ss:$44 sps:$4 sm:$0xff]  }
 0x722   :  { %19615 = vmatpush3.bf16.msra.mxu1 %v22760_v13  ;;  %v22810_v13 = vld [vmem:[#allocation5 + $0x1cb0] ss:$44 sps:$4 sm:$0xff]  }
 0x723   :  { %15430 = vmatpush1.bf16.msra.mxu0 %v22756_v15  ;;  %19616 = vmatprep.subr.bf16.mxu1 %v22764_v36  ;;  %v22806_v15 = vld [vmem:[#allocation5 + $0x19e8] ss:$44 sps:$4 sm:$0xff]  }
 0x724   :  { %15431 = vmatprep.subr.bf16.mxu0 %v22763_v5  ;;  %v22813_v5 = vld [vmem:[#allocation5 + $0x1a44] ss:$44 sps:$4 sm:$0xff]   ;;  %v22814_v36 = vld [vmem:[#allocation5 + $0x1fc8] ss:$44 sps:$4 sm:$0xff]  }
 0x726   :  { %19617 = vmatpush3.bf16.msra.mxu1 %v22765_v18  ;;  %v22815_v18 = vld [vmem:[#allocation5 + $0x1d08] ss:$44 sps:$4 sm:$0xff]  }
 0x727   :  { %15432 = vmatpush1.bf16.msra.mxu0 %v22761_v17  ;;  %19618 = vmatprep.subr.bf16.mxu1 %v22769_v26  ;;  %v22811_v17 = vld [vmem:[#allocation5 + $0x1a40] ss:$44 sps:$4 sm:$0xff]  }
 0x728   :  { %15433 = vmatprep.subr.bf16.mxu0 %v22768_v21  ;;  %v22818_v21 = vld [vmem:[#allocation5 + $0x1a9c] ss:$44 sps:$4 sm:$0xff]   ;;  %v22819_v26 = vld [vmem:[#allocation5 + $0x2020] ss:$44 sps:$4 sm:$0xff]  }
 0x72a   :  { %19619 = vmatpush3.bf16.msra.mxu1 %v22770_v24  ;;  %v22820_v24 = vld [vmem:[#allocation5 + $0x1d60] ss:$44 sps:$4 sm:$0xff]  }
 0x72b   :  { %15434 = vmatpush1.bf16.msra.mxu0 %v22766_v22  ;;  %19620 = vmatprep.subr.bf16.mxu1 %v22774_v28  ;;  %v22816_v22 = vld [vmem:[#allocation5 + $0x1a98] ss:$44 sps:$4 sm:$0xff]  }
 0x72c   :  { %15435 = vmatprep.subr.bf16.mxu0 %v22773_v25  ;;  %v22823_v25 = vld [vmem:[#allocation5 + $0x1af4] ss:$44 sps:$4 sm:$0xff]   ;;  %v22824_v28 = vld [vmem:[#allocation5 + $0x2078] ss:$44 sps:$4 sm:$0xff]  }
 0x72e   :  { %19621 = vmatpush3.bf16.msra.mxu1 %v22775_v31  ;;  %v22825_v31 = vld [vmem:[#allocation5 + $0x1db8] ss:$44 sps:$4 sm:$0xff]  }
 0x72f   :  { %15436 = vmatpush1.bf16.msra.mxu0 %v22771_v29  ;;  %19622 = vmatprep.subr.bf16.mxu1 %v22779_v19  ;;  %v22821_v29 = vld [vmem:[#allocation5 + $0x1af0] ss:$44 sps:$4 sm:$0xff]  }
 0x730   :  { %15437 = vmatprep.subr.bf16.mxu0 %v22778_v30  ;;  %v22828_v30 = vld [vmem:[#allocation5 + $0x1b4c] ss:$44 sps:$4 sm:$0xff]   ;;  %v22829_v19 = vld [vmem:[#allocation5 + $0x20d0] ss:$44 sps:$4 sm:$0xff]  }
 0x732   :  { %19623 = vmatpush3.bf16.msra.mxu1 %v22780_v33  ;;  %v22830_v33 = vld [vmem:[#allocation5 + $0x1e10] ss:$44 sps:$4 sm:$0xff]  }
 0x733   :  { %15438 = vmatpush1.bf16.msra.mxu0 %v22776_v16  ;;  %19624 = vmatprep.subr.bf16.mxu1 %v22784_v35  ;;  %v22826_v16 = vld [vmem:[#allocation5 + $0x1b48] ss:$44 sps:$4 sm:$0xff]  }
 0x734   :  { %15439 = vmatprep.subr.bf16.mxu0 %v22783_v7  ;;  %v22833_v7 = vld [vmem:[#allocation5 + $0x1ba4] ss:$44 sps:$4 sm:$0xff]   ;;  %v22834_v35 = vld [vmem:[#allocation5 + $0x23e8] ss:$44 sps:$4 sm:$0xff]  }
 0x736   :  { %19625 = vmatpush3.bf16.msra.mxu1 %v22785_v20  ;;  %v22835_v20 = vld [vmem:[#allocation5 + $0x2128] ss:$44 sps:$4 sm:$0xff]  }
 0x737   :  { %15440 = vmatpush1.bf16.msra.mxu0 %v22781_v40  ;;  %19626 = vmatprep.subr.bf16.mxu1 %v22789_v0  ;;  %v22831_v40 = vld [vmem:[#allocation5 + $0x1ba0] ss:$44 sps:$4 sm:$0xff]  }
 0x738   :  { %15441 = vmatprep.subr.bf16.mxu0 %v22788_v45  ;;  %v22838_v45 = vld [vmem:[#allocation5 + $0x1bfc] ss:$44 sps:$4 sm:$0xff]   ;;  %v22839_v0 = vld [vmem:[#allocation5 + $0x2440] ss:$44 sps:$4 sm:$0xff]  }
 0x73a   :  { %19627 = vmatpush3.bf16.msra.mxu1 %v22790_v48  ;;  %v22840_v48 = vld [vmem:[#allocation5 + $0x2180] ss:$44 sps:$4 sm:$0xff]  }
 0x73b   :  { %15442 = vmatpush1.bf16.msra.mxu0 %v22786_v34  ;;  %19634 = vmatprep.subr.bf16.mxu1 %v22794_v49  ;;  %v22836_v34 = vld [vmem:[#allocation5 + $0x1bf8] ss:$44 sps:$4 sm:$0xff]  }
 0x73c   :  { %15443 = vmatprep.subr.bf16.mxu0 %v22793_v6  ;;  %v22843_v6 = vld [vmem:[#allocation5 + $0x1c54] ss:$44 sps:$4 sm:$0xff]   ;;  %v22844_v49 = vld [vmem:[#allocation5 + $0x2498] ss:$44 sps:$4 sm:$0xff]  }
 0x73d   :  { %15948 = vmatmul.mubr.bf16.vlgmr.msra.gmra.mrb[28].mxu1 %v23693_v38 }
 0x73e   :  { %19635 = vmatpush3.bf16.msra.mxu1 %v22795_v52  ;;  %15987 = vmatprep.mubr.bf16.mxu1 %v23699_v44  ;;  %v22845_v52 = vld [vmem:[#allocation5 + $0x21d8] ss:$44 sps:$4 sm:$0xff]  }
 0x73f   :  { %15444 = vmatpush1.bf16.msra.mxu0 %v22791_v50  ;;  %19636 = vmatprep.subr.bf16.mxu1 %v22799_v51  ;;  %v22841_v50 = vld [vmem:[#allocation5 + $0x1c50] ss:$44 sps:$4 sm:$0xff]   ;;  %v22846_v51 = vld [vmem:[#allocation5 + $0x1ca8] ss:$44 sps:$4 sm:$0xff]  }
 0x740   :  { %15445 = vmatprep.subr.bf16.mxu0 %v22798_v53  ;;  %v22849_v53 = vld [vmem:[#allocation5 + $0x24f0] ss:$44 sps:$4 sm:$0xff]  }
 0x742   :  { %19637 = vmatpush3.bf16.msra.mxu1 %v22800_v59  ;;  %v22853_v59 = vld [vmem:[#allocation5 + $0x1d04] ss:$44 sps:$4 sm:$0xff]  }
 0x743   :  { %15446 = vmatpush1.bf16.msra.mxu0 %v22796_v47  ;;  %19638 = vmatprep.subr.bf16.mxu1 %v22804_v63  ;;  %v22850_v47 = vld [vmem:[#allocation5 + $0x2230] ss:$44 sps:$4 sm:$0xff]   ;;  %v22851_v63 = vld [vmem:[#allocation5 + $0x1d00] ss:$44 sps:$4 sm:$0xff]  }
 0x744   :  { %15447 = vmatprep.subr.bf16.mxu0 %v22803_v62  ;;  %v22854_v62 = vld [vmem:[#allocation5 + $0x2548] ss:$44 sps:$4 sm:$0xff]  }
 0x746   :  { %19639 = vmatpush3.bf16.msra.mxu1 %v22805_v2  ;;  %v22859_v2 = vld [vmem:[#allocation5 + $0x25a0] ss:$44 sps:$4 sm:$0xff]  }
 0x747   :  { %15448 = vmatpush1.bf16.msra.mxu0 %v22801_v12  ;;  %19640 = vmatprep.subr.bf16.mxu1 %v22809_v4  ;;  %v22858_v12 = vld [vmem:[#allocation5 + $0x1d5c] ss:$44 sps:$4 sm:$0xff]   ;;  %v22860_v4 = vld [vmem:[#allocation5 + $0x22e0] ss:$44 sps:$4 sm:$0xff]  }
 0x748   :  { %15449 = vmatprep.subr.bf16.mxu0 %v22808_v3  ;;  %v22856_v3 = vld [vmem:[#allocation5 + $0x1d58] ss:$44 sps:$4 sm:$0xff]  }
 0x74a   :  { %19641 = vmatpush3.bf16.msra.mxu1 %v22810_v13  ;;  %v22864_v13 = vld [vmem:[#allocation5 + $0x25f8] ss:$44 sps:$4 sm:$0xff]  }
 0x74b   :  { %15450 = vmatpush1.bf16.msra.mxu0 %v22806_v15  ;;  %19642 = vmatprep.subr.bf16.mxu1 %v22814_v36  ;;  %v22863_v15 = vld [vmem:[#allocation5 + $0x1db4] ss:$44 sps:$4 sm:$0xff]  }
 0x74c   :  { %15451 = vmatprep.subr.bf16.mxu0 %v22813_v5 }
 0x74e   :  { %19643 = vmatpush3.bf16.msra.mxu1 %v22815_v18  ;;  %v22861_v18 = vld [vmem:[#allocation5 + $0x1db0] ss:$44 sps:$4 sm:$0xff]  }
 0x74f   :  { %15452 = vmatpush1.bf16.msra.mxu0 %v22811_v17  ;;  %19644 = vmatprep.subr.bf16.mxu1 %v22819_v26 }
 0x750   :  { %15453 = vmatprep.subr.bf16.mxu0 %v22818_v21  ;;  %v22865_v21 = vld [vmem:[#allocation5 + $0x2338] ss:$44 sps:$4 sm:$0xff]  }
 0x752   :  { %19645 = vmatpush3.bf16.msra.mxu1 %v22820_v24  ;;  %v22869_v24 = vld [vmem:[#allocation5 + $0x2650] ss:$44 sps:$4 sm:$0xff]  }
 0x753   :  { %15454 = vmatpush1.bf16.msra.mxu0 %v22816_v22  ;;  %19646 = vmatprep.subr.bf16.mxu1 %v22824_v28  ;;  %v22868_v22 = vld [vmem:[#allocation5 + $0x1e0c] ss:$44 sps:$4 sm:$0xff]   ;;  %v22870_v28 = vld [vmem:[#allocation5 + $0x2390] ss:$44 sps:$4 sm:$0xff]  }
 0x754   :  { %15455 = vmatprep.subr.bf16.mxu0 %v22823_v25  ;;  %v22866_v25 = vld [vmem:[#allocation5 + $0x1e08] ss:$44 sps:$4 sm:$0xff]  }
 0x756   :  { %19647 = vmatpush3.bf16.msra.mxu1 %v22825_v31  ;;  %v22874_v31 = vld [vmem:[#allocation5 + $0x2968] ss:$44 sps:$4 sm:$0xff]  }
 0x757   :  { %15456 = vmatpush1.bf16.msra.mxu0 %v22821_v29  ;;  %19648 = vmatprep.subr.bf16.mxu1 %v22829_v19  ;;  %v22873_v29 = vld [vmem:[#allocation5 + $0x1e64] ss:$44 sps:$4 sm:$0xff]   ;;  %v22875_v19 = vld [vmem:[#allocation5 + $0x26a8] ss:$44 sps:$4 sm:$0xff]  }
 0x758   :  { %15457 = vmatprep.subr.bf16.mxu0 %v22828_v30  ;;  %v22871_v30 = vld [vmem:[#allocation5 + $0x1e60] ss:$44 sps:$4 sm:$0xff]  }
 0x75a   :  { %19649 = vmatpush3.bf16.msra.mxu1 %v22830_v33  ;;  %v22879_v33 = vld [vmem:[#allocation5 + $0x29c0] ss:$44 sps:$4 sm:$0xff]  }
 0x75b   :  { %15458 = vmatpush1.bf16.msra.mxu0 %v22826_v16  ;;  %19656 = vmatprep.subr.bf16.mxu1 %v22834_v35  ;;  %v22878_v16 = vld [vmem:[#allocation5 + $0x1ebc] ss:$44 sps:$4 sm:$0xff]   ;;  %v22880_v35 = vld [vmem:[#allocation5 + $0x2700] ss:$44 sps:$4 sm:$0xff]  }
 0x75c   :  { %15468 = vmatprep.subr.bf16.mxu0 %v22833_v7  ;;  %v22876_v7 = vld [vmem:[#allocation5 + $0x1eb8] ss:$44 sps:$4 sm:$0xff]  }
 0x75d   :  { %15988 = vmatmul.mubr.bf16.vlgmr.msra.gmra.mrb[32].mxu1 %v23709_v55 }
 0x75e   :  { %15460 = vmatmul.mubr.bf16.vlgmr.msra.gmra.mrb[8].mxu0 %v23693_v38  ;;  %19657 = vmatpush3.bf16.msra.mxu1 %v22835_v20  ;;  %v22848_v38 = vld [vmem:[#allocation5 + $0x1cac] ss:$44 sps:$4 sm:$0xff]  }
 0x75f   :  { %15469 = vmatpush1.bf16.msra.mxu0 %v22831_v40  ;;  %19658 = vmatprep.subr.bf16.mxu1 %v22839_v0  ;;  %v22883_v40 = vld [vmem:[#allocation5 + $0x1f14] ss:$44 sps:$4 sm:$0xff]   ;;  %v22884_v20 = vld [vmem:[#allocation5 + $0x2a18] ss:$44 sps:$4 sm:$0xff]  }
 0x760   :  { %15470 = vmatprep.subr.bf16.mxu0 %v22838_v45  ;;  %16027 = vmatprep.mubr.bf16.mxu1 %v23713_v60  ;;  %v22881_v45 = vld [vmem:[#allocation5 + $0x1f10] ss:$44 sps:$4 sm:$0xff]   ;;  %v22885_v0 = vld [vmem:[#allocation5 + $0x2758] ss:$44 sps:$4 sm:$0xff]  }
 0x761   :  { %15500 = vmatprep.mubr.bf16.mxu0 %v23699_v44  ;;  %v22855_v44 = vld [vmem:[#allocation5 + $0x2288] ss:$44 sps:$4 sm:$0xff]  }
 0x762   :  { %19659 = vmatpush3.bf16.msra.mxu1 %v22840_v48  ;;  %v22889_v48 = vld [vmem:[#allocation5 + $0x2a70] ss:$44 sps:$4 sm:$0xff]  }
 0x763   :  { %15471 = vmatpush1.bf16.msra.mxu0 %v22836_v34  ;;  %19660 = vmatprep.subr.bf16.mxu1 %v22844_v49  ;;  %v22888_v34 = vld [vmem:[#allocation5 + $0x1f6c] ss:$44 sps:$4 sm:$0xff]   ;;  %v22890_v49 = vld [vmem:[#allocation5 + $0x27b0] ss:$44 sps:$4 sm:$0xff]  }
 0x764   :  { %15472 = vmatprep.subr.bf16.mxu0 %v22843_v6  ;;  %v22886_v6 = vld [vmem:[#allocation5 + $0x1f68] ss:$44 sps:$4 sm:$0xff]  }
 0x766   :  { %19661 = vmatpush3.bf16.msra.mxu1 %v22845_v52  ;;  %v22894_v52 = vld [vmem:[#allocation5 + $0x2ac8] ss:$44 sps:$4 sm:$0xff]  }
 0x767   :  { %15473 = vmatpush1.bf16.msra.mxu0 %v22841_v50  ;;  %19662 = vmatprep.subr.bf16.mxu1 %v22849_v53  ;;  %v22893_v50 = vld [vmem:[#allocation5 + $0x1fc4] ss:$44 sps:$4 sm:$0xff]   ;;  %v22895_v53 = vld [vmem:[#allocation5 + $0x2808] ss:$44 sps:$4 sm:$0xff]  }
 0x768   :  { %15474 = vmatprep.subr.bf16.mxu0 %v22848_v38  ;;  %v22891_v38 = vld [vmem:[#allocation5 + $0x1fc0] ss:$44 sps:$4 sm:$0xff]  }
 0x76a   :  { %19663 = vmatpush3.bf16.msra.mxu1 %v22850_v47  ;;  %v22899_v47 = vld [vmem:[#allocation5 + $0x2b20] ss:$44 sps:$4 sm:$0xff]  }
 0x76b   :  { %15475 = vmatpush1.bf16.msra.mxu0 %v22846_v51  ;;  %19664 = vmatprep.subr.bf16.mxu1 %v22854_v62  ;;  %v22898_v51 = vld [vmem:[#allocation5 + $0x201c] ss:$44 sps:$4 sm:$0xff]   ;;  %v22900_v62 = vld [vmem:[#allocation5 + $0x2860] ss:$44 sps:$4 sm:$0xff]  }
 0x76c   :  { %15476 = vmatprep.subr.bf16.mxu0 %v22853_v59  ;;  %v22896_v59 = vld [vmem:[#allocation5 + $0x2018] ss:$44 sps:$4 sm:$0xff]  }
 0x76e   :  { %19665 = vmatpush3.bf16.msra.mxu1 %v22855_v44  ;;  %v22904_v44 = vld [vmem:[#allocation5 + $0x2b78] ss:$44 sps:$4 sm:$0xff]  }
 0x76f   :  { %15477 = vmatpush1.bf16.msra.mxu0 %v22851_v63  ;;  %19666 = vmatprep.subr.bf16.mxu1 %v22859_v2  ;;  %v22903_v63 = vld [vmem:[#allocation5 + $0x2074] ss:$44 sps:$4 sm:$0xff]   ;;  %v22905_v2 = vld [vmem:[#allocation5 + $0x28b8] ss:$44 sps:$4 sm:$0xff]  }
 0x770   :  { %15478 = vmatprep.subr.bf16.mxu0 %v22858_v12  ;;  %v23897_v5 = vpop.f32.mrb[8].mxu1  ;;  %v22901_v12 = vld [vmem:[#allocation5 + $0x2070] ss:$44 sps:$4 sm:$0xff]  }
 0x771   :  { %v23899_v36 = vpop.f32.mrb[9].mxu1 }
 0x772   :  { %v15260_v17 = vpop.f32.mrb[10].mxu1  ;;  %19667 = vmatpush3.bf16.msra.mxu1 %v22860_v4  ;;  %v22909_v4 = vld [vmem:[#allocation5 + $0x2bd0] ss:$44 sps:$4 sm:$0xff]  }
 0x773   :  { %15479 = vmatpush1.bf16.msra.mxu0 %v22856_v3  ;;  %v15261_v26 = vpop.f32.mrb[11].mxu1  ;;  %19668 = vmatprep.subr.bf16.mxu1 %v22864_v13  ;;  %v22908_v3 = vld [vmem:[#allocation5 + $0x20cc] ss:$44 sps:$4 sm:$0xff]   ;;  %v22910_v13 = vld [vmem:[#allocation5 + $0x2910] ss:$44 sps:$4 sm:$0xff]  }
 0x774   :  { %15480 = vmatprep.subr.bf16.mxu0 %v22863_v15  ;;  %v22906_v15 = vld [vmem:[#allocation5 + $0x20c8] ss:$44 sps:$4 sm:$0xff]   ;;  %v22913_v17 = vld [vmem:[#allocation5 + $0x2124] ss:$44 sps:$4 sm:$0xff]  }
 0x775   :  { %v22915_v26 = vld [vmem:[#allocation5 + $0x2c28] ss:$44 sps:$4 sm:$0xff]  }
 0x776   :  { %19669 = vmatpush3.bf16.msra.mxu1 %v22865_v21  ;;  %v22911_v21 = vld [vmem:[#allocation5 + $0x2120] ss:$44 sps:$4 sm:$0xff]  }
 0x777   :  { %15481 = vmatpush1.bf16.msra.mxu0 %v22861_v18  ;;  %19670 = vmatprep.subr.bf16.mxu1 %v22869_v24  ;;  %v22914_v18 = vld [vmem:[#allocation5 + $0x2ee8] ss:$44 sps:$4 sm:$0xff]   ;;  %v22919_v24 = vld [vmem:[#allocation5 + $0x2f40] ss:$44 sps:$4 sm:$0xff]  }
 0x778   :  { %15482 = vmatprep.subr.bf16.mxu0 %v22868_v22  ;;  %v22918_v22 = vld [vmem:[#allocation5 + $0x217c] ss:$44 sps:$4 sm:$0xff]  }
 0x77a   :  { %19671 = vmatpush3.bf16.msra.mxu1 %v22870_v28  ;;  %v22920_v28 = vld [vmem:[#allocation5 + $0x2c80] ss:$44 sps:$4 sm:$0xff]  }
 0x77b   :  { %15483 = vmatpush1.bf16.msra.mxu0 %v22866_v25  ;;  %19678 = vmatprep.subr.bf16.mxu1 %v22874_v31  ;;  %v22916_v25 = vld [vmem:[#allocation5 + $0x2178] ss:$44 sps:$4 sm:$0xff]  }
 0x77c   :  { %15484 = vmatprep.subr.bf16.mxu0 %v22873_v29  ;;  %v22923_v29 = vld [vmem:[#allocation5 + $0x21d4] ss:$44 sps:$4 sm:$0xff]   ;;  %v22924_v31 = vld [vmem:[#allocation5 + $0x2f98] ss:$44 sps:$4 sm:$0xff]  }
 0x77d   :  { %16028 = vmatmul.mubr.bf16.vlgmr.msra.gmra.mrb[36].mxu1 %v23723_v9 }
 0x77e   :  { %19679 = vmatpush3.bf16.msra.mxu1 %v22875_v19  ;;  %16067 = vmatprep.mubr.bf16.mxu1 %v23727_v14  ;;  %v22925_v19 = vld [vmem:[#allocation5 + $0x2cd8] ss:$44 sps:$4 sm:$0xff]  }
 0x77f   :  { %15485 = vmatpush1.bf16.msra.mxu0 %v22871_v30  ;;  %19680 = vmatprep.subr.bf16.mxu1 %v22879_v33  ;;  %v22921_v30 = vld [vmem:[#allocation5 + $0x21d0] ss:$44 sps:$4 sm:$0xff]   ;;  %v22926_v33 = vld [vmem:[#allocation5 + $0x2228] ss:$44 sps:$4 sm:$0xff]  }
 0x780   :  { %15486 = vmatprep.subr.bf16.mxu0 %v22878_v16  ;;  %v22929_v16 = vld [vmem:[#allocation5 + $0x2ff0] ss:$44 sps:$4 sm:$0xff]  }
 0x782   :  { %19681 = vmatpush3.bf16.msra.mxu1 %v22880_v35  ;;  %v22933_v35 = vld [vmem:[#allocation5 + $0x2284] ss:$44 sps:$4 sm:$0xff]  }
 0x783   :  { %15487 = vmatpush1.bf16.msra.mxu0 %v22876_v7  ;;  %19682 = vmatprep.subr.bf16.mxu1 %v22884_v20  ;;  %v22930_v7 = vld [vmem:[#allocation5 + $0x2d30] ss:$44 sps:$4 sm:$0xff]   ;;  %v22931_v20 = vld [vmem:[#allocation5 + $0x2280] ss:$44 sps:$4 sm:$0xff]  }
 0x784   :  { %15488 = vmatprep.subr.bf16.mxu0 %v22883_v40  ;;  %v22934_v40 = vld [vmem:[#allocation5 + $0x3048] ss:$44 sps:$4 sm:$0xff]  }
 0x786   :  { %19683 = vmatpush3.bf16.msra.mxu1 %v22885_v0  ;;  %v22939_v0 = vld [vmem:[#allocation5 + $0x30a0] ss:$44 sps:$4 sm:$0xff]  }
 0x787   :  { %15489 = vmatpush1.bf16.msra.mxu0 %v22881_v45  ;;  %19684 = vmatprep.subr.bf16.mxu1 %v22889_v48  ;;  %v22938_v45 = vld [vmem:[#allocation5 + $0x22dc] ss:$44 sps:$4 sm:$0xff]   ;;  %v22940_v48 = vld [vmem:[#allocation5 + $0x2de0] ss:$44 sps:$4 sm:$0xff]  }
 0x788   :  { %15490 = vmatprep.subr.bf16.mxu0 %v22888_v34  ;;  %v22936_v34 = vld [vmem:[#allocation5 + $0x22d8] ss:$44 sps:$4 sm:$0xff]  }
 0x78a   :  { %19685 = vmatpush3.bf16.msra.mxu1 %v22890_v49  ;;  %v22944_v49 = vld [vmem:[#allocation5 + $0x30f8] ss:$44 sps:$4 sm:$0xff]  }
 0x78b   :  { %15491 = vmatpush1.bf16.msra.mxu0 %v22886_v6  ;;  %19686 = vmatprep.subr.bf16.mxu1 %v22894_v52  ;;  %v22943_v6 = vld [vmem:[#allocation5 + $0x2334] ss:$44 sps:$4 sm:$0xff]   ;;  %v22945_v52 = vld [vmem:[#allocation5 + $0x2e38] ss:$44 sps:$4 sm:$0xff]  }
 0x78c   :  { %15492 = vmatprep.subr.bf16.mxu0 %v22893_v50  ;;  %v22941_v50 = vld [vmem:[#allocation5 + $0x2330] ss:$44 sps:$4 sm:$0xff]  }
 0x78e   :  { %19687 = vmatpush3.bf16.msra.mxu1 %v22895_v53  ;;  %v22949_v53 = vld [vmem:[#allocation5 + $0x3150] ss:$44 sps:$4 sm:$0xff]  }
 0x78f   :  { %15493 = vmatpush1.bf16.msra.mxu0 %v22891_v38  ;;  %19688 = vmatprep.subr.bf16.mxu1 %v22899_v47  ;;  %v22948_v38 = vld [vmem:[#allocation5 + $0x238c] ss:$44 sps:$4 sm:$0xff]   ;;  %v22950_v47 = vld [vmem:[#allocation5 + $0x2e90] ss:$44 sps:$4 sm:$0xff]  }
 0x790   :  { %15494 = vmatprep.subr.bf16.mxu0 %v22898_v51  ;;  %v22946_v51 = vld [vmem:[#allocation5 + $0x2388] ss:$44 sps:$4 sm:$0xff]  }
 0x792   :  { %19689 = vmatpush3.bf16.msra.mxu1 %v22900_v62  ;;  %v22954_v62 = vld [vmem:[#allocation5 + $0x3468] ss:$44 sps:$4 sm:$0xff]  }
 0x793   :  { %15495 = vmatpush1.bf16.msra.mxu0 %v22896_v59  ;;  %19690 = vmatprep.subr.bf16.mxu1 %v22904_v44  ;;  %v22953_v59 = vld [vmem:[#allocation5 + $0x23e4] ss:$44 sps:$4 sm:$0xff]   ;;  %v22955_v44 = vld [vmem:[#allocation5 + $0x31a8] ss:$44 sps:$4 sm:$0xff]  }
 0x794   :  { %15496 = vmatprep.subr.bf16.mxu0 %v22903_v63  ;;  %v22951_v63 = vld [vmem:[#allocation5 + $0x23e0] ss:$44 sps:$4 sm:$0xff]  }
 0x796   :  { %19691 = vmatpush3.bf16.msra.mxu1 %v22905_v2  ;;  %v22959_v2 = vld [vmem:[#allocation5 + $0x34c0] ss:$44 sps:$4 sm:$0xff]  }
 0x797   :  { %15497 = vmatpush1.bf16.msra.mxu0 %v22901_v12  ;;  %19692 = vmatprep.subr.bf16.mxu1 %v22909_v4  ;;  %v22958_v12 = vld [vmem:[#allocation5 + $0x243c] ss:$44 sps:$4 sm:$0xff]   ;;  %v22960_v4 = vld [vmem:[#allocation5 + $0x3200] ss:$44 sps:$4 sm:$0xff]  }
 0x798   :  { %15498 = vmatprep.subr.bf16.mxu0 %v22908_v3  ;;  %v22956_v3 = vld [vmem:[#allocation5 + $0x2438] ss:$44 sps:$4 sm:$0xff]  }
 0x79a   :  { %19693 = vmatpush3.bf16.msra.mxu1 %v22910_v13  ;;  %v22964_v13 = vld [vmem:[#allocation5 + $0x3518] ss:$44 sps:$4 sm:$0xff]  }
 0x79b   :  { %15499 = vmatpush1.bf16.msra.mxu0 %v22906_v15  ;;  %19700 = vmatprep.subr.bf16.mxu1 %v22914_v18  ;;  %v22963_v15 = vld [vmem:[#allocation5 + $0x2494] ss:$44 sps:$4 sm:$0xff]   ;;  %v22965_v18 = vld [vmem:[#allocation5 + $0x3258] ss:$44 sps:$4 sm:$0xff]  }
 0x79c   :  { %15509 = vmatprep.subr.bf16.mxu0 %v22913_v17  ;;  %v22961_v17 = vld [vmem:[#allocation5 + $0x2490] ss:$44 sps:$4 sm:$0xff]  }
 0x79d   :  { %16068 = vmatmul.mubr.bf16.vlgmr.msra.gmra.mrb[40].mxu1 %v23741_v37 }
 0x79e   :  { %15501 = vmatmul.mubr.bf16.vlgmr.msra.gmra.mrb[8].mxu0 %v23709_v55  ;;  %19701 = vmatpush3.bf16.msra.mxu1 %v22915_v26  ;;  %v22928_v55 = vld [vmem:[#allocation5 + $0x222c] ss:$44 sps:$4 sm:$0xff]   ;;  %v22969_v26 = vld [vmem:[#allocation5 + $0x3570] ss:$44 sps:$4 sm:$0xff]  }
 0x79f   :  { %15510 = vmatpush1.bf16.msra.mxu0 %v22911_v21  ;;  %19702 = vmatprep.subr.bf16.mxu1 %v22919_v24  ;;  %v22968_v21 = vld [vmem:[#allocation5 + $0x24ec] ss:$44 sps:$4 sm:$0xff]   ;;  %v22970_v24 = vld [vmem:[#allocation5 + $0x32b0] ss:$44 sps:$4 sm:$0xff]  }
 0x7a0   :  { %15511 = vmatprep.subr.bf16.mxu0 %v22918_v22  ;;  %16107 = vmatprep.mubr.bf16.mxu1 %v23745_v27  ;;  %v22966_v22 = vld [vmem:[#allocation5 + $0x24e8] ss:$44 sps:$4 sm:$0xff]  }
 0x7a1   :  { %15541 = vmatprep.mubr.bf16.mxu0 %v23713_v60  ;;  %v22935_v60 = vld [vmem:[#allocation5 + $0x2d88] ss:$44 sps:$4 sm:$0xff]  }
 0x7a2   :  { %19703 = vmatpush3.bf16.msra.mxu1 %v22920_v28  ;;  %v22974_v28 = vld [vmem:[#allocation5 + $0x35c8] ss:$44 sps:$4 sm:$0xff]  }
 0x7a3   :  { %15512 = vmatpush1.bf16.msra.mxu0 %v22916_v25  ;;  %19704 = vmatprep.subr.bf16.mxu1 %v22924_v31  ;;  %v22973_v25 = vld [vmem:[#allocation5 + $0x2544] ss:$44 sps:$4 sm:$0xff]   ;;  %v22975_v31 = vld [vmem:[#allocation5 + $0x3308] ss:$44 sps:$4 sm:$0xff]  }
 0x7a4   :  { %15513 = vmatprep.subr.bf16.mxu0 %v22923_v29  ;;  %v22971_v29 = vld [vmem:[#allocation5 + $0x2540] ss:$44 sps:$4 sm:$0xff]  }
 0x7a6   :  { %19705 = vmatpush3.bf16.msra.mxu1 %v22925_v19  ;;  %v22979_v19 = vld [vmem:[#allocation5 + $0x3620] ss:$44 sps:$4 sm:$0xff]  }
 0x7a7   :  { %15514 = vmatpush1.bf16.msra.mxu0 %v22921_v30  ;;  %19706 = vmatprep.subr.bf16.mxu1 %v22929_v16  ;;  %v22978_v30 = vld [vmem:[#allocation5 + $0x259c] ss:$44 sps:$4 sm:$0xff]   ;;  %v22980_v16 = vld [vmem:[#allocation5 + $0x3360] ss:$44 sps:$4 sm:$0xff]  }
 0x7a8   :  { %15515 = vmatprep.subr.bf16.mxu0 %v22928_v55  ;;  %v22976_v55 = vld [vmem:[#allocation5 + $0x2598] ss:$44 sps:$4 sm:$0xff]  }
 0x7aa   :  { %19707 = vmatpush3.bf16.msra.mxu1 %v22930_v7  ;;  %v22984_v7 = vld [vmem:[#allocation5 + $0x3678] ss:$44 sps:$4 sm:$0xff]  }
 0x7ab   :  { %15516 = vmatpush1.bf16.msra.mxu0 %v22926_v33  ;;  %19708 = vmatprep.subr.bf16.mxu1 %v22934_v40  ;;  %v22983_v33 = vld [vmem:[#allocation5 + $0x25f4] ss:$44 sps:$4 sm:$0xff]   ;;  %v22985_v40 = vld [vmem:[#allocation5 + $0x33b8] ss:$44 sps:$4 sm:$0xff]  }
 0x7ac   :  { %15517 = vmatprep.subr.bf16.mxu0 %v22933_v35  ;;  %v22981_v35 = vld [vmem:[#allocation5 + $0x25f0] ss:$44 sps:$4 sm:$0xff]  }
 0x7ae   :  { %19709 = vmatpush3.bf16.msra.mxu1 %v22935_v60  ;;  %v22989_v60 = vld [vmem:[#allocation5 + $0x36d0] ss:$44 sps:$4 sm:$0xff]  }
 0x7af   :  { %15518 = vmatpush1.bf16.msra.mxu0 %v22931_v20  ;;  %19710 = vmatprep.subr.bf16.mxu1 %v22939_v0  ;;  %v22988_v20 = vld [vmem:[#allocation5 + $0x264c] ss:$44 sps:$4 sm:$0xff]   ;;  %v22990_v0 = vld [vmem:[#allocation5 + $0x3410] ss:$44 sps:$4 sm:$0xff]  }
 0x7b0   :  { %15519 = vmatprep.subr.bf16.mxu0 %v22938_v45  ;;  %v22986_v45 = vld [vmem:[#allocation5 + $0x2648] ss:$44 sps:$4 sm:$0xff]  }
 0x7b2   :  { %19711 = vmatpush3.bf16.msra.mxu1 %v22940_v48  ;;  %v22994_v48 = vld [vmem:[#allocation5 + $0x39e8] ss:$44 sps:$4 sm:$0xff]  }
 0x7b3   :  { %15520 = vmatpush1.bf16.msra.mxu0 %v22936_v34  ;;  %19712 = vmatprep.subr.bf16.mxu1 %v22944_v49  ;;  %v22993_v34 = vld [vmem:[#allocation5 + $0x26a4] ss:$44 sps:$4 sm:$0xff]   ;;  %v22995_v49 = vld [vmem:[#allocation5 + $0x3728] ss:$44 sps:$4 sm:$0xff]  }
 0x7b4   :  { %15521 = vmatprep.subr.bf16.mxu0 %v22943_v6  ;;  %v22991_v6 = vld [vmem:[#allocation5 + $0x26a0] ss:$44 sps:$4 sm:$0xff]  }
 0x7b6   :  { %19713 = vmatpush3.bf16.msra.mxu1 %v22945_v52  ;;  %v22999_v52 = vld [vmem:[#allocation5 + $0x3a40] ss:$44 sps:$4 sm:$0xff]  }
 0x7b7   :  { %15522 = vmatpush1.bf16.msra.mxu0 %v22941_v50  ;;  %19714 = vmatprep.subr.bf16.mxu1 %v22949_v53  ;;  %v22998_v50 = vld [vmem:[#allocation5 + $0x26fc] ss:$44 sps:$4 sm:$0xff]   ;;  %v23000_v53 = vld [vmem:[#allocation5 + $0x3780] ss:$44 sps:$4 sm:$0xff]  }
 0x7b8   :  { %15523 = vmatprep.subr.bf16.mxu0 %v22948_v38  ;;  %v22996_v38 = vld [vmem:[#allocation5 + $0x26f8] ss:$44 sps:$4 sm:$0xff]  }
 0x7ba   :  { %19715 = vmatpush3.bf16.msra.mxu1 %v22950_v47  ;;  %v23004_v47 = vld [vmem:[#allocation5 + $0x3a98] ss:$44 sps:$4 sm:$0xff]  }
 0x7bb   :  { %15524 = vmatpush1.bf16.msra.mxu0 %v22946_v51  ;;  %19722 = vmatprep.subr.bf16.mxu1 %v22954_v62  ;;  %v23003_v51 = vld [vmem:[#allocation5 + $0x2754] ss:$44 sps:$4 sm:$0xff]   ;;  %v23005_v62 = vld [vmem:[#allocation5 + $0x37d8] ss:$44 sps:$4 sm:$0xff]  }
 0x7bc   :  { %15525 = vmatprep.subr.bf16.mxu0 %v22953_v59  ;;  %v23001_v59 = vld [vmem:[#allocation5 + $0x2750] ss:$44 sps:$4 sm:$0xff]  }
 0x7bd   :  { %16108 = vmatmul.mubr.bf16.vlgmr.msra.gmra.mrb[44].mxu1 %v23755_v1 }
 0x7be   :  { %19723 = vmatpush3.bf16.msra.mxu1 %v22955_v44  ;;  %16147 = vmatprep.mubr.bf16.mxu1 %v23759_v10  ;;  %v23006_v44 = vld [vmem:[#allocation5 + $0x27a8] ss:$44 sps:$4 sm:$0xff]  }
 0x7bf   :  { %15526 = vmatpush1.bf16.msra.mxu0 %v22951_v63  ;;  %19724 = vmatprep.subr.bf16.mxu1 %v22959_v2  ;;  %v23009_v63 = vld [vmem:[#allocation5 + $0x3af0] ss:$44 sps:$4 sm:$0xff]  }
 0x7c0   :  { %15527 = vmatprep.subr.bf16.mxu0 %v22958_v12  ;;  %v23010_v12 = vld [vmem:[#allocation5 + $0x3830] ss:$44 sps:$4 sm:$0xff]  }
 0x7c1   :  { %v23013_v2 = vld [vmem:[#allocation5 + $0x2804] ss:$44 sps:$4 sm:$0xff]  }
 0x7c2   :  { %19725 = vmatpush3.bf16.msra.mxu1 %v22960_v4  ;;  %v23011_v4 = vld [vmem:[#allocation5 + $0x2800] ss:$44 sps:$4 sm:$0xff]  }
 0x7c3   :  { %15528 = vmatpush1.bf16.msra.mxu0 %v22956_v3  ;;  %19726 = vmatprep.subr.bf16.mxu1 %v22964_v13  ;;  %v23014_v3 = vld [vmem:[#allocation5 + $0x3b48] ss:$44 sps:$4 sm:$0xff]   ;;  %v23019_v13 = vld [vmem:[#allocation5 + $0x3ba0] ss:$44 sps:$4 sm:$0xff]  }
 0x7c4   :  { %15529 = vmatprep.subr.bf16.mxu0 %v22963_v15  ;;  %v23018_v15 = vld [vmem:[#allocation5 + $0x285c] ss:$44 sps:$4 sm:$0xff]  }
 0x7c6   :  { %19727 = vmatpush3.bf16.msra.mxu1 %v22965_v18  ;;  %v23020_v18 = vld [vmem:[#allocation5 + $0x38e0] ss:$44 sps:$4 sm:$0xff]  }
 0x7c7   :  { %15530 = vmatpush1.bf16.msra.mxu0 %v22961_v17  ;;  %19728 = vmatprep.subr.bf16.mxu1 %v22969_v26  ;;  %v23016_v17 = vld [vmem:[#allocation5 + $0x2858] ss:$44 sps:$4 sm:$0xff]  }
 0x7c8   :  { %15531 = vmatprep.subr.bf16.mxu0 %v22968_v21  ;;  %v23023_v21 = vld [vmem:[#allocation5 + $0x28b4] ss:$44 sps:$4 sm:$0xff]   ;;  %v23024_v26 = vld [vmem:[#allocation5 + $0x3bf8] ss:$44 sps:$4 sm:$0xff]  }
 0x7ca   :  { %19729 = vmatpush3.bf16.msra.mxu1 %v22970_v24  ;;  %v23025_v24 = vld [vmem:[#allocation5 + $0x3938] ss:$44 sps:$4 sm:$0xff]  }
 0x7cb   :  { %15532 = vmatpush1.bf16.msra.mxu0 %v22966_v22  ;;  %19730 = vmatprep.subr.bf16.mxu1 %v22974_v28  ;;  %v23021_v22 = vld [vmem:[#allocation5 + $0x28b0] ss:$44 sps:$4 sm:$0xff]  }
 0x7cc   :  { %15533 = vmatprep.subr.bf16.mxu0 %v22973_v25  ;;  %v23028_v25 = vld [vmem:[#allocation5 + $0x290c] ss:$44 sps:$4 sm:$0xff]   ;;  %v23029_v28 = vld [vmem:[#allocation5 + $0x3c50] ss:$44 sps:$4 sm:$0xff]  }
 0x7ce   :  { %19731 = vmatpush3.bf16.msra.mxu1 %v22975_v31  ;;  %v23030_v31 = vld [vmem:[#allocation5 + $0x3990] ss:$44 sps:$4 sm:$0xff]  }
 0x7cf   :  { %15534 = vmatpush1.bf16.msra.mxu0 %v22971_v29  ;;  %19732 = vmatprep.subr.bf16.mxu1 %v22979_v19  ;;  %v23026_v29 = vld [vmem:[#allocation5 + $0x2908] ss:$44 sps:$4 sm:$0xff]  }
 0x7d0   :  { %15535 = vmatprep.subr.bf16.mxu0 %v22978_v30  ;;  %v23033_v30 = vld [vmem:[#allocation5 + $0x2964] ss:$44 sps:$4 sm:$0xff]   ;;  %v23034_v19 = vld [vmem:[#allocation5 + $0x3f68] ss:$44 sps:$4 sm:$0xff]  }
 0x7d2   :  { %19733 = vmatpush3.bf16.msra.mxu1 %v22980_v16  ;;  %v23035_v16 = vld [vmem:[#allocation5 + $0x3ca8] ss:$44 sps:$4 sm:$0xff]  }
 0x7d3   :  { %15536 = vmatpush1.bf16.msra.mxu0 %v22976_v55  ;;  %19734 = vmatprep.subr.bf16.mxu1 %v22984_v7  ;;  %v23031_v55 = vld [vmem:[#allocation5 + $0x2960] ss:$44 sps:$4 sm:$0xff]   ;;  %v23038_v7 = vld [vmem:[#allocation5 + $0x29bc] ss:$44 sps:$4 sm:$0xff]  }
 0x7d4   :  { %15537 = vmatprep.subr.bf16.mxu0 %v22983_v33  ;;  %v19424_v33 = vmul.f32 -1.442695, %v23825_v61  ;;  %v23041_v61 = vld [vmem:[#allocation5 + $0x2a10] ss:$44 sps:$4 sm:$0xff]  }
 0x7d6   :  { %19735 = vmatpush3.bf16.msra.mxu1 %v22985_v40  ;;  %v23036_v40 = vld [vmem:[#allocation5 + $0x29b8] ss:$44 sps:$4 sm:$0xff]   ;;  %23351 = vpow2.f32 %v19424_v33 }
 0x7d7   :  { %15538 = vmatpush1.bf16.msra.mxu0 %v22981_v35  ;;  %19736 = vmatprep.subr.bf16.mxu1 %v22989_v60  ;;  %v23039_v35 = vld [vmem:[#allocation5 + $0x3fc0] ss:$44 sps:$4 sm:$0xff]  }
 0x7d8   :  { %15539 = vmatprep.subr.bf16.mxu0 %v22988_v20  ;;  %v23040_v20 = vld [vmem:[#allocation5 + $0x3d00] ss:$44 sps:$4 sm:$0xff]  }
 0x7d9   :  { %v23043_v60 = vld [vmem:[#allocation5 + $0x2a14] ss:$44 sps:$4 sm:$0xff]  }
 0x7da   :  { %19737 = vmatpush3.bf16.msra.mxu1 %v22990_v0  ;;  %v23045_v0 = vld [vmem:[#allocation5 + $0x3d58] ss:$44 sps:$4 sm:$0xff]  }
 0x7db   :  { %15540 = vmatpush1.bf16.msra.mxu0 %v22986_v45  ;;  %19744 = vmatprep.subr.bf16.mxu1 %v22994_v48  ;;  %v23044_v45 = vld [vmem:[#allocation5 + $0x4018] ss:$44 sps:$4 sm:$0xff]   ;;  %v23049_v48 = vld [vmem:[#allocation5 + $0x4070] ss:$44 sps:$4 sm:$0xff]  }
 0x7dc   :  { %15550 = vmatprep.subr.bf16.mxu0 %v22993_v34  ;;  %v23048_v34 = vld [vmem:[#allocation5 + $0x2a6c] ss:$44 sps:$4 sm:$0xff]  }
 0x7dd   :  { %16148 = vmatmul.mubr.bf16.vlgmr.msra.gmra.mrb[48].mxu1 %v23767_v42 }
 0x7de   :  { %15542 = vmatmul.mubr.bf16.vlgmr.msra.gmra.mrb[8].mxu0 %v23723_v9  ;;  %19745 = vmatpush3.bf16.msra.mxu1 %v22995_v49  ;;  %v23008_v9 = vld [vmem:[#allocation5 + $0x27ac] ss:$44 sps:$4 sm:$0xff]   ;;  %v23050_v49 = vld [vmem:[#allocation5 + $0x3db0] ss:$44 sps:$4 sm:$0xff]  }
 0x7df   :  { %15551 = vmatpush1.bf16.msra.mxu0 %v22991_v6  ;;  %19746 = vmatprep.subr.bf16.mxu1 %v22999_v52  ;;  %v23046_v6 = vld [vmem:[#allocation5 + $0x2a68] ss:$44 sps:$4 sm:$0xff]  }
 0x7e0   :  { %15552 = vmatprep.subr.bf16.mxu0 %v22998_v50  ;;  %16187 = vmatprep.mubr.bf16.mxu1 %v23773_v46  ;;  %v23053_v50 = vld [vmem:[#allocation5 + $0x2ac4] ss:$44 sps:$4 sm:$0xff]   ;;  %v23054_v52 = vld [vmem:[#allocation5 + $0x40c8] ss:$44 sps:$4 sm:$0xff]  }
 0x7e1   :  { %15582 = vmatprep.mubr.bf16.mxu0 %v23727_v14  ;;  %v23015_v14 = vld [vmem:[#allocation5 + $0x3888] ss:$44 sps:$4 sm:$0xff]  }
 0x7e2   :  { %19747 = vmatpush3.bf16.msra.mxu1 %v23000_v53  ;;  %v23051_v53 = vld [vmem:[#allocation5 + $0x2ac0] ss:$44 sps:$4 sm:$0xff]  }
 0x7e3   :  { %15553 = vmatpush1.bf16.msra.mxu0 %v22996_v38  ;;  %19748 = vmatprep.subr.bf16.mxu1 %v23004_v47  ;;  %v23352_v38 = vpop.eup %23351  ;;  %v23058_v47 = vld [vmem:[#allocation5 + $0x2b1c] ss:$44 sps:$4 sm:$0xff]  }
 0x7e4   :  { %15554 = vmatprep.subr.bf16.mxu0 %v23003_v51  ;;  %v23055_v51 = vld [vmem:[#allocation5 + $0x3e08] ss:$44 sps:$4 sm:$0xff]  }
 0x7e6   :  { %19749 = vmatpush3.bf16.msra.mxu1 %v23005_v62  ;;  %v16269_v62 = vadd.f32 1.0, %v23352_v38  ;;  %v23081_v38 = vld [vmem:[#allocation5 + $0x2cd0] ss:$44 sps:$4 sm:$0xff]  }
 0x7e7   :  { %15555 = vmatpush1.bf16.msra.mxu0 %v23001_v59  ;;  %19750 = vmatprep.subr.bf16.mxu1 %v23009_v63  ;;  %v23059_v59 = vld [vmem:[#allocation5 + $0x4120] ss:$44 sps:$4 sm:$0xff]   ;;  %v23056_v63 = vld [vmem:[#allocation5 + $0x2b18] ss:$44 sps:$4 sm:$0xff]  }
 0x7e8   :  { %15556 = vmatprep.subr.bf16.mxu0 %v23008_v9  ;;  %v2418_v9 = vsub.s32 3, %v23811_v11  ;;  %23353 = vrcp.f32 %v16269_v62  ;;  %v23089_v62 = vld [vmem:[#allocation8 + $0x58] sm:$0xff]  }
 0x7ea   :  { %19751 = vmatpush3.bf16.msra.mxu1 %v23010_v12  ;;  %v23063_v12 = vld [vmem:[#allocation5 + $0x2b74] ss:$44 sps:$4 sm:$0xff]  }
 0x7eb   :  { %15557 = vmatpush1.bf16.msra.mxu0 %v23006_v44  ;;  %19752 = vmatprep.subr.bf16.mxu1 %v23014_v3  ;;  %v23060_v44 = vld [vmem:[#allocation5 + $0x3e60] ss:$44 sps:$4 sm:$0xff]  }
 0x7ec   :  { %15558 = vmatprep.subr.bf16.mxu0 %v23013_v2  ;;  %v23064_v2 = vld [vmem:[#allocation5 + $0x4178] ss:$44 sps:$4 sm:$0xff]  }
 0x7ed   :  { %v23917_v3 = vld [vmem:[#allocation7] sm:$0xff] }
 0x7ee   :  { %19753 = vmatpush3.bf16.msra.mxu1 %v23015_v14  ;;  %v23061_v14 = vld [vmem:[#allocation5 + $0x2b70] ss:$44 sps:$4 sm:$0xff]  }
 0x7ef   :  { %15559 = vmatpush1.bf16.msra.mxu0 %v23011_v4  ;;  %19754 = vmatprep.subr.bf16.mxu1 %v23019_v13  ;;  %v2419_v4 = vrot.slane %v23917_v3, %v2418_v9  ;;  %v23068_v13 = vld [vmem:[#allocation5 + $0x2bcc] ss:$44 sps:$4 sm:$0xff]  }
 0x7f0   :  { %15560 = vmatprep.subr.bf16.mxu0 %v23018_v15  ;;  %v23065_v15 = vld [vmem:[#allocation5 + $0x3eb8] ss:$44 sps:$4 sm:$0xff]  }
 0x7f2   :  { %19755 = vmatpush3.bf16.msra.mxu1 %v23020_v18  ;;  %v19932_v18 = vadd.f32 %v23837_v8, %v2419_v4  ;;  %v23078_v8 = vld [vmem:[#allocation5 + $0x2c7c] ss:$44 sps:$4 sm:$0xff]  }
 0x7f3   :  { %15561 = vmatpush1.bf16.msra.mxu0 %v23016_v17  ;;  %19756 = vmatprep.subr.bf16.mxu1 %v23024_v26  ;;  %v23069_v17 = vld [vmem:[#allocation5 + $0x41d0] ss:$44 sps:$4 sm:$0xff]  }
 0x7f4   :  { %15562 = vmatprep.subr.bf16.mxu0 %v23023_v21  ;;  %v23066_v21 = vld [vmem:[#allocation5 + $0x2bc8] ss:$44 sps:$4 sm:$0xff]   ;;  %v23070_v26 = vld [vmem:[#allocation5 + $0x3f10] ss:$44 sps:$4 sm:$0xff]  }
 0x7f6   :  { %19757 = vmatpush3.bf16.msra.mxu1 %v23025_v24  ;;  %v23074_v24 = vld [vmem:[#allocation8 + $0x40] sm:$0xff]  }
 0x7f7   :  { %15563 = vmatpush1.bf16.msra.mxu0 %v23021_v22  ;;  %19758 = vmatprep.subr.bf16.mxu1 %v23029_v28  ;;  %v23073_v22 = vld [vmem:[#allocation5 + $0x2c24] ss:$44 sps:$4 sm:$0xff]   ;;  %v2414_v28 = vsub.s32 2, %v23811_v11 }
 0x7f8   :  { %15564 = vmatprep.subr.bf16.mxu0 %v23028_v25  ;;  %v19423_v25 = vmul.f32 -1.442695, %v23823_v58 }
 0x7fa   :  { %19759 = vmatpush3.bf16.msra.mxu1 %v23030_v31  ;;  %v19426_v31 = vmul.f32 -1.442695, %v19932_v18  ;;  %23355 = vpow2.f32 %v19423_v25 }
 0x7fb   :  { %15565 = vmatpush1.bf16.msra.mxu0 %v23026_v29  ;;  %19766 = vmatprep.subr.bf16.mxu1 %v23034_v19  ;;  %v23354_v29 = vpop.eup %23353  ;;  %v23075_v19 = vld [vmem:[#allocation8] sm:$0xff]  }
 0x7fc   :  { %15566 = vmatprep.subr.bf16.mxu0 %v23033_v30  ;;  %v23071_v30 = vld [vmem:[#allocation5 + $0x2c20] ss:$44 sps:$4 sm:$0xff]   ;;  %23357 = vpow2.f32 %v19426_v31 }
 0x7fd   :  { %16188 = vmatmul.mubr.bf16.vlgmr.msra.gmra.mrb[52].mxu1 %v23783_v54  ;;  %v23095_v31 = vld [vmem:[#allocation8 + $0x20] sm:$0xff]  }
 0x7fe   :  { %19767 = vmatpush3.bf16.msra.mxu1 %v23035_v16  ;;  %16227 = vmatprep.mubr.bf16.mxu1 %v23787_v23  ;;  %v2401_v16 = vld [vmem:[#allocation7 + $0x8] sm:$0x7] }
 0x7ff   :  { %15567 = vmatpush1.bf16.msra.mxu0 %v23031_v55  ;;  %19768 = vmatprep.subr.bf16.mxu1 %v23039_v35  ;;  %v19540_v55 = vpop.f32.mrb[12].mxu1  ;;  %v2447_v35 = vrot.slane %v2401_v16, %v2414_v28 }
 0x800   :  { %15568 = vmatprep.subr.bf16.mxu0 %v23038_v7  ;;  %v19541_v33 = vpop.f32.mrb[13].mxu1  ;;  %v23079_v7 = vld [vmem:[#allocation8 + $0x48] sm:$0xff]  }
 0x801   :  { %v19543_v58 = vpop.f32.mrb[14].mxu1 }
 0x802   :  { %19769 = vmatpush3.bf16.msra.mxu1 %v23040_v20  ;;  %v16302_v20 = vpack.c.bf16 %v23354_v29, %v23354_v29  ;;  %v23091_v29 = vld [vmem:[#allocation5 + $0x2d80] ss:$44 sps:$4 sm:$0xff]   ;;  %v23096_v58 = vld [vmem:[#allocation5 + $0x2dd8] ss:$44 sps:$4 sm:$0xff]  }
 0x803   :  { %15569 = vmatpush1.bf16.msra.mxu0 %v23036_v40  ;;  %19770 = vmatprep.subr.bf16.mxu1 %v23044_v45  ;;  %v19542_v40 = vadd.f32 %v19541_v33, %v19540_v55  ;;  %v23076_v45 = vld [vmem:[#allocation5 + $0x2c78] ss:$44 sps:$4 sm:$0xff]   ;;  %v23098_v55 = vld [vmem:[#allocation5 + $0x2ddc] ss:$44 sps:$4 sm:$0xff]  }
 0x804   :  { %15570 = vmatprep.subr.bf16.mxu0 %v23043_v60  ;;  %v19544_v60 = vpop.f32.mrb[15].mxu1 }
 0x806   :  { %19771 = vmatpush3.bf16.msra.mxu1 %v23045_v0  ;;  %v15790_v0 = vadd.f32 %v19542_v40, %v2447_v35 }
 0x807   :  { %15571 = vmatpush1.bf16.msra.mxu0 %v23041_v61  ;;  %19772 = vmatprep.subr.bf16.mxu1 %v23049_v48  ;;  %v23080_v61 = vld [vmem:[#allocation8 + $0x8] sm:$0xff]  }
 0x808   :  { %15572 = vmatprep.subr.bf16.mxu0 %v23048_v34  ;;  %v19562_v34 = vpop.f32.mrb[16].mxu1  ;;  %v23083_v48 = vld [vmem:[#allocation5 + $0x2cd4] ss:$44 sps:$4 sm:$0xff]  }
 0x80a   :  { %19773 = vmatpush3.bf16.msra.mxu1 %v23050_v49  ;;  %v19563_v49 = vpop.f32.mrb[17].mxu1 }
 0x80b   :  { %15573 = vmatpush1.bf16.msra.mxu0 %v23046_v6  ;;  %19774 = vmatprep.subr.bf16.mxu1 %v23054_v52  ;;  %v23084_v6 = vld [vmem:[#allocation8 + $0x50] sm:$0xff]   ;;  %v19565_v52 = vpop.f32.mrb[18].mxu1 }
 0x80c   :  { %15574 = vmatprep.subr.bf16.mxu0 %v23053_v50  ;;  %v19564_v50 = vadd.f32 %v19563_v49, %v19562_v34  ;;  %v23101_v49 = vld [vmem:[#allocation5 + $0x2e30] ss:$44 sps:$4 sm:$0xff]  }
 0x80e   :  { %19775 = vmatpush3.bf16.msra.mxu1 %v23055_v51  ;;  %v15830_v51 = vadd.f32 %v19564_v50, %v15790_v0  ;;  %v23104_v0 = vld [vmem:[#allocation8 + $0x70] sm:$0xff]  }
 0x80f   :  { %15575 = vmatpush1.bf16.msra.mxu0 %v23051_v53  ;;  %19776 = vmatprep.subr.bf16.mxu1 %v23059_v59  ;;  %v23085_v53 = vld [vmem:[#allocation8 + $0x10] sm:$0xff]   ;;  %v23088_v59 = vld [vmem:[#allocation5 + $0x2d2c] ss:$44 sps:$4 sm:$0xff]  }
 0x810   :  { %15576 = vmatprep.subr.bf16.mxu0 %v23058_v47  ;;  %v23105_v50 = vld [vmem:[#allocation8 + $0x30] sm:$0xff]  }
 0x812   :  { %19777 = vmatpush3.bf16.msra.mxu1 %v23060_v44 }
 0x813   :  { %15577 = vmatpush1.bf16.msra.mxu0 %v23056_v63  ;;  %19778 = vmatprep.subr.bf16.mxu1 %v23064_v2  ;;  %v23090_v2 = vld [vmem:[#allocation8 + $0x18] sm:$0xff]  }
 0x814   :  { %15578 = vmatprep.subr.bf16.mxu0 %v23063_v12 }
 0x816   :  { %19779 = vmatpush3.bf16.msra.mxu1 %v23065_v15  ;;  %v23356_v15 = vpop.eup %23355 }
 0x817   :  { %15579 = vmatpush1.bf16.msra.mxu0 %v23061_v14  ;;  %19780 = vmatprep.subr.bf16.mxu1 %v23069_v17  ;;  %v23094_v17 = vld [vmem:[#allocation8 + $0x60] sm:$0xff]   ;;  %v16268_v25 = vadd.f32 1.0, %v23356_v15 }
 0x818   :  { %15580 = vmatprep.subr.bf16.mxu0 %v23068_v13  ;;  %v23093_v13 = vld [vmem:[#allocation5 + $0x2d84] ss:$44 sps:$4 sm:$0xff]  }
 0x819   :  { %23359 = vrcp.f32 %v16268_v25  ;;  %v23115_v15 = vld [vmem:[#allocation8 + $0x80] sm:$0xff]  }
 0x81a   :  { %19781 = vmatpush3.bf16.msra.mxu1 %v23070_v26  ;;  %v23121_v25 = vld [vmem:[#allocation5 + $0x2f90] ss:$44 sps:$4 sm:$0xff]  }
 0x81b   :  { %15581 = vmatpush1.bf16.msra.mxu0 %v23066_v21  ;;  %19788 = vmatprep.subr.bf16.mxu1 %v23074_v24 }
 0x81c   :  { %15591 = vmatprep.subr.bf16.mxu0 %v23073_v22  ;;  %v23358_v22 = vpop.eup %23357 }
 0x81d   :  { %16228 = vmatmul.mubr.bf16.vlgmr.msra.gmra.mrb[56].mxu1 %v23795_v39  ;;  %v16271_v33 = vadd.f32 1.0, %v23358_v22  ;;  %v23123_v22 = vld [vmem:[#allocation5 + $0x2f94] ss:$44 sps:$4 sm:$0xff]  }
 0x81e   :  { %15583 = vmatmul.mubr.bf16.vlgmr.msra.gmra.mrb[8].mxu0 %v23741_v37  ;;  %19789 = vmatpush3.bf16.msra.mxu1 %v23075_v19  ;;  %v19566_v37 = vpop.f32.mrb[19].mxu1 }
 0x81f   :  { %15592 = vmatpush1.bf16.msra.mxu0 %v23071_v30  ;;  %17055 = vmatprep.mubr.bf16.mxu1 %v16302_v20  ;;  %v19584_v47 = vpop.f32.mrb[20].mxu1  ;;  %v23100_v20 = vld [vmem:[#allocation8 + $0x28] sm:$0xff]   ;;  %23361 = vrcp.f32 %v16271_v33  ;;  %v23134_v33 = vld [vmem:[#allocation8 + $0xe0] sm:$0xff]  }
 0x820   :  { %15593 = vmatprep.subr.bf16.mxu0 %v23078_v8  ;;  %19790 = vmatprep.subr.bf16.mxu1 %v23079_v7  ;;  %v19585_v9 = vpop.f32.mrb[21].mxu1  ;;  %v23099_v8 = vld [vmem:[#allocation8 + $0x68] sm:$0xff]  }
 0x821   :  { %15623 = vmatprep.mubr.bf16.mxu0 %v23745_v27  ;;  %v19586_v63 = vadd.f32 %v19585_v9, %v19584_v47  ;;  %v19587_v44 = vpop.f32.mrb[22].mxu1  ;;  %v23086_v27 = vld [vmem:[#allocation5 + $0x2d28] ss:$44 sps:$4 sm:$0xff]  }
 0x822   :  { %19791 = vmatpush3.bf16.msra.mxu1 %v23080_v61  ;;  %v19588_v12 = vpop.f32.mrb[23].mxu1  ;;  %v23103_v61 = vld [vmem:[#allocation5 + $0x2e34] ss:$44 sps:$4 sm:$0xff]   ;;  %v23110_v9 = vld [vmem:[#allocation8 + $0x38] sm:$0xff]  }
 0x823   :  { %15594 = vmatpush1.bf16.msra.mxu0 %v23076_v45  ;;  %19792 = vmatprep.subr.bf16.mxu1 %v23084_v6  ;;  %v15870_v4 = vadd.f32 %v19586_v63, %v15830_v51  ;;  %v19606_v14 = vpop.f32.mrb[24].mxu1  ;;  %v2426_v45 = vsub.s32 5, %v23811_v11  ;;  %v23109_v51 = vld [vmem:[#allocation8 + $0x78] sm:$0xff]   ;;  %v23114_v12 = vld [vmem:[#allocation8 + $0xc0] sm:$0xff]  }
 0x824   :  { %15595 = vmatprep.subr.bf16.mxu0 %v23083_v48  ;;  %v19607_v18 = vpop.f32.mrb[25].mxu1  ;;  %v2415_v48 = vrot.slane %v23917_v3, %v2414_v28  ;;  %v23106_v28 = vld [vmem:[#allocation5 + $0x2e88] ss:$44 sps:$4 sm:$0xff]   ;;  %v23113_v44 = vld [vmem:[#allocation5 + $0x2ee4] ss:$44 sps:$4 sm:$0xff]  }
 0x825   :  { %v19608_v21 = vadd.f32 %v19607_v18, %v19606_v14  ;;  %v19609_v26 = vpop.f32.mrb[26].mxu1  ;;  %v23111_v14 = vld [vmem:[#allocation5 + $0x2ee0] ss:$44 sps:$4 sm:$0xff]   ;;  %v23119_v18 = vld [vmem:[#allocation8 + $0xc8] sm:$0xff]  }
 0x826   :  { %19793 = vmatpush3.bf16.msra.mxu1 %v23085_v53  ;;  %v19610_v24 = vpop.f32.mrb[27].mxu1  ;;  %v23108_v53 = vld [vmem:[#allocation5 + $0x2e8c] ss:$44 sps:$4 sm:$0xff]  }
 0x827   :  { %15596 = vmatpush1.bf16.msra.mxu0 %v23081_v38  ;;  %19794 = vmatprep.subr.bf16.mxu1 %v23089_v62  ;;  %v15910_v30 = vadd.f32 %v19608_v21, %v15870_v4  ;;  %v19628_v19 = vpop.f32.mrb[28].mxu1  ;;  %v2427_v38 = vrot.slane %v23917_v3, %v2426_v45  ;;  %v19931_v62 = vadd.f32 %v23835_v41, %v2415_v48  ;;  %v23116_v21 = vld [vmem:[#allocation5 + $0x2f38] ss:$44 sps:$4 sm:$0xff]   ;;  %v23124_v24 = vld [vmem:[#allocation8 + $0xd0] sm:$0xff]   ;;  %v2434_v48 = vsub.s32 7, %v23811_v11 }
 0x828   :  { %15597 = vmatprep.subr.bf16.mxu0 %v23088_v59  ;;  %v19629_v16 = vpop.f32.mrb[29].mxu1  ;;  %v23120_v26 = vld [vmem:[#allocation8 + $0x88] sm:$0xff]  }
 0x829   :  { %v19630_v7 = vadd.f32 %v19629_v16, %v19628_v19  ;;  %v19631_v35 = vpop.f32.mrb[30].mxu1  ;;  %v19934_v63 = vadd.f32 %v23883_v57, %v2427_v38  ;;  %v23126_v19 = vld [vmem:[#allocation5 + $0x2fe8] ss:$44 sps:$4 sm:$0xff]   ;;  %v23133_v16 = vld [vmem:[#allocation5 + $0x3044] ss:$44 sps:$4 sm:$0xff]  }
 0x82a   :  { %19795 = vmatpush3.bf16.msra.mxu1 %v23090_v2  ;;  %v19632_v40 = vpop.f32.mrb[31].mxu1  ;;  %v19425_v2 = vmul.f32 -1.442695, %v19931_v62  ;;  %v23141_v38 = vld [vmem:[#allocation5 + $0x30f0] ss:$44 sps:$4 sm:$0xff]   ;;  %v2435_v62 = vrot.slane %v23917_v3, %v2434_v48 }
 0x82b   :  { %15598 = vmatpush1.bf16.msra.mxu0 %v23086_v27  ;;  %19796 = vmatprep.subr.bf16.mxu1 %v23094_v17  ;;  %v15950_v60 = vadd.f32 %v19630_v7, %v15910_v30  ;;  %v23360_v27 = vpop.eup %23359  ;;  %v23118_v17 = vld [vmem:[#allocation5 + $0x2f3c] ss:$44 sps:$4 sm:$0xff]   ;;  %v23131_v40 = vld [vmem:[#allocation5 + $0x3040] ss:$44 sps:$4 sm:$0xff]  }
 0x82c   :  { %15599 = vmatprep.subr.bf16.mxu0 %v23093_v13  ;;  %v23362_v4 = vpop.eup %23361  ;;  %v19428_v13 = vmul.f32 -1.442695, %v19934_v63  ;;  %v16301_v41 = vpack.c.bf16 %v23360_v27, %v23360_v27  ;;  %23363 = vpow2.f32 %v19425_v2  ;;  %v23129_v30 = vld [vmem:[#allocation8 + $0xd8] sm:$0xff]   ;;  %v23183_v48 = vld [vmem:[#allocation5 + $0x33b4] ss:$44 sps:$4 sm:$0xff]  }
 0x82d   :  { %v16304_v57 = vpack.c.bf16 %v23362_v4, %v23362_v4  ;;  %v23146_v27 = vld [vmem:[#allocation5 + $0x3148] ss:$44 sps:$4 sm:$0xff]   ;;  %v19936_v4 = vadd.f32 %v23899_v36, %v2435_v62 }
 0x82e   :  { %19797 = vmatpush3.bf16.msra.mxu1 %v23095_v31  ;;  %23365 = vpow2.f32 %v19428_v13  ;;  %v23128_v31 = vld [vmem:[#allocation5 + $0x2fec] ss:$44 sps:$4 sm:$0xff]   ;;  %v23150_v2 = vld [vmem:[#allocation8 + $0xb8] sm:$0xff]  }
 0x82f   :  { %15600 = vmatpush1.bf16.msra.mxu0 %v23091_v29  ;;  %19798 = vmatprep.subr.bf16.mxu1 %v23099_v8  ;;  %v23125_v29 = vld [vmem:[#allocation8 + $0x90] sm:$0xff]   ;;  %v23189_v62 = vld [vmem:[#allocation8 + $0x178] sm:$0xff]  }
 0x830   :  { %15601 = vmatprep.subr.bf16.mxu0 %v23098_v55  ;;  %v19650_v34 = vpop.f32.mrb[32].mxu1  ;;  %v23130_v55 = vld [vmem:[#allocation8 + $0x98] sm:$0xff]  }
 0x831   :  { %v19651_v6 = vpop.f32.mrb[33].mxu1 }
 0x832   :  { %19799 = vmatpush3.bf16.msra.mxu1 %v23100_v20  ;;  %v19652_v52 = vadd.f32 %v19651_v6, %v19650_v34  ;;  %v19653_v37 = vpop.f32.mrb[34].mxu1  ;;  %v23138_v20 = vld [vmem:[#allocation5 + $0x309c] ss:$44 sps:$4 sm:$0xff]   ;;  %v23140_v34 = vld [vmem:[#allocation8 + $0xa8] sm:$0xff]  }
 0x833   :  { %15602 = vmatpush1.bf16.msra.mxu0 %v23096_v58  ;;  %19800 = vmatprep.subr.bf16.mxu1 %v23104_v0  ;;  %v19654_v47 = vpop.f32.mrb[35].mxu1  ;;  %v23135_v58 = vld [vmem:[#allocation8 + $0xa0] sm:$0xff]   ;;  %v23136_v0 = vld [vmem:[#allocation5 + $0x3098] ss:$44 sps:$4 sm:$0xff]   ;;  %v23143_v6 = vld [vmem:[#allocation5 + $0x30f4] ss:$44 sps:$4 sm:$0xff]  }
 0x834   :  { %15603 = vmatprep.subr.bf16.mxu0 %v23103_v61  ;;  %v23933_v59 = vadd.f32 %v19652_v52, %v15950_v60  ;;  %v23139_v60 = vld [vmem:[#allocation8 + $0xe8] sm:$0xff]   ;;  %v2422_v61 = vsub.s32 4, %v23811_v11 }
 0x836   :  { %19801 = vmatpush3.bf16.msra.mxu1 %v23105_v50  ;;  %v23364_v8 = vpop.eup %23363  ;;  %v2423_v52 = vrot.slane %v23917_v3, %v2422_v61  ;;  %v2430_v61 = vsub.s32 6, %v23811_v11 }
 0x837   :  { %15604 = vmatpush1.bf16.msra.mxu0 %v23101_v49  ;;  %19802 = vmatprep.subr.bf16.mxu1 %v23109_v51  ;;  %v16270_v35 = vadd.f32 1.0, %v23364_v8  ;;  %v23144_v49 = vld [vmem:[#allocation8 + $0xf0] sm:$0xff]   ;;  %v23170_v8 = vld [vmem:[#allocation8 + $0x118] sm:$0xff]  }
 0x838   :  { %15605 = vmatprep.subr.bf16.mxu0 %v23108_v53  ;;  %v23366_v7 = vpop.eup %23365  ;;  %v23145_v53 = vld [vmem:[#allocation8 + $0xb0] sm:$0xff]  }
 0x839   :  { %v16273_v45 = vadd.f32 1.0, %v23366_v7  ;;  %23367 = vrcp.f32 %v16270_v35  ;;  %v23174_v7 = vld [vmem:[#allocation8 + $0x160] sm:$0xff]  }
 0x83a   :  { %19803 = vmatpush3.bf16.msra.mxu1 %v23110_v9  ;;  %v23149_v9 = vld [vmem:[#allocation8 + $0xf8] sm:$0xff]  }
 0x83b   :  { %15606 = vmatpush1.bf16.msra.mxu0 %v23106_v28  ;;  %19810 = vmatprep.subr.bf16.mxu1 %v23114_v12  ;;  %23369 = vrcp.f32 %v16273_v45  ;;  %v23148_v28 = vld [vmem:[#allocation5 + $0x314c] ss:$44 sps:$4 sm:$0xff]   ;;  %v19933_v12 = vadd.f32 %v23881_v56, %v2423_v52 }
 0x83c   :  { %15607 = vmatprep.subr.bf16.mxu0 %v23113_v44 }
 0x83d   :  { %17056 = vmatmul.mubr.bf16.vlgmr.msra.gmra.mrb[60].mxu1 %v16301_v41  ;;  %v19427_v41 = vmul.f32 -1.442695, %v19933_v12  ;;  %v23190_v12 = vld [vmem:[#allocation8 + $0x138] sm:$0xff]  }
 0x83e   :  { %19811 = vmatpush3.bf16.msra.mxu1 %v23115_v15  ;;  %17095 = vmatprep.mubr.bf16.mxu1 %v16304_v57  ;;  %v23154_v15 = vld [vmem:[#allocation8 + $0x140] sm:$0xff]   ;;  %v19430_v57 = vmul.f32 -1.442695, %v19936_v4 }
 0x83f   :  { %15608 = vmatpush1.bf16.msra.mxu0 %v23111_v14  ;;  %19812 = vmatprep.subr.bf16.mxu1 %v23119_v18  ;;  %v23153_v14 = vld [vmem:[#allocation5 + $0x31a4] ss:$44 sps:$4 sm:$0xff]   ;;  %v23151_v18 = vld [vmem:[#allocation5 + $0x31a0] ss:$44 sps:$4 sm:$0xff]   ;;  %23371 = vpow2.f32 %v19427_v41 }
 0x840   :  { %15609 = vmatprep.subr.bf16.mxu0 %v23118_v17  ;;  %23373 = vpow2.f32 %v19430_v57  ;;  %v23195_v41 = vld [vmem:[#allocation8 + $0x180] sm:$0xff]   ;;  %v23200_v57 = vld [vmem:[#allocation8 + $0x188] sm:$0xff]  }
 0x842   :  { %19813 = vmatpush3.bf16.msra.mxu1 %v23120_v26  ;;  %v23159_v26 = vld [vmem:[#allocation8 + $0x148] sm:$0xff]  }
 0x843   :  { %15610 = vmatpush1.bf16.msra.mxu0 %v23116_v21  ;;  %19814 = vmatprep.subr.bf16.mxu1 %v23124_v24  ;;  %v23368_v13 = vpop.eup %23367  ;;  %v23158_v21 = vld [vmem:[#allocation5 + $0x31fc] ss:$44 sps:$4 sm:$0xff]   ;;  %v23160_v24 = vld [vmem:[#allocation8 + $0x108] sm:$0xff]  }
 0x844   :  { %15611 = vmatprep.subr.bf16.mxu0 %v23123_v22  ;;  %v16303_v56 = vpack.c.bf16 %v23368_v13, %v23368_v13  ;;  %v23156_v22 = vld [vmem:[#allocation5 + $0x31f8] ss:$44 sps:$4 sm:$0xff]   ;;  %v23191_v13 = vld [vmem:[#allocation5 + $0x3460] ss:$44 sps:$4 sm:$0xff]  }
 0x845   :  { %v23370_v17 = vpop.eup %23369 }
 0x846   :  { %19815 = vmatpush3.bf16.msra.mxu1 %v23125_v29  ;;  %v16306_v36 = vpack.c.bf16 %v23370_v17, %v23370_v17  ;;  %v23164_v29 = vld [vmem:[#allocation8 + $0x150] sm:$0xff]  }
 0x847   :  { %15612 = vmatpush1.bf16.msra.mxu0 %v23121_v25  ;;  %19816 = vmatprep.subr.bf16.mxu1 %v23129_v30  ;;  %v23163_v25 = vld [vmem:[#allocation5 + $0x3254] ss:$44 sps:$4 sm:$0xff]   ;;  %v23198_v17 = vld [vmem:[#allocation5 + $0x34bc] ss:$44 sps:$4 sm:$0xff]  }
 0x848   :  { %15613 = vmatprep.subr.bf16.mxu0 %v23128_v31  ;;  %v23161_v31 = vld [vmem:[#allocation5 + $0x3250] ss:$44 sps:$4 sm:$0xff]  }
 0x849   :  { %v23165_v30 = vld [vmem:[#allocation8 + $0x110] sm:$0xff]  }
 0x84a   :  { %19817 = vmatpush3.bf16.msra.mxu1 %v23130_v55  ;;  %v23166_v55 = vld [vmem:[#allocation5 + $0x32a8] ss:$44 sps:$4 sm:$0xff]  }
 0x84b   :  { %15614 = vmatpush1.bf16.msra.mxu0 %v23126_v19  ;;  %19818 = vmatprep.subr.bf16.mxu1 %v23134_v33  ;;  %v23169_v19 = vld [vmem:[#allocation8 + $0x158] sm:$0xff]  }
 0x84c   :  { %15615 = vmatprep.subr.bf16.mxu0 %v23133_v16  ;;  %v23372_v16 = vpop.eup %23371  ;;  %v23173_v33 = vld [vmem:[#allocation5 + $0x3304] ss:$44 sps:$4 sm:$0xff]  }
 0x84d   :  { %v23374_v35 = vpop.eup %23373 }
 0x84e   :  { %19819 = vmatpush3.bf16.msra.mxu1 %v23135_v58  ;;  %v23175_v58 = vld [vmem:[#allocation8 + $0x120] sm:$0xff]   ;;  %v16275_v45 = vadd.f32 1.0, %v23374_v35  ;;  %v23220_v35 = vld [vmem:[#allocation8 + $0x1a8] sm:$0xff]  }
 0x84f   :  { %15616 = vmatpush1.bf16.msra.mxu0 %v23131_v40  ;;  %19820 = vmatprep.subr.bf16.mxu1 %v23139_v60  ;;  %v16272_v40 = vadd.f32 1.0, %v23372_v16  ;;  %v23179_v60 = vld [vmem:[#allocation8 + $0x168] sm:$0xff]   ;;  %v23218_v16 = vld [vmem:[#allocation5 + $0x361c] ss:$44 sps:$4 sm:$0xff]  }
 0x850   :  { %15617 = vmatprep.subr.bf16.mxu0 %v23138_v20  ;;  %v19672_v50 = vpop.f32.mrb[36].mxu1  ;;  %v23178_v20 = vld [vmem:[#allocation5 + $0x335c] ss:$44 sps:$4 sm:$0xff]  }
 0x851   :  { %v19673_v37 = vpop.f32.mrb[37].mxu1  ;;  %23375 = vrcp.f32 %v16272_v40  ;;  %v23223_v40 = vld [vmem:[#allocation5 + $0x3674] ss:$44 sps:$4 sm:$0xff]  }
 0x852   :  { %19821 = vmatpush3.bf16.msra.mxu1 %v23140_v34  ;;  %v19674_v51 = vadd.f32 %v19673_v37, %v19672_v50  ;;  %v19675_v47 = vpop.f32.mrb[38].mxu1  ;;  %v23180_v34 = vld [vmem:[#allocation8 + $0x128] sm:$0xff]   ;;  %23377 = vrcp.f32 %v16275_v45  ;;  %v2431_v50 = vrot.slane %v23917_v3, %v2430_v61  ;;  %v23181_v37 = vld [vmem:[#allocation5 + $0x33b0] ss:$44 sps:$4 sm:$0xff]  }
 0x853   :  { %15618 = vmatpush1.bf16.msra.mxu0 %v23136_v0  ;;  %19822 = vmatprep.subr.bf16.mxu1 %v23144_v49  ;;  %v19676_v63 = vpop.f32.mrb[39].mxu1  ;;  %v23176_v0 = vld [vmem:[#allocation5 + $0x3358] ss:$44 sps:$4 sm:$0xff]   ;;  %v23186_v3 = vld [vmem:[#allocation5 + $0x3408] ss:$44 sps:$4 sm:$0xff]   ;;  %v23225_v45 = vld [vmem:[#allocation8 + $0x1b0] sm:$0xff]  }
 0x854   :  { %15619 = vmatprep.subr.bf16.mxu0 %v23143_v6  ;;  %v23942_v44 = vadd.f32 %v19674_v51, %v23933_v59  ;;  %v23155_v59 = vld [vmem:[#allocation8 + $0x100] sm:$0xff]   ;;  %v23184_v6 = vld [vmem:[#allocation8 + $0x170] sm:$0xff]   ;;  %v19935_v63 = vadd.f32 %v23897_v5, %v2431_v50  ;;  %v23199_v5 = vld [vmem:[#allocation8 + $0x1c8] sm:$0xff]  }
 0x855   :  { %v23188_v47 = vld [vmem:[#allocation5 + $0x340c] ss:$44 sps:$4 sm:$0xff]   ;;  %v23226_v50 = vld [vmem:[#allocation5 + $0x36c8] ss:$44 sps:$4 sm:$0xff]  }
 0x856   :  { %19823 = vmatpush3.bf16.msra.mxu1 %v23145_v53 }
 0x857   :  { %15620 = vmatpush1.bf16.msra.mxu0 %v23141_v38  ;;  %19824 = vmatprep.subr.bf16.mxu1 %v23149_v9  ;;  %v23185_v38 = vld [vmem:[#allocation8 + $0x130] sm:$0xff]  }
 0x858   :  { %15621 = vmatprep.subr.bf16.mxu0 %v23148_v28 }
 0x85a   :  { %19825 = vmatpush3.bf16.msra.mxu1 %v23150_v2  ;;  %v23194_v2 = vld [vmem:[#allocation8 + $0x1c0] sm:$0xff]  }
 0x85b   :  { %15622 = vmatpush1.bf16.msra.mxu0 %v23146_v27  ;;  %19832 = vmatprep.subr.bf16.mxu1 %v23154_v15  ;;  %v23193_v27 = vld [vmem:[#allocation5 + $0x3464] ss:$44 sps:$4 sm:$0xff]   ;;  %v23376_v4 = vpop.eup %23375 }
 0x85c   :  { %15632 = vmatprep.subr.bf16.mxu0 %v23153_v14  ;;  %v19429_v14 = vmul.f32 -1.442695, %v19935_v63  ;;  %v23378_v15 = vpop.eup %23377  ;;  %v23242_v63 = vld [vmem:[#allocation5 + $0x382c] ss:$44 sps:$4 sm:$0xff]  }
 0x85d   :  { %17096 = vmatmul.mubr.bf16.vlgmr.msra.gmra.mrb[64].mxu1 %v16303_v56  ;;  %v23203_v56 = vld [vmem:[#allocation5 + $0x3514] ss:$44 sps:$4 sm:$0xff]  }
 0x85e   :  { %15624 = vmatmul.mubr.bf16.vlgmr.msra.gmra.mrb[8].mxu0 %v23755_v1  ;;  %19833 = vmatpush3.bf16.msra.mxu1 %v23155_v59  ;;  %v23168_v1 = vld [vmem:[#allocation5 + $0x32ac] ss:$44 sps:$4 sm:$0xff]   ;;  %23379 = vpow2.f32 %v19429_v14 }
 0x85f   :  { %15633 = vmatpush1.bf16.msra.mxu0 %v23151_v18  ;;  %17135 = vmatprep.mubr.bf16.mxu1 %v16306_v36  ;;  %v16308_v18 = vpack.c.bf16 %v23378_v15, %v23378_v15  ;;  %v23196_v59 = vld [vmem:[#allocation5 + $0x34b8] ss:$44 sps:$4 sm:$0xff]   ;;  %v23205_v36 = vld [vmem:[#allocation8 + $0x190] sm:$0xff]  }
 0x860   :  { %15634 = vmatprep.subr.bf16.mxu0 %v23158_v21  ;;  %19834 = vmatprep.subr.bf16.mxu1 %v23159_v26  ;;  %v23204_v21 = vld [vmem:[#allocation8 + $0x1d0] sm:$0xff]  }
 0x861   :  { %15664 = vmatprep.mubr.bf16.mxu0 %v23759_v10  ;;  %v23171_v10 = vld [vmem:[#allocation5 + $0x3300] ss:$44 sps:$4 sm:$0xff]   ;;  %v23201_v26 = vld [vmem:[#allocation5 + $0x3510] ss:$44 sps:$4 sm:$0xff]  }
 0x862   :  { %19835 = vmatpush3.bf16.msra.mxu1 %v23160_v24  ;;  %v23209_v24 = vld [vmem:[#allocation8 + $0x1d8] sm:$0xff]   ;;  %v23249_v15 = vld [vmem:[#allocation5 + $0x3930] ss:$44 sps:$4 sm:$0xff]  }
 0x863   :  { %15635 = vmatpush1.bf16.msra.mxu0 %v23156_v22  ;;  %19836 = vmatprep.subr.bf16.mxu1 %v23164_v29  ;;  %v23208_v22 = vld [vmem:[#allocation5 + $0x356c] ss:$44 sps:$4 sm:$0xff]   ;;  %v23210_v29 = vld [vmem:[#allocation8 + $0x198] sm:$0xff]  }
 0x864   :  { %15636 = vmatprep.subr.bf16.mxu0 %v23163_v25  ;;  %v23206_v25 = vld [vmem:[#allocation5 + $0x3568] ss:$44 sps:$4 sm:$0xff]  }
 0x866   :  { %19837 = vmatpush3.bf16.msra.mxu1 %v23165_v30  ;;  %v23213_v30 = vld [vmem:[#allocation5 + $0x35c4] ss:$44 sps:$4 sm:$0xff]  }
 0x867   :  { %15637 = vmatpush1.bf16.msra.mxu0 %v23161_v31  ;;  %19838 = vmatprep.subr.bf16.mxu1 %v23169_v19 }
 0x868   :  { %15638 = vmatprep.subr.bf16.mxu0 %v23168_v1  ;;  %v23380_v31 = vpop.eup %23379  ;;  %v23214_v1 = vld [vmem:[#allocation8 + $0x1e0] sm:$0xff]  }
 0x869   :  { %v16274_v19 = vadd.f32 1.0, %v23380_v31  ;;  %v23272_v31 = vld [vmem:[#allocation5 + $0x3b9c] ss:$44 sps:$4 sm:$0xff]  }
 0x86a   :  { %19839 = vmatpush3.bf16.msra.mxu1 %v23170_v8  ;;  %v23215_v8 = vld [vmem:[#allocation8 + $0x1a0] sm:$0xff]  }
 0x86b   :  { %15639 = vmatpush1.bf16.msra.mxu0 %v23166_v55  ;;  %19840 = vmatprep.subr.bf16.mxu1 %v23174_v7  ;;  %v23211_v55 = vld [vmem:[#allocation5 + $0x35c0] ss:$44 sps:$4 sm:$0xff]   ;;  %23381 = vrcp.f32 %v16274_v19  ;;  %v23216_v7 = vld [vmem:[#allocation5 + $0x3618] ss:$44 sps:$4 sm:$0xff]  }
 0x86c   :  { %15640 = vmatprep.subr.bf16.mxu0 %v23173_v33  ;;  %v23219_v33 = vld [vmem:[#allocation8 + $0x1e8] sm:$0xff]  }
 0x86e   :  { %19841 = vmatpush3.bf16.msra.mxu1 %v23175_v58 }
 0x86f   :  { %15641 = vmatpush1.bf16.msra.mxu0 %v23171_v10  ;;  %19842 = vmatprep.subr.bf16.mxu1 %v23179_v60  ;;  %v23224_v10 = vld [vmem:[#allocation8 + $0x1f0] sm:$0xff]  }
 0x870   :  { %15642 = vmatprep.subr.bf16.mxu0 %v23178_v20  ;;  %v19694_v49 = vpop.f32.mrb[40].mxu1  ;;  %v23221_v60 = vld [vmem:[#allocation5 + $0x3670] ss:$44 sps:$4 sm:$0xff]  }
 0x871   :  { %v19695_v52 = vpop.f32.mrb[41].mxu1 }
 0x872   :  { %19843 = vmatpush3.bf16.msra.mxu1 %v23180_v34  ;;  %v19696_v53 = vadd.f32 %v19695_v52, %v19694_v49  ;;  %v19697_v51 = vpop.f32.mrb[42].mxu1  ;;  %v23228_v34 = vld [vmem:[#allocation5 + $0x36cc] ss:$44 sps:$4 sm:$0xff]   ;;  %v23230_v52 = vld [vmem:[#allocation8 + $0x1b8] sm:$0xff]  }
 0x873   :  { %15643 = vmatpush1.bf16.msra.mxu0 %v23176_v0  ;;  %19844 = vmatprep.subr.bf16.mxu1 %v23184_v6  ;;  %v19698_v28 = vpop.f32.mrb[43].mxu1 }
 0x874   :  { %15644 = vmatprep.subr.bf16.mxu0 %v23183_v48  ;;  %v23951_v9 = vadd.f32 %v19696_v53, %v23942_v44  ;;  %v16305_v44 = vpack.c.bf16 %v23376_v4, %v23376_v4  ;;  %v23229_v48 = vld [vmem:[#allocation8 + $0x1f8] sm:$0xff]   ;;  %v23231_v53 = vld [vmem:[#allocation5 + $0x3720] ss:$44 sps:$4 sm:$0xff]  }
 0x875   :  { %v23239_v28 = vld [vmem:[#allocation5 + $0x37d4] ss:$44 sps:$4 sm:$0xff]  }
 0x876   :  { %19845 = vmatpush3.bf16.msra.mxu1 %v23185_v38  ;;  %v23382_v38 = vpop.eup %23381  ;;  %v23251_v4 = vld [vmem:[#allocation5 + $0x3934] ss:$44 sps:$4 sm:$0xff]  }
 0x877   :  { %15645 = vmatpush1.bf16.msra.mxu0 %v23181_v37  ;;  %19846 = vmatprep.subr.bf16.mxu1 %v23189_v62  ;;  %v23233_v37 = vld [vmem:[#allocation5 + $0x3724] ss:$44 sps:$4 sm:$0xff]   ;;  %v16307_v51 = vpack.c.bf16 %v23382_v38, %v23382_v38 }
 0x878   :  { %15646 = vmatprep.subr.bf16.mxu0 %v23188_v47  ;;  %v23236_v47 = vld [vmem:[#allocation5 + $0x377c] ss:$44 sps:$4 sm:$0xff]   ;;  %v23234_v62 = vld [vmem:[#allocation5 + $0x3778] ss:$44 sps:$4 sm:$0xff]  }
 0x87a   :  { %19847 = vmatpush3.bf16.msra.mxu1 %v23190_v12  ;;  %v23245_v12 = vld [vmem:[#allocation5 + $0x3884] ss:$44 sps:$4 sm:$0xff]  }
 0x87b   :  { %15647 = vmatpush1.bf16.msra.mxu0 %v23186_v3  ;;  %19854 = vmatprep.subr.bf16.mxu1 %v23194_v2  ;;  %v23240_v3 = vld [vmem:[#allocation5 + $0x3828] ss:$44 sps:$4 sm:$0xff]  }
 0x87c   :  { %15648 = vmatprep.subr.bf16.mxu0 %v23193_v27  ;;  %v23243_v27 = vld [vmem:[#allocation5 + $0x3880] ss:$44 sps:$4 sm:$0xff]   ;;  %v23248_v2 = vld [vmem:[#allocation5 + $0x38dc] ss:$44 sps:$4 sm:$0xff]  }
 0x87d   :  { %17136 = vmatmul.mubr.bf16.vlgmr.msra.gmra.mrb[68].mxu1 %v16305_v44  ;;  %v23254_v44 = vld [vmem:[#allocation5 + $0x398c] ss:$44 sps:$4 sm:$0xff]  }
 0x87e   :  { %19855 = vmatpush3.bf16.msra.mxu1 %v23195_v41  ;;  %17175 = vmatprep.mubr.bf16.mxu1 %v16308_v18  ;;  %v23252_v18 = vld [vmem:[#allocation5 + $0x3988] ss:$44 sps:$4 sm:$0xff]  }
 0x87f   :  { %15649 = vmatpush1.bf16.msra.mxu0 %v23191_v13  ;;  %19856 = vmatprep.subr.bf16.mxu1 %v23199_v5 }
 0x880   :  { %15650 = vmatprep.subr.bf16.mxu0 %v23198_v17 }
 0x882   :  { %19857 = vmatpush3.bf16.msra.mxu1 %v23200_v57  ;;  %v23255_v57 = vld [vmem:[#allocation5 + $0x39e0] ss:$44 sps:$4 sm:$0xff]  }
 0x883   :  { %15651 = vmatpush1.bf16.msra.mxu0 %v23196_v59  ;;  %19858 = vmatprep.subr.bf16.mxu1 %v23204_v21  ;;  %v23257_v59 = vld [vmem:[#allocation5 + $0x39e4] ss:$44 sps:$4 sm:$0xff]  }
 0x884   :  { %15652 = vmatprep.subr.bf16.mxu0 %v23203_v56  ;;  %v23260_v56 = vld [vmem:[#allocation5 + $0x3a3c] ss:$44 sps:$4 sm:$0xff]   ;;  %v23258_v21 = vld [vmem:[#allocation5 + $0x3a38] ss:$44 sps:$4 sm:$0xff]  }
 0x886   :  { %19859 = vmatpush3.bf16.msra.mxu1 %v23205_v36  ;;  %v23261_v36 = vld [vmem:[#allocation5 + $0x3a90] ss:$44 sps:$4 sm:$0xff]  }
 0x887   :  { %15653 = vmatpush1.bf16.msra.mxu0 %v23201_v26  ;;  %19860 = vmatprep.subr.bf16.mxu1 %v23209_v24  ;;  %v23263_v26 = vld [vmem:[#allocation5 + $0x3a94] ss:$44 sps:$4 sm:$0xff]  }
 0x888   :  { %15654 = vmatprep.subr.bf16.mxu0 %v23208_v22  ;;  %v23266_v22 = vld [vmem:[#allocation5 + $0x3aec] ss:$44 sps:$4 sm:$0xff]   ;;  %v23264_v24 = vld [vmem:[#allocation5 + $0x3ae8] ss:$44 sps:$4 sm:$0xff]  }
 0x88a   :  { %19861 = vmatpush3.bf16.msra.mxu1 %v23210_v29  ;;  %v23267_v29 = vld [vmem:[#allocation5 + $0x3b40] ss:$44 sps:$4 sm:$0xff]  }
 0x88b   :  { %15655 = vmatpush1.bf16.msra.mxu0 %v23206_v25  ;;  %19862 = vmatprep.subr.bf16.mxu1 %v23214_v1  ;;  %v23269_v25 = vld [vmem:[#allocation5 + $0x3b44] ss:$44 sps:$4 sm:$0xff]   ;;  %v23275_v1 = vld [vmem:[#allocation5 + $0x3bf4] ss:$44 sps:$4 sm:$0xff]  }
 0x88c   :  { %15656 = vmatprep.subr.bf16.mxu0 %v23213_v30  ;;  %v23270_v30 = vld [vmem:[#allocation5 + $0x3b98] ss:$44 sps:$4 sm:$0xff]  }
 0x88e   :  { %19863 = vmatpush3.bf16.msra.mxu1 %v23215_v8 }
 0x88f   :  { %15657 = vmatpush1.bf16.msra.mxu0 %v23211_v55  ;;  %19864 = vmatprep.subr.bf16.mxu1 %v23219_v33 }
 0x890   :  { %15658 = vmatprep.subr.bf16.mxu0 %v23218_v16  ;;  %v19716_v58 = vpop.f32.mrb[44].mxu1  ;;  %v23273_v16 = vld [vmem:[#allocation5 + $0x3bf0] ss:$44 sps:$4 sm:$0xff]  }
 0x891   :  { %v19717_v20 = vpop.f32.mrb[45].mxu1 }
 0x892   :  { %19865 = vmatpush3.bf16.msra.mxu1 %v23220_v35  ;;  %v19718_v61 = vadd.f32 %v19717_v20, %v19716_v58  ;;  %v19719_v0 = vpop.f32.mrb[46].mxu1  ;;  %v23281_v58 = vld [vmem:[#allocation5 + $0x3ca4] ss:$44 sps:$4 sm:$0xff]   ;;  %v23279_v20 = vld [vmem:[#allocation5 + $0x3ca0] ss:$44 sps:$4 sm:$0xff]  }
 0x893   :  { %15659 = vmatpush1.bf16.msra.mxu0 %v23216_v7  ;;  %19866 = vmatprep.subr.bf16.mxu1 %v23224_v10  ;;  %v19720_v6 = vpop.f32.mrb[47].mxu1  ;;  %v23278_v7 = vld [vmem:[#allocation5 + $0x3c4c] ss:$44 sps:$4 sm:$0xff]   ;;  %v23276_v10 = vld [vmem:[#allocation5 + $0x3c48] ss:$44 sps:$4 sm:$0xff]  }
 0x894   :  { %15660 = vmatprep.subr.bf16.mxu0 %v23223_v40  ;;  %v16110_v49 = vadd.f32 %v19718_v61, %v23951_v9  ;;  %v23237_v9 = vld [vmem:[#allocation5 + $0x37d0] ss:$44 sps:$4 sm:$0xff]   ;;  %v23287_v61 = vld [vmem:[#allocation5 + $0x3d54] ss:$44 sps:$4 sm:$0xff]  }
 0x895   :  { %v23285_v0 = vld [vmem:[#allocation5 + $0x3d50] ss:$44 sps:$4 sm:$0xff]  }
 0x896   :  { %19867 = vmatpush3.bf16.msra.mxu1 %v23225_v45  ;;  %v23282_v45 = vld [vmem:[#allocation5 + $0x3cf8] ss:$44 sps:$4 sm:$0xff]  }
 0x897   :  { %15661 = vmatpush1.bf16.msra.mxu0 %v23221_v60  ;;  %19868 = vmatprep.subr.bf16.mxu1 %v23229_v48  ;;  %v23284_v60 = vld [vmem:[#allocation5 + $0x3cfc] ss:$44 sps:$4 sm:$0xff]   ;;  %v23293_v6 = vld [vmem:[#allocation5 + $0x3e04] ss:$44 sps:$4 sm:$0xff]  }
 0x898   :  { %15662 = vmatprep.subr.bf16.mxu0 %v23228_v34  ;;  %v23290_v34 = vld [vmem:[#allocation5 + $0x3dac] ss:$44 sps:$4 sm:$0xff]   ;;  %v23288_v48 = vld [vmem:[#allocation5 + $0x3da8] ss:$44 sps:$4 sm:$0xff]  }
 0x89a   :  { %19869 = vmatpush3.bf16.msra.mxu1 %v23230_v52  ;;  %v23299_v52 = vld [vmem:[#allocation5 + $0x3eb4] ss:$44 sps:$4 sm:$0xff]  }
 0x89b   :  { %15663 = vmatpush1.bf16.msra.mxu0 %v23226_v50  ;;  %v23296_v50 = vld [vmem:[#allocation5 + $0x3e5c] ss:$44 sps:$4 sm:$0xff]  }
 0x89c   :  { %15673 = vmatprep.subr.bf16.mxu0 %v23233_v37 }
 0x89d   :  { %17176 = vmatmul.mubr.bf16.vlgmr.msra.gmra.mrb[72].mxu1 %v16307_v51 }
 0x89e   :  { %15665 = vmatmul.mubr.bf16.vlgmr.msra.gmra.mrb[8].mxu0 %v23767_v42  ;;  %v23246_v42 = vld [vmem:[#allocation5 + $0x38d8] ss:$44 sps:$4 sm:$0xff]  }
 0x89f   :  { %15674 = vmatpush1.bf16.msra.mxu0 %v23231_v53  ;;  %15705 = vmatprep.mubr.bf16.mxu0 %v23773_v46  ;;  %v23297_v53 = vld [vmem:[#allocation5 + $0x3eb0] ss:$44 sps:$4 sm:$0xff]  }
 0x8a0   :  { %15675 = vmatprep.subr.bf16.mxu0 %v23236_v47  ;;  %v23302_v47 = vld [vmem:[#allocation5 + $0x3f0c] ss:$44 sps:$4 sm:$0xff]  }
 0x8a3   :  { %15676 = vmatpush1.bf16.msra.mxu0 %v23234_v62 }
 0x8a4   :  { %15677 = vmatprep.subr.bf16.mxu0 %v23239_v28 }
 0x8a7   :  { %15678 = vmatpush1.bf16.msra.mxu0 %v23237_v9  ;;  %v23300_v9 = vld [vmem:[#allocation5 + $0x3f08] ss:$44 sps:$4 sm:$0xff]  }
 0x8a8   :  { %15679 = vmatprep.subr.bf16.mxu0 %v23242_v63  ;;  %v23305_v63 = vld [vmem:[#allocation5 + $0x3f64] ss:$44 sps:$4 sm:$0xff]  }
 0x8ab   :  { %15680 = vmatpush1.bf16.msra.mxu0 %v23240_v3  ;;  %v23303_v3 = vld [vmem:[#allocation5 + $0x3f60] ss:$44 sps:$4 sm:$0xff]  }
 0x8ac   :  { %15681 = vmatprep.subr.bf16.mxu0 %v23245_v12  ;;  %v23308_v12 = vld [vmem:[#allocation5 + $0x3fbc] ss:$44 sps:$4 sm:$0xff]  }
 0x8af   :  { %15682 = vmatpush1.bf16.msra.mxu0 %v23243_v27  ;;  %v23306_v27 = vld [vmem:[#allocation5 + $0x3fb8] ss:$44 sps:$4 sm:$0xff]  }
 0x8b0   :  { %15683 = vmatprep.subr.bf16.mxu0 %v23248_v2  ;;  %v19738_v14 = vpop.f32.mrb[48].mxu1  ;;  %v23311_v2 = vld [vmem:[#allocation5 + $0x4014] ss:$44 sps:$4 sm:$0xff]  }
 0x8b1   :  { %v19739_v46 = vpop.f32.mrb[49].mxu1 }
 0x8b2   :  { %v19740_v13 = vadd.f32 %v19739_v46, %v19738_v14  ;;  %v19741_v41 = vpop.f32.mrb[50].mxu1  ;;  %v23312_v14 = vld [vmem:[#allocation5 + $0x4068] ss:$44 sps:$4 sm:$0xff]   ;;  %v23317_v46 = vld [vmem:[#allocation5 + $0x40c4] ss:$44 sps:$4 sm:$0xff]  }
 0x8b3   :  { %15684 = vmatpush1.bf16.msra.mxu0 %v23246_v42  ;;  %v19742_v17 = vpop.f32.mrb[51].mxu1  ;;  %v23309_v42 = vld [vmem:[#allocation5 + $0x4010] ss:$44 sps:$4 sm:$0xff]   ;;  %v23318_v41 = vld [vmem:[#allocation5 + $0x4118] ss:$44 sps:$4 sm:$0xff]  }
 0x8b4   :  { %15685 = vmatprep.subr.bf16.mxu0 %v23251_v4  ;;  %v16150_v5 = vadd.f32 %v19740_v13, %v16110_v49  ;;  %v23291_v49 = vld [vmem:[#allocation5 + $0x3e00] ss:$44 sps:$4 sm:$0xff]   ;;  %v23320_v13 = vld [vmem:[#allocation5 + $0x411c] ss:$44 sps:$4 sm:$0xff]  }
 0x8b5   :  { %v23314_v4 = vld [vmem:[#allocation5 + $0x406c] ss:$44 sps:$4 sm:$0xff]  }
 0x8b7   :  { %15686 = vmatpush1.bf16.msra.mxu0 %v23249_v15  ;;  %v23315_v15 = vld [vmem:[#allocation5 + $0x40c0] ss:$44 sps:$4 sm:$0xff]  }
 0x8b8   :  { %15687 = vmatprep.subr.bf16.mxu0 %v23254_v44  ;;  %v23323_v44 = vld [vmem:[#allocation5 + $0x4174] ss:$44 sps:$4 sm:$0xff]  }
 0x8bb   :  { %15688 = vmatpush1.bf16.msra.mxu0 %v23252_v18 }
 0x8bc   :  { %15689 = vmatprep.subr.bf16.mxu0 %v23257_v59 }
 0x8bf   :  { %15690 = vmatpush1.bf16.msra.mxu0 %v23255_v57  ;;  %v23321_v57 = vld [vmem:[#allocation5 + $0x4170] ss:$44 sps:$4 sm:$0xff]  }
 0x8c0   :  { %15691 = vmatprep.subr.bf16.mxu0 %v23260_v56 }
 0x8c3   :  { %15692 = vmatpush1.bf16.msra.mxu0 %v23258_v21  ;;  %v23326_v21 = vld [vmem:[#allocation5 + $0x41cc] ss:$44 sps:$4 sm:$0xff]  }
 0x8c4   :  { %15693 = vmatprep.subr.bf16.mxu0 %v23263_v26  ;;  %v23324_v26 = vld [vmem:[#allocation5 + $0x41c8] ss:$44 sps:$4 sm:$0xff]  }
 0x8c7   :  { %15694 = vmatpush1.bf16.msra.mxu0 %v23261_v36  ;;  %v19434_v36 = vld [vmem:[#allocation10] ss:$0 sm:$0xff] }
 0x8c8   :  { %15695 = vmatprep.subr.bf16.mxu0 %v23266_v22 }
 0x8cb   :  { %15696 = vmatpush1.bf16.msra.mxu0 %v23264_v24 }
 0x8cc   :  { %15697 = vmatprep.subr.bf16.mxu0 %v23269_v25 }
 0x8cf   :  { %15698 = vmatpush1.bf16.msra.mxu0 %v23267_v29 }
 0x8d0   :  { %15699 = vmatprep.subr.bf16.mxu0 %v23272_v31  ;;  %v19760_v19 = vpop.f32.mrb[52].mxu1 }
 0x8d1   :  { %v19761_v55 = vpop.f32.mrb[53].mxu1 }
 0x8d2   :  { %v19762_v8 = vadd.f32 %v19761_v55, %v19760_v19  ;;  %v19763_v33 = vpop.f32.mrb[54].mxu1 }
 0x8d3   :  { %15700 = vmatpush1.bf16.msra.mxu0 %v23270_v30  ;;  %v19764_v35 = vpop.f32.mrb[55].mxu1 }
 0x8d4   :  { %15701 = vmatprep.subr.bf16.mxu0 %v23275_v1  ;;  %v16190_v40 = vadd.f32 %v19762_v8, %v16150_v5  ;;  %v23327_v35 = vld [vmem:[#allocation8 + $0x240] sm:$0xff]  }
 0x8d5   :  { %19876 = vmatprep.subr.bf16.mxu1 %v23327_v35 }
 0x8d7   :  { %15702 = vmatpush1.bf16.msra.mxu0 %v23273_v16 }
 0x8d8   :  { %15703 = vmatprep.subr.bf16.mxu0 %v23278_v7 }
 0x8db   :  { %15704 = vmatpush1.bf16.msra.mxu0 %v23276_v10  ;;  %v23328_v10 = vld [vmem:[#allocation8 + $0x200] sm:$0xff]  }
 0x8dc   :  { %15714 = vmatprep.subr.bf16.mxu0 %v23281_v58  ;;  %19877 = vmatpush3.bf16.msra.mxu1 %v23328_v10 }
 0x8de   :  { %15706 = vmatmul.mubr.bf16.vlgmr.msra.gmra.mrb[8].mxu0 %v23783_v54  ;;  %v23294_v54 = vld [vmem:[#allocation5 + $0x3e58] ss:$44 sps:$4 sm:$0xff]  }
 0x8df   :  { %15715 = vmatpush1.bf16.msra.mxu0 %v23279_v20  ;;  %15746 = vmatprep.mubr.bf16.mxu0 %v23787_v23 }
 0x8e0   :  { %15716 = vmatprep.subr.bf16.mxu0 %v23284_v60 }
 0x8e3   :  { %15717 = vmatpush1.bf16.msra.mxu0 %v23282_v45  ;;  %v23329_v45 = vld [vmem:[#allocation8 + $0x248] sm:$0xff]  }
 0x8e4   :  { %15718 = vmatprep.subr.bf16.mxu0 %v23287_v61  ;;  %19878 = vmatprep.subr.bf16.mxu1 %v23329_v45 }
 0x8e7   :  { %15719 = vmatpush1.bf16.msra.mxu0 %v23285_v0  ;;  %v23330_v0 = vld [vmem:[#allocation8 + $0x208] sm:$0xff]  }
 0x8e8   :  { %15720 = vmatprep.subr.bf16.mxu0 %v23290_v34  ;;  %19879 = vmatpush3.bf16.msra.mxu1 %v23330_v0  ;;  %v23331_v34 = vld [vmem:[#allocation8 + $0x250] sm:$0xff]  }
 0x8e9   :  { %19880 = vmatprep.subr.bf16.mxu1 %v23331_v34 }
 0x8eb   :  { %15721 = vmatpush1.bf16.msra.mxu0 %v23288_v48  ;;  %v23332_v48 = vld [vmem:[#allocation8 + $0x210] sm:$0xff]  }
 0x8ec   :  { %15722 = vmatprep.subr.bf16.mxu0 %v23293_v6  ;;  %19881 = vmatpush3.bf16.msra.mxu1 %v23332_v48  ;;  %v23333_v6 = vld [vmem:[#allocation8 + $0x258] sm:$0xff]  }
 0x8ed   :  { %19882 = vmatprep.subr.bf16.mxu1 %v23333_v6 }
 0x8ef   :  { %15723 = vmatpush1.bf16.msra.mxu0 %v23291_v49  ;;  %v23334_v49 = vld [vmem:[#allocation8 + $0x218] sm:$0xff]  }
 0x8f0   :  { %15724 = vmatprep.subr.bf16.mxu0 %v23296_v50  ;;  %v19782_v37 = vpop.f32.mrb[56].mxu1  ;;  %19883 = vmatpush3.bf16.msra.mxu1 %v23334_v49  ;;  %v23335_v50 = vld [vmem:[#allocation8 + $0x260] sm:$0xff]  }
 0x8f1   :  { %v19783_v23 = vpop.f32.mrb[57].mxu1  ;;  %19884 = vmatprep.subr.bf16.mxu1 %v23335_v50 }
 0x8f2   :  { %v19784_v38 = vadd.f32 %v19783_v23, %v19782_v37  ;;  %v19785_v51 = vpop.f32.mrb[58].mxu1  ;;  %v23338_v37 = vld [vmem:[#allocation8 + $0x228] sm:$0xff]   ;;  %v23339_v23 = vld [vmem:[#allocation8 + $0x270] sm:$0xff]  }
 0x8f3   :  { %15725 = vmatpush1.bf16.msra.mxu0 %v23294_v54  ;;  %v19786_v62 = vpop.f32.mrb[59].mxu1  ;;  %v23336_v54 = vld [vmem:[#allocation8 + $0x220] sm:$0xff]   ;;  %v23342_v51 = vld [vmem:[#allocation8 + $0x238] sm:$0xff]  }
 0x8f4   :  { %15726 = vmatprep.subr.bf16.mxu0 %v23299_v52  ;;  %v23959_v28 = vadd.f32 %v19784_v38, %v16190_v40  ;;  %19885 = vmatpush3.bf16.msra.mxu1 %v23336_v54  ;;  %v23337_v52 = vld [vmem:[#allocation8 + $0x268] sm:$0xff]   ;;  %v23340_v38 = vld [vmem:[#allocation8 + $0x230] sm:$0xff]   ;;  %v23400_v62 = vld [vmem:[#allocation7 + $0x8] sm:$0x7] }
 0x8f5   :  { %19886 = vmatprep.subr.bf16.mxu1 %v23337_v52 }
 0x8f6   :  { %v19433_v11 = vmul.f32 -1.442695, %v23959_v28  ;;  %v23347_v28 = vld [vmem:[#allocation8 + $0x2a0] sm:$0xff]  }
 0x8f7   :  { %15727 = vmatpush1.bf16.msra.mxu0 %v23297_v53  ;;  %v23341_v53 = vld [vmem:[#allocation8 + $0x278] sm:$0xff]  }
 0x8f8   :  { %15728 = vmatprep.subr.bf16.mxu0 %v23302_v47  ;;  %19887 = vmatpush3.bf16.msra.mxu1 %v23338_v37  ;;  %v23550_v47 = vmov 0.0  }
 0x8f9   :  { %19888 = vmatprep.subr.bf16.mxu1 %v23339_v23 }
 0x8fb   :  { %15729 = vmatpush1.bf16.msra.mxu0 %v23300_v9  ;;  %v2439_v9 = vrot.slane %v23400_v62, %v2406_v43 }
 0x8fc   :  { %15730 = vmatprep.subr.bf16.mxu0 %v23305_v63  ;;  %19889 = vmatpush3.bf16.msra.mxu1 %v23340_v38  ;;  %v2443_v63 = vrot.slane %v23400_v62, %v2410_v32 }
 0x8fd   :  { %19890 = vmatprep.subr.bf16.mxu1 %v23341_v53 }
 0x8ff   :  { %15731 = vmatpush1.bf16.msra.mxu0 %v23303_v3 }
 0x900   :  { %15732 = vmatprep.subr.bf16.mxu0 %v23308_v12  ;;  %19891 = vmatpush3.bf16.msra.mxu1 %v23342_v51 }
 0x901   :  { %19907 = vmatprep.subr.bf16.mxu1 %v23550_v47 }
 0x903   :  { %15733 = vmatpush1.bf16.msra.mxu0 %v23306_v27 }
 0x904   :  { %15734 = vmatprep.subr.bf16.mxu0 %v23311_v2 }
 0x907   :  { %15735 = vmatpush1.bf16.msra.mxu0 %v23309_v42 }
 0x908   :  { %15736 = vmatprep.subr.bf16.mxu0 %v23314_v4 }
 0x90b   :  { %15737 = vmatpush1.bf16.msra.mxu0 %v23312_v14 }
 0x90c   :  { %15738 = vmatprep.subr.bf16.mxu0 %v23317_v46 }
 0x90f   :  { %15739 = vmatpush1.bf16.msra.mxu0 %v23315_v15 }
 0x910   :  { %15740 = vmatprep.subr.bf16.mxu0 %v23320_v13  ;;  %v19804_v17 = vpop.f32.mrb[60].mxu1 }
 0x911   :  { %v19805_v5 = vpop.f32.mrb[61].mxu1 }
 0x912   :  { %v19806_v18 = vadd.f32 %v19805_v5, %v19804_v17  ;;  %v19807_v59 = vpop.f32.mrb[62].mxu1  ;;  %v23343_v5 = vld [vmem:[#allocation8 + $0x280] sm:$0xff]  }
 0x913   :  { %15741 = vmatpush1.bf16.msra.mxu0 %v23318_v41  ;;  %v19808_v56 = vpop.f32.mrb[63].mxu1  ;;  %v23344_v59 = vld [vmem:[#allocation8 + $0x288] sm:$0xff]  }
 0x914   :  { %15742 = vmatprep.subr.bf16.mxu0 %v23323_v44  ;;  %v17058_v25 = vadd.f32 %v19806_v18, %v19434_v36  ;;  %v23346_v56 = vld [vmem:[#allocation8 + $0x298] sm:$0xff]   ;;  %v23348_v36 = vld [vmem:[#allocation8 + $0x2a8] sm:$0xff]  }
 0x917   :  { %15743 = vmatpush1.bf16.msra.mxu0 %v23321_v57  ;;  %v23345_v57 = vld [vmem:[#allocation8 + $0x290] sm:$0xff]  }
 0x918   :  { %15744 = vmatprep.subr.bf16.mxu0 %v23326_v21 }
 0x91b   :  { %15745 = vmatpush1.bf16.msra.mxu0 %v23324_v26 }
 0x91e   :  { %15747 = vmatmul.mubr.bf16.vlgmr.msra.gmra.mrb[8].mxu0 %v23795_v39 }
 0x930   :  { %v19826_v22 = vpop.f32.mrb[64].mxu1 }
 0x931   :  { %v19827_v24 = vpop.f32.mrb[65].mxu1 }
 0x932   :  { %v19828_v29 = vadd.f32 %v19827_v24, %v19826_v22  ;;  %v19829_v31 = vpop.f32.mrb[66].mxu1  ;;  %v23349_v22 = vld [vmem:[#allocation8 + $0x2b0] sm:$0xff]   ;;  %v23350_v24 = vld [vmem:[#allocation8 + $0x2b8] sm:$0xff]  }
 0x933   :  { %v19830_v30 = vpop.f32.mrb[67].mxu1 }
 0x934   :  { %v17098_v1 = vadd.f32 %v19828_v29, %v17058_v25 }
 0x950   :  { %v19848_v19 = vpop.f32.mrb[68].mxu1 }
 0x951   :  { %v19849_v55 = vpop.f32.mrb[69].mxu1 }
 0x952   :  { %v19850_v8 = vadd.f32 %v19849_v55, %v19848_v19  ;;  %v19851_v16 = vpop.f32.mrb[70].mxu1 }
 0x953   :  { %v19852_v33 = vpop.f32.mrb[71].mxu1 }
 0x954   :  { %v17138_v7 = vadd.f32 %v19850_v8, %v17098_v1 }
 0x970   :  { %v19870_v40 = vpop.f32.mrb[72].mxu1 }
 0x971   :  { %v19871_v58 = vpop.f32.mrb[73].mxu1 }
 0x972   :  { %v19872_v39 = vadd.f32 %v19871_v58, %v19870_v40  ;;  %v19873_v20 = vpop.f32.mrb[74].mxu1 }
 0x973   :  { %v19874_v60 = vpop.f32.mrb[75].mxu1 }
 0x974   :  { %v23962_v61 = vadd.f32 %v19872_v39, %v17138_v7 }
 0x9f1   :  { %v15748_v3 = vpop.f32.mrb[8].mxu0 }
 0x9f2   :  { %v19937_v12 = vadd.f32 %v15748_v3, %v2439_v9  ;;  %v15750_v27 = vpop.f32.mrb[9].mxu0 }
 0x9f3   :  { %v19938_v2 = vadd.f32 %v15750_v27, %v2443_v63  ;;  %v15752_v42 = vpop.f32.mrb[10].mxu0 }
 0x9f4   :  { %v19431_v4 = vmul.f32 -1.442695, %v19937_v12  ;;  %v15753_v14 = vpop.f32.mrb[11].mxu0 }
 0x9f5   :  { %v19432_v46 = vmul.f32 -1.442695, %v19938_v2 }
 0x9f6   :  { %23383 = vpow2.f32 %v19431_v4 }
 0x9f7   :  { %23385 = vpow2.f32 %v19432_v46 }
 0xa00   :  { %v23384_v15 = vpop.eup %23383 }
 0xa01   :  { %v23386_v13 = vpop.eup %23385  ;;  %v16276_v41 = vadd.f32 1.0, %v23384_v15 }
 0xa02   :  { %v16277_v44 = vadd.f32 1.0, %v23386_v13 }
 0xa03   :  { %23387 = vrcp.f32 %v16276_v41 }
 0xa04   :  { %23389 = vrcp.f32 %v16277_v44 }
 0xa05   :  { %23391 = vpow2.f32 %v19433_v11 }
 0xa0d   :  { %v23388_v43 = vpop.eup %23387 }
 0xa0e   :  { %v23390_v17 = vpop.eup %23389  ;;  %v16309_v18 = vpack.c.bf16 %v23388_v43, %v23388_v43 }
 0xa0f   :  { %v16310_v32 = vpack.c.bf16 %v23390_v17, %v23390_v17  ;;  %v23392_v21 = vpop.eup %23391 }
 0xa10   :  { %v16278_v26 = vadd.f32 1.0, %v23392_v21 }
 0xa11   :  { %17215 = vmatprep.mubr.bf16.mxu1 %v16310_v32 }
 0xa12   :  { %17216 = vmatmul.mubr.bf16.vlgmr.msra.gmra.mrb[76].mxu1 %v16309_v18  ;;  %23393 = vrcp.f32 %v16278_v26 }
 0xa13   :  { %19908 = vmatpush3.bf16.msra.mxu1 %v23343_v5  ;;  %19923 = vmatprep.mubr.msk.bf16.mxu1 %vm23551_vm0, %v23550_v47 }
 0xa14   :  { %19909 = vmatprep.subr.bf16.mxu1 %v23550_v47 }
 0xa17   :  { %19910 = vmatpush3.bf16.msra.mxu1 %v23344_v59 }
 0xa18   :  { %19911 = vmatprep.subr.bf16.mxu1 %v23550_v47 }
 0xa1b   :  { %19912 = vmatpush3.bf16.msra.mxu1 %v23345_v57 }
 0xa1c   :  { %19913 = vmatprep.subr.bf16.mxu1 %v23550_v47  ;;  %v23394_v25 = vpop.eup %23393 }
 0xa1d   :  { %v16311_v29 = vpack.c.bf16 %v23394_v25, %v23394_v25 }
 0xa1f   :  { %19914 = vmatpush3.bf16.msra.mxu1 %v23346_v56 }
 0xa20   :  { %19915 = vmatprep.subr.bf16.mxu1 %v23550_v47 }
 0xa23   :  { %19916 = vmatpush3.bf16.msra.mxu1 %v23347_v28 }
 0xa24   :  { %19917 = vmatprep.subr.bf16.mxu1 %v23550_v47 }
 0xa27   :  { %19918 = vmatpush3.bf16.msra.mxu1 %v23348_v36 }
 0xa28   :  { %19919 = vmatprep.subr.bf16.mxu1 %v23550_v47 }
 0xa2b   :  { %19920 = vmatpush3.bf16.msra.mxu1 %v23349_v22 }
 0xa2c   :  { %19921 = vmatprep.subr.bf16.mxu1 %v23550_v47 }
 0xa2f   :  { %19922 = vmatpush3.bf16.msra.mxu1 %v23350_v24 }
 0xa32   :  { %19924 = vmatmul.mubr.bf16.vlgmr.msra.gmra.mrb[80].mxu1 %v16311_v29 }
 0xae5   :  { %v19892_v31 = vpop.f32.mrb[76].mxu1 }
 0xae6   :  { %v19893_v30 = vpop.f32.mrb[77].mxu1 }
 0xae7   :  { %v19894_v1 = vadd.f32 %v19893_v30, %v19892_v31  ;;  %v19895_v19 = vpop.f32.mrb[78].mxu1 }
 0xae8   :  { %v19896_v55 = vpop.f32.mrb[79].mxu1 }
 0xae9   :  { %v17218_v8 = vadd.f32 %v19894_v1, %v23962_v61 }
 0xb05   :  { %v17257_v16 = vpop.f32.mrb[80].mxu1 }
 0xb06   :  { %v17258_v33 = vadd.f32 %v17257_v16, %v17218_v8  ;;  %v19925_v7 = vpop.f32.mrb[81].mxu1 }
 0xb07   :  { %v17260_v35 = vpop.f32.mrb[82].mxu1 }
 0xb08   :  { %v19523_v40 = vmul.f32 -1.442695, %v17258_v33  ;;  %v19926_v10 = vpop.f32.mrb[83].mxu1 }
 0xb0a   :  { %23395 = vpow2.f32 %v19523_v40 }
 0xb14   :  { %v23396_v58 = vpop.eup %23395 }
 0xb15   :  { %v17266_v39 = vadd.f32 1.0, %v23396_v58 }
 0xb17   :  { %23397 = vrcp.f32 %v17266_v39 }
 0xb21   :  { %v23398_v20 = vpop.eup %23397 }
 0xb22   :  { %17269 = vst [vmem:[#allocation11] sm:$0xff] %v23398_v20 }
 0xb23   :  { %23522 = shalt.err (!%p23519_p2)
}
 0xb24   :  { %s23523_s7 = scalar_lea.hbm %s23987_s5, 128 }
 0xb25   :  { %p23524_p3 = scmp.ne.s32.totalorder %s23987_s5, %s23523_s7  ;;  %p23527_p4 = scmp.lt.u32.totalorder %s23523_s7, %s23987_s5 }
 0xb27   :  { %p23529_p5 = pnand %p23527_p4, %p23524_p3 }
 0xb29   :  { %23532 = shalt.err (!%p23529_p5)
}
 0xb2a   :  { %17279 = dma.vmem_to_hbm [thread:$0]  %s17277_s29, 128, %s23987_s5, [#allocation4]  }
 0xb2b   :  { %23539 = dma.done.wait [#allocation4], 128  }
 0xb2c   :  { %23540 = vsyncadd [#allocation4], 4294967168 }
 0xb2d   :  { %17283 = vsyncpa [#allocation3], 1 }
 0xb2e   :  { %17284 = vsyncpa [#allocation6], 1 }
 0xb2f   :  { %17285 = vsyncpa [#allocation9], 1 }
 0xb30   :  { %17286 = vsyncpa [#allocation4], 1 }

</bundles_post_ra>
